<compile_context>
chip_gen: v7x
topology: tpu7x:2x2x1
jax: 0.10.0
libtpu: 0.0.40
codegen_flags: <defaults>
</compile_context>

<pallas_src>
import functools
import math

import numpy as np
import jax
import jax.numpy as jnp
from jax import lax
from jax.experimental import pallas as pl
from jax.experimental.pallas import tpu as pltpu


# ------------------------------------------------------------------ helpers

def _gelu_tanh(x):
    # GELU(approximate='tanh'), identical formula to PyTorch
    c = math.sqrt(2.0 / math.pi)
    return 0.5 * x * (1.0 + jnp.tanh(c * (x + 0.044715 * x * x * x)))


def _layer_norm(v, g, b):
    mu = jnp.mean(v, axis=-1, keepdims=True)
    var = jnp.mean((v - mu) * (v - mu), axis=-1, keepdims=True)
    return (v - mu) * lax.rsqrt(var + 1e-5) * g + b


# ------------------------------------------------------------------ fused whole-model kernel (grid over layers)

def _gpt_fused_kernel(
        # constant-block inputs (resident across the layer grid)
        idx_ref, wte_ref, wpe_ref, mask_ref,
        # per-layer stacked params (pipelined across layers)
        ln1_g_ref, ln1_b_ref, w_attn_ref, b_attn_ref,
        w_aproj_ref, b_aproj_ref,
        ln2_g_ref, ln2_b_ref, w_fc_ref, b_fc_ref,
        w_mproj_ref, b_mproj_ref,
        # final LN + tied head (resident)
        lnf_g_ref, lnf_b_ref, lm_head_ref,
        # output
        logits_ref,
        # scratch: residual stream, VMEM-resident across all layers
        x_ref,
        *, n_head, n_embd, seq_len, n_batch):
    l = pl.program_id(0)
    C, H = n_embd, n_head
    hd = C // H
    T, Bn = seq_len, n_batch
    M = Bn * T
    V = wte_ref.shape[0]

    # ---- first grid step only: embedding (one-hot MXU gather + positional add) ----
    @pl.when(l == 0)
    def _():
        ids = idx_ref[...]                                        # (M, 1) int32
        col = lax.broadcasted_iota(jnp.int32, (M, V), 1)
        onehot = (col == ids).astype(jnp.float32)                 # (M, V)
        tok = jnp.dot(onehot, wte_ref[...],
                      preferred_element_type=jnp.float32)         # (M, C)
        pos = jnp.concatenate([wpe_ref[...]] * Bn, axis=0)        # (M, C)
        x_ref[...] = tok + pos

    x = x_ref[...]                                                # (M, C) f32 residual stream

    # ---- attention: LN1 -> qkv matmul -> batch-folded causal attention -> proj + residual ----
    h1 = _layer_norm(x, ln1_g_ref[0], ln1_b_ref[0])
    qkv = jnp.dot(h1.astype(jnp.bfloat16), w_attn_ref[0],
                  preferred_element_type=jnp.float32) + b_attn_ref[0]   # (M, 3C)

    scale = 1.0 / math.sqrt(hd)
    # scale + casts hoisted out of the head loop: once on dense (M, C) tiles
    q_bf = (qkv[:, 0:C] * scale).astype(jnp.bfloat16)
    k_bf = qkv[:, C:2 * C].astype(jnp.bfloat16)
    v_bf = qkv[:, 2 * C:3 * C].astype(jnp.bfloat16)
    mask_bias = mask_ref[...]                                     # (M, M) additive block-diag causal

    heads = []
    for hh in range(H):                                           # static unroll, H small
        lo = hh * hd
        # s = q_h @ k_h^T (no materialized transpose), batch-fold handled by mask
        s = lax.dot_general(q_bf[:, lo:lo + hd], k_bf[:, lo:lo + hd],
                            (((1,), (1,)), ((), ())),
                            preferred_element_type=jnp.float32) + mask_bias
        m = jnp.max(s, axis=-1, keepdims=True)
        p = jnp.exp(s - m)
        inv = pl.reciprocal(jnp.sum(p, axis=-1, keepdims=True), approx=True)
        heads.append(jnp.dot(p.astype(jnp.bfloat16), v_bf[:, lo:lo + hd],
                             preferred_element_type=jnp.float32) * inv)
    y = jnp.concatenate(heads, axis=-1)                           # (M, C) lane-dense

    x = jnp.dot(y.astype(jnp.bfloat16), w_aproj_ref[0],
                preferred_element_type=jnp.float32) + b_aproj_ref[0] + x

    # ---- MLP: LN2 -> fc -> tanh GELU -> proj + residual ----
    h2 = _layer_norm(x, ln2_g_ref[0], ln2_b_ref[0])
    ff = jnp.dot(h2.astype(jnp.bfloat16), w_fc_ref[0],
                 preferred_element_type=jnp.float32) + b_fc_ref[0]
    ff = _gelu_tanh(ff)
    x = jnp.dot(ff.astype(jnp.bfloat16), w_mproj_ref[0],
                preferred_element_type=jnp.float32) + b_mproj_ref[0] + x

    x_ref[...] = x

    # ---- last grid step only: final LN + tied lm_head ----
    @pl.when(l == pl.num_programs(0) - 1)
    def _():
        xf = _layer_norm(x, lnf_g_ref[...], lnf_b_ref[...])
        logits_ref[...] = jnp.dot(xf.astype(jnp.bfloat16), lm_head_ref[...],
                                  preferred_element_type=jnp.float32)


# ------------------------------------------------------------------ model

class GPTConfig:
    def __init__(self, block_size=64, vocab_size=256, n_layer=2, n_head=4, n_embd=128):
        self.block_size = block_size
        self.vocab_size = vocab_size
        self.n_layer = n_layer
        self.n_head = n_head
        self.n_embd = n_embd


def init_params(config, key):
    """Shapes/semantics match the PyTorch module. Linear weights stored (in, out)
    so the kernel computes x @ W + b; matmul weights stored bf16 (MXU-native)
    and stacked on a leading n_layer axis; lm_head weight is tied to wte
    (forward-only pre-transposed bf16 copy)."""
    C, V, L = config.n_embd, config.vocab_size, config.n_layer
    std = 0.02
    keys = jax.random.split(key, 2 + 4 * L)
    wte = std * jax.random.normal(keys[0], (V, C), jnp.float32)

    def nrm(k, shape):
        return (std * jax.random.normal(k, shape, jnp.float32)).astype(jnp.bfloat16)

    w_attn, w_aproj, w_fc, w_mproj = [], [], [], []
    for l in range(L):
        k0, k1, k2, k3 = keys[2 + 4 * l: 6 + 4 * l]
        w_attn.append(nrm(k0, (C, 3 * C)))
        w_aproj.append(nrm(k1, (C, C)))
        w_fc.append(nrm(k2, (C, 4 * C)))
        w_mproj.append(nrm(k3, (4 * C, C)))

    return {
        "wte": wte,                                       # f32, used for the in-kernel gather
        "lm_head_w": wte.T.astype(jnp.bfloat16),          # tied weight, pre-transposed copy
        "wpe": std * jax.random.normal(keys[1], (config.block_size, C), jnp.float32),
        "lnf_g": jnp.ones((1, C), jnp.float32), "lnf_b": jnp.zeros((1, C), jnp.float32),
        "ln1_g": jnp.ones((L, 1, C), jnp.float32), "ln1_b": jnp.zeros((L, 1, C), jnp.float32),
        "ln2_g": jnp.ones((L, 1, C), jnp.float32), "ln2_b": jnp.zeros((L, 1, C), jnp.float32),
        "w_attn": jnp.stack(w_attn), "b_attn": jnp.zeros((L, 1, 3 * C), jnp.float32),
        "w_attn_proj": jnp.stack(w_aproj), "b_attn_proj": jnp.zeros((L, 1, C), jnp.float32),
        "w_fc": jnp.stack(w_fc), "b_fc": jnp.zeros((L, 1, 4 * C), jnp.float32),
        "w_mlp_proj": jnp.stack(w_mproj), "b_mlp_proj": jnp.zeros((L, 1, C), jnp.float32),
    }


def gpt_forward(params, token_idx, config):
    B, T = token_idx.shape
    C, V, L, H = config.n_embd, config.vocab_size, config.n_layer, config.n_head
    M = B * T
    C3, C4 = 3 * C, 4 * C

    idx2d = token_idx.reshape(M, 1).astype(jnp.int32)
    wpeT = params["wpe"][:T]                                       # (T, C)

    # Trace-time constant: block-diagonal causal additive mask for the
    # batch-folded rows (row/col in the same batch AND col <= row -> 0, else -1e30).
    r = np.arange(M)
    allowed = (r[None, :] <= r[:, None]) & ((r[:, None] // T) == (r[None, :] // T))
    mask_bias = jnp.asarray(np.where(allowed, 0.0, -1e30).astype(np.float32))

    args = (idx2d, params["wte"], wpeT, mask_bias,
            params["ln1_g"], params["ln1_b"], params["w_attn"], params["b_attn"],
            params["w_attn_proj"], params["b_attn_proj"],
            params["ln2_g"], params["ln2_b"], params["w_fc"], params["b_fc"],
            params["w_mlp_proj"], params["b_mlp_proj"],
            params["lnf_g"], params["lnf_b"], params["lm_head_w"])

    flops = int(L * (2 * M * C * C3 + 4 * M * M * C + 2 * M * C * C
                     + 4 * M * C * C4) + 2 * M * V * C + 2 * M * C * V)
    transcendentals = int(L * (H * M * M + M * C4))
    bytes_accessed = int(sum(a.size * a.dtype.itemsize for a in args) + M * V * 4)

    grid_spec = pltpu.PrefetchScalarGridSpec(
        num_scalar_prefetch=0,
        grid=(L,),
        in_specs=[
            pl.BlockSpec((M, 1), lambda l: (0, 0)),                # token idx
            pl.BlockSpec((V, C), lambda l: (0, 0)),                # wte
            pl.BlockSpec((T, C), lambda l: (0, 0)),                # wpe[:T]
            pl.BlockSpec((M, M), lambda l: (0, 0)),                # additive mask
            pl.BlockSpec((1, 1, C), lambda l: (l, 0, 0)),          # ln1_g
            pl.BlockSpec((1, 1, C), lambda l: (l, 0, 0)),          # ln1_b
            pl.BlockSpec((1, C, C3), lambda l: (l, 0, 0)),         # w_attn
            pl.BlockSpec((1, 1, C3), lambda l: (l, 0, 0)),         # b_attn
            pl.BlockSpec((1, C, C), lambda l: (l, 0, 0)),          # w_attn_proj
            pl.BlockSpec((1, 1, C), lambda l: (l, 0, 0)),          # b_attn_proj
            pl.BlockSpec((1, 1, C), lambda l: (l, 0, 0)),          # ln2_g
            pl.BlockSpec((1, 1, C), lambda l: (l, 0, 0)),          # ln2_b
            pl.BlockSpec((1, C, C4), lambda l: (l, 0, 0)),         # w_fc
            pl.BlockSpec((1, 1, C4), lambda l: (l, 0, 0)),         # b_fc
            pl.BlockSpec((1, C4, C), lambda l: (l, 0, 0)),         # w_mlp_proj
            pl.BlockSpec((1, 1, C), lambda l: (l, 0, 0)),          # b_mlp_proj
            pl.BlockSpec((1, C), lambda l: (0, 0)),                # ln_f gamma
            pl.BlockSpec((1, C), lambda l: (0, 0)),                # ln_f beta
            pl.BlockSpec((C, V), lambda l: (0, 0)),                # lm_head (tied)
        ],
        out_specs=pl.BlockSpec((M, V), lambda l: (0, 0)),          # logits (written at l == L-1)
        scratch_shapes=[pltpu.VMEM((M, C), jnp.float32)],          # residual stream
    )

    logits = pl.pallas_call(
        functools.partial(_gpt_fused_kernel, n_head=H, n_embd=C, seq_len=T, n_batch=B),
        out_shape=jax.ShapeDtypeStruct((M, V), jnp.float32),
        grid_spec=grid_spec,
        compiler_params=pltpu.CompilerParams(dimension_semantics=("arbitrary",)),
        cost_estimate=pl.CostEstimate(flops=flops, transcendentals=transcendentals,
                                      bytes_accessed=bytes_accessed),
    )(*args)
    return logits.reshape(B, T, V)


# ------------------------------------------------------------------ reference (pure JAX, matching bf16-matmul numerics)

def gpt_forward_ref(params, token_idx, config):
    B, T = token_idx.shape
    C, H = config.n_embd, config.n_head
    hd = C // H

    def mm(a, b):
        return jnp.dot(a.astype(jnp.bfloat16), b.astype(jnp.bfloat16),
                       preferred_element_type=jnp.float32)

    def ln(x, g, b):
        mu = x.mean(-1, keepdims=True)
        var = ((x - mu) ** 2).mean(-1, keepdims=True)
        return (x - mu) * lax.rsqrt(var + 1e-5) * g.reshape(1, -1) + b.reshape(1, -1)

    def gelu(x):
        c = math.sqrt(2.0 / math.pi)
        return 0.5 * x * (1.0 + jnp.tanh(c * (x + 0.044715 * x ** 3)))

    x = (jnp.take(params["wte"], token_idx, axis=0)
         + params["wpe"][:T][None]).reshape(B * T, C)
    for l in range(config.n_layer):
        h = ln(x, params["ln1_g"][l], params["ln1_b"][l])
        qkv = mm(h, params["w_attn"][l]) + params["b_attn"][l].reshape(1, -1)
        q, k, v = jnp.split(qkv.reshape(B, T, 3 * C), 3, axis=-1)
        q = q.reshape(B, T, H, hd).transpose(0, 2, 1, 3)
        k = k.reshape(B, T, H, hd).transpose(0, 2, 1, 3)
        v = v.reshape(B, T, H, hd).transpose(0, 2, 1, 3)
        s = jnp.einsum("bhqd,bhkd->bhqk",
                       (q / math.sqrt(hd)).astype(jnp.bfloat16),
                       k.astype(jnp.bfloat16),
                       preferred_element_type=jnp.float32)
        mask = jnp.tril(jnp.ones((T, T), bool))
        s = jnp.where(mask[None, None], s, -1e30)
        p = jax.nn.softmax(s, axis=-1)
        y = jnp.einsum("bhqk,bhkd->bhqd", p.astype(jnp.bfloat16),
                       v.astype(jnp.bfloat16), preferred_element_type=jnp.float32)
        y = y.transpose(0, 2, 1, 3).reshape(B * T, C)
        x = x + (mm(y, params["w_attn_proj"][l]) + params["b_attn_proj"][l].reshape(1, -1))
        h = ln(x, params["ln2_g"][l], params["ln2_b"][l])
        m = gelu(mm(h, params["w_fc"][l]) + params["b_fc"][l].reshape(1, -1))
        x = x + (mm(m, params["w_mlp_proj"][l]) + params["b_mlp_proj"][l].reshape(1, -1))
    x = ln(x, params["lnf_g"], params["lnf_b"])
    return mm(x, params["lm_head_w"]).reshape(B, T, config.vocab_size)


# ------------------------------------------------------------------ main

if __name__ == "__main__":
    config = GPTConfig(block_size=64, vocab_size=256, n_layer=2, n_head=4, n_embd=128)
    B, T = 2, 64

    key = jax.random.PRNGKey(0)
    pkey, tkey = jax.random.split(key)
    params = init_params(config, pkey)
    token_idx = jax.random.randint(tkey, (B, T), 0, config.vocab_size, dtype=jnp.int32)

    logits = jax.block_until_ready(gpt_forward(params, token_idx, config))

    ref = gpt_forward_ref(params, token_idx, config)
    assert logits.shape == (B, T, config.vocab_size)
    # bf16 matmuls + approx reciprocal => compare against a matching-precision ref
    assert jnp.allclose(logits, ref, atol=2e-2, rtol=2e-2), "mismatch vs reference"

    # TODO(synk): cross-entropy loss path (targets!=None) not ported; forward logits only.
    print("KERNEL_OK")
</pallas_src>

<mosaic_0001>
module attributes {stable_mosaic.version = 11 : i64} {
  func.func @_gpt_fused_kernel(%arg0: i32, %arg1: memref<128x1xi32, #tpu.memory_space<vmem>>, %arg2: memref<256x128xf32, #tpu.memory_space<vmem>>, %arg3: memref<64x128xf32, #tpu.memory_space<vmem>>, %arg4: memref<128x128xf32, #tpu.memory_space<vmem>>, %arg5: memref<1x1x128xf32, #tpu.memory_space<vmem>>, %arg6: memref<1x1x128xf32, #tpu.memory_space<vmem>>, %arg7: memref<1x128x384xbf16, #tpu.memory_space<vmem>>, %arg8: memref<1x1x384xf32, #tpu.memory_space<vmem>>, %arg9: memref<1x128x128xbf16, #tpu.memory_space<vmem>>, %arg10: memref<1x1x128xf32, #tpu.memory_space<vmem>>, %arg11: memref<1x1x128xf32, #tpu.memory_space<vmem>>, %arg12: memref<1x1x128xf32, #tpu.memory_space<vmem>>, %arg13: memref<1x128x512xbf16, #tpu.memory_space<vmem>>, %arg14: memref<1x1x512xf32, #tpu.memory_space<vmem>>, %arg15: memref<1x512x128xbf16, #tpu.memory_space<vmem>>, %arg16: memref<1x1x128xf32, #tpu.memory_space<vmem>>, %arg17: memref<1x128xf32, #tpu.memory_space<vmem>>, %arg18: memref<1x128xf32, #tpu.memory_space<vmem>>, %arg19: memref<128x256xbf16, #tpu.memory_space<vmem>>, %arg20: memref<128x256xf32, #tpu.memory_space<vmem>>, %arg21: memref<128x128xf32, #tpu.memory_space<vmem>>) attributes {dimension_semantics = [#tpu.dimension_semantics<arbitrary>], iteration_bounds = array<i64: 2>, scalar_prefetch = 0 : i64, scratch_operands = 1 : i64, tpu.core_type = #tpu.core_type<tc>, window_params = [{pipeline_mode = #tpu.pipeline_mode<synchronous>, transform_indices = @transform_0, window_bounds = array<i64: 128, 1>}, {pipeline_mode = #tpu.pipeline_mode<synchronous>, transform_indices = @transform_1, window_bounds = array<i64: 256, 128>}, {pipeline_mode = #tpu.pipeline_mode<synchronous>, transform_indices = @transform_2, window_bounds = array<i64: 64, 128>}, {pipeline_mode = #tpu.pipeline_mode<synchronous>, transform_indices = @transform_3, window_bounds = array<i64: 128, 128>}, {transform_indices = @transform_4, window_bounds = array<i64: 1, 1, 128>}, {transform_indices = @transform_5, window_bounds = array<i64: 1, 1, 128>}, {transform_indices = @transform_6, window_bounds = array<i64: 1, 128, 384>}, {transform_indices = @transform_7, window_bounds = array<i64: 1, 1, 384>}, {transform_indices = @transform_8, window_bounds = array<i64: 1, 128, 128>}, {transform_indices = @transform_9, window_bounds = array<i64: 1, 1, 128>}, {transform_indices = @transform_10, window_bounds = array<i64: 1, 1, 128>}, {transform_indices = @transform_11, window_bounds = array<i64: 1, 1, 128>}, {transform_indices = @transform_12, window_bounds = array<i64: 1, 128, 512>}, {transform_indices = @transform_13, window_bounds = array<i64: 1, 1, 512>}, {transform_indices = @transform_14, window_bounds = array<i64: 1, 512, 128>}, {transform_indices = @transform_15, window_bounds = array<i64: 1, 1, 128>}, {pipeline_mode = #tpu.pipeline_mode<synchronous>, transform_indices = @transform_16, window_bounds = array<i64: 1, 128>}, {pipeline_mode = #tpu.pipeline_mode<synchronous>, transform_indices = @transform_17, window_bounds = array<i64: 1, 128>}, {pipeline_mode = #tpu.pipeline_mode<synchronous>, transform_indices = @transform_18, window_bounds = array<i64: 128, 256>}, {pipeline_mode = #tpu.pipeline_mode<synchronous>, transform_indices = @transform_19, window_bounds = array<i64: 128, 256>}]} {
    %c0_i32 = arith.constant 0 : i32
    %0 = arith.cmpi eq, %arg0, %c0_i32 : i32
    %1 = arith.extui %0 : i1 to i32
    %c0_i32_0 = arith.constant 0 : i32
    %2 = arith.cmpi ne, %1, %c0_i32_0 : i32
    scf.if %2 {
      %c0_77 = arith.constant 0 : index
      %c0_78 = arith.constant 0 : index
      %189 = vector.load %arg1[%c0_77, %c0_78] : memref<128x1xi32, #tpu.memory_space<vmem>>, vector<128x1xi32>
      %190 = tpu.iota {dimensions = array<i32: 1>} : vector<128x256xi32>
      %191 = vector.broadcast %189 : vector<128x1xi32> to vector<128x256xi32>
      %192 = arith.cmpi eq, %190, %191 : vector<128x256xi32>
      %193 = arith.extui %192 : vector<128x256xi1> to vector<128x256xi32>
      %194 = arith.sitofp %193 : vector<128x256xi32> to vector<128x256xf32>
      %c0_79 = arith.constant 0 : index
      %c0_80 = arith.constant 0 : index
      %195 = vector.load %arg2[%c0_79, %c0_80] : memref<256x128xf32, #tpu.memory_space<vmem>>, vector<256x128xf32>
      %cst_81 = arith.constant dense<0.000000e+00> : vector<128x128xf32>
      %196 = tpu.matmul %194, %195, %cst_81 {dimension_numbers = #tpu.dot_dimension_numbers<[1], [0], [0], [1], [0, 0, 1, 1], [], []>} : vector<128x256xf32>, vector<256x128xf32>, vector<128x128xf32> -> vector<128x128xf32>
      %c0_82 = arith.constant 0 : index
      %c0_83 = arith.constant 0 : index
      %197 = vector.load %arg3[%c0_82, %c0_83] : memref<64x128xf32, #tpu.memory_space<vmem>>, vector<64x128xf32>
      %198 = tpu.concatenate %197, %197 in 0 : vector<64x128xf32>, vector<64x128xf32> -> vector<128x128xf32>
      %199 = arith.addf %196, %198 : vector<128x128xf32>
      %c0_84 = arith.constant 0 : index
      %c0_85 = arith.constant 0 : index
      %200 = vector.load %arg21[%c0_84, %c0_85] : memref<128x128xf32, #tpu.memory_space<vmem>>, vector<128x128xf32>
      tpu.vector_store %arg21[%c0_84, %c0_85], %199 {strides = array<i32>} : memref<128x128xf32, #tpu.memory_space<vmem>>, vector<128x128xf32>,
    } else {
    }
    %c0 = arith.constant 0 : index
    %c0_1 = arith.constant 0 : index
    %3 = vector.load %arg21[%c0, %c0_1] : memref<128x128xf32, #tpu.memory_space<vmem>>, vector<128x128xf32>
    %c0_2 = arith.constant 0 : index
    %c0_3 = arith.constant 0 : index
    %c0_4 = arith.constant 0 : index
    %4 = vector.load %arg5[%c0_2, %c0_3, %c0_4] : memref<1x1x128xf32, #tpu.memory_space<vmem>>, vector<1x1x128xf32>
    %5 = vector.shape_cast %4 : vector<1x1x128xf32> to vector<1x128xf32>
    %c0_5 = arith.constant 0 : index
    %c0_6 = arith.constant 0 : index
    %c0_7 = arith.constant 0 : index
    %6 = vector.load %arg6[%c0_5, %c0_6, %c0_7] : memref<1x1x128xf32, #tpu.memory_space<vmem>>, vector<1x1x128xf32>
    %7 = vector.shape_cast %6 : vector<1x1x128xf32> to vector<1x128xf32>
    %cst = arith.constant dense<0.000000e+00> : vector<128xf32>
    %8 = vector.multi_reduction <add>, %3, %cst [1] : vector<128x128xf32> to vector<128xf32>
    %9 = vector.shape_cast %8 : vector<128xf32> to vector<128x1xf32>
    %cst_8 = arith.constant 1.280000e+02 : f32
    %10 = vector.broadcast %cst_8 : f32 to vector<128x1xf32>
    %11 = arith.divf %9, %10 : vector<128x1xf32>
    %12 = vector.broadcast %11 : vector<128x1xf32> to vector<128x128xf32>
    %13 = arith.subf %3, %12 : vector<128x128xf32>
    %14 = vector.broadcast %11 : vector<128x1xf32> to vector<128x128xf32>
    %15 = arith.subf %3, %14 : vector<128x128xf32>
    %16 = arith.mulf %13, %15 : vector<128x128xf32>
    %cst_9 = arith.constant dense<0.000000e+00> : vector<128xf32>
    %17 = vector.multi_reduction <add>, %16, %cst_9 [1] : vector<128x128xf32> to vector<128xf32>
    %18 = vector.shape_cast %17 : vector<128xf32> to vector<128x1xf32>
    %cst_10 = arith.constant 1.280000e+02 : f32
    %19 = vector.broadcast %cst_10 : f32 to vector<128x1xf32>
    %20 = arith.divf %18, %19 : vector<128x1xf32>
    %21 = vector.broadcast %11 : vector<128x1xf32> to vector<128x128xf32>
    %22 = arith.subf %3, %21 : vector<128x128xf32>
    %cst_11 = arith.constant 9.99999974E-6 : f32
    %23 = vector.broadcast %cst_11 : f32 to vector<128x1xf32>
    %24 = arith.addf %20, %23 : vector<128x1xf32>
    %25 = math.rsqrt %24 : vector<128x1xf32>
    %26 = vector.broadcast %25 : vector<128x1xf32> to vector<128x128xf32>
    %27 = arith.mulf %22, %26 : vector<128x128xf32>
    %28 = vector.broadcast %5 : vector<1x128xf32> to vector<128x128xf32>
    %29 = arith.mulf %27, %28 : vector<128x128xf32>
    %30 = vector.broadcast %7 : vector<1x128xf32> to vector<128x128xf32>
    %31 = arith.addf %29, %30 : vector<128x128xf32>
    %32 = arith.truncf %31 : vector<128x128xf32> to vector<128x128xbf16>
    %c0_12 = arith.constant 0 : index
    %c0_13 = arith.constant 0 : index
    %c0_14 = arith.constant 0 : index
    %33 = vector.load %arg7[%c0_12, %c0_13, %c0_14] : memref<1x128x384xbf16, #tpu.memory_space<vmem>>, vector<1x128x384xbf16>
    %34 = vector.shape_cast %33 : vector<1x128x384xbf16> to vector<128x384xbf16>
    %cst_15 = arith.constant dense<0.000000e+00> : vector<128x384xf32>
    %35 = tpu.matmul %32, %34, %cst_15 {dimension_numbers = #tpu.dot_dimension_numbers<[1], [0], [0], [1], [0, 0, 1, 1], [], []>} : vector<128x128xbf16>, vector<128x384xbf16>, vector<128x384xf32> -> vector<128x384xf32>
    %c0_16 = arith.constant 0 : index
    %c0_17 = arith.constant 0 : index
    %c0_18 = arith.constant 0 : index
    %36 = vector.load %arg8[%c0_16, %c0_17, %c0_18] : memref<1x1x384xf32, #tpu.memory_space<vmem>>, vector<1x1x384xf32>
    %37 = vector.shape_cast %36 : vector<1x1x384xf32> to vector<1x384xf32>
    %38 = vector.broadcast %37 : vector<1x384xf32> to vector<128x384xf32>
    %39 = arith.addf %35, %38 : vector<128x384xf32>
    %40 = vector.extract_strided_slice %39 {offsets = [0, 0], sizes = [128, 128], strides = [1, 1]} : vector<128x384xf32> to vector<128x128xf32>
    %cst_19 = arith.constant 0.176776692 : f32
    %41 = vector.broadcast %cst_19 : f32 to vector<128x128xf32>
    %42 = arith.mulf %40, %41 : vector<128x128xf32>
    %43 = arith.truncf %42 : vector<128x128xf32> to vector<128x128xbf16>
    %44 = vector.extract_strided_slice %39 {offsets = [0, 128], sizes = [128, 128], strides = [1, 1]} : vector<128x384xf32> to vector<128x128xf32>
    %45 = arith.truncf %44 : vector<128x128xf32> to vector<128x128xbf16>
    %46 = vector.extract_strided_slice %39 {offsets = [0, 256], sizes = [128, 128], strides = [1, 1]} : vector<128x384xf32> to vector<128x128xf32>
    %47 = arith.truncf %46 : vector<128x128xf32> to vector<128x128xbf16>
    %c0_20 = arith.constant 0 : index
    %c0_21 = arith.constant 0 : index
    %48 = vector.load %arg4[%c0_20, %c0_21] : memref<128x128xf32, #tpu.memory_space<vmem>>, vector<128x128xf32>
    %49 = vector.extract_strided_slice %43 {offsets = [0, 0], sizes = [128, 32], strides = [1, 1]} : vector<128x128xbf16> to vector<128x32xbf16>
    %50 = vector.extract_strided_slice %45 {offsets = [0, 0], sizes = [128, 32], strides = [1, 1]} : vector<128x128xbf16> to vector<128x32xbf16>
    %cst_22 = arith.constant dense<0.000000e+00> : vector<128x128xf32>
    %51 = tpu.matmul %49, %50, %cst_22 {dimension_numbers = #tpu.dot_dimension_numbers<[1], [1], [0], [0], [0, 0, 1, 0], [], []>} : vector<128x32xbf16>, vector<128x32xbf16>, vector<128x128xf32> -> vector<128x128xf32>
    %52 = arith.addf %51, %48 : vector<128x128xf32>
    %cst_23 = arith.constant dense<0xFF800000> : vector<128xf32>
    %53 = vector.multi_reduction <maximumf>, %52, %cst_23 [1] : vector<128x128xf32> to vector<128xf32>
    %54 = vector.shape_cast %53 : vector<128xf32> to vector<128x1xf32>
    %55 = vector.broadcast %54 : vector<128x1xf32> to vector<128x128xf32>
    %56 = arith.subf %52, %55 : vector<128x128xf32>
    %57 = math.exp %56 : vector<128x128xf32>
    %cst_24 = arith.constant dense<0.000000e+00> : vector<128xf32>
    %58 = vector.multi_reduction <add>, %57, %cst_24 [1] : vector<128x128xf32> to vector<128xf32>
    %59 = vector.shape_cast %58 : vector<128xf32> to vector<128x1xf32>
    %60 = tpu.reciprocal %59 {approx = true} : vector<128x1xf32> -> vector<128x1xf32>
    %61 = arith.truncf %57 : vector<128x128xf32> to vector<128x128xbf16>
    %62 = vector.extract_strided_slice %47 {offsets = [0, 0], sizes = [128, 32], strides = [1, 1]} : vector<128x128xbf16> to vector<128x32xbf16>
    %cst_25 = arith.constant dense<0.000000e+00> : vector<128x32xf32>
    %63 = tpu.matmul %61, %62, %cst_25 {dimension_numbers = #tpu.dot_dimension_numbers<[1], [0], [0], [1], [0, 0, 1, 1], [], []>} : vector<128x128xbf16>, vector<128x32xbf16>, vector<128x32xf32> -> vector<128x32xf32>
    %64 = vector.broadcast %60 : vector<128x1xf32> to vector<128x32xf32>
    %65 = arith.mulf %63, %64 : vector<128x32xf32>
    %66 = vector.extract_strided_slice %43 {offsets = [0, 32], sizes = [128, 32], strides = [1, 1]} : vector<128x128xbf16> to vector<128x32xbf16>
    %67 = vector.extract_strided_slice %45 {offsets = [0, 32], sizes = [128, 32], strides = [1, 1]} : vector<128x128xbf16> to vector<128x32xbf16>
    %cst_26 = arith.constant dense<0.000000e+00> : vector<128x128xf32>
    %68 = tpu.matmul %66, %67, %cst_26 {dimension_numbers = #tpu.dot_dimension_numbers<[1], [1], [0], [0], [0, 0, 1, 0], [], []>} : vector<128x32xbf16>, vector<128x32xbf16>, vector<128x128xf32> -> vector<128x128xf32>
    %69 = arith.addf %68, %48 : vector<128x128xf32>
    %cst_27 = arith.constant dense<0xFF800000> : vector<128xf32>
    %70 = vector.multi_reduction <maximumf>, %69, %cst_27 [1] : vector<128x128xf32> to vector<128xf32>
    %71 = vector.shape_cast %70 : vector<128xf32> to vector<128x1xf32>
    %72 = vector.broadcast %71 : vector<128x1xf32> to vector<128x128xf32>
    %73 = arith.subf %69, %72 : vector<128x128xf32>
    %74 = math.exp %73 : vector<128x128xf32>
    %cst_28 = arith.constant dense<0.000000e+00> : vector<128xf32>
    %75 = vector.multi_reduction <add>, %74, %cst_28 [1] : vector<128x128xf32> to vector<128xf32>
    %76 = vector.shape_cast %75 : vector<128xf32> to vector<128x1xf32>
    %77 = tpu.reciprocal %76 {approx = true} : vector<128x1xf32> -> vector<128x1xf32>
    %78 = arith.truncf %74 : vector<128x128xf32> to vector<128x128xbf16>
    %79 = vector.extract_strided_slice %47 {offsets = [0, 32], sizes = [128, 32], strides = [1, 1]} : vector<128x128xbf16> to vector<128x32xbf16>
    %cst_29 = arith.constant dense<0.000000e+00> : vector<128x32xf32>
    %80 = tpu.matmul %78, %79, %cst_29 {dimension_numbers = #tpu.dot_dimension_numbers<[1], [0], [0], [1], [0, 0, 1, 1], [], []>} : vector<128x128xbf16>, vector<128x32xbf16>, vector<128x32xf32> -> vector<128x32xf32>
    %81 = vector.broadcast %77 : vector<128x1xf32> to vector<128x32xf32>
    %82 = arith.mulf %80, %81 : vector<128x32xf32>
    %83 = vector.extract_strided_slice %43 {offsets = [0, 64], sizes = [128, 32], strides = [1, 1]} : vector<128x128xbf16> to vector<128x32xbf16>
    %84 = vector.extract_strided_slice %45 {offsets = [0, 64], sizes = [128, 32], strides = [1, 1]} : vector<128x128xbf16> to vector<128x32xbf16>
    %cst_30 = arith.constant dense<0.000000e+00> : vector<128x128xf32>
    %85 = tpu.matmul %83, %84, %cst_30 {dimension_numbers = #tpu.dot_dimension_numbers<[1], [1], [0], [0], [0, 0, 1, 0], [], []>} : vector<128x32xbf16>, vector<128x32xbf16>, vector<128x128xf32> -> vector<128x128xf32>
    %86 = arith.addf %85, %48 : vector<128x128xf32>
    %cst_31 = arith.constant dense<0xFF800000> : vector<128xf32>
    %87 = vector.multi_reduction <maximumf>, %86, %cst_31 [1] : vector<128x128xf32> to vector<128xf32>
    %88 = vector.shape_cast %87 : vector<128xf32> to vector<128x1xf32>
    %89 = vector.broadcast %88 : vector<128x1xf32> to vector<128x128xf32>
    %90 = arith.subf %86, %89 : vector<128x128xf32>
    %91 = math.exp %90 : vector<128x128xf32>
    %cst_32 = arith.constant dense<0.000000e+00> : vector<128xf32>
    %92 = vector.multi_reduction <add>, %91, %cst_32 [1] : vector<128x128xf32> to vector<128xf32>
    %93 = vector.shape_cast %92 : vector<128xf32> to vector<128x1xf32>
    %94 = tpu.reciprocal %93 {approx = true} : vector<128x1xf32> -> vector<128x1xf32>
    %95 = arith.truncf %91 : vector<128x128xf32> to vector<128x128xbf16>
    %96 = vector.extract_strided_slice %47 {offsets = [0, 64], sizes = [128, 32], strides = [1, 1]} : vector<128x128xbf16> to vector<128x32xbf16>
    %cst_33 = arith.constant dense<0.000000e+00> : vector<128x32xf32>
    %97 = tpu.matmul %95, %96, %cst_33 {dimension_numbers = #tpu.dot_dimension_numbers<[1], [0], [0], [1], [0, 0, 1, 1], [], []>} : vector<128x128xbf16>, vector<128x32xbf16>, vector<128x32xf32> -> vector<128x32xf32>
    %98 = vector.broadcast %94 : vector<128x1xf32> to vector<128x32xf32>
    %99 = arith.mulf %97, %98 : vector<128x32xf32>
    %100 = vector.extract_strided_slice %43 {offsets = [0, 96], sizes = [128, 32], strides = [1, 1]} : vector<128x128xbf16> to vector<128x32xbf16>
    %101 = vector.extract_strided_slice %45 {offsets = [0, 96], sizes = [128, 32], strides = [1, 1]} : vector<128x128xbf16> to vector<128x32xbf16>
    %cst_34 = arith.constant dense<0.000000e+00> : vector<128x128xf32>
    %102 = tpu.matmul %100, %101, %cst_34 {dimension_numbers = #tpu.dot_dimension_numbers<[1], [1], [0], [0], [0, 0, 1, 0], [], []>} : vector<128x32xbf16>, vector<128x32xbf16>, vector<128x128xf32> -> vector<128x128xf32>
    %103 = arith.addf %102, %48 : vector<128x128xf32>
    %cst_35 = arith.constant dense<0xFF800000> : vector<128xf32>
    %104 = vector.multi_reduction <maximumf>, %103, %cst_35 [1] : vector<128x128xf32> to vector<128xf32>
    %105 = vector.shape_cast %104 : vector<128xf32> to vector<128x1xf32>
    %106 = vector.broadcast %105 : vector<128x1xf32> to vector<128x128xf32>
    %107 = arith.subf %103, %106 : vector<128x128xf32>
    %108 = math.exp %107 : vector<128x128xf32>
    %cst_36 = arith.constant dense<0.000000e+00> : vector<128xf32>
    %109 = vector.multi_reduction <add>, %108, %cst_36 [1] : vector<128x128xf32> to vector<128xf32>
    %110 = vector.shape_cast %109 : vector<128xf32> to vector<128x1xf32>
    %111 = tpu.reciprocal %110 {approx = true} : vector<128x1xf32> -> vector<128x1xf32>
    %112 = arith.truncf %108 : vector<128x128xf32> to vector<128x128xbf16>
    %113 = vector.extract_strided_slice %47 {offsets = [0, 96], sizes = [128, 32], strides = [1, 1]} : vector<128x128xbf16> to vector<128x32xbf16>
    %cst_37 = arith.constant dense<0.000000e+00> : vector<128x32xf32>
    %114 = tpu.matmul %112, %113, %cst_37 {dimension_numbers = #tpu.dot_dimension_numbers<[1], [0], [0], [1], [0, 0, 1, 1], [], []>} : vector<128x128xbf16>, vector<128x32xbf16>, vector<128x32xf32> -> vector<128x32xf32>
    %115 = vector.broadcast %111 : vector<128x1xf32> to vector<128x32xf32>
    %116 = arith.mulf %114, %115 : vector<128x32xf32>
    %117 = tpu.concatenate %65, %82, %99, %116 in 1 : vector<128x32xf32>, vector<128x32xf32>, vector<128x32xf32>, vector<128x32xf32> -> vector<128x128xf32>
    %118 = arith.truncf %117 : vector<128x128xf32> to vector<128x128xbf16>
    %c0_38 = arith.constant 0 : index
    %c0_39 = arith.constant 0 : index
    %c0_40 = arith.constant 0 : index
    %119 = vector.load %arg9[%c0_38, %c0_39, %c0_40] : memref<1x128x128xbf16, #tpu.memory_space<vmem>>, vector<1x128x128xbf16>
    %120 = vector.shape_cast %119 : vector<1x128x128xbf16> to vector<128x128xbf16>
    %cst_41 = arith.constant dense<0.000000e+00> : vector<128x128xf32>
    %121 = tpu.matmul %118, %120, %cst_41 {dimension_numbers = #tpu.dot_dimension_numbers<[1], [0], [0], [1], [0, 0, 1, 1], [], []>} : vector<128x128xbf16>, vector<128x128xbf16>, vector<128x128xf32> -> vector<128x128xf32>
    %c0_42 = arith.constant 0 : index
    %c0_43 = arith.constant 0 : index
    %c0_44 = arith.constant 0 : index
    %122 = vector.load %arg10[%c0_42, %c0_43, %c0_44] : memref<1x1x128xf32, #tpu.memory_space<vmem>>, vector<1x1x128xf32>
    %123 = vector.shape_cast %122 : vector<1x1x128xf32> to vector<1x128xf32>
    %124 = vector.broadcast %123 : vector<1x128xf32> to vector<128x128xf32>
    %125 = arith.addf %121, %124 : vector<128x128xf32>
    %126 = arith.addf %125, %3 : vector<128x128xf32>
    %c0_45 = arith.constant 0 : index
    %c0_46 = arith.constant 0 : index
    %c0_47 = arith.constant 0 : index
    %127 = vector.load %arg11[%c0_45, %c0_46, %c0_47] : memref<1x1x128xf32, #tpu.memory_space<vmem>>, vector<1x1x128xf32>
    %128 = vector.shape_cast %127 : vector<1x1x128xf32> to vector<1x128xf32>
    %c0_48 = arith.constant 0 : index
    %c0_49 = arith.constant 0 : index
    %c0_50 = arith.constant 0 : index
    %129 = vector.load %arg12[%c0_48, %c0_49, %c0_50] : memref<1x1x128xf32, #tpu.memory_space<vmem>>, vector<1x1x128xf32>
    %130 = vector.shape_cast %129 : vector<1x1x128xf32> to vector<1x128xf32>
    %cst_51 = arith.constant dense<0.000000e+00> : vector<128xf32>
    %131 = vector.multi_reduction <add>, %126, %cst_51 [1] : vector<128x128xf32> to vector<128xf32>
    %132 = vector.shape_cast %131 : vector<128xf32> to vector<128x1xf32>
    %cst_52 = arith.constant 1.280000e+02 : f32
    %133 = vector.broadcast %cst_52 : f32 to vector<128x1xf32>
    %134 = arith.divf %132, %133 : vector<128x1xf32>
    %135 = vector.broadcast %134 : vector<128x1xf32> to vector<128x128xf32>
    %136 = arith.subf %126, %135 : vector<128x128xf32>
    %137 = vector.broadcast %134 : vector<128x1xf32> to vector<128x128xf32>
    %138 = arith.subf %126, %137 : vector<128x128xf32>
    %139 = arith.mulf %136, %138 : vector<128x128xf32>
    %cst_53 = arith.constant dense<0.000000e+00> : vector<128xf32>
    %140 = vector.multi_reduction <add>, %139, %cst_53 [1] : vector<128x128xf32> to vector<128xf32>
    %141 = vector.shape_cast %140 : vector<128xf32> to vector<128x1xf32>
    %cst_54 = arith.constant 1.280000e+02 : f32
    %142 = vector.broadcast %cst_54 : f32 to vector<128x1xf32>
    %143 = arith.divf %141, %142 : vector<128x1xf32>
    %144 = vector.broadcast %134 : vector<128x1xf32> to vector<128x128xf32>
    %145 = arith.subf %126, %144 : vector<128x128xf32>
    %cst_55 = arith.constant 9.99999974E-6 : f32
    %146 = vector.broadcast %cst_55 : f32 to vector<128x1xf32>
    %147 = arith.addf %143, %146 : vector<128x1xf32>
    %148 = math.rsqrt %147 : vector<128x1xf32>
    %149 = vector.broadcast %148 : vector<128x1xf32> to vector<128x128xf32>
    %150 = arith.mulf %145, %149 : vector<128x128xf32>
    %151 = vector.broadcast %128 : vector<1x128xf32> to vector<128x128xf32>
    %152 = arith.mulf %150, %151 : vector<128x128xf32>
    %153 = vector.broadcast %130 : vector<1x128xf32> to vector<128x128xf32>
    %154 = arith.addf %152, %153 : vector<128x128xf32>
    %155 = arith.truncf %154 : vector<128x128xf32> to vector<128x128xbf16>
    %c0_56 = arith.constant 0 : index
    %c0_57 = arith.constant 0 : index
    %c0_58 = arith.constant 0 : index
    %156 = vector.load %arg13[%c0_56, %c0_57, %c0_58] : memref<1x128x512xbf16, #tpu.memory_space<vmem>>, vector<1x128x512xbf16>
    %157 = vector.shape_cast %156 : vector<1x128x512xbf16> to vector<128x512xbf16>
    %cst_59 = arith.constant dense<0.000000e+00> : vector<128x512xf32>
    %158 = tpu.matmul %155, %157, %cst_59 {dimension_numbers = #tpu.dot_dimension_numbers<[1], [0], [0], [1], [0, 0, 1, 1], [], []>} : vector<128x128xbf16>, vector<128x512xbf16>, vector<128x512xf32> -> vector<128x512xf32>
    %c0_60 = arith.constant 0 : index
    %c0_61 = arith.constant 0 : index
    %c0_62 = arith.constant 0 : index
    %159 = vector.load %arg14[%c0_60, %c0_61, %c0_62] : memref<1x1x512xf32, #tpu.memory_space<vmem>>, vector<1x1x512xf32>
    %160 = vector.shape_cast %159 : vector<1x1x512xf32> to vector<1x512xf32>
    %161 = vector.broadcast %160 : vector<1x512xf32> to vector<128x512xf32>
    %162 = arith.addf %158, %161 : vector<128x512xf32>
    %cst_63 = arith.constant 5.000000e-01 : f32
    %163 = vector.broadcast %cst_63 : f32 to vector<128x512xf32>
    %164 = arith.mulf %163, %162 : vector<128x512xf32>
    %cst_64 = arith.constant 4.471500e-02 : f32
    %165 = vector.broadcast %cst_64 : f32 to vector<128x512xf32>
    %166 = arith.mulf %165, %162 : vector<128x512xf32>
    %167 = arith.mulf %166, %162 : vector<128x512xf32>
    %168 = arith.mulf %167, %162 : vector<128x512xf32>
    %169 = arith.addf %162, %168 : vector<128x512xf32>
    %cst_65 = arith.constant 0.797884583 : f32
    %170 = vector.broadcast %cst_65 : f32 to vector<128x512xf32>
    %171 = arith.mulf %170, %169 : vector<128x512xf32>
    %172 = math.tanh %171 : vector<128x512xf32>
    %cst_66 = arith.constant 1.000000e+00 : f32
    %173 = vector.broadcast %cst_66 : f32 to vector<128x512xf32>
    %174 = arith.addf %173, %172 : vector<128x512xf32>
    %175 = arith.mulf %164, %174 : vector<128x512xf32>
    %176 = arith.truncf %175 : vector<128x512xf32> to vector<128x512xbf16>
    %c0_67 = arith.constant 0 : index
    %c0_68 = arith.constant 0 : index
    %c0_69 = arith.constant 0 : index
    %177 = vector.load %arg15[%c0_67, %c0_68, %c0_69] : memref<1x512x128xbf16, #tpu.memory_space<vmem>>, vector<1x512x128xbf16>
    %178 = vector.shape_cast %177 : vector<1x512x128xbf16> to vector<512x128xbf16>
    %cst_70 = arith.constant dense<0.000000e+00> : vector<128x128xf32>
    %179 = tpu.matmul %176, %178, %cst_70 {dimension_numbers = #tpu.dot_dimension_numbers<[1], [0], [0], [1], [0, 0, 1, 1], [], []>} : vector<128x512xbf16>, vector<512x128xbf16>, vector<128x128xf32> -> vector<128x128xf32>
    %c0_71 = arith.constant 0 : index
    %c0_72 = arith.constant 0 : index
    %c0_73 = arith.constant 0 : index
    %180 = vector.load %arg16[%c0_71, %c0_72, %c0_73] : memref<1x1x128xf32, #tpu.memory_space<vmem>>, vector<1x1x128xf32>
    %181 = vector.shape_cast %180 : vector<1x1x128xf32> to vector<1x128xf32>
    %182 = vector.broadcast %181 : vector<1x128xf32> to vector<128x128xf32>
    %183 = arith.addf %179, %182 : vector<128x128xf32>
    %184 = arith.addf %183, %126 : vector<128x128xf32>
    %c0_74 = arith.constant 0 : index
    %c0_75 = arith.constant 0 : index
    %185 = vector.load %arg21[%c0_74, %c0_75] : memref<128x128xf32, #tpu.memory_space<vmem>>, vector<128x128xf32>
    tpu.vector_store %arg21[%c0_74, %c0_75], %184 {strides = array<i32>} : memref<128x128xf32, #tpu.memory_space<vmem>>, vector<128x128xf32>,
    %c1_i32 = arith.constant 1 : i32
    %186 = arith.cmpi eq, %arg0, %c1_i32 : i32
    %187 = arith.extui %186 : i1 to i32
    %c0_i32_76 = arith.constant 0 : i32
    %188 = arith.cmpi ne, %187, %c0_i32_76 : i32
    scf.if %188 {
      %c0_77 = arith.constant 0 : index
      %c0_78 = arith.constant 0 : index
      %189 = vector.load %arg17[%c0_77, %c0_78] : memref<1x128xf32, #tpu.memory_space<vmem>>, vector<1x128xf32>
      %c0_79 = arith.constant 0 : index
      %c0_80 = arith.constant 0 : index
      %190 = vector.load %arg18[%c0_79, %c0_80] : memref<1x128xf32, #tpu.memory_space<vmem>>, vector<1x128xf32>
      %cst_81 = arith.constant dense<0.000000e+00> : vector<128xf32>
      %191 = vector.multi_reduction <add>, %184, %cst_81 [1] : vector<128x128xf32> to vector<128xf32>
      %192 = vector.shape_cast %191 : vector<128xf32> to vector<128x1xf32>
      %cst_82 = arith.constant 1.280000e+02 : f32
      %193 = vector.broadcast %cst_82 : f32 to vector<128x1xf32>
      %194 = arith.divf %192, %193 : vector<128x1xf32>
      %195 = vector.broadcast %194 : vector<128x1xf32> to vector<128x128xf32>
      %196 = arith.subf %184, %195 : vector<128x128xf32>
      %197 = vector.broadcast %194 : vector<128x1xf32> to vector<128x128xf32>
      %198 = arith.subf %184, %197 : vector<128x128xf32>
      %199 = arith.mulf %196, %198 : vector<128x128xf32>
      %cst_83 = arith.constant dense<0.000000e+00> : vector<128xf32>
      %200 = vector.multi_reduction <add>, %199, %cst_83 [1] : vector<128x128xf32> to vector<128xf32>
      %201 = vector.shape_cast %200 : vector<128xf32> to vector<128x1xf32>
      %cst_84 = arith.constant 1.280000e+02 : f32
      %202 = vector.broadcast %cst_84 : f32 to vector<128x1xf32>
      %203 = arith.divf %201, %202 : vector<128x1xf32>
      %204 = vector.broadcast %194 : vector<128x1xf32> to vector<128x128xf32>
      %205 = arith.subf %184, %204 : vector<128x128xf32>
      %cst_85 = arith.constant 9.99999974E-6 : f32
      %206 = vector.broadcast %cst_85 : f32 to vector<128x1xf32>
      %207 = arith.addf %203, %206 : vector<128x1xf32>
      %208 = math.rsqrt %207 : vector<128x1xf32>
      %209 = vector.broadcast %208 : vector<128x1xf32> to vector<128x128xf32>
      %210 = arith.mulf %205, %209 : vector<128x128xf32>
      %211 = vector.broadcast %189 : vector<1x128xf32> to vector<128x128xf32>
      %212 = arith.mulf %210, %211 : vector<128x128xf32>
      %213 = vector.broadcast %190 : vector<1x128xf32> to vector<128x128xf32>
      %214 = arith.addf %212, %213 : vector<128x128xf32>
      %215 = arith.truncf %214 : vector<128x128xf32> to vector<128x128xbf16>
      %c0_86 = arith.constant 0 : index
      %c0_87 = arith.constant 0 : index
      %216 = vector.load %arg19[%c0_86, %c0_87] : memref<128x256xbf16, #tpu.memory_space<vmem>>, vector<128x256xbf16>
      %cst_88 = arith.constant dense<0.000000e+00> : vector<128x256xf32>
      %217 = tpu.matmul %215, %216, %cst_88 {dimension_numbers = #tpu.dot_dimension_numbers<[1], [0], [0], [1], [0, 0, 1, 1], [], []>} : vector<128x128xbf16>, vector<128x256xbf16>, vector<128x256xf32> -> vector<128x256xf32>
      %c0_89 = arith.constant 0 : index
      %c0_90 = arith.constant 0 : index
      %218 = vector.load %arg20[%c0_89, %c0_90] : memref<128x256xf32, #tpu.memory_space<vmem>>, vector<128x256xf32>
      tpu.vector_store %arg20[%c0_89, %c0_90], %217 {strides = array<i32>} : memref<128x256xf32, #tpu.memory_space<vmem>>, vector<128x256xf32>,
    } else {
    }
    return
  }
  func.func @transform_0(%arg0: i32) -> (i32, i32) {
    %c0_i32 = arith.constant 0 : i32
    %c0_i32_0 = arith.constant 0 : i32
    %c0_i32_1 = arith.constant 0 : i32
    return %c0_i32, %c0_i32_0 : i32, i32
  }
  func.func @transform_1(%arg0: i32) -> (i32, i32) {
    %c0_i32 = arith.constant 0 : i32
    %c0_i32_0 = arith.constant 0 : i32
    %c0_i32_1 = arith.constant 0 : i32
    return %c0_i32, %c0_i32_0 : i32, i32
  }
  func.func @transform_2(%arg0: i32) -> (i32, i32) {
    %c0_i32 = arith.constant 0 : i32
    %c0_i32_0 = arith.constant 0 : i32
    %c0_i32_1 = arith.constant 0 : i32
    return %c0_i32, %c0_i32_0 : i32, i32
  }
  func.func @transform_3(%arg0: i32) -> (i32, i32) {
    %c0_i32 = arith.constant 0 : i32
    %c0_i32_0 = arith.constant 0 : i32
    %c0_i32_1 = arith.constant 0 : i32
    return %c0_i32, %c0_i32_0 : i32, i32
  }
  func.func @transform_4(%arg0: i32) -> (i32, i32, i32) {
    %c0_i32 = arith.constant 0 : i32
    %c0_i32_0 = arith.constant 0 : i32
    %c0_i32_1 = arith.constant 0 : i32
    return %arg0, %c0_i32, %c0_i32_0 : i32, i32, i32
  }
  func.func @transform_5(%arg0: i32) -> (i32, i32, i32) {
    %c0_i32 = arith.constant 0 : i32
    %c0_i32_0 = arith.constant 0 : i32
    %c0_i32_1 = arith.constant 0 : i32
    return %arg0, %c0_i32, %c0_i32_0 : i32, i32, i32
  }
  func.func @transform_6(%arg0: i32) -> (i32, i32, i32) {
    %c0_i32 = arith.constant 0 : i32
    %c0_i32_0 = arith.constant 0 : i32
    %c0_i32_1 = arith.constant 0 : i32
    return %arg0, %c0_i32, %c0_i32_0 : i32, i32, i32
  }
  func.func @transform_7(%arg0: i32) -> (i32, i32, i32) {
    %c0_i32 = arith.constant 0 : i32
    %c0_i32_0 = arith.constant 0 : i32
    %c0_i32_1 = arith.constant 0 : i32
    return %arg0, %c0_i32, %c0_i32_0 : i32, i32, i32
  }
  func.func @transform_8(%arg0: i32) -> (i32, i32, i32) {
    %c0_i32 = arith.constant 0 : i32
    %c0_i32_0 = arith.constant 0 : i32
    %c0_i32_1 = arith.constant 0 : i32
    return %arg0, %c0_i32, %c0_i32_0 : i32, i32, i32
  }
  func.func @transform_9(%arg0: i32) -> (i32, i32, i32) {
    %c0_i32 = arith.constant 0 : i32
    %c0_i32_0 = arith.constant 0 : i32
    %c0_i32_1 = arith.constant 0 : i32
    return %arg0, %c0_i32, %c0_i32_0 : i32, i32, i32
  }
  func.func @transform_10(%arg0: i32) -> (i32, i32, i32) {
    %c0_i32 = arith.constant 0 : i32
    %c0_i32_0 = arith.constant 0 : i32
    %c0_i32_1 = arith.constant 0 : i32
    return %arg0, %c0_i32, %c0_i32_0 : i32, i32, i32
  }
  func.func @transform_11(%arg0: i32) -> (i32, i32, i32) {
    %c0_i32 = arith.constant 0 : i32
    %c0_i32_0 = arith.constant 0 : i32
    %c0_i32_1 = arith.constant 0 : i32
    return %arg0, %c0_i32, %c0_i32_0 : i32, i32, i32
  }
  func.func @transform_12(%arg0: i32) -> (i32, i32, i32) {
    %c0_i32 = arith.constant 0 : i32
    %c0_i32_0 = arith.constant 0 : i32
    %c0_i32_1 = arith.constant 0 : i32
    return %arg0, %c0_i32, %c0_i32_0 : i32, i32, i32
  }
  func.func @transform_13(%arg0: i32) -> (i32, i32, i32) {
    %c0_i32 = arith.constant 0 : i32
    %c0_i32_0 = arith.constant 0 : i32
    %c0_i32_1 = arith.constant 0 : i32
    return %arg0, %c0_i32, %c0_i32_0 : i32, i32, i32
  }
  func.func @transform_14(%arg0: i32) -> (i32, i32, i32) {
    %c0_i32 = arith.constant 0 : i32
    %c0_i32_0 = arith.constant 0 : i32
    %c0_i32_1 = arith.constant 0 : i32
    return %arg0, %c0_i32, %c0_i32_0 : i32, i32, i32
  }
  func.func @transform_15(%arg0: i32) -> (i32, i32, i32) {
    %c0_i32 = arith.constant 0 : i32
    %c0_i32_0 = arith.constant 0 : i32
    %c0_i32_1 = arith.constant 0 : i32
    return %arg0, %c0_i32, %c0_i32_0 : i32, i32, i32
  }
  func.func @transform_16(%arg0: i32) -> (i32, i32) {
    %c0_i32 = arith.constant 0 : i32
    %c0_i32_0 = arith.constant 0 : i32
    %c0_i32_1 = arith.constant 0 : i32
    return %c0_i32, %c0_i32_0 : i32, i32
  }
  func.func @transform_17(%arg0: i32) -> (i32, i32) {
    %c0_i32 = arith.constant 0 : i32
    %c0_i32_0 = arith.constant 0 : i32
    %c0_i32_1 = arith.constant 0 : i32
    return %c0_i32, %c0_i32_0 : i32, i32
  }
  func.func @transform_18(%arg0: i32) -> (i32, i32) {
    %c0_i32 = arith.constant 0 : i32
    %c0_i32_0 = arith.constant 0 : i32
    %c0_i32_1 = arith.constant 0 : i32
    return %c0_i32, %c0_i32_0 : i32, i32
  }
  func.func @transform_19(%arg0: i32) -> (i32, i32) {
    %c0_i32 = arith.constant 0 : i32
    %c0_i32_0 = arith.constant 0 : i32
    %c0_i32_1 = arith.constant 0 : i32
    return %c0_i32, %c0_i32_0 : i32, i32
  }
}

</mosaic_0001>

<bundles_post_ra>
// kernel: tpu_custom_call.1
= control target key start
LH: loop header
LB: loop body
LE: loop exit
PB: predicated region body
PF: predicated region fallthrough
CT: control target
= control target key end

     0   :  { %s12485_s0 = inlined_call_operand.vmem [shape: s32[128,1], index: 0, kind: input, shape index: {}]   ;;  %s12486_s1 = inlined_call_operand.hbm [shape: f32[256,128], index: 1, kind: input, shape index: {}]   ;;  %s12487_s2 = inlined_call_operand.hbm [shape: f32[64,128], index: 2, kind: input, shape index: {}]   ;;  %s12488_s3 = inlined_call_operand.vmem [shape: f32[128,128], index: 3, kind: input, shape index: {}]   ;;  %s12489_s4 = inlined_call_operand.vmem [shape: f32[2,1,128], index: 4, kind: input, shape index: {}]   ;;  %s12490_s5 = inlined_call_operand.vmem [shape: f32[2,1,128], index: 5, kind: input, shape index: {}]   ;;  %s12491_s6 = inlined_call_operand.hbm [shape: bf16[2,128,384], index: 6, kind: input, shape index: {}]   ;;  %s12492_s7 = inlined_call_operand.vmem [shape: f32[2,1,384], index: 7, kind: input, shape index: {}]   ;;  %s12493_s8 = inlined_call_operand.hbm [shape: bf16[2,128,128], index: 8, kind: input, shape index: {}]   ;;  %s12494_s9 = inlined_call_operand.vmem [shape: f32[2,1,128], index: 9, kind: input, shape index: {}]   ;;  %s12495_s10 = inlined_call_operand.vmem [shape: f32[2,1,128], index: 10, kind: input, shape index: {}]   ;;  %s12496_s11 = inlined_call_operand.vmem [shape: f32[2,1,128], index: 11, kind: input, shape index: {}]   ;;  %s12497_s12 = inlined_call_operand.hbm [shape: bf16[2,128,512], index: 12, kind: input, shape index: {}]   ;;  %s12498_s13 = inlined_call_operand.vmem [shape: f32[2,1,512], index: 13, kind: input, shape index: {}]   ;;  %s12499_s14 = inlined_call_operand.hbm [shape: bf16[2,512,128], index: 14, kind: input, shape index: {}]   ;;  %s12500_s15 = inlined_call_operand.vmem [shape: f32[2,1,128], index: 15, kind: input, shape index: {}]   ;;  %s12501_s16 = inlined_call_operand.vmem [shape: f32[1,128], index: 16, kind: input, shape index: {}]   ;;  %s12502_s17 = inlined_call_operand.vmem [shape: f32[1,128], index: 17, kind: input, shape index: {}]   ;;  %s12503_s18 = inlined_call_operand.hbm [shape: bf16[128,256], index: 18, kind: input, shape index: {}]   ;;  %s12504_s19 = inlined_call_operand.hbm [shape: f32[128,256], index: 19, kind: output, shape index: {}]  }
   0x1   :  { %12620 = sst [smem:[#allocation75_spill]] %s12485_s0 }
   0x2   :  { %12621 = sst [smem:[#allocation76_spill]] %s12486_s1 }
   0x3   :  { %12622 = sst [smem:[#allocation77_spill]] %s12487_s2 }
   0x4   :  { %12623 = sst [smem:[#allocation78_spill]] %s12488_s3 }
   0x5   :  { %12624 = sst [smem:[#allocation79_spill]] %s12490_s5 }
   0x6   :  { %12625 = sst [smem:[#allocation80_spill]] %s12491_s6 }
   0x7   :  { %12626 = sst [smem:[#allocation81_spill]] %s12492_s7 }
   0x8   :  { %12627 = sst [smem:[#allocation82_spill]] %s12493_s8 }
   0x9   :  { %12628 = sst [smem:[#allocation83_spill]] %s12494_s9 }
   0xa   :  { %12629 = sst [smem:[#allocation84_spill]] %s12495_s10 }
   0xb   :  { %12630 = sst [smem:[#allocation85_spill]] %s12496_s11 }
   0xc   :  { %12631 = sst [smem:[#allocation86_spill]] %s12497_s12 }
   0xd   :  { %12632 = sst [smem:[#allocation87_spill]] %s12498_s13 }
   0xe   :  { %12633 = sst [smem:[#allocation88_spill]] %s12499_s14 }
   0xf   :  { %12634 = sst [smem:[#allocation89_spill]] %s12500_s15 }
  0x10   :  { %12635 = sst [smem:[#allocation90_spill]] %s12501_s16 }
  0x11   :  { %12636 = sst [smem:[#allocation91_spill]] %s12502_s17 }
  0x12   :  { %12637 = sst [smem:[#allocation92_spill]] %s12504_s19 }
  0x13   :  { %24 = vsyncpa [#allocation4], 0 }
  0x14   :  { %25 = vsyncpa [#allocation7], 0 }
  0x15   :  { %26 = vsyncpa [#allocation5], 0  ;;  %s8955_s0 = smov 0   ;;  %s8957_s30 = smov 0  }
  0x16   :  { %s8959_s20 = smov 0   ;;  %s8961_s21 = smov 0  }
  0x17 LB: > { %12638 = sst [smem:[#allocation19_spill]] %s8824_s20  ;;  %s8974_s1 = sadd.s32 4294967295, %s8828_s21   ;;  %s8828_s21 = sphi %s8961_s21, %s12926_s21   ;;  %s8824_s20 = sphi %s8959_s20, %s12928_s20   ;;  %s8820_s30 = sphi %s8957_s30, %s12930_s30   ;;  %s8816_s0 = sphi %s8955_s0, %s12929_s0  }
  0x18   : > { %s8977_s22 = sadd.s32 1, %s8828_s21   ;;  %s175_s23 = sadd.s32 1, %s8824_s20 }
  0x19   : > { %12639 = sst [smem:[#allocation20_spill]] %s8977_s22  ;;  %s172_s2 = ssub.s32 %s8828_s21, %s8977_s22 }
  0x1a   : > { %p173_p0 = scmp.eq.s32.totalorder %s172_s2, 0  ;;  %p182_p1 = scmp.ne.s32.totalorder %s8824_s20, %s8820_s30 }
  0x1b   : > { %p183_p2 = scmp.eq.s32.totalorder %s8828_s21, 0  ;;  %p188_p3 = scmp.ne.s32.totalorder %s8820_s30, %s8816_s0 }
  0x1c   : > { %s8987_s24 = scalar_select %p173_p0, %s8824_s20, %s175_s23  }
  0x1d   : > { %p8989_p4 = por %p183_p2, %p182_p1  ;;  %p12512_p5 = scmp.eq.s32.totalorder %s8974_s1, 0 }
  0x1e   : > { %12640 = sst [smem:[#allocation21_spill]] %s8987_s24  ;;  %p6609_p6 = scmp.ge.s32.totalorder %s8828_s21, 1 }
  0x1f   : > { %p517_p7 = scmp.lt.s32.totalorder %s8828_s21, 3  ;;  %p8998_p8 = por %p12512_p5, %p188_p3 }
  0x20   : > { %s8830_s27 = smov [#allocation3]   ;;  %p7711_p13 = scmp.lt.s32.totalorder %s8828_s21, 2 }
  0x21   : > { %s12642_s3 = scalar_select %p8998_p8, 1, 0 }
  0x22   : > { %p9003_p10 = pnand %p6609_p6, %p517_p7  ;;  %s532_s28 = sshll.u32 %s8830_s27, 4  ;;  %s533_s28 = int_to_ptr.vmem [resolvable:$true] %s532_s28 }
  0x23   : > { %s9018_s2 = sand.u32 1, %s8824_s20   ;;  %p9022_p0 = pnand %p7711_p13, %p8989_p4 }
  0x24   : > { %s12643_s26 = scalar_select %p9003_p10, 1, 0 }
  0x25   : > { %p7685_p11 = pneg %p9003_p10  ;;  %s12646_s22 = sld [smem:[#allocation76_spill]] }
  0x26   : > { %s12645_s23 = scalar_select %p9022_p0, 1, 0 }
  0x27   : > { %p9011_p12 = pnand %p7685_p11, %p12512_p5 }
  0x29   : > { %s12644_s29 = scalar_select %p9011_p12, 1, 0 }
  0x2a   : > { %p9034_p2 = pneg %p9011_p12 }
  0x2b   : > { %s8548_s19 = scalar_lea.hbm %s12646_s22, 4096 }
  0x2c   : > { %p8549_p1 = scmp.ne.s32.totalorder %s12646_s22, %s8548_s19  ;;  %p8555_p6 = scmp.lt.u32.totalorder %s8548_s19, %s12646_s22 }
  0x2d   : > { %s12647_s15 = scalar_select %p9034_p2, 1, 0 }
  0x2e   : > { %p8551_p3 = pnand %p9034_p2, %p8549_p1 }
  0x30   : > { %p8552_p4 = pneg %p8551_p3 }
  0x32   : > { %p8557_p7 = pnand %p8555_p6, %p8552_p4 }
  0x34   : > { %8560 = shalt.err (!%p8557_p7)
}
  0x35   : > { %s8561_s24 = scalar_lea.vmem %s533_s28, 4096  ;;  %p8569_p5 = scmp.lt.s32.totalorder %s533_s28, %s533_s28 }
  0x36   : > { %p8562_p11 = scmp.ne.s32.totalorder %s533_s28, %s8561_s24  ;;  %p8570_p8 = scmp.lt.s32.totalorder %s8561_s24, %s8561_s24 }
  0x38   : > { %p8564_p13 = pnand %p8562_p11, %p9034_p2  ;;  %p8571_p10 = por %p8570_p8, %p8569_p5 }
  0x3a   : > { %p8565_p9 = pneg %p8564_p13 }
  0x3c   : > { %p8572_p0 = pnand %p8571_p10, %p8565_p9 }
  0x3e   : > { %8575 = shalt.err (!%p8572_p0)
}
  0x3f   : > { %s12521_s16 = smov 128   ;;  %s12523_s17 = smov 8  }
  0x40   : > { %7688 = dma.hbm_to_vmem [thread:$0]  (!%p9011_p12), %s12646_s22, 4096, %s533_s28, [#allocation4], %s12521_s16, %s12521_s16, %s12523_s17  }
  0x41   : > { %s7657_s27 = smul.u32 192, %s9018_s2  ;;  %s6615_s24 = sshll.u32 %s9018_s2, 6 }
  0x42   : > { %s7658_s25 = smul.u32 3072, %s8828_s21  ;;  %s12648_s6 = sld [smem:[#allocation80_spill]] }
  0x43   : > { %s597_s11 = scalar_lea.vmem [#allocation8], %s7657_s27  ;;  %s12649_s9 = sand.u32 1, %s8828_s21  }
  0x44   : > { %s604_s10 = sshll.u32 %s597_s11, 4  ;;  %s9065_s5 = scalar_lea.sflag [#allocation4], %s12649_s9  ;;  %s9061_s10 = int_to_ptr.vmem [resolvable:$true] %s604_s10 }
  0x45   : > { %p12650_p8 = scmp.ne.s32.totalorder %s12645_s23, 0 }
  0x47   : > { %p9071_p9 = pneg %p12650_p8 }
  0x48   : > { %s9059_s7 = scalar_lea.hbm %s12648_s6, %s7658_s25  ;;  %s8581_s11 = scalar_lea.hbm %s12648_s6, 6144 }
  0x49   : > { %s8576_s28 = scalar_lea.hbm %s9059_s7, 3072  ;;  %p8582_p1 = scmp.lt.u32.totalorder %s9059_s7, %s12648_s6 }
  0x4a   : > { %p8577_p5 = scmp.ne.s32.totalorder %s9059_s7, %s8576_s28  ;;  %p8583_p3 = scmp.lt.u32.totalorder %s8581_s11, %s8576_s28 }
  0x4b   : > { %p8585_p6 = scmp.lt.u32.totalorder %s8576_s28, %s9059_s7 }
  0x4c   : > { %p8579_p10 = pnand %p9071_p9, %p8577_p5  ;;  %p8584_p4 = por %p8583_p3, %p8582_p1 }
  0x4e   : > { %p8580_p0 = pneg %p8579_p10  ;;  %p8586_p7 = por %p8585_p6, %p8584_p4 }
  0x50   : > { %p8587_p11 = pnand %p8586_p7, %p8580_p0 }
  0x52   : > { %8590 = shalt.err (!%p8587_p11)
}
  0x53   : > { %s8591_s9 = scalar_lea.vmem %s9061_s10, 3072  ;;  %s8833_s25 = smov [#allocation8]  }
  0x54   : > { %p8592_p13 = scmp.ne.s32.totalorder %s9061_s10, %s8591_s9  ;;  %s8596_s13 = sshll.u32 %s8833_s25, 4  ;;  %s8597_s13 = int_to_ptr.vmem [resolvable:$false] %s8596_s13 }
  0x55   : > { %s8598_s20 = scalar_lea.vmem %s8597_s13, 6144  ;;  %p8599_p12 = scmp.lt.s32.totalorder %s9061_s10, %s8597_s13 }
  0x56   : > { %p8594_p5 = pnand %p8592_p13, %p9071_p9  ;;  %p8600_p2 = scmp.lt.s32.totalorder %s8598_s20, %s8591_s9 }
  0x58   : > { %p8595_p10 = pneg %p8594_p5  ;;  %p8601_p1 = por %p8600_p2, %p8599_p12 }
  0x5a   : > { %p8602_p3 = pnand %p8601_p1, %p8595_p10 }
  0x5c   : > { %8605 = shalt.err (!%p8602_p3)
}
  0x5d   : > { %s8834_s28 = smov 192   ;;  %s8835_s11 = smov 12  }
  0x5e   : > { %7698 = dma.hbm_to_vmem [thread:$0]  (!%p12650_p8), %s9059_s7, 3072, %s9061_s10, %s9065_s5, %s8834_s28, %s8834_s28, %s8835_s11  }
  0x5f   : > { %s6854_s0 = sshll.u32 %s8828_s21, 10  ;;  %s625_s27 = scalar_lea.vmem [#allocation9], %s6615_s24 }
  0x60   : > { %s632_s25 = sshll.u32 %s625_s27, 4  ;;  %s12652_s8 = sld [smem:[#allocation82_spill]]  ;;  %s9103_s25 = int_to_ptr.vmem [resolvable:$true] %s632_s25 }
  0x66   : > { %s9101_s20 = scalar_lea.hbm %s12652_s8, %s6854_s0  ;;  %s8611_s24 = scalar_lea.hbm %s12652_s8, 2048 }
  0x67   : > { %s8606_s16 = scalar_lea.hbm %s9101_s20, 1024  ;;  %p8612_p4 = scmp.lt.u32.totalorder %s9101_s20, %s12652_s8 }
  0x68   : > { %p8607_p12 = scmp.ne.s32.totalorder %s9101_s20, %s8606_s16  ;;  %p8613_p6 = scmp.lt.u32.totalorder %s8611_s24, %s8606_s16 }
  0x69   : > { %p8615_p11 = scmp.lt.u32.totalorder %s8606_s16, %s9101_s20 }
  0x6a   : > { %p8609_p2 = pnand %p8607_p12, %p9071_p9  ;;  %p8614_p7 = por %p8613_p6, %p8612_p4 }
  0x6c   : > { %p8610_p0 = pneg %p8609_p2  ;;  %p8616_p13 = por %p8615_p11, %p8614_p7 }
  0x6e   : > { %p8617_p5 = pnand %p8616_p13, %p8610_p0 }
  0x70   : > { %8620 = shalt.err (!%p8617_p5)
}
  0x71   : > { %s8621_s0 = scalar_lea.vmem %s9103_s25, 1024  ;;  %s8836_s27 = smov [#allocation9]  }
  0x72   : > { %p8622_p10 = scmp.ne.s32.totalorder %s9103_s25, %s8621_s0  ;;  %s8626_s13 = sshll.u32 %s8836_s27, 4  ;;  %s8627_s13 = int_to_ptr.vmem [resolvable:$false] %s8626_s13 }
  0x73   : > { %s8628_s9 = scalar_lea.vmem %s8627_s13, 2048  ;;  %p8629_p12 = scmp.lt.s32.totalorder %s9103_s25, %s8627_s13 }
  0x74   : > { %p8624_p1 = pnand %p8622_p10, %p9071_p9  ;;  %p8630_p2 = scmp.lt.s32.totalorder %s8628_s9, %s8621_s0 }
  0x76   : > { %p8625_p3 = pneg %p8624_p1  ;;  %p8631_p4 = por %p8630_p2, %p8629_p12 }
  0x78   : > { %p8632_p6 = pnand %p8631_p4, %p8625_p3 }
  0x7a   : > { %8635 = shalt.err (!%p8632_p6)
}
  0x7b   : > { %s12527_s16 = smov 64   ;;  %s12528_s7 = smov 4  }
  0x7c   : > { %7701 = dma.hbm_to_vmem [thread:$0]  (!%p12650_p8), %s9101_s20, 1024, %s9103_s25, %s9065_s5, %s12527_s16, %s12527_s16, %s12528_s7  }
  0x7d   : > { %s12529_s10 = sshll.u32 %s9018_s2, 8  ;;  %s8839_s24 = smov [#allocation6]  }
  0x7e   : > { %s545_s28 = sshll.u32 %s8839_s24, 4  ;;  %s6855_s11 = sshll.u32 %s8828_s21, 12  ;;  %s546_s28 = int_to_ptr.vmem [resolvable:$true] %s545_s28 }
  0x7f   : > { %s12653_s13 = sld [smem:[#allocation77_spill]]  ;;  %p12654_p7 = scmp.ne.s32.totalorder %s12647_s15, 0 }
  0x85   : > { %s8636_s9 = scalar_lea.hbm %s12653_s13, 1024 }
  0x86   : > { %p8637_p0 = scmp.ne.s32.totalorder %s12653_s13, %s8636_s9  ;;  %p8643_p5 = scmp.lt.u32.totalorder %s8636_s9, %s12653_s13 }
  0x88   : > { %p8639_p11 = pnand %p8637_p0, %p12654_p7 }
  0x8a   : > { %p8640_p13 = pneg %p8639_p11 }
  0x8c   : > { %p8645_p10 = pnand %p8643_p5, %p8640_p13 }
  0x8e   : > { %8648 = shalt.err (!%p8645_p10)
}
  0x8f   : > { %s8649_s25 = scalar_lea.vmem %s546_s28, 1024  ;;  %p8657_p2 = scmp.lt.s32.totalorder %s546_s28, %s546_s28 }
  0x90   : > { %p8650_p1 = scmp.ne.s32.totalorder %s546_s28, %s8649_s25  ;;  %p8658_p4 = scmp.lt.s32.totalorder %s8649_s25, %s8649_s25 }
  0x92   : > { %p8652_p3 = pnand %p8650_p1, %p12654_p7  ;;  %p8659_p6 = por %p8658_p4, %p8657_p2 }
  0x94   : > { %p8653_p12 = pneg %p8652_p3 }
  0x96   : > { %p8660_p8 = pnand %p8659_p6, %p8653_p12 }
  0x98   : > { %8663 = shalt.err (!%p8660_p8)
}
  0x99   : > { %p12655_p0 = scmp.ne.s32.totalorder %s12644_s29, 0  ;;  %s12656_s6 = smov 8  }
  0x9a   : > { %s12657_s17 = smov 128   ;;  %s12658_s12 = sld [smem:[#allocation86_spill]] }
  0x9b   : > { %7691 = dma.hbm_to_vmem [thread:$0]  (!%p12655_p0), %s12653_s13, 1024, %s546_s28, [#allocation7], %s12657_s17, %s12657_s17, %s12656_s6  }
  0x9c   : > { %s664_s27 = scalar_lea.vmem [#allocation10], %s12529_s10 }
  0x9d   : > { %s671_s9 = sshll.u32 %s664_s27, 4  ;;  %s9162_s9 = int_to_ptr.vmem [resolvable:$true] %s671_s9 }
  0xa0   : > { %s9158_s0 = scalar_lea.hbm %s12658_s12, %s6855_s11  ;;  %s8669_s22 = scalar_lea.hbm %s12658_s12, 8192 }
  0xa1   : > { %s8664_s25 = scalar_lea.hbm %s9158_s0, 4096  ;;  %p8670_p5 = scmp.lt.u32.totalorder %s9158_s0, %s12658_s12 }
  0xa2   : > { %p8665_p8 = scmp.ne.s32.totalorder %s9158_s0, %s8664_s25  ;;  %p8671_p10 = scmp.lt.u32.totalorder %s8669_s22, %s8664_s25 }
  0xa3   : > { %p8673_p3 = scmp.lt.u32.totalorder %s8664_s25, %s9158_s0 }
  0xa4   : > { %p8667_p11 = pnand %p8665_p8, %p9071_p9  ;;  %p8672_p1 = por %p8671_p10, %p8670_p5 }
  0xa6   : > { %p8668_p13 = pneg %p8667_p11  ;;  %p8674_p12 = por %p8673_p3, %p8672_p1 }
  0xa8   : > { %p8675_p2 = pnand %p8674_p12, %p8668_p13 }
  0xaa   : > { %8678 = shalt.err (!%p8675_p2)
}
  0xab   : > { %s8679_s27 = scalar_lea.vmem %s9162_s9, 4096  ;;  %s8840_s28 = smov [#allocation10]  }
  0xac   : > { %p8680_p4 = scmp.ne.s32.totalorder %s9162_s9, %s8679_s27  ;;  %s8684_s8 = sshll.u32 %s8840_s28, 4  ;;  %s8685_s8 = int_to_ptr.vmem [resolvable:$false] %s8684_s8 }
  0xad   : > { %s8686_s20 = scalar_lea.vmem %s8685_s8, 8192  ;;  %p8687_p11 = scmp.lt.s32.totalorder %s9162_s9, %s8685_s8 }
  0xae   : > { %p8682_p6 = pnand %p8680_p4, %p9071_p9  ;;  %p8688_p0 = scmp.lt.s32.totalorder %s8686_s20, %s8679_s27 }
  0xb0   : > { %p8683_p8 = pneg %p8682_p6  ;;  %p8689_p5 = por %p8688_p0, %p8687_p11 }
  0xb2   : > { %p8690_p10 = pnand %p8689_p5, %p8683_p8 }
  0xb4   : > { %8693 = shalt.err (!%p8690_p10)
}
  0xb5   : > { %s8841_s25 = smov 256   ;;  %s8842_s22 = smov 16  }
  0xb6   : > { %p12659_p13 = scmp.ne.s32.totalorder %s12645_s23, 0  ;;  %s8843_s24 = smov [#allocation12]  }
  0xb7   : > { %s567_s16 = sshll.u32 %s8843_s24, 4  ;;  %s12660_s14 = sld [smem:[#allocation88_spill]]  ;;  %s568_s16 = int_to_ptr.vmem [resolvable:$true] %s567_s16 }
  0xb8   : > { %7704 = dma.hbm_to_vmem [thread:$0]  (!%p12659_p13), %s9158_s0, 4096, %s9162_s9, %s9065_s5, %s8841_s25, %s8841_s25, %s8842_s22  }
  0xb9   : > { %s8694_s10 = scalar_lea.hbm %s12503_s18, 2048 }
  0xba   : > { %p8695_p0 = scmp.ne.s32.totalorder %s12503_s18, %s8694_s10  ;;  %p8701_p12 = scmp.lt.u32.totalorder %s8694_s10, %s12503_s18 }
  0xbc   : > { %p8697_p1 = pnand %p8695_p0, %p12654_p7 }
  0xbd   : > { %s9191_s27 = scalar_lea.hbm %s12660_s14, %s6855_s11 }
  0xbe   : > { %p8698_p3 = pneg %p8697_p1 }
  0xc0   : > { %p8703_p2 = pnand %p8701_p12, %p8698_p3 }
  0xc2   : > { %8706 = shalt.err (!%p8703_p2)
}
  0xc3   : > { %s8707_s21 = scalar_lea.vmem %s568_s16, 2048  ;;  %p8715_p11 = scmp.lt.s32.totalorder %s568_s16, %s568_s16 }
  0xc4   : > { %p8708_p4 = scmp.ne.s32.totalorder %s568_s16, %s8707_s21  ;;  %p8716_p5 = scmp.lt.s32.totalorder %s8707_s21, %s8707_s21 }
  0xc6   : > { %p8710_p6 = pnand %p8708_p4, %p12654_p7  ;;  %p8717_p10 = por %p8716_p5, %p8715_p11 }
  0xc8   : > { %p8711_p8 = pneg %p8710_p6 }
  0xca   : > { %p8718_p13 = pnand %p8717_p10, %p8711_p8 }
  0xcc   : > { %8721 = shalt.err (!%p8718_p13)
}
  0xcd   : > { %p12661_p0 = scmp.ne.s32.totalorder %s12644_s29, 0  ;;  %s12662_s15 = sshll.u32 %s9018_s2, 8 }
  0xce   : > { %s692_s10 = scalar_lea.vmem [#allocation11], %s12662_s15  ;;  %s8722_s13 = scalar_lea.hbm %s9191_s27, 4096 }
  0xcf   : > { %7694 = dma.hbm_to_vmem [thread:$0]  (!%p12661_p0), %s12503_s18, 2048, %s568_s16, [#allocation7], %s12657_s17, %s12657_s17, %s12656_s6  }
  0xd0   : > { %s699_s11 = sshll.u32 %s692_s10, 4  ;;  %p8723_p7 = scmp.ne.s32.totalorder %s9191_s27, %s8722_s13  ;;  %s9216_s11 = int_to_ptr.vmem [resolvable:$true] %s699_s11 }
  0xd1   : > { %s8727_s22 = scalar_lea.hbm %s12660_s14, 8192  ;;  %p8728_p3 = scmp.lt.u32.totalorder %s9191_s27, %s12660_s14 }
  0xd2   : > { %p8725_p13 = pnand %p8723_p7, %p9071_p9  ;;  %p8729_p12 = scmp.lt.u32.totalorder %s8727_s22, %s8722_s13 }
  0xd3   : > { %p8731_p4 = scmp.lt.u32.totalorder %s8722_s13, %s9191_s27 }
  0xd4   : > { %p8726_p1 = pneg %p8725_p13  ;;  %p8730_p2 = por %p8729_p12, %p8728_p3 }
  0xd6   : > { %p8732_p6 = por %p8731_p4, %p8730_p2 }
  0xd8   : > { %p8733_p8 = pnand %p8732_p6, %p8726_p1 }
  0xda   : > { %8736 = shalt.err (!%p8733_p8)
}
  0xdb   : > { %s8737_s2 = scalar_lea.vmem %s9216_s11, 4096  ;;  %s8844_s16 = smov [#allocation11]  }
  0xdc   : > { %p8738_p11 = scmp.ne.s32.totalorder %s9216_s11, %s8737_s2  ;;  %s8742_s6 = sshll.u32 %s8844_s16, 4  ;;  %s8743_s6 = int_to_ptr.vmem [resolvable:$false] %s8742_s6 }
  0xdd   : > { %s8744_s17 = scalar_lea.vmem %s8743_s6, 8192  ;;  %p8745_p0 = scmp.lt.s32.totalorder %s9216_s11, %s8743_s6 }
  0xde   : > { %p8740_p5 = pnand %p8738_p11, %p9071_p9  ;;  %p8746_p7 = scmp.lt.s32.totalorder %s8744_s17, %s8737_s2 }
  0xe0   : > { %p8741_p10 = pneg %p8740_p5  ;;  %p8747_p13 = por %p8746_p7, %p8745_p0 }
  0xe2   : > { %p8748_p3 = pnand %p8747_p13, %p8741_p10 }
  0xe4   : > { %8751 = shalt.err (!%p8748_p3)
}
  0xe5   : > { %p12663_p1 = scmp.ne.s32.totalorder %s12645_s23, 0  ;;  %s12664_s8 = smov 4  }
  0xe6   : > { %s12665_s20 = smov 64   ;;  %p12666_p9 = scmp.ne.s32.totalorder %s12643_s26, 0 }
  0xe7   : > { %7707 = dma.hbm_to_vmem [thread:$0]  (!%p12663_p1), %s9191_s27, 4096, %s9216_s11, %s9065_s5, %s12665_s20, %s12665_s20, %s12664_s8  }
  0xe8   : > { %717 = sbr.rel (%p12666_p9) target bundleno = 5139 (0x1413), region = 96 }
  0xef   : > { %p12667_p12 = scmp.eq.s32.totalorder %s8974_s1, 0 }
  0xf1   : > { %8795 = dma.done.wait (%p12667_p12), [#allocation4], 4096   ;;  %p12668_p2 = pmov %p12667_p12 }
  0xf3   : > { %8797 = vsyncadd (%p12668_p2), [#allocation4], 4294963200  ;;  %p12669_p4 = pmov %p12668_p2 }
  0xf4   : > { %p12670_p6 = pmov %p12668_p2 }
  0xf5   : > { %8799 = dma.done.wait (%p12669_p4), [#allocation7], 1024  }
  0xf6   : > { %8801 = vsyncadd (%p12670_p6), [#allocation7], 4294966272  ;;  %s727_s23 = sand.u32 1, %s8974_s1   ;;  %s729_s5 = sand.u32 1, %s8820_s30  }
  0xf7   : > { %s7659_s19 = smul.u32 192, %s729_s5  ;;  %s728_s26 = scalar_lea.sflag [#allocation4], %s727_s23 }
  0xf8   : > { %p12671_p8 = scmp.ne.s32.totalorder %s12642_s3, 0 }
  0xf9   : > { %s9255_s27 = scalar_lea.vmem [#allocation8], %s7659_s19 }
  0xfa   : > { %8803 = dma.done.wait (%p12671_p8), %s728_s26, 12288  }
  0xfb   : > { %8805 = vsyncadd (%p12671_p8), %s728_s26, 4294955008  ;;  %s6627_s0 = sshll.u32 %s729_s5, 6  ;;  %s6628_s9 = sshll.u32 %s729_s5, 8 }
  0xfc   : > { %s9261_s21 = scalar_lea.vmem [#allocation9], %s6627_s0  ;;  %s9263_s12 = scalar_lea.vmem [#allocation10], %s6628_s9 }
  0xfd   : > { %s9265_s7 = scalar_lea.vmem [#allocation11], %s6628_s9  ;;  %p12672_p11 = pmov %p12668_p2 }
  0xfe   : > { %p12673_p5 = pmov %p12668_p2 }
  0xff   : > { %8807 = dma.done.wait (%p12672_p11), [#allocation7], 2048  }
 0x100   : > { %8809 = vsyncadd (%p12673_p5), [#allocation7], 4294965248  ;;  %p853_p10 = scmp.lt.s32.totalorder %s8974_s1, 1  ;;  %s12675_s16 = sld [smem:[#allocation83_spill]] }
 0x101   : > { %s12676_s20 = sld [smem:[#allocation84_spill]]  ;;  %s12677_s26 = sld [smem:[#allocation85_spill]] }
 0x102   : > { %s9273_s15 = scalar_select %p853_p10, %s8974_s1, 1 }
 0x103   : > { %s12678_s10 = sld [smem:[#allocation81_spill]]  ;;  %s12679_s22 = sld [smem:[#allocation87_spill]] }
 0x104   : > { %s7660_s24 = smul.u32 3, %s9273_s15  ;;  %s6631_s13 = sshll.u32 %s9273_s15, 2 }
 0x105   : > { %p12681_p0 = scmp.ne.s32.totalorder %s8974_s1, 0 }
 0x106   : > { %s865_s6 = scalar_lea.vmem %s12675_s16, %s9273_s15  ;;  %s12680_s16 = sld [smem:[#allocation89_spill]]  ;;  %v8845_v2 = vmov (!%p12681_p0), 0   ;;  %v1063_v7 = vld [vmem:[#allocation3 + $0x80] sm:$0xff] (!%p12681_p0)  ;;  %v1064_v8 = vld [vmem:[#allocation3 + $0x88] sm:$0xff] (!%p12681_p0)  ;;  %v1065_v12 = vld [vmem:[#allocation3 + $0x90] sm:$0xff] (!%p12681_p0) }
 0x107   : > { %s868_s23 = scalar_lea.vmem %s12676_s20, %s9273_s15  ;;  %s871_s0 = scalar_lea.vmem %s12677_s26, %s9273_s15  ;;  %7771 = vset.pattern.permute.xlu1 (!%p12681_p0), %v8845_v2  ;;  %7770 = vset.pattern.permute.xlu0 (!%p12681_p0), %v8845_v2  ;;  %v7545_v9 = vpack.c.bf16 (!%p12681_p0), %v1064_v8, %v1063_v7  ;;  %v1047_v10 = vld [vmem:[#allocation3] sm:$0xff] (!%p12681_p0)  ;;  %v1048_v11 = vld [vmem:[#allocation3 + $0x8] sm:$0xff] (!%p12681_p0)  ;;  %v1066_v14 = vld [vmem:[#allocation3 + $0x98] sm:$0xff] (!%p12681_p0) }
 0x108   : > { %883 = sbr.rel (%p12681_p0) target bundleno = 651 (0x28b), region = 128  ;;  %s12682_s5 = sld [smem:[#allocation75_spill]] (!%p12681_p0)  ;;  %v7547_v13 = vpack.c.bf16 (!%p12681_p0), %v1048_v11, %v1047_v10  ;;  %v1049_v15 = vld [vmem:[#allocation3 + $0x10] sm:$0xff] (!%p12681_p0)  ;;  %v1050_v16 = vld [vmem:[#allocation3 + $0x18] sm:$0xff] (!%p12681_p0)  ;;  %v7549_v17 = vpack.c.bf16 (!%p12681_p0), %v1066_v14, %v1065_v12  ;;  %v1067_v18 = vld [vmem:[#allocation3 + $0xa0] sm:$0xff] (!%p12681_p0) }
 0x109   : > { %s9299_s11 = scalar_lea.vmem %s12678_s10, %s7660_s24  ;;  %s9305_s14 = scalar_lea.vmem %s12679_s22, %s6631_s13  ;;  %7546 = vmatprep.subr.bf16.mxu0 (!%p12681_p0), %v7545_v9  ;;  %7577 = vmatprep.subr.bf16.mxu1 (!%p12681_p0), %v7545_v9  ;;  %v1068_v19 = vld [vmem:[#allocation3 + $0xa8] sm:$0xff] (!%p12681_p0)  ;;  %v7551_v20 = vpack.c.bf16 (!%p12681_p0), %v1050_v16, %v1049_v15  ;;  %v1051_v21 = vld [vmem:[#allocation3 + $0x20] sm:$0xff] (!%p12681_p0)  ;;  %v1069_v26 = vld [vmem:[#allocation3 + $0xb0] sm:$0xff] (!%p12681_p0) }
 0x10a   : > { %7548 = vmatpush3.bf16.msra.mxu0 (!%p12681_p0), %v7547_v13  ;;  %7585 = vmatpush3.bf16.msra.mxu1 (!%p12681_p0), %v7547_v13  ;;  %v1052_v22 = vld [vmem:[#allocation3 + $0x28] sm:$0xff] (!%p12681_p0)  ;;  %v7553_v25 = vpack.c.bf16 (!%p12681_p0), %v1068_v19, %v1067_v18  ;;  %v1070_v27 = vld [vmem:[#allocation3 + $0xb8] sm:$0xff] (!%p12681_p0)  ;;  %v1053_v29 = vld [vmem:[#allocation3 + $0x30] sm:$0xff] (!%p12681_p0) }
 0x10b   : > { %7550 = vmatprep.subr.bf16.mxu0 (!%p12681_p0), %v7549_v17  ;;  %7578 = vmatprep.subr.bf16.mxu1 (!%p12681_p0), %v7549_v17  ;;  %v7555_v28 = vpack.c.bf16 (!%p12681_p0), %v1052_v22, %v1051_v21  ;;  %v1054_v30 = vld [vmem:[#allocation3 + $0x38] sm:$0xff] (!%p12681_p0)  ;;  %v7557_v33 = vpack.c.bf16 (!%p12681_p0), %v1070_v27, %v1069_v26  ;;  %v1071_v34 = vld [vmem:[#allocation3 + $0xc0] sm:$0xff] (!%p12681_p0)  ;;  %v1072_v35 = vld [vmem:[#allocation3 + $0xc8] sm:$0xff] (!%p12681_p0) }
 0x10c   : > { %s878_s17 = scalar_lea.vmem %s12680_s16, %s9273_s15  ;;  %v7559_v36 = vpack.c.bf16 (!%p12681_p0), %v1054_v30, %v1053_v29  ;;  %v1055_v37 = vld [vmem:[#allocation3 + $0x40] sm:$0xff] (!%p12681_p0)  ;;  %v1056_v38 = vld [vmem:[#allocation3 + $0x48] sm:$0xff] (!%p12681_p0)  ;;  %v7561_v41 = vpack.c.bf16 (!%p12681_p0), %v1072_v35, %v1071_v34  ;;  %v1073_v42 = vld [vmem:[#allocation3 + $0xd0] sm:$0xff] (!%p12681_p0) }
 0x10d   : > { %v1074_v43 = vld [vmem:[#allocation3 + $0xd8] sm:$0xff] (!%p12681_p0)  ;;  %v7563_v44 = vpack.c.bf16 (!%p12681_p0), %v1056_v38, %v1055_v37  ;;  %v1057_v45 = vld [vmem:[#allocation3 + $0x50] sm:$0xff] (!%p12681_p0)  ;;  %v1075_v50 = vld [vmem:[#allocation3 + $0xe0] sm:$0xff] (!%p12681_p0) }
 0x10e   : > { %v885_v0 = vld [vmem:[%s12682_s5 + $0x8] sm:$0xff] (!%p12681_p0)  ;;  %v884_v1 = vld [vmem:[%s12682_s5] sm:$0xff] (!%p12681_p0)  ;;  %v894_v5 = vld [vmem:[%s12682_s5 + $0x50] sm:$0xff] (!%p12681_p0)  ;;  %7552 = vmatpush3.bf16.msra.mxu0 (!%p12681_p0), %v7551_v20  ;;  %7586 = vmatpush3.bf16.msra.mxu1 (!%p12681_p0), %v7551_v20  ;;  %v7565_v49 = vpack.c.bf16 (!%p12681_p0), %v1074_v43, %v1073_v42 }
 0x10f   : > { %907 = vperm.xlu1 %7771, %v885_v0   ;;  %904 = vperm.xlu0 %7770, %v884_v1   ;;  %v893_v3 = vld [vmem:[%s12682_s5 + $0x48] sm:$0xff]  ;;  %v892_v4 = vld [vmem:[%s12682_s5 + $0x40] sm:$0xff]  ;;  %v886_v6 = vld [vmem:[%s12682_s5 + $0x10] sm:$0xff]  ;;  %v900_v1 = vlaneseq }
 0x110   : > { %v895_v23 = vld [vmem:[%s12682_s5 + $0x58] sm:$0xff]  ;;  %v896_v31 = vld [vmem:[%s12682_s5 + $0x60] sm:$0xff]  ;;  %7554 = vmatprep.subr.bf16.mxu0 %v7553_v25  ;;  %7579 = vmatprep.subr.bf16.mxu1 %v7553_v25  ;;  %v897_v39 = vld [vmem:[%s12682_s5 + $0x68] sm:$0xff] }
 0x111   : > { %v887_v24 = vld [vmem:[%s12682_s5 + $0x18] sm:$0xff]  ;;  %v888_v32 = vld [vmem:[%s12682_s5 + $0x20] sm:$0xff]  ;;  %v889_v40 = vld [vmem:[%s12682_s5 + $0x28] sm:$0xff]  ;;  %v9361_v2 = vand.u32 127, %v900_v1 }
 0x112   : > { %7556 = vmatpush3.bf16.msra.mxu0 %v7555_v28  ;;  %7587 = vmatpush3.bf16.msra.mxu1 %v7555_v28  ;;  %v1058_v46 = vld [vmem:[#allocation3 + $0x58] sm:$0xff]  ;;  %v898_v47 = vld [vmem:[%s12682_s5 + $0x70] sm:$0xff]  ;;  %v1076_v51 = vld [vmem:[#allocation3 + $0xe8] sm:$0xff] }
 0x113   : > { %931 = vperm.xlu1 %7771, %v893_v3   ;;  %928 = vperm.xlu0 %7770, %v892_v4   ;;  %v890_v48 = vld [vmem:[%s12682_s5 + $0x30] sm:$0xff]  ;;  %v7567_v52 = vpack.c.bf16 %v1058_v46, %v1057_v45  ;;  %v899_v53 = vld [vmem:[%s12682_s5 + $0x78] sm:$0xff]  ;;  %v1059_v54 = vld [vmem:[#allocation3 + $0x60] sm:$0xff]  ;;  %v7569_v57 = vpack.c.bf16 %v1076_v51, %v1075_v50  ;;  %v9364_v3 = vadd.s32 128, %v9361_v2 }
 0x114   : > { %7558 = vmatprep.subr.bf16.mxu0 %v7557_v33  ;;  %7580 = vmatprep.subr.bf16.mxu1 %v7557_v33  ;;  %v1060_v55 = vld [vmem:[#allocation3 + $0x68] sm:$0xff]  ;;  %v891_v56 = vld [vmem:[%s12682_s5 + $0x38] sm:$0xff]  ;;  %v1077_v58 = vld [vmem:[#allocation3 + $0xf0] sm:$0xff] }
 0x115   : > { %v1078_v59 = vld [vmem:[#allocation3 + $0xf8] sm:$0xff]  ;;  %v7571_v60 = vpack.c.bf16 %v1060_v55, %v1059_v54  ;;  %v1061_v62 = vld [vmem:[#allocation3 + $0x70] sm:$0xff]  ;;  %v1079_v22 = vld [vmem:[#allocation6] sm:$0xff] }
 0x116   : > { %7560 = vmatpush3.bf16.msra.mxu0 %v7559_v36  ;;  %7588 = vmatpush3.bf16.msra.mxu1 %v7559_v36  ;;  %v7573_v61 = vpack.c.bf16 %v1078_v59, %v1077_v58  ;;  %v1062_v63 = vld [vmem:[#allocation3 + $0x78] sm:$0xff]  ;;  %v1080_v28 = vld [vmem:[#allocation6 + $0x8] sm:$0xff]  ;;  %v1081_v37 = vld [vmem:[#allocation6 + $0x10] sm:$0xff] }
 0x117   : > { %934 = vperm.xlu1 %7771, %v894_v5   ;;  %910 = vperm.xlu0 %7770, %v886_v6   ;;  %v7575_v0 = vpack.c.bf16 %v1062_v63, %v1061_v62  ;;  %v8846_v6 = vmov 1.0   ;;  %v1082_v46 = vld [vmem:[#allocation6 + $0x18] sm:$0xff]  ;;  %v1083_v55 = vld [vmem:[#allocation6 + $0x20] sm:$0xff] }
 0x118   : > { %7562 = vmatprep.subr.bf16.mxu0 %v7561_v41  ;;  %7581 = vmatprep.subr.bf16.mxu1 %v7561_v41 }
 0x11a   : > { %7564 = vmatpush3.bf16.msra.mxu0 %v7563_v44  ;;  %7589 = vmatpush3.bf16.msra.mxu1 %v7563_v44 }
 0x11b   : > { %937 = vperm.xlu1 %7771, %v895_v23   ;;  %913 = vperm.xlu0 %7770, %v887_v24  }
 0x11c   : > { %7566 = vmatprep.subr.bf16.mxu0 %v7565_v49  ;;  %7582 = vmatprep.subr.bf16.mxu1 %v7565_v49 }
 0x11e   : > { %7568 = vmatpush3.bf16.msra.mxu0 %v7567_v52  ;;  %7590 = vmatpush3.bf16.msra.mxu1 %v7567_v52 }
 0x11f   : > { %940 = vperm.xlu1 %7771, %v896_v31   ;;  %916 = vperm.xlu0 %7770, %v888_v32  }
 0x120   : > { %7570 = vmatprep.subr.bf16.mxu0 %v7569_v57  ;;  %7583 = vmatprep.subr.bf16.mxu1 %v7569_v57 }
 0x122   : > { %7572 = vmatpush3.bf16.msra.mxu0 %v7571_v60  ;;  %7591 = vmatpush3.bf16.msra.mxu1 %v7571_v60 }
 0x123   : > { %943 = vperm.xlu1 %7771, %v897_v39   ;;  %919 = vperm.xlu0 %7770, %v889_v40  }
 0x124   : > { %7574 = vmatprep.subr.bf16.mxu0 %v7573_v61  ;;  %7584 = vmatprep.subr.bf16.mxu1 %v7573_v61 }
 0x126   : > { %7576 = vmatpush3.bf16.msra.mxu0 %v7575_v0  ;;  %7592 = vmatpush3.bf16.msra.mxu1 %v7575_v0  ;;  %v1084_v0 = vld [vmem:[#allocation6 + $0x28] sm:$0xff] }
 0x127   : > { %946 = vperm.xlu1 %7771, %v898_v47   ;;  %922 = vperm.xlu0 %7770, %v890_v48  }
 0x12b   : > { %949 = vperm.xlu1 %7771, %v899_v53   ;;  %925 = vperm.xlu0 %7770, %v891_v56  }
 0x18e   : > { %v908_v4 = vpop.permute.xlu1 %907  ;;  %v905_v5 = vpop.permute.xlu0 %904 }
 0x18f   : > { %vm954_vm0 = vcmp.eq.s32.totalorder %v9364_v3, %v908_v4  ;;  %vm951_vm1 = vcmp.eq.s32.totalorder %v9361_v2, %v905_v5  ;;  %vm952_vm2 = vcmp.eq.s32.totalorder %v9364_v3, %v905_v5  ;;  %vm953_vm3 = vcmp.eq.s32.totalorder %v9361_v2, %v908_v4 }
 0x190   : > { %6665 = vmatprep.mubr.msk.f32.mxu0 %vm952_vm2, %v8846_v6 }
 0x191   : > { %6666 = vmatmul.mubr.msk.f32.vlgmr.msra.gmra.mrb[0].mxu0 %vm951_vm1, %v8846_v6 }
 0x192   : > { %v932_v7 = vpop.permute.xlu1 %931  ;;  %v929_v8 = vpop.permute.xlu0 %928  ;;  %6667 = vmatprep.mubr.msk.f32.mxu0 %vm954_vm0, %v8846_v6 }
 0x193   : > { %vm967_vm4 = vcmp.eq.s32.totalorder %v9361_v2, %v929_v8  ;;  %vm968_vm5 = vcmp.eq.s32.totalorder %v9364_v3, %v929_v8  ;;  %vm970_vm6 = vcmp.eq.s32.totalorder %v9364_v3, %v932_v7  ;;  %vm969_vm9 = vcmp.eq.s32.totalorder %v9361_v2, %v932_v7 }
 0x194   : > { %6681 = vmatprep.mubr.msk.f32.mxu1 %vm968_vm5, %v8846_v6 }
 0x195   : > { %6668 = vmatmul.mubr.msk.f32.gmra.mrb[2].mxu0 %vm953_vm3, %v8846_v6  ;;  %6682 = vmatmul.mubr.msk.f32.vlgmr.msra.gmra.mrb[0].mxu1 %vm967_vm4, %v8846_v6 }
 0x196   : > { %v935_v9 = vpop.permute.xlu1 %934  ;;  %6683 = vmatprep.mubr.msk.f32.mxu1 %vm970_vm6, %v8846_v6  ;;  %v911_v10 = vpop.permute.xlu0 %910 }
 0x197   : > { %vm955_vm7 = vcmp.eq.s32.totalorder %v9361_v2, %v911_v10  ;;  %vm956_vm8 = vcmp.eq.s32.totalorder %v9364_v3, %v911_v10  ;;  %vm972_vm10 = vcmp.eq.s32.totalorder %v9364_v3, %v935_v9  ;;  %vm971_vm13 = vcmp.eq.s32.totalorder %v9361_v2, %v935_v9  ;;  %v1085_v9 = vld [vmem:[#allocation6 + $0x30] sm:$0xff] }
 0x198   : > { %6669 = vmatprep.mubr.msk.f32.mxu0 %vm956_vm8, %v8846_v6 }
 0x199   : > { %6670 = vmatmul.mubr.msk.f32.gmra.mrb[4].mxu0 %vm955_vm7, %v8846_v6  ;;  %6684 = vmatmul.mubr.msk.f32.gmra.mrb[2].mxu1 %vm969_vm9, %v8846_v6 }
 0x19a   : > { %v938_v11 = vpop.permute.xlu1 %937  ;;  %6685 = vmatprep.mubr.msk.f32.mxu1 %vm972_vm10, %v8846_v6  ;;  %v914_v12 = vpop.permute.xlu0 %913 }
 0x19b   : > { %vm957_vm11 = vcmp.eq.s32.totalorder %v9361_v2, %v914_v12  ;;  %vm958_vm12 = vcmp.eq.s32.totalorder %v9364_v3, %v914_v12  ;;  %vm974_vm14 = vcmp.eq.s32.totalorder %v9364_v3, %v938_v11  ;;  %vm973_vm1 = vcmp.eq.s32.totalorder %v9361_v2, %v938_v11 }
 0x19c   : > { %6671 = vmatprep.mubr.msk.f32.mxu0 %vm958_vm12, %v8846_v6 }
 0x19d   : > { %6672 = vmatmul.mubr.msk.f32.gmra.mrb[6].mxu0 %vm957_vm11, %v8846_v6  ;;  %6686 = vmatmul.mubr.msk.f32.gmra.mrb[4].mxu1 %vm971_vm13, %v8846_v6 }
 0x19e   : > { %v941_v13 = vpop.permute.xlu1 %940  ;;  %6687 = vmatprep.mubr.msk.f32.mxu1 %vm974_vm14, %v8846_v6  ;;  %v917_v14 = vpop.permute.xlu0 %916 }
 0x19f   : > { %vm959_vm15 = vcmp.eq.s32.totalorder %v9361_v2, %v917_v14  ;;  %vm960_vm0 = vcmp.eq.s32.totalorder %v9364_v3, %v917_v14  ;;  %vm976_vm2 = vcmp.eq.s32.totalorder %v9364_v3, %v941_v13  ;;  %vm975_vm5 = vcmp.eq.s32.totalorder %v9361_v2, %v941_v13 }
 0x1a0   : > { %6673 = vmatprep.mubr.msk.f32.mxu0 %vm960_vm0, %v8846_v6 }
 0x1a1   : > { %6674 = vmatmul.mubr.msk.f32.gmra.mrb[8].mxu0 %vm959_vm15, %v8846_v6  ;;  %6688 = vmatmul.mubr.msk.f32.gmra.mrb[6].mxu1 %vm973_vm1, %v8846_v6 }
 0x1a2   : > { %v944_v15 = vpop.permute.xlu1 %943  ;;  %6689 = vmatprep.mubr.msk.f32.mxu1 %vm976_vm2, %v8846_v6  ;;  %v920_v16 = vpop.permute.xlu0 %919 }
 0x1a3   : > { %vm961_vm3 = vcmp.eq.s32.totalorder %v9361_v2, %v920_v16  ;;  %vm962_vm4 = vcmp.eq.s32.totalorder %v9364_v3, %v920_v16  ;;  %vm978_vm6 = vcmp.eq.s32.totalorder %v9364_v3, %v944_v15  ;;  %vm977_vm9 = vcmp.eq.s32.totalorder %v9361_v2, %v944_v15 }
 0x1a4   : > { %6675 = vmatprep.mubr.msk.f32.mxu0 %vm962_vm4, %v8846_v6 }
 0x1a5   : > { %6676 = vmatmul.mubr.msk.f32.gmra.mrb[10].mxu0 %vm961_vm3, %v8846_v6  ;;  %6690 = vmatmul.mubr.msk.f32.gmra.mrb[8].mxu1 %vm975_vm5, %v8846_v6 }
 0x1a6   : > { %v947_v17 = vpop.permute.xlu1 %946  ;;  %6691 = vmatprep.mubr.msk.f32.mxu1 %vm978_vm6, %v8846_v6  ;;  %v923_v18 = vpop.permute.xlu0 %922 }
 0x1a7   : > { %vm963_vm7 = vcmp.eq.s32.totalorder %v9361_v2, %v923_v18  ;;  %vm964_vm8 = vcmp.eq.s32.totalorder %v9364_v3, %v923_v18  ;;  %vm980_vm10 = vcmp.eq.s32.totalorder %v9364_v3, %v947_v17  ;;  %vm979_vm13 = vcmp.eq.s32.totalorder %v9361_v2, %v947_v17  ;;  %v1086_v18 = vld [vmem:[#allocation6 + $0x38] sm:$0xff] }
 0x1a8   : > { %6677 = vmatprep.mubr.msk.f32.mxu0 %vm964_vm8, %v8846_v6 }
 0x1a9   : > { %6678 = vmatmul.mubr.msk.f32.gmra.mrb[12].mxu0 %vm963_vm7, %v8846_v6  ;;  %6692 = vmatmul.mubr.msk.f32.gmra.mrb[10].mxu1 %vm977_vm9, %v8846_v6 }
 0x1aa   : > { %v950_v19 = vpop.permute.xlu1 %949  ;;  %6693 = vmatprep.mubr.msk.f32.mxu1 %vm980_vm10, %v8846_v6  ;;  %v926_v20 = vpop.permute.xlu0 %925 }
 0x1ab   : > { %vm965_vm11 = vcmp.eq.s32.totalorder %v9361_v2, %v926_v20  ;;  %vm966_vm12 = vcmp.eq.s32.totalorder %v9364_v3, %v926_v20  ;;  %vm982_vm14 = vcmp.eq.s32.totalorder %v9364_v3, %v950_v19  ;;  %vm981_vm15 = vcmp.eq.s32.totalorder %v9361_v2, %v950_v19 }
 0x1ac   : > { %6679 = vmatprep.mubr.msk.f32.mxu0 %vm966_vm12, %v8846_v6 }
 0x1ad   : > { %6680 = vmatmul.mubr.msk.f32.gmra.mrb[14].mxu0 %vm965_vm11, %v8846_v6  ;;  %6694 = vmatmul.mubr.msk.f32.gmra.mrb[12].mxu1 %vm979_vm13, %v8846_v6 }
 0x1ae   : > { %6695 = vmatprep.mubr.msk.f32.mxu1 %vm982_vm14, %v8846_v6 }
 0x1b1   : > { %6696 = vmatmul.mubr.msk.f32.gmra.mrb[14].mxu1 %vm981_vm15, %v8846_v6 }
 0x264   : > { %v6889_v21 = vpop.f32.mrb[0].mxu0 }
 0x265   : > { %v6890_v23 = vpop.f32.mrb[1].mxu0 }
 0x266   : > { %v6891_v24 = vadd.f32 %v6890_v23, %v6889_v21 }
 0x268   : > { %v1154_v25 = vadd.f32 %v6891_v24, %v1079_v22  ;;  %v6892_v26 = vpop.f32.mrb[2].mxu0  ;;  %v6913_v27 = vpop.f32.mrb[0].mxu1 }
 0x269   : > { %v6893_v29 = vpop.f32.mrb[3].mxu0  ;;  %v6914_v30 = vpop.f32.mrb[1].mxu1 }
 0x26a   : > { %1232 = vst [vmem:[#allocation2] sm:$0xff] %v1154_v25  ;;  %v6894_v31 = vadd.f32 %v6893_v29, %v6892_v26  ;;  %v6915_v32 = vadd.f32 %v6914_v30, %v6913_v27 }
 0x26c   : > { %v1159_v33 = vadd.f32 %v6894_v31, %v1080_v28  ;;  %v1194_v34 = vadd.f32 %v6915_v32, %v1079_v22  ;;  %v6895_v35 = vpop.f32.mrb[4].mxu0  ;;  %v6916_v36 = vpop.f32.mrb[2].mxu1 }
 0x26d   : > { %v6896_v38 = vpop.f32.mrb[5].mxu0  ;;  %v6917_v39 = vpop.f32.mrb[3].mxu1 }
 0x26e   : > { %1233 = vst [vmem:[#allocation2 + $0x8] sm:$0xff] %v1159_v33  ;;  %1240 = vst [vmem:[#allocation2 + $0x40] sm:$0xff] %v1194_v34  ;;  %v6897_v40 = vadd.f32 %v6896_v38, %v6895_v35  ;;  %v6918_v41 = vadd.f32 %v6917_v39, %v6916_v36 }
 0x270   : > { %v1164_v42 = vadd.f32 %v6897_v40, %v1081_v37  ;;  %v1199_v43 = vadd.f32 %v6918_v41, %v1080_v28  ;;  %v6898_v44 = vpop.f32.mrb[6].mxu0  ;;  %v6919_v45 = vpop.f32.mrb[4].mxu1 }
 0x271   : > { %v6899_v47 = vpop.f32.mrb[7].mxu0  ;;  %v6920_v48 = vpop.f32.mrb[5].mxu1 }
 0x272   : > { %1234 = vst [vmem:[#allocation2 + $0x10] sm:$0xff] %v1164_v42  ;;  %1241 = vst [vmem:[#allocation2 + $0x48] sm:$0xff] %v1199_v43  ;;  %v6900_v49 = vadd.f32 %v6899_v47, %v6898_v44  ;;  %v6921_v50 = vadd.f32 %v6920_v48, %v6919_v45 }
 0x274   : > { %v1169_v51 = vadd.f32 %v6900_v49, %v1082_v46  ;;  %v1204_v52 = vadd.f32 %v6921_v50, %v1081_v37  ;;  %v6901_v53 = vpop.f32.mrb[8].mxu0  ;;  %v6922_v54 = vpop.f32.mrb[6].mxu1 }
 0x275   : > { %v6902_v56 = vpop.f32.mrb[9].mxu0  ;;  %v6923_v57 = vpop.f32.mrb[7].mxu1 }
 0x276   : > { %1235 = vst [vmem:[#allocation2 + $0x18] sm:$0xff] %v1169_v51  ;;  %1242 = vst [vmem:[#allocation2 + $0x50] sm:$0xff] %v1204_v52  ;;  %v6903_v58 = vadd.f32 %v6902_v56, %v6901_v53  ;;  %v6924_v59 = vadd.f32 %v6923_v57, %v6922_v54 }
 0x278   : > { %v1174_v60 = vadd.f32 %v6903_v58, %v1083_v55  ;;  %v1209_v61 = vadd.f32 %v6924_v59, %v1082_v46  ;;  %v6904_v62 = vpop.f32.mrb[10].mxu0  ;;  %v6925_v63 = vpop.f32.mrb[8].mxu1 }
 0x279   : > { %v6905_v1 = vpop.f32.mrb[11].mxu0  ;;  %v6926_v2 = vpop.f32.mrb[9].mxu1 }
 0x27a   : > { %1236 = vst [vmem:[#allocation2 + $0x20] sm:$0xff] %v1174_v60  ;;  %1243 = vst [vmem:[#allocation2 + $0x58] sm:$0xff] %v1209_v61  ;;  %v6906_v3 = vadd.f32 %v6905_v1, %v6904_v62  ;;  %v6927_v4 = vadd.f32 %v6926_v2, %v6925_v63 }
 0x27c   : > { %v1179_v5 = vadd.f32 %v6906_v3, %v1084_v0  ;;  %v1214_v6 = vadd.f32 %v6927_v4, %v1083_v55  ;;  %v6907_v7 = vpop.f32.mrb[12].mxu0  ;;  %v6928_v8 = vpop.f32.mrb[10].mxu1 }
 0x27d   : > { %v6908_v10 = vpop.f32.mrb[13].mxu0  ;;  %v6929_v11 = vpop.f32.mrb[11].mxu1 }
 0x27e   : > { %1237 = vst [vmem:[#allocation2 + $0x28] sm:$0xff] %v1179_v5  ;;  %1244 = vst [vmem:[#allocation2 + $0x60] sm:$0xff] %v1214_v6  ;;  %v6909_v12 = vadd.f32 %v6908_v10, %v6907_v7  ;;  %v6930_v13 = vadd.f32 %v6929_v11, %v6928_v8 }
 0x280   : > { %v1184_v14 = vadd.f32 %v6909_v12, %v1085_v9  ;;  %v1219_v15 = vadd.f32 %v6930_v13, %v1084_v0  ;;  %v6910_v16 = vpop.f32.mrb[14].mxu0  ;;  %v6931_v17 = vpop.f32.mrb[12].mxu1 }
 0x281   : > { %v6911_v19 = vpop.f32.mrb[15].mxu0  ;;  %v6932_v20 = vpop.f32.mrb[13].mxu1 }
 0x282   : > { %1238 = vst [vmem:[#allocation2 + $0x30] sm:$0xff] %v1184_v14  ;;  %1245 = vst [vmem:[#allocation2 + $0x68] sm:$0xff] %v1219_v15  ;;  %v6912_v21 = vadd.f32 %v6911_v19, %v6910_v16  ;;  %v6933_v22 = vadd.f32 %v6932_v20, %v6931_v17 }
 0x284   : > { %v1189_v23 = vadd.f32 %v6912_v21, %v1086_v18  ;;  %v1224_v24 = vadd.f32 %v6933_v22, %v1085_v9  ;;  %v6934_v25 = vpop.f32.mrb[14].mxu1 }
 0x285   : > { %v6935_v26 = vpop.f32.mrb[15].mxu1 }
 0x286   : > { %1239 = vst [vmem:[#allocation2 + $0x38] sm:$0xff] %v1189_v23  ;;  %1246 = vst [vmem:[#allocation2 + $0x70] sm:$0xff] %v1224_v24  ;;  %v6936_v27 = vadd.f32 %v6935_v26, %v6934_v25 }
 0x288   : > { %v1229_v28 = vadd.f32 %v6936_v27, %v1086_v18 }
 0x28a   : > { %1247 = vst [vmem:[#allocation2 + $0x78] sm:$0xff] %v1229_v28 }
 0x28b PF: > { %v1248_v29 = vld [vmem:[#allocation2] sm:$0xff]  ;;  %v1250_v30 = vld [vmem:[#allocation2 + $0x10] sm:$0xff]  ;;  %v1249_v31 = vld [vmem:[#allocation2 + $0x8] sm:$0xff]  ;;  %s12683_s24 = scalar_lea.vmem %s12489_s4, %s9273_s15  ;;  %s12684_s9 = sld [smem:[#allocation79_spill]]  ;;  %vm1938_vm0 = vcmask 261120   ;;  %vm3915_vm1 = vcmask 523264  }
 0x28c   : > { %1266 = vadd.xlane.f32.xlu0 %v1248_v29  ;;  %1270 = vadd.xlane.f32.xlu1 %v1250_v30  ;;  %v1251_v32 = vld [vmem:[#allocation2 + $0x18] sm:$0xff]  ;;  %v1252_v33 = vld [vmem:[#allocation2 + $0x20] sm:$0xff]  ;;  %v1253_v34 = vld [vmem:[#allocation2 + $0x28] sm:$0xff]  ;;  %s12695_s29 = sld [smem:[#allocation78_spill]]  ;;  %s8849_s25 = smov 64   ;;  %vm3932_vm2 = vcmask 785408  }
 0x28d   : > { %v9430_v35 = vld [vmem:[#allocation2 + $0x30] sm:$0xff]  ;;  %v9432_v36 = vld [vmem:[#allocation2 + $0x38] sm:$0xff]  ;;  %v9434_v37 = vld [vmem:[#allocation2 + $0x40] sm:$0xff]  ;;  %s8850_s28 = smov 32   ;;  %p6831_p7 = scmp.ne.s32.totalorder %s8974_s1, 1 }
 0x28e   : > { %v9436_v38 = vld [vmem:[#allocation2 + $0x48] sm:$0xff]  ;;  %v9440_v39 = vld [vmem:[#allocation2 + $0x50] sm:$0xff]  ;;  %v9442_v40 = vld [vmem:[#allocation2 + $0x58] sm:$0xff]  ;;  %s12924_s10 = sld [smem:[#allocation91_spill]] (!%p6831_p7) }
 0x28f   : > { %v9446_v41 = vld [vmem:[#allocation2 + $0x60] sm:$0xff]  ;;  %v9448_v42 = vld [vmem:[#allocation2 + $0x68] sm:$0xff]  ;;  %v9452_v43 = vld [vmem:[#allocation2 + $0x70] sm:$0xff] }
 0x290   : > { %1268 = vadd.xlane.f32.xlu0 %v1249_v31  ;;  %1272 = vadd.xlane.f32.xlu1 %v1251_v32  ;;  %v7892_v45 = vld [vmem:[%s9255_s27 + $0x4] ss:$12 sps:$4 sm:$0xff]   ;;  %v7894_v46 = vld [vmem:[%s9255_s27] ss:$12 sps:$4 sm:$0xff]   ;;  %v7895_v47 = vld [vmem:[%s9255_s27 + $0x1c] ss:$12 sps:$4 sm:$0xff]  }
 0x291   : > { %v9454_v44 = vld [vmem:[#allocation2 + $0x78] sm:$0xff]  ;;  %v7897_v48 = vld [vmem:[%s9255_s27 + $0x8] ss:$12 sps:$4 sm:$0xff]   ;;  %1672 = vmatprep.subr.bf16.mxu0 %v7892_v45  ;;  %s12685_s3 = scalar_lea.vmem %s12684_s9, %s9273_s15 }
 0x292   : > { %1673 = vmatpush1.bf16.msra.mxu0 %v7894_v46  ;;  %7225 = vmatprep.subr.bf16.mxu1 %v7897_v48  ;;  %v7898_v23 = vld [vmem:[%s9255_s27 + $0x18] ss:$12 sps:$4 sm:$0xff]  }
 0x293   : > { %1674 = vmatprep.subr.bf16.mxu0 %v7895_v47  ;;  %7226 = vmatpush3.bf16.msra.mxu1 %v7897_v48  ;;  %v7903_v47 = vld [vmem:[%s9255_s27 + $0x4c] ss:$12 sps:$4 sm:$0xff]  }
 0x294   : > { %1274 = vadd.xlane.f32.xlu0 %v1252_v33  ;;  %1276 = vadd.xlane.f32.xlu1 %v1253_v34  ;;  %v7905_v48 = vld [vmem:[%s9255_s27 + $0x38] ss:$12 sps:$4 sm:$0xff]  }
 0x296   : > { %1675 = vmatpush1.bf16.msra.mxu0 %v7898_v23 }
 0x298   : > { %1278 = vadd.xlane.f32.xlu0 %v9430_v35  ;;  %1280 = vadd.xlane.f32.xlu1 %v9432_v36 }
 0x29c   : > { %1282 = vadd.xlane.f32.xlu0 %v9434_v37  ;;  %1284 = vadd.xlane.f32.xlu1 %v9436_v38 }
 0x2a0   : > { %1286 = vadd.xlane.f32.xlu0 %v9440_v39  ;;  %1288 = vadd.xlane.f32.xlu1 %v9442_v40 }
 0x2a4   : > { %1290 = vadd.xlane.f32.xlu0 %v9446_v41  ;;  %1292 = vadd.xlane.f32.xlu1 %v9448_v42 }
 0x2a8   : > { %1294 = vadd.xlane.f32.xlu0 %v9452_v43  ;;  %1296 = vadd.xlane.f32.xlu1 %v9454_v44 }
 0x319   : > { %v1267_v49 = vpop.xlane.xlu0 %1266  ;;  %v1271_v50 = vpop.xlane.xlu1 %1270 }
 0x31a   : > { %v1299_v51 = vmul.f32 0.0078125, %v1267_v49  ;;  %v1301_v52 = vmul.f32 0.0078125, %v1271_v50 }
 0x31c   : > { %v9464_v53 = vsub.f32 %v1248_v29, %v1299_v51  ;;  %v9466_v54 = vsub.f32 %v1250_v30, %v1301_v52  ;;  %v7899_v29 = vld [vmem:[%s9255_s27 + $0x34] ss:$12 sps:$4 sm:$0xff]  }
 0x31d   : > { %v1269_v55 = vpop.xlane.xlu0 %1268  ;;  %v1273_v56 = vpop.xlane.xlu1 %1272  ;;  %v7901_v30 = vld [vmem:[%s9255_s27 + $0x20] ss:$12 sps:$4 sm:$0xff]   ;;  %1676 = vmatprep.subr.bf16.mxu0 %v7899_v29  ;;  %v7906_v51 = vld [vmem:[%s9255_s27 + $0x48] ss:$12 sps:$4 sm:$0xff]  }
 0x31e   : > { %v1300_v57 = vmul.f32 0.0078125, %v1269_v55  ;;  %v1331_v58 = vmul.f32 %v9464_v53, %v9464_v53  ;;  %v1302_v59 = vmul.f32 0.0078125, %v1273_v56  ;;  %v1333_v60 = vmul.f32 %v9466_v54, %v9466_v54  ;;  %7227 = vmatprep.subr.bf16.mxu1 %v7901_v30 }
 0x31f   : > { %7228 = vmatpush3.bf16.msra.mxu1 %v7901_v30 }
 0x320   : > { %1347 = vadd.xlane.f32.xlu0 %v1331_v58  ;;  %v9472_v61 = vsub.f32 %v1249_v31, %v1300_v57  ;;  %v9474_v62 = vsub.f32 %v1251_v32, %v1302_v59  ;;  %7229 = vmatprep.subr.bf16.mxu1 %v7905_v48  ;;  %v7907_v58 = vld [vmem:[%s9255_s27 + $0x64] ss:$12 sps:$4 sm:$0xff]  }
 0x321   : > { %v1275_v63 = vpop.xlane.xlu0 %1274  ;;  %v1277_v0 = vpop.xlane.xlu1 %1276  ;;  %v7909_v59 = vld [vmem:[%s9255_s27 + $0x50] ss:$12 sps:$4 sm:$0xff]  }
 0x322   : > { %v1303_v1 = vmul.f32 0.0078125, %v1275_v63  ;;  %v1332_v2 = vmul.f32 %v9472_v61, %v9472_v61  ;;  %v1304_v3 = vmul.f32 0.0078125, %v1277_v0  ;;  %v1334_v4 = vmul.f32 %v9474_v62, %v9474_v62  ;;  %v7913_v0 = vld [vmem:[%s9255_s27 + $0x68] ss:$12 sps:$4 sm:$0xff]  }
 0x323   : > { %7230 = vmatpush3.bf16.msra.mxu1 %v7905_v48 }
 0x324   : > { %1351 = vadd.xlane.f32.xlu0 %v1333_v60  ;;  %1349 = vadd.xlane.f32.xlu1 %v1332_v2  ;;  %v9480_v5 = vsub.f32 %v1252_v33, %v1303_v1  ;;  %v9482_v6 = vsub.f32 %v1253_v34, %v1304_v3  ;;  %v7910_v60 = vld [vmem:[%s9255_s27 + $0x60] ss:$12 sps:$4 sm:$0xff]   ;;  %v7914_v1 = vld [vmem:[%s9255_s27 + $0x78] ss:$12 sps:$4 sm:$0xff]  }
 0x325   : > { %v1279_v7 = vpop.xlane.xlu0 %1278  ;;  %v1281_v8 = vpop.xlane.xlu1 %1280  ;;  %7231 = vmatprep.subr.bf16.mxu1 %v7909_v59  ;;  %v7915_v2 = vld [vmem:[%s9255_s27 + $0x94] ss:$12 sps:$4 sm:$0xff]  }
 0x326   : > { %v1305_v9 = vmul.f32 0.0078125, %v1279_v7  ;;  %v1335_v10 = vmul.f32 %v9480_v5, %v9480_v5  ;;  %v1306_v11 = vmul.f32 0.0078125, %v1281_v8  ;;  %v1336_v12 = vmul.f32 %v9482_v6, %v9482_v6  ;;  %v7917_v3 = vld [vmem:[%s9255_s27 + $0x80] ss:$12 sps:$4 sm:$0xff]   ;;  %v7921_v8 = vld [vmem:[%s9255_s27 + $0x98] ss:$12 sps:$4 sm:$0xff]  }
 0x327   : > { %7232 = vmatpush3.bf16.msra.mxu1 %v7909_v59  ;;  %v7919_v7 = vld [vmem:[%s9255_s27 + $0xac] ss:$12 sps:$4 sm:$0xff]  }
 0x328   : > { %1353 = vadd.xlane.f32.xlu1 %v1334_v4  ;;  %1355 = vadd.xlane.f32.xlu0 %v1335_v10  ;;  %v9489_v13 = vsub.f32 %v9430_v35, %v1305_v9  ;;  %v9492_v14 = vsub.f32 %v9432_v36, %v1306_v11  ;;  %v7902_v36 = vld [vmem:[%s9255_s27 + $0x30] ss:$12 sps:$4 sm:$0xff]   ;;  %v7922_v9 = vld [vmem:[%s9255_s27 + $0xa8] ss:$12 sps:$4 sm:$0xff]   ;;  %v12534_v11 = vmov 0  }
 0x329   : > { %v1283_v15 = vpop.xlane.xlu0 %1282  ;;  %v1285_v16 = vpop.xlane.xlu1 %1284  ;;  %1677 = vmatpush1.bf16.msra.mxu0 %v7902_v36  ;;  %7233 = vmatprep.subr.bf16.mxu1 %v7913_v0  ;;  %v7918_v4 = vld [vmem:[%s9255_s27 + $0x90] ss:$12 sps:$4 sm:$0xff]  }
 0x32a   : > { %v1307_v17 = vmul.f32 0.0078125, %v1283_v15  ;;  %v1337_v18 = vmul.f32 %v9489_v13, %v9489_v13  ;;  %v1308_v19 = vmul.f32 0.0078125, %v1285_v16  ;;  %v1338_v20 = vmul.f32 %v9492_v14, %v9492_v14  ;;  %1678 = vmatprep.subr.bf16.mxu0 %v7903_v47  ;;  %v7923_v10 = vld [vmem:[%s9255_s27 + $0xb0] ss:$12 sps:$4 sm:$0xff]   ;;  %1704 = vmatprep.mubr.bf16.mxu0 %v12534_v11 }
 0x32b   : > { %7234 = vmatpush3.bf16.msra.mxu1 %v7913_v0 }
 0x32c   : > { %1357 = vadd.xlane.f32.xlu1 %v1336_v12  ;;  %1359 = vadd.xlane.f32.xlu0 %v1337_v18  ;;  %v9499_v21 = vsub.f32 %v9434_v37, %v1307_v17  ;;  %v9502_v22 = vsub.f32 %v9436_v38, %v1308_v19 }
 0x32d   : > { %v1287_v24 = vpop.xlane.xlu0 %1286  ;;  %v1289_v25 = vpop.xlane.xlu1 %1288  ;;  %1679 = vmatpush1.bf16.msra.mxu0 %v7906_v51  ;;  %7235 = vmatprep.subr.bf16.mxu1 %v7917_v3  ;;  %v9565_v51 = vld [vmem:[%s12683_s24] ss:$0 sm:$0xff] }
 0x32e   : > { %v1309_v26 = vmul.f32 0.0078125, %v1287_v24  ;;  %v1339_v27 = vmul.f32 %v9499_v21, %v9499_v21  ;;  %v1310_v28 = vmul.f32 0.0078125, %v1289_v25  ;;  %v1340_v31 = vmul.f32 %v9502_v22, %v9502_v22  ;;  %1680 = vmatprep.subr.bf16.mxu0 %v7907_v58 }
 0x32f   : > { %7236 = vmatpush3.bf16.msra.mxu1 %v7917_v3 }
 0x330   : > { %1361 = vadd.xlane.f32.xlu1 %v1338_v20  ;;  %1363 = vadd.xlane.f32.xlu0 %v1339_v27  ;;  %v9512_v32 = vsub.f32 %v9440_v39, %v1309_v26  ;;  %v9515_v33 = vsub.f32 %v9442_v40, %v1310_v28 }
 0x331   : > { %v1291_v34 = vpop.xlane.xlu0 %1290  ;;  %v1293_v35 = vpop.xlane.xlu1 %1292  ;;  %1681 = vmatpush1.bf16.msra.mxu0 %v7910_v60  ;;  %7237 = vmatprep.subr.bf16.mxu1 %v7921_v8 }
 0x332   : > { %v1311_v37 = vmul.f32 0.0078125, %v1291_v34  ;;  %v1341_v38 = vmul.f32 %v9512_v32, %v9512_v32  ;;  %v1312_v45 = vmul.f32 0.0078125, %v1293_v35  ;;  %v1342_v39 = vmul.f32 %v9515_v33, %v9515_v33 }
 0x333   : > { %7238 = vmatpush3.bf16.msra.mxu1 %v7921_v8 }
 0x334   : > { %1365 = vadd.xlane.f32.xlu1 %v1340_v31  ;;  %1367 = vadd.xlane.f32.xlu0 %v1341_v38  ;;  %v9523_v40 = vsub.f32 %v9446_v41, %v1311_v37  ;;  %v9526_v46 = vsub.f32 %v9448_v42, %v1312_v45 }
 0x335   : > { %v1295_v49 = vpop.xlane.xlu0 %1294  ;;  %v1297_v50 = vpop.xlane.xlu1 %1296  ;;  %7239 = vmatprep.subr.bf16.mxu1 %v7923_v10 }
 0x336   : > { %v1313_v52 = vmul.f32 0.0078125, %v1295_v49  ;;  %v1343_v55 = vmul.f32 %v9523_v40, %v9523_v40  ;;  %v1314_v56 = vmul.f32 0.0078125, %v1297_v50  ;;  %v1344_v41 = vmul.f32 %v9526_v46, %v9526_v46 }
 0x337   : > { %7240 = vmatpush3.bf16.msra.mxu1 %v7923_v10 }
 0x338   : > { %1369 = vadd.xlane.f32.xlu1 %v1342_v39  ;;  %1371 = vadd.xlane.f32.xlu0 %v1343_v55  ;;  %v9536_v42 = vsub.f32 %v9452_v43, %v1313_v52  ;;  %v9539_v57 = vsub.f32 %v9454_v44, %v1314_v56  ;;  %v7911_v44 = vld [vmem:[%s9255_s27 + $0x7c] ss:$12 sps:$4 sm:$0xff]  }
 0x339   : > { %1682 = vmatprep.subr.bf16.mxu0 %v7911_v44  ;;  %v9574_v44 = vld [vmem:[%s12685_s3] ss:$0 sm:$0xff] }
 0x33a   : > { %v1345_v63 = vmul.f32 %v9536_v42, %v9536_v42  ;;  %v1346_v43 = vmul.f32 %v9539_v57, %v9539_v57  ;;  %1683 = vmatpush1.bf16.msra.mxu0 %v7914_v1 }
 0x33b   : > { %1684 = vmatprep.subr.bf16.mxu0 %v7915_v2 }
 0x33c   : > { %1373 = vadd.xlane.f32.xlu1 %v1344_v41  ;;  %1375 = vadd.xlane.f32.xlu0 %v1345_v63 }
 0x33e   : > { %1685 = vmatpush1.bf16.msra.mxu0 %v7918_v4 }
 0x33f   : > { %1686 = vmatprep.subr.bf16.mxu0 %v7919_v7 }
 0x340   : > { %1377 = vadd.xlane.f32.xlu1 %v1346_v43 }
 0x342   : > { %1687 = vmatpush1.bf16.msra.mxu0 %v7922_v9 }
 0x3ad   : > { %v1348_v12 = vpop.xlane.xlu0 %1347 }
 0x3ae   : > { %v1379_v15 = vmul.f32 0.0078125, %v1348_v12 }
 0x3b0   : > { %v1395_v16 = vadd.f32 1e-05, %v1379_v15 }
 0x3b1   : > { %v1350_v17 = vpop.xlane.xlu1 %1349  ;;  %v1352_v18 = vpop.xlane.xlu0 %1351 }
 0x3b2   : > { %8012 = vrsqrt.f32 %v1395_v16  ;;  %v1380_v19 = vmul.f32 0.0078125, %v1350_v17  ;;  %v1381_v20 = vmul.f32 0.0078125, %v1352_v18 }
 0x3b4   : > { %v1396_v23 = vadd.f32 1e-05, %v1380_v19  ;;  %v1397_v24 = vadd.f32 1e-05, %v1381_v20 }
 0x3b5   : > { %v1354_v25 = vpop.xlane.xlu1 %1353  ;;  %v1356_v26 = vpop.xlane.xlu0 %1355 }
 0x3b6   : > { %8014 = vrsqrt.f32 %v1396_v23  ;;  %v1382_v27 = vmul.f32 0.0078125, %v1354_v25  ;;  %v1383_v28 = vmul.f32 0.0078125, %v1356_v26 }
 0x3b7   : > { %8016 = vrsqrt.f32 %v1397_v24 }
 0x3b8   : > { %v1398_v29 = vadd.f32 1e-05, %v1382_v27  ;;  %v1399_v30 = vadd.f32 1e-05, %v1383_v28 }
 0x3b9   : > { %v1358_v31 = vpop.xlane.xlu1 %1357  ;;  %v1360_v34 = vpop.xlane.xlu0 %1359 }
 0x3ba   : > { %8018 = vrsqrt.f32 %v1398_v29  ;;  %v1384_v35 = vmul.f32 0.0078125, %v1358_v31  ;;  %v1385_v36 = vmul.f32 0.0078125, %v1360_v34 }
 0x3bb   : > { %8020 = vrsqrt.f32 %v1399_v30 }
 0x3bc   : > { %v8013_v37 = vpop.eup %8012  ;;  %v1400_v38 = vadd.f32 1e-05, %v1384_v35  ;;  %v1401_v45 = vadd.f32 1e-05, %v1385_v36 }
 0x3bd   : > { %v1362_v39 = vpop.xlane.xlu1 %1361  ;;  %v1364_v47 = vpop.xlane.xlu0 %1363  ;;  %v1427_v48 = vmul.f32 %v8013_v37, %v9464_v53 }
 0x3be   : > { %8022 = vrsqrt.f32 %v1400_v38  ;;  %v1386_v49 = vmul.f32 0.0078125, %v1362_v39  ;;  %v1387_v50 = vmul.f32 0.0078125, %v1364_v47 }
 0x3bf   : > { %8024 = vrsqrt.f32 %v1401_v45  ;;  %v1449_v53 = vmul.f32 %v9565_v51, %v1427_v48 }
 0x3c0   : > { %v8015_v52 = vpop.eup %8014  ;;  %v1402_v55 = vadd.f32 1e-05, %v1386_v49  ;;  %v1403_v56 = vadd.f32 1e-05, %v1387_v50 }
 0x3c1   : > { %v8017_v41 = vpop.eup %8016  ;;  %v1366_v58 = vpop.xlane.xlu1 %1365  ;;  %v1428_v60 = vmul.f32 %v8015_v52, %v9472_v61  ;;  %v1471_v10 = vadd.f32 %v9574_v44, %v1449_v53 }
 0x3c2   : > { %v1368_v59 = vpop.xlane.xlu0 %1367  ;;  %8026 = vrsqrt.f32 %v1402_v55  ;;  %v1388_v63 = vmul.f32 0.0078125, %v1366_v58  ;;  %v1429_v0 = vmul.f32 %v8017_v41, %v9466_v54 }
 0x3c3   : > { %v1389_v43 = vmul.f32 0.0078125, %v1368_v59  ;;  %8028 = vrsqrt.f32 %v1403_v56  ;;  %v1450_v1 = vmul.f32 %v9565_v51, %v1428_v60 }
 0x3c4   : > { %v8019_v2 = vpop.eup %8018  ;;  %v1404_v3 = vadd.f32 1e-05, %v1388_v63  ;;  %v1451_v61 = vmul.f32 %v9565_v51, %v1429_v0 }
 0x3c5   : > { %v1405_v4 = vadd.f32 1e-05, %v1389_v43  ;;  %v8021_v7 = vpop.eup %8020  ;;  %v1370_v8 = vpop.xlane.xlu1 %1369  ;;  %v1472_v12 = vadd.f32 %v9574_v44, %v1450_v1  ;;  %v1430_v15 = vmul.f32 %v8019_v2, %v9474_v62 }
 0x3c6   : > { %v1372_v9 = vpop.xlane.xlu0 %1371  ;;  %8030 = vrsqrt.f32 %v1404_v3  ;;  %v1390_v16 = vmul.f32 0.0078125, %v1370_v8  ;;  %v1431_v19 = vmul.f32 %v8021_v7, %v9480_v5  ;;  %v1473_v25 = vadd.f32 %v9574_v44, %v1451_v61 }
 0x3c7   : > { %v1391_v54 = vmul.f32 0.0078125, %v1372_v9  ;;  %8032 = vrsqrt.f32 %v1405_v4  ;;  %v1487_v17 = vpack.c.bf16 %v1472_v12, %v1471_v10  ;;  %v1452_v18 = vmul.f32 %v9565_v51, %v1430_v15 }
 0x3c8   : > { %v8023_v20 = vpop.eup %8022  ;;  %v1406_v23 = vadd.f32 1e-05, %v1390_v16  ;;  %v1453_v30 = vmul.f32 %v9565_v51, %v1431_v19 }
 0x3c9   : > { %v1407_v24 = vadd.f32 1e-05, %v1391_v54  ;;  %v8025_v26 = vpop.eup %8024  ;;  %v1374_v27 = vpop.xlane.xlu1 %1373  ;;  %1705 = vmatmul.mubr.bf16.vlgmr.msra.gmra.mrb[0].mxu0 %v1487_v17  ;;  %7241 = vmatprep.mubr.bf16.mxu1 %v1487_v17  ;;  %v1474_v62 = vadd.f32 %v9574_v44, %v1452_v18  ;;  %v1432_v29 = vmul.f32 %v8023_v20, %v9482_v6 }
 0x3ca   : > { %v1376_v28 = vpop.xlane.xlu0 %1375  ;;  %8034 = vrsqrt.f32 %v1406_v23  ;;  %v1392_v31 = vmul.f32 0.0078125, %v1374_v27  ;;  %1714 = vmatprep.mubr.bf16.mxu0 %v12534_v11  ;;  %v1433_v5 = vmul.f32 %v8025_v26, %v9489_v13  ;;  %v1475_v48 = vadd.f32 %v9574_v44, %v1453_v30 }
 0x3cb   : > { %v1393_v34 = vmul.f32 0.0078125, %v1376_v28  ;;  %8036 = vrsqrt.f32 %v1407_v24  ;;  %v1488_v35 = vpack.c.bf16 %v1474_v62, %v1473_v25  ;;  %v1454_v36 = vmul.f32 %v9565_v51, %v1432_v29 }
 0x3cc   : > { %v8027_v37 = vpop.eup %8026  ;;  %v1408_v38 = vadd.f32 1e-05, %v1392_v31  ;;  %v1455_v39 = vmul.f32 %v9565_v51, %v1433_v5 }
 0x3cd   : > { %v1409_v45 = vadd.f32 1e-05, %v1393_v34  ;;  %v8029_v47 = vpop.eup %8028  ;;  %v1378_v6 = vpop.xlane.xlu1 %1377  ;;  %7242 = vmatmul.mubr.bf16.vlgmr.msra.gmra.mrb[0].mxu1 %v1488_v35  ;;  %v1476_v49 = vadd.f32 %v9574_v44, %v1454_v36  ;;  %v1434_v50 = vmul.f32 %v8027_v37, %v9492_v14 }
 0x3ce   : > { %8038 = vrsqrt.f32 %v1408_v38  ;;  %v1394_v13 = vmul.f32 0.0078125, %v1378_v6  ;;  %v1435_v52 = vmul.f32 %v8029_v47, %v9499_v21  ;;  %v1477_v59 = vadd.f32 %v9574_v44, %v1455_v39 }
 0x3cf   : > { %8040 = vrsqrt.f32 %v1409_v45  ;;  %v1489_v55 = vpack.c.bf16 %v1476_v49, %v1475_v48  ;;  %v1456_v56 = vmul.f32 %v9565_v51, %v1434_v50 }
 0x3d0   : > { %v8031_v41 = vpop.eup %8030  ;;  %v1410_v58 = vadd.f32 1e-05, %v1394_v13  ;;  %v1457_v14 = vmul.f32 %v9565_v51, %v1435_v52 }
 0x3d1   : > { %v8033_v60 = vpop.eup %8032  ;;  %1715 = vmatmul.mubr.bf16.gmra.mrb[4].mxu0 %v1488_v35  ;;  %7245 = vmatprep.mubr.bf16.mxu1 %v1489_v55  ;;  %v1478_v53 = vadd.f32 %v9574_v44, %v1456_v56  ;;  %v1436_v63 = vmul.f32 %v8031_v41, %v9502_v22 }
 0x3d2   : > { %8042 = vrsqrt.f32 %v1410_v58  ;;  %1724 = vmatprep.mubr.bf16.mxu0 %v12534_v11  ;;  %v1437_v21 = vmul.f32 %v8033_v60, %v9512_v32  ;;  %v1479_v4 = vadd.f32 %v9574_v44, %v1457_v14 }
 0x3d3   : > { %v1490_v43 = vpack.c.bf16 %v1478_v53, %v1477_v59  ;;  %v1458_v0 = vmul.f32 %v9565_v51, %v1436_v63 }
 0x3d4   : > { %v8035_v1 = vpop.eup %8034  ;;  %v1459_v2 = vmul.f32 %v9565_v51, %v1437_v21 }
 0x3d5   : > { %v8037_v3 = vpop.eup %8036  ;;  %7246 = vmatmul.mubr.bf16.gmra.mrb[4].mxu1 %v1490_v43  ;;  %v1480_v61 = vadd.f32 %v9574_v44, %v1458_v0  ;;  %v1438_v22 = vmul.f32 %v8035_v1, %v9515_v33 }
 0x3d6   : > { %v1439_v7 = vmul.f32 %v8037_v3, %v9523_v40  ;;  %v1481_v10 = vadd.f32 %v9574_v44, %v1459_v2 }
 0x3d7   : > { %v1491_v8 = vpack.c.bf16 %v1480_v61, %v1479_v4  ;;  %v1460_v9 = vmul.f32 %v9565_v51, %v1438_v22 }
 0x3d8   : > { %v8039_v32 = vpop.eup %8038  ;;  %v1461_v54 = vmul.f32 %v9565_v51, %v1439_v7 }
 0x3d9   : > { %v8041_v12 = vpop.eup %8040  ;;  %1725 = vmatmul.mubr.bf16.gmra.mrb[8].mxu0 %v1489_v55  ;;  %7249 = vmatprep.mubr.bf16.mxu1 %v1491_v8  ;;  %v1482_v15 = vadd.f32 %v9574_v44, %v1460_v9  ;;  %v1440_v16 = vmul.f32 %v8039_v32, %v9526_v46 }
 0x3da   : > { %1734 = vmatprep.mubr.bf16.mxu0 %v12534_v11  ;;  %v1441_v33 = vmul.f32 %v8041_v12, %v9536_v42  ;;  %v1483_v19 = vadd.f32 %v9574_v44, %v1461_v54 }
 0x3db   : > { %v1492_v40 = vpack.c.bf16 %v1482_v15, %v1481_v10  ;;  %v1462_v17 = vmul.f32 %v9565_v51, %v1440_v16 }
 0x3dc   : > { %v8043_v18 = vpop.eup %8042  ;;  %v1463_v24 = vmul.f32 %v9565_v51, %v1441_v33 }
 0x3dd   : > { %7250 = vmatmul.mubr.bf16.gmra.mrb[8].mxu1 %v1492_v40  ;;  %v1484_v20 = vadd.f32 %v9574_v44, %v1462_v17  ;;  %v1442_v23 = vmul.f32 %v8043_v18, %v9539_v57  ;;  %v1529_v57 = vlaneseq }
 0x3de   : > { %v1485_v42 = vadd.f32 %v9574_v44, %v1463_v24 }
 0x3df   : > { %v1493_v46 = vpack.c.bf16 %v1484_v20, %v1483_v19  ;;  %v1464_v25 = vmul.f32 %v9565_v51, %v1442_v23  ;;  %v9628_v51 = vshrl.u32 %v1529_v57, 7 }
 0x3e1   : > { %1735 = vmatmul.mubr.bf16.gmra.mrb[12].mxu0 %v1490_v43  ;;  %7253 = vmatprep.mubr.bf16.mxu1 %v1493_v46  ;;  %v1486_v26 = vadd.f32 %v9574_v44, %v1464_v25  ;;  %12686 = vst [vmem:[#allocation22_spill] sm:$0xff] %v9628_v51  ;;  %v12533_v28 = vsub.s32 0, %v9628_v51  ;;  %v1527_v44 = vld [vmem:[%s9299_s11] sm:$0x7]  ;;  %v12531_v62 = vsub.s32 1, %v9628_v51  ;;  %v12532_v30 = vsub.s32 2, %v9628_v51 }
 0x3e2   : > { %1744 = vmatprep.mubr.bf16.mxu0 %v12534_v11  ;;  %s8848_s11 = smov 96  }
 0x3e3   : > { %v1494_v27 = vpack.c.bf16 %v1486_v26, %v1485_v42  ;;  %v9635_v29 = vrot.slane %v1527_v44, %v12533_v28  ;;  %v9640_v34 = vrot.slane %v1527_v44, %v12531_v62  ;;  %v9646_v45 = vrot.slane %v1527_v44, %v12532_v30 }
 0x3e5   : > { %7254 = vmatmul.mubr.bf16.gmra.mrb[12].mxu1 %v1494_v27 }
 0x3e9   : > { %1745 = vmatmul.mubr.bf16.gmra.mrb[16].mxu0 %v1491_v8 }
 0x3ea   : > { %1754 = vmatprep.mubr.bf16.mxu0 %v12534_v11 }
 0x3f1   : > { %1755 = vmatmul.mubr.bf16.gmra.mrb[20].mxu0 %v1492_v40 }
 0x3f2   : > { %1764 = vmatprep.mubr.bf16.mxu0 %v12534_v11 }
 0x3f9   : > { %1765 = vmatmul.mubr.bf16.gmra.mrb[24].mxu0 %v1493_v46 }
 0x3fa   : > { %1774 = vmatprep.mubr.bf16.mxu0 %v12534_v11 }
 0x401   : > { %1775 = vmatmul.mubr.bf16.gmra.mrb[28].mxu0 %v1494_v27 }
 0x49c   : > { %v1706_v31 = vpop.f32.mrb[0].mxu0 }
 0x49d   : > { %v1707_v5 = vadd.f32 %v1706_v31, %v9635_v29  ;;  %v1708_v35 = vpop.f32.mrb[1].mxu0 }
 0x49e   : > { %v1710_v36 = vpop.f32.mrb[2].mxu0  ;;  %v1709_v39 = vadd.f32 %v1708_v35, %v9640_v34 }
 0x49f   : > { %v1711_v37 = vadd.f32 %v1710_v36, %v9635_v29  ;;  %v1712_v38 = vpop.f32.mrb[3].mxu0  ;;  %v1882_v48 = vmul.f32 0.17677669, %v1707_v5 }
 0x4a0   : > { %v1713_v47 = vadd.f32 %v1712_v38, %v9640_v34  ;;  %v7243_v6 = vpop.f32.mrb[0].mxu1 }
 0x4a1   : > { %v1883_v49 = vmul.f32 0.17677669, %v1711_v37  ;;  %v1819_v50 = vpop.f32.mrb[1].mxu1  ;;  %v1828_v56 = vadd.f32 %v7243_v6, %v9646_v45 }
 0x4a2   : > { %v9650_v13 = vpack.c.bf16 %v1713_v47, %v1709_v39  ;;  %v7244_v52 = vpop.f32.mrb[2].mxu1  ;;  %v1820_v59 = vadd.f32 %v1819_v50, %v9646_v45 }
 0x4a3   : > { %v9652_v55 = vpack.c.bf16 %v1883_v49, %v1882_v48  ;;  %v1831_v41 = vadd.f32 %v7244_v52, %v9646_v45  ;;  %v1822_v58 = vpop.f32.mrb[3].mxu1 }
 0x4a4   : > { %12687 = vst [vmem:[#allocation23_spill] sm:$0xff] %v9650_v13  ;;  %v1823_v60 = vadd.f32 %v1822_v58, %v9646_v45  ;;  %2365 = vrot.lane.b32.xlu0 %v9650_v13, %s8848_s11  ;;  %v1716_v53 = vpop.f32.mrb[4].mxu0  ;;  %7625 = vmatprep.subr.msk.bf16.mxu0 %vm1938_vm0, %v9650_v13  ;;  %v1964_v63 = vsel %vm1938_vm0, %v9650_v13, 0 }
 0x4a5   : > { %v9664_v14 = vpack.c.bf16 %v1831_v41, %v1828_v56  ;;  %v1717_v21 = vadd.f32 %v1716_v53, %v9635_v29  ;;  %v1718_v43 = vpop.f32.mrb[5].mxu0  ;;  %7258 = vmatpush3.bf16.xpose.msra.mxu0 %v1964_v63  ;;  %7273 = vmatprep.mubr.msk.bf16.mxu0 %vm1938_vm0, %v9652_v55 }
 0x4a6   : > { %v9669_v0 = vpack.c.bf16 %v1823_v60, %v1820_v59  ;;  %v1720_v1 = vpop.f32.mrb[6].mxu0  ;;  %v1719_v4 = vadd.f32 %v1718_v43, %v9640_v34 }
 0x4a7   : > { %v1721_v2 = vadd.f32 %v1720_v1, %v9635_v29  ;;  %v1722_v3 = vpop.f32.mrb[7].mxu0  ;;  %v1884_v7 = vmul.f32 0.17677669, %v1717_v21 }
 0x4a8   : > { %12688 = vst [vmem:[#allocation24_spill] sm:$0xff] %v9669_v0  ;;  %v1723_v61 = vadd.f32 %v1722_v3, %v9640_v34  ;;  %v7247_v22 = vpop.f32.mrb[4].mxu1  ;;  %7289 = vmatprep.subr.bf16.mxu1 %v9669_v0 }
 0x4a9   : > { %v1885_v8 = vmul.f32 0.17677669, %v1721_v2  ;;  %v1835_v9 = vpop.f32.mrb[5].mxu1  ;;  %7290 = vmatpush3.bf16.msra.mxu1 %v9669_v0  ;;  %v1844_v15 = vadd.f32 %v7247_v22, %v9646_v45 }
 0x4aa   : > { %v9676_v32 = vpack.c.bf16 %v1723_v61, %v1719_v4  ;;  %v7248_v10 = vpop.f32.mrb[6].mxu1  ;;  %7291 = vmatprep.subr.bf16.mxu1 %v9664_v14  ;;  %v1836_v33 = vadd.f32 %v1835_v9, %v9646_v45 }
 0x4ab   : > { %v9679_v12 = vpack.c.bf16 %v1885_v8, %v1884_v7  ;;  %v1847_v16 = vadd.f32 %v7248_v10, %v9646_v45  ;;  %v1838_v54 = vpop.f32.mrb[7].mxu1 }
 0x4ac   : > { %12689 = vst [vmem:[#allocation25_spill] sm:$0xff] %v9676_v32  ;;  %v1839_v40 = vadd.f32 %v1838_v54, %v9646_v45  ;;  %2367 = vrot.lane.b32.xlu1 %v9676_v32, %s8848_s11  ;;  %v1726_v17 = vpop.f32.mrb[8].mxu0  ;;  %7626 = vmatprep.subr.msk.bf16.mxu0 %vm1938_vm0, %v9676_v32  ;;  %v1967_v18 = vsel %vm1938_vm0, %v9676_v32, 0 }
 0x4ad   : > { %v9691_v19 = vpack.c.bf16 %v1847_v16, %v1844_v15  ;;  %v1727_v20 = vadd.f32 %v1726_v17, %v9635_v29  ;;  %v1728_v23 = vpop.f32.mrb[9].mxu0  ;;  %7260 = vmatpush3.bf16.xpose.msra.mxu0 %v1967_v18  ;;  %7292 = vmatpush3.bf16.msra.mxu1 %v9664_v14 }
 0x4ae   : > { %v9695_v24 = vpack.c.bf16 %v1839_v40, %v1836_v33  ;;  %v1730_v46 = vpop.f32.mrb[10].mxu0  ;;  %v1729_v26 = vadd.f32 %v1728_v23, %v9640_v34 }
 0x4af   : > { %v1731_v25 = vadd.f32 %v1730_v46, %v9635_v29  ;;  %v1732_v42 = vpop.f32.mrb[11].mxu0  ;;  %v1886_v44 = vmul.f32 0.17677669, %v1727_v20 }
 0x4b0   : > { %12690 = vst [vmem:[#allocation26_spill] sm:$0xff] %v9695_v24  ;;  %v1733_v27 = vadd.f32 %v1732_v42, %v9640_v34  ;;  %v7251_v57 = vpop.f32.mrb[8].mxu1  ;;  %7293 = vmatprep.subr.bf16.mxu1 %v9695_v24 }
 0x4b1   : > { %v1887_v31 = vmul.f32 0.17677669, %v1731_v25  ;;  %v1851_v5 = vpop.f32.mrb[9].mxu1  ;;  %7294 = vmatpush3.bf16.msra.mxu1 %v9695_v24  ;;  %v1860_v38 = vadd.f32 %v7251_v57, %v9646_v45 }
 0x4b2   : > { %v9702_v35 = vpack.c.bf16 %v1733_v27, %v1729_v26  ;;  %v7252_v36 = vpop.f32.mrb[10].mxu1  ;;  %7295 = vmatprep.subr.bf16.mxu1 %v9691_v19  ;;  %v1852_v6 = vadd.f32 %v1851_v5, %v9646_v45 }
 0x4b3   : > { %v9705_v37 = vpack.c.bf16 %v1887_v31, %v1886_v44  ;;  %v1863_v39 = vadd.f32 %v7252_v36, %v9646_v45  ;;  %v1854_v47 = vpop.f32.mrb[11].mxu1 }
 0x4b4   : > { %v1855_v48 = vadd.f32 %v1854_v47, %v9646_v45  ;;  %2369 = vrot.lane.b32.xlu0 %v9702_v35, %s8848_s11  ;;  %v1736_v49 = vpop.f32.mrb[12].mxu0  ;;  %7627 = vmatprep.subr.msk.bf16.mxu0 %vm1938_vm0, %v9702_v35  ;;  %v1970_v50 = vsel %vm1938_vm0, %v9702_v35, 0 }
 0x4b5   : > { %v9717_v52 = vpack.c.bf16 %v1863_v39, %v1860_v38  ;;  %v1737_v56 = vadd.f32 %v1736_v49, %v9635_v29  ;;  %v1738_v41 = vpop.f32.mrb[13].mxu0  ;;  %7262 = vmatpush3.bf16.xpose.msra.mxu0 %v1970_v50  ;;  %7296 = vmatpush3.bf16.msra.mxu1 %v9691_v19 }
 0x4b6   : > { %v9721_v58 = vpack.c.bf16 %v1855_v48, %v1852_v6  ;;  %v1740_v59 = vpop.f32.mrb[14].mxu0  ;;  %v1739_v63 = vadd.f32 %v1738_v41, %v9640_v34 }
 0x4b7   : > { %v1741_v60 = vadd.f32 %v1740_v59, %v9635_v29  ;;  %v1742_v53 = vpop.f32.mrb[15].mxu0  ;;  %v1888_v1 = vmul.f32 0.17677669, %v1737_v56 }
 0x4b8   : > { %v1743_v21 = vadd.f32 %v1742_v53, %v9640_v34  ;;  %v7255_v43 = vpop.f32.mrb[12].mxu1  ;;  %7297 = vmatprep.subr.bf16.mxu1 %v9721_v58 }
 0x4b9   : > { %v1889_v2 = vmul.f32 0.17677669, %v1741_v60  ;;  %v1867_v3 = vpop.f32.mrb[13].mxu1  ;;  %7298 = vmatpush3.bf16.msra.mxu1 %v9721_v58  ;;  %v1876_v7 = vadd.f32 %v7255_v43, %v9646_v45 }
 0x4ba   : > { %v9728_v4 = vpack.c.bf16 %v1743_v21, %v1739_v63  ;;  %v7256_v61 = vpop.f32.mrb[14].mxu1  ;;  %7299 = vmatprep.subr.bf16.mxu1 %v9717_v52  ;;  %v1868_v10 = vadd.f32 %v1867_v3, %v9646_v45 }
 0x4bb   : > { %v9731_v22 = vpack.c.bf16 %v1889_v2, %v1888_v1  ;;  %v1879_v8 = vadd.f32 %v7256_v61, %v9646_v45  ;;  %v1870_v9 = vpop.f32.mrb[15].mxu1 }
 0x4bc   : > { %12691 = vst [vmem:[#allocation27_spill] sm:$0xff] %v9728_v4  ;;  %v1871_v15 = vadd.f32 %v1870_v9, %v9646_v45  ;;  %v1746_v16 = vpop.f32.mrb[16].mxu0  ;;  %7628 = vmatprep.subr.msk.bf16.mxu0 %vm1938_vm0, %v9728_v4  ;;  %v1973_v54 = vsel %vm1938_vm0, %v9728_v4, 0 }
 0x4bd   : > { %v9741_v33 = vpack.c.bf16 %v1879_v8, %v1876_v7  ;;  %v1747_v40 = vadd.f32 %v1746_v16, %v9635_v29  ;;  %v1748_v17 = vpop.f32.mrb[17].mxu0  ;;  %7264 = vmatpush3.bf16.xpose.msra.mxu0 %v1973_v54  ;;  %7300 = vmatpush3.bf16.msra.mxu1 %v9717_v52 }
 0x4be   : > { %v9745_v18 = vpack.c.bf16 %v1871_v15, %v1868_v10  ;;  %v1750_v20 = vpop.f32.mrb[18].mxu0  ;;  %v1749_v46 = vadd.f32 %v1748_v17, %v9640_v34 }
 0x4bf   : > { %v1751_v45 = vadd.f32 %v1750_v20, %v9635_v29  ;;  %v1752_v23 = vpop.f32.mrb[19].mxu0  ;;  %v1890_v42 = vmul.f32 0.17677669, %v1747_v40 }
 0x4c0   : > { %12692 = vst [vmem:[#allocation28_spill] sm:$0xff] %v9745_v18  ;;  %v1753_v25 = vadd.f32 %v1752_v23, %v9640_v34  ;;  %7301 = vmatprep.subr.bf16.mxu1 %v9745_v18 }
 0x4c1   : > { %v1891_v26 = vmul.f32 0.17677669, %v1751_v45  ;;  %7302 = vmatpush3.bf16.msra.mxu1 %v9745_v18 }
 0x4c2   : > { %v9752_v27 = vpack.c.bf16 %v1753_v25, %v1749_v46  ;;  %7303 = vmatprep.subr.bf16.mxu1 %v9741_v33 }
 0x4c3   : > { %v9755_v57 = vpack.c.bf16 %v1891_v26, %v1890_v42 }
 0x4c4   : > { %v1756_v44 = vpop.f32.mrb[20].mxu0  ;;  %7629 = vmatprep.subr.msk.bf16.mxu0 %vm1938_vm0, %v9752_v27  ;;  %v1976_v31 = vsel %vm1938_vm0, %v9752_v27, 0 }
 0x4c5   : > { %12693 = vst [vmem:[#allocation29_spill] sm:$0xff] %v9755_v57  ;;  %v1757_v5 = vadd.f32 %v1756_v44, %v9635_v29  ;;  %v1758_v36 = vpop.f32.mrb[21].mxu0  ;;  %7266 = vmatpush3.bf16.xpose.msra.mxu0 %v1976_v31  ;;  %7304 = vmatpush3.bf16.msra.mxu1 %v9741_v33 }
 0x4c6   : > { %v1760_v38 = vpop.f32.mrb[22].mxu0  ;;  %v1759_v6 = vadd.f32 %v1758_v36, %v9640_v34 }
 0x4c7   : > { %v1761_v39 = vadd.f32 %v1760_v38, %v9635_v29  ;;  %v1762_v47 = vpop.f32.mrb[23].mxu0  ;;  %v1892_v49 = vmul.f32 0.17677669, %v1757_v5  ;;  %v9824_v5 = vld [vmem:[%s12695_s29 + $0x18] sm:$0xff] }
 0x4c8   : > { %v1763_v48 = vadd.f32 %v1762_v47, %v9640_v34 }
 0x4c9   : > { %v1893_v50 = vmul.f32 0.17677669, %v1761_v39  ;;  %v9832_v39 = vld [vmem:[%s12695_s29] sm:$0xff] }
 0x4ca   : > { %v9766_v56 = vpack.c.bf16 %v1763_v48, %v1759_v6 }
 0x4cb   : > { %v9768_v41 = vpack.c.bf16 %v1893_v50, %v1892_v49  ;;  %v9841_v49 = vld [vmem:[%s12695_s29 + $0x8] sm:$0xff] }
 0x4cc   : > { %v1766_v59 = vpop.f32.mrb[24].mxu0  ;;  %7630 = vmatprep.subr.msk.bf16.mxu0 %vm1938_vm0, %v9766_v56  ;;  %v1979_v60 = vsel %vm1938_vm0, %v9766_v56, 0 }
 0x4cd   : > { %v1767_v53 = vadd.f32 %v1766_v59, %v9635_v29  ;;  %v1768_v63 = vpop.f32.mrb[25].mxu0  ;;  %7268 = vmatpush3.bf16.xpose.msra.mxu0 %v1979_v60 }
 0x4ce   : > { %v1770_v21 = vpop.f32.mrb[26].mxu0  ;;  %v1769_v2 = vadd.f32 %v1768_v63, %v9640_v34 }
 0x4cf   : > { %v1771_v43 = vadd.f32 %v1770_v21, %v9635_v29  ;;  %v1772_v1 = vpop.f32.mrb[27].mxu0  ;;  %v1894_v61 = vmul.f32 0.17677669, %v1767_v53 }
 0x4d0   : > { %v1773_v3 = vadd.f32 %v1772_v1, %v9640_v34 }
 0x4d1   : > { %v1895_v7 = vmul.f32 0.17677669, %v1771_v43 }
 0x4d2   : > { %v9778_v8 = vpack.c.bf16 %v1773_v3, %v1769_v2 }
 0x4d3   : > { %v9780_v9 = vpack.c.bf16 %v1895_v7, %v1894_v61 }
 0x4d4   : > { %v1776_v10 = vpop.f32.mrb[28].mxu0  ;;  %7631 = vmatprep.subr.msk.bf16.mxu0 %vm1938_vm0, %v9778_v8  ;;  %v1982_v15 = vsel %vm1938_vm0, %v9778_v8, 0 }
 0x4d5   : > { %12694 = vst [vmem:[#allocation30_spill] sm:$0xff] %v9780_v9  ;;  %v1777_v16 = vadd.f32 %v1776_v10, %v9635_v29  ;;  %v1778_v54 = vpop.f32.mrb[29].mxu0  ;;  %7270 = vmatpush3.bf16.xpose.msra.mxu0 %v1982_v15 }
 0x4d6   : > { %v1780_v40 = vpop.f32.mrb[30].mxu0  ;;  %v1779_v45 = vadd.f32 %v1778_v54, %v9640_v34  ;;  %v9864_v54 = vld [vmem:[%s12695_s29 + $0x20] sm:$0xff] }
 0x4d7   : > { %v1781_v17 = vadd.f32 %v1780_v40, %v9635_v29  ;;  %v1782_v20 = vpop.f32.mrb[31].mxu0  ;;  %v1896_v46 = vmul.f32 0.17677669, %v1777_v16  ;;  %v9859_v16 = vld [vmem:[%s12695_s29 + $0x30] sm:$0xff] }
 0x4d8   : > { %v1783_v23 = vadd.f32 %v1782_v20, %v9640_v34  ;;  %v9819_v34 = vld [vmem:[%s12695_s29 + $0x10] sm:$0xff] }
 0x4d9   : > { %v1897_v25 = vmul.f32 0.17677669, %v1781_v17  ;;  %v9872_v17 = vld [vmem:[%s12695_s29 + $0x40] sm:$0xff] }
 0x4da   : > { %v9790_v42 = vpack.c.bf16 %v1783_v23, %v1779_v45  ;;  %v9881_v45 = vld [vmem:[%s12695_s29 + $0x38] sm:$0xff] }
 0x4db   : > { %v9792_v26 = vpack.c.bf16 %v1897_v25, %v1896_v46  ;;  %v9890_v46 = vld [vmem:[%s12695_s29 + $0x48] sm:$0xff] }
 0x4dc   : > { %7632 = vmatprep.subr.msk.bf16.mxu0 %vm1938_vm0, %v9790_v42  ;;  %v1985_v44 = vsel %vm1938_vm0, %v9790_v42, 0 }
 0x4dd   : > { %7272 = vmatpush3.bf16.xpose.msra.mxu0 %v1985_v44  ;;  %v9899_v44 = vld [vmem:[%s12695_s29 + $0x28] sm:$0xff] }
 0x4e4   : > { %7274 = vmatmul.mubr.msk.bf16.vlgmr.msra.gmra.mrb[32].mxu0 %vm1938_vm0, %v9679_v12 }
 0x4e5   : > { %7277 = vmatprep.mubr.msk.bf16.mxu0 %vm1938_vm0, %v9705_v37 }
 0x4ec   : > { %7278 = vmatmul.mubr.msk.bf16.gmra.mrb[36].mxu0 %vm1938_vm0, %v9731_v22 }
 0x4ed   : > { %7281 = vmatprep.mubr.msk.bf16.mxu0 %vm1938_vm0, %v9755_v57 }
 0x4f4   : > { %7282 = vmatmul.mubr.msk.bf16.gmra.mrb[40].mxu0 %vm1938_vm0, %v9768_v41 }
 0x4f5   : > { %7285 = vmatprep.mubr.msk.bf16.mxu0 %vm1938_vm0, %v9780_v9 }
 0x4fc   : > { %7286 = vmatmul.mubr.msk.bf16.gmra.mrb[44].mxu0 %vm1938_vm0, %v9792_v26 }
 0x516   : > { %v9812_v29 = vpop.permute.xlu0 %2365 }
 0x517   : > { %7633 = vmatprep.subr.msk.bf16.mxu1 %vm1938_vm0, %v9812_v29 }
 0x5b7   : > { %v7275_v31 = vpop.f32.mrb[32].mxu0 }
 0x5b8   : > { %v9827_v36 = vadd.f32 %v7275_v31, %v9819_v34  ;;  %v2021_v38 = vpop.f32.mrb[33].mxu0 }
 0x5b9   : > { %v7276_v47 = vpop.f32.mrb[34].mxu0  ;;  %v9844_v50 = vadd.f32 %v2021_v38, %v9832_v39  ;;  %v9908_v38 = vld [vmem:[%s12695_s29 + $0x70] sm:$0xff] }
 0x5ba   : > { %v9835_v6 = vadd.f32 %v7276_v47, %v9824_v5  ;;  %2088 = vmax.xlane.f32.xlu0 %v9827_v36  ;;  %v2024_v48 = vpop.f32.mrb[35].mxu0 }
 0x5bb   : > { %v9848_v59 = vadd.f32 %v2024_v48, %v9841_v49  ;;  %v9917_v48 = vld [vmem:[%s12695_s29 + $0x50] sm:$0xff] }
 0x5bc   : > { %2090 = vmax.xlane.f32.xlu1 %v9835_v6 }
 0x5be   : > { %2084 = vmax.xlane.f32.xlu0 %v9844_v50 }
 0x5bf   : > { %v7279_v60 = vpop.f32.mrb[36].mxu0 }
 0x5c0   : > { %v2037_v53 = vpop.f32.mrb[37].mxu0  ;;  %2086 = vmax.xlane.f32.xlu1 %v9848_v59  ;;  %v9867_v40 = vadd.f32 %v7279_v60, %v9859_v16 }
 0x5c1   : > { %v7280_v63 = vpop.f32.mrb[38].mxu0  ;;  %v9875_v20 = vadd.f32 %v2037_v53, %v9864_v54 }
 0x5c2   : > { %v2040_v21 = vpop.f32.mrb[39].mxu0  ;;  %v9893_v25 = vadd.f32 %v7280_v63, %v9881_v45  ;;  %v9930_v63 = vld [vmem:[%s12695_s29 + $0x58] sm:$0xff] }
 0x5c3   : > { %v9911_v47 = vadd.f32 %v2040_v21, %v9899_v44 }
 0x5c7   : > { %v7283_v43 = vpop.f32.mrb[40].mxu0 }
 0x5c8   : > { %v2053_v1 = vpop.f32.mrb[41].mxu0  ;;  %v9924_v53 = vadd.f32 %v7283_v43, %v9917_v48 }
 0x5c9   : > { %v7284_v2 = vpop.f32.mrb[42].mxu0  ;;  %v9884_v23 = vadd.f32 %v2053_v1, %v9872_v17  ;;  %v9939_v1 = vld [vmem:[%s12695_s29 + $0x60] sm:$0xff] }
 0x5ca   : > { %v2056_v3 = vpop.f32.mrb[43].mxu0  ;;  %v9934_v21 = vadd.f32 %v7284_v2, %v9930_v63 }
 0x5cb   : > { %v9902_v31 = vadd.f32 %v2056_v3, %v9890_v46  ;;  %v9948_v3 = vld [vmem:[%s12695_s29 + $0x78] sm:$0xff] }
 0x5cf   : > { %v7287_v61 = vpop.f32.mrb[44].mxu0 }
 0x5d0   : > { %v2069_v7 = vpop.f32.mrb[45].mxu0  ;;  %v9920_v60 = vadd.f32 %v7287_v61, %v9908_v38  ;;  %v9957_v61 = vld [vmem:[%s12695_s29 + $0x68] sm:$0xff] }
 0x5d1   : > { %2371 = vrot.lane.b32.xlu1 %v9728_v4, %s8848_s11  ;;  %v7288_v10 = vpop.f32.mrb[46].mxu0  ;;  %v9943_v43 = vadd.f32 %v2069_v7, %v9939_v1 }
 0x5d2   : > { %v2072_v15 = vpop.f32.mrb[47].mxu0  ;;  %v9952_v2 = vadd.f32 %v7288_v10, %v9948_v3  ;;  %v2370_v10 = vpop.permute.xlu0 %2369 }
 0x5d3   : > { %v9961_v7 = vadd.f32 %v2072_v15, %v9957_v61  ;;  %v2368_v15 = vpop.permute.xlu1 %2367 }
 0x5d4   : > { %2373 = vrot.lane.b32.xlu0 %v9752_v27, %s8848_s11 }
 0x5f3   : > { %2096 = vmax.xlane.f32.xlu0 %v9867_v40 }
 0x5f5   : > { %2092 = vmax.xlane.f32.xlu1 %v9875_v20 }
 0x5f7   : > { %2100 = vmax.xlane.f32.xlu0 %v9884_v23 }
 0x5f9   : > { %2098 = vmax.xlane.f32.xlu1 %v9893_v25 }
 0x5fb   : > { %2102 = vmax.xlane.f32.xlu0 %v9902_v31 }
 0x5fd   : > { %2094 = vmax.xlane.f32.xlu1 %v9911_v47 }
 0x5ff   : > { %2112 = vmax.xlane.f32.xlu0 %v9920_v60 }
 0x601   : > { %2104 = vmax.xlane.f32.xlu1 %v9924_v53 }
 0x605   : > { %2106 = vmax.xlane.f32.xlu1 %v9934_v21 }
 0x609   : > { %2108 = vmax.xlane.f32.xlu1 %v9943_v43 }
 0x60d   : > { %2114 = vmax.xlane.f32.xlu1 %v9952_v2 }
 0x611   : > { %2110 = vmax.xlane.f32.xlu1 %v9961_v7 }
 0x615   : > { %2377 = vrot.lane.b32.xlu0 %v9778_v8, %s8848_s11 }
 0x619   : > { %2379 = vrot.lane.b32.xlu0 %v9790_v42, %s8848_s11 }
 0x61d   : > { %2341 = vrot.lane.b32.xlu0 %v9652_v55, %s8848_s11 }
 0x621   : > { %2345 = vrot.lane.b32.xlu0 %v9705_v37, %s8848_s11 }
 0x622   : > { %2375 = vrot.lane.b32.xlu1 %v9766_v56, %s8848_s11 }
 0x625   : > { %2349 = vrot.lane.b32.xlu0 %v9755_v57, %s8848_s11 }
 0x626   : > { %2343 = vrot.lane.b32.xlu1 %v9679_v12, %s8848_s11 }
 0x629   : > { %2353 = vrot.lane.b32.xlu0 %v9780_v9, %s8848_s11 }
 0x62a   : > { %2347 = vrot.lane.b32.xlu1 %v9731_v22, %s8848_s11 }
 0x62d   : > { %2670 = vrot.lane.b32.xlu0 %v9669_v0, %s8848_s11 }
 0x62e   : > { %2351 = vrot.lane.b32.xlu1 %v9768_v41, %s8848_s11 }
 0x631   : > { %2674 = vrot.lane.b32.xlu0 %v9695_v24, %s8848_s11 }
 0x632   : > { %2355 = vrot.lane.b32.xlu1 %v9792_v26, %s8848_s11 }
 0x635   : > { %2682 = vrot.lane.b32.xlu0 %v9745_v18, %s8848_s11 }
 0x636   : > { %2672 = vrot.lane.b32.xlu1 %v9664_v14, %s8848_s11 }
 0x639   : > { %2823 = vrot.lane.b32.xlu0 %v9650_v13, %s8849_s25 }
 0x63a   : > { %2676 = vrot.lane.b32.xlu1 %v9691_v19, %s8848_s11 }
 0x63d   : > { %2825 = vrot.lane.b32.xlu0 %v9676_v32, %s8849_s25 }
 0x63e   : > { %2678 = vrot.lane.b32.xlu1 %v9721_v58, %s8848_s11 }
 0x641   : > { %2829 = vrot.lane.b32.xlu0 %v9728_v4, %s8849_s25 }
 0x642   : > { %2680 = vrot.lane.b32.xlu1 %v9717_v52, %s8848_s11 }
 0x646   : > { %2684 = vrot.lane.b32.xlu1 %v9741_v33, %s8848_s11 }
 0x647   : > { %v2089_v62 = vpop.xlane.xlu0 %2088 }
 0x648   : > { %v2118_v11 = vsub.f32 %v9827_v36, %v2089_v62 }
 0x649   : > { %v2091_v30 = vpop.xlane.xlu1 %2090 }
 0x64a   : > { %v2119_v28 = vsub.f32 %v9835_v6, %v2091_v30  ;;  %2827 = vrot.lane.b32.xlu1 %v9702_v35, %s8849_s25  ;;  %v2136_v0 = vmul.f32 1.442695, %v2118_v11  ;;  %v2406_v11 = vsel %vm1938_vm0, %v9812_v29, 0 }
 0x64b   : > { %v2085_v51 = vpop.xlane.xlu0 %2084 }
 0x64c   : > { %v2138_v32 = vmul.f32 1.442695, %v2119_v28  ;;  %v2116_v4 = vsub.f32 %v9844_v50, %v2085_v51 }
 0x64d   : > { %v2087_v13 = vpop.xlane.xlu1 %2086 }
 0x64e   : > { %v2132_v18 = vmul.f32 1.442695, %v2116_v4  ;;  %v2117_v24 = vsub.f32 %v9848_v59, %v2087_v13  ;;  %8044 = vpow2.f32 %v2138_v32  ;;  %v2409_v13 = vsel %vm1938_vm0, %v2368_v15, 0 }
 0x64f   : > { %v2374_v4 = vpop.permute.xlu0 %2373 }
 0x650   : > { %v2134_v9 = vmul.f32 1.442695, %v2117_v24  ;;  %8046 = vpow2.f32 %v2132_v18  ;;  %v2418_v18 = vsel %vm1938_vm0, %v2374_v4, 0 }
 0x651   : > { %v2372_v32 = vpop.permute.xlu1 %2371 }
 0x652   : > { %8048 = vpow2.f32 %v2134_v9  ;;  %v2415_v24 = vsel %vm1938_vm0, %v2372_v32, 0 }
 0x653   : > { %8050 = vpow2.f32 %v2136_v0  ;;  %v2412_v0 = vsel %vm1938_vm0, %v2370_v10, 0 }
 0x658   : > { %v10014_v30 = vpop.eup %8044 }
 0x659   : > { %12696 = vst [vmem:[#allocation31_spill] sm:$0xff] %v10014_v30 }
 0x65a   : > { %v10016_v6 = vpop.eup %8046 }
 0x65b   : > { %12697 = vst [vmem:[#allocation32_spill] sm:$0xff] %v10016_v6 }
 0x65c   : > { %v10018_v57 = vpop.eup %8048 }
 0x65d   : > { %12698 = vst [vmem:[#allocation33_spill] sm:$0xff] %v10018_v57  ;;  %v10020_v62 = vpop.eup %8050  ;;  %v2212_v51 = vpack.c.bf16 %v10018_v57, %v10016_v6  ;;  %v10460_v6 = vld [vmem:[%s12695_s29 + $0x40] sm:$0xff] }
 0x65e   : > { %12699 = vst [vmem:[#allocation34_spill] sm:$0xff] %v10020_v62  ;;  %v2213_v28 = vpack.c.bf16 %v10014_v30, %v10020_v62 }
 0x65f   : > { %7305 = vmatprep.mubr.bf16.mxu1 %v2212_v51 }
 0x660   : > { %7306 = vmatmul.mubr.bf16.vlgmr.msra.gmra.mrb[16].mxu1 %v2213_v28 }
 0x661   : > { %7322 = vmatpush3.bf16.xpose.msra.mxu1 %v2406_v11 }
 0x662   : > { %7634 = vmatprep.subr.msk.bf16.mxu1 %vm1938_vm0, %v2368_v15 }
 0x669   : > { %7324 = vmatpush3.bf16.xpose.msra.mxu1 %v2409_v13 }
 0x66a   : > { %7635 = vmatprep.subr.msk.bf16.mxu1 %vm1938_vm0, %v2370_v10 }
 0x671   : > { %7326 = vmatpush3.bf16.xpose.msra.mxu1 %v2412_v0 }
 0x672   : > { %7636 = vmatprep.subr.msk.bf16.mxu1 %vm1938_vm0, %v2372_v32 }
 0x679   : > { %7328 = vmatpush3.bf16.xpose.msra.mxu1 %v2415_v24 }
 0x67a   : > { %7637 = vmatprep.subr.msk.bf16.mxu1 %vm1938_vm0, %v2374_v4 }
 0x680   : > { %v2097_v9 = vpop.xlane.xlu0 %2096 }
 0x681   : > { %7330 = vmatpush3.bf16.xpose.msra.mxu1 %v2418_v18  ;;  %v2122_v15 = vsub.f32 %v9867_v40, %v2097_v9 }
 0x682   : > { %v2093_v29 = vpop.xlane.xlu1 %2092 }
 0x683   : > { %v2120_v36 = vsub.f32 %v9875_v20, %v2093_v29  ;;  %v2144_v18 = vmul.f32 1.442695, %v2122_v15 }
 0x684   : > { %v2101_v50 = vpop.xlane.xlu0 %2100 }
 0x685   : > { %v2140_v51 = vmul.f32 1.442695, %v2120_v36  ;;  %v2124_v11 = vsub.f32 %v9884_v23, %v2101_v50 }
 0x686   : > { %v2099_v59 = vpop.xlane.xlu1 %2098 }
 0x687   : > { %v2123_v10 = vsub.f32 %v9893_v25, %v2099_v59  ;;  %8052 = vpow2.f32 %v2140_v51  ;;  %v2148_v29 = vmul.f32 1.442695, %v2124_v11 }
 0x688   : > { %v2103_v28 = vpop.xlane.xlu0 %2102 }
 0x689   : > { %v2146_v13 = vmul.f32 1.442695, %v2123_v10  ;;  %v2125_v0 = vsub.f32 %v9902_v31, %v2103_v28 }
 0x68a   : > { %v2095_v32 = vpop.xlane.xlu1 %2094 }
 0x68b   : > { %v2150_v24 = vmul.f32 1.442695, %v2125_v0  ;;  %v2121_v4 = vsub.f32 %v9911_v47, %v2095_v32  ;;  %8054 = vpow2.f32 %v2146_v13 }
 0x68c   : > { %v2113_v20 = vpop.xlane.xlu0 %2112 }
 0x68d   : > { %v2142_v30 = vmul.f32 1.442695, %v2121_v4  ;;  %8056 = vpow2.f32 %v2150_v24  ;;  %v2130_v4 = vsub.f32 %v9920_v60, %v2113_v20 }
 0x68e   : > { %v2105_v25 = vpop.xlane.xlu1 %2104 }
 0x68f   : > { %8058 = vpow2.f32 %v2142_v30  ;;  %v2126_v40 = vsub.f32 %v9924_v53, %v2105_v25 }
 0x690   : > { %8060 = vpow2.f32 %v2144_v18  ;;  %v2378_v23 = vpop.permute.xlu0 %2377 }
 0x691   : > { %8062 = vpow2.f32 %v2148_v29  ;;  %v2152_v9 = vmul.f32 1.442695, %v2126_v40  ;;  %v10046_v59 = vpop.eup %8052 }
 0x692   : > { %v2107_v31 = vpop.xlane.xlu1 %2106  ;;  %12700 = vst [vmem:[#allocation35_spill] sm:$0xff] %v10046_v59 }
 0x693   : > { %v2127_v36 = vsub.f32 %v9934_v21, %v2107_v31  ;;  %8064 = vpow2.f32 %v2152_v9 }
 0x694   : > { %v10044_v50 = vpop.permute.xlu0 %2379 }
 0x695   : > { %v2154_v47 = vmul.f32 1.442695, %v2127_v36  ;;  %v10048_v15 = vpop.eup %8054 }
 0x696   : > { %v2109_v10 = vpop.xlane.xlu1 %2108  ;;  %12701 = vst [vmem:[#allocation36_spill] sm:$0xff] %v10048_v15 }
 0x697   : > { %8066 = vpow2.f32 %v2154_v47  ;;  %v10050_v30 = vpop.eup %8056  ;;  %v2128_v28 = vsub.f32 %v9943_v43, %v2109_v10 }
 0x698   : > { %12702 = vst [vmem:[#allocation37_spill] sm:$0xff] %v10050_v30  ;;  %v2342_v53 = vpop.permute.xlu0 %2341 }
 0x699   : > { %v10052_v51 = vpop.eup %8058  ;;  %v2156_v29 = vmul.f32 1.442695, %v2128_v28 }
 0x69a   : > { %12703 = vst [vmem:[#allocation38_spill] sm:$0xff] %v10052_v51  ;;  %v10055_v11 = vpop.eup %8060  ;;  %v2115_v21 = vpop.xlane.xlu1 %2114  ;;  %v2214_v13 = vpack.c.bf16 %v10052_v51, %v10046_v59  ;;  %v10447_v59 = vld [vmem:[%s12695_s29 + $0x38] sm:$0xff] }
 0x69b   : > { %12704 = vst [vmem:[#allocation39_spill] sm:$0xff] %v10055_v11  ;;  %v10059_v0 = vpop.eup %8062  ;;  %v2131_v32 = vsub.f32 %v9952_v2, %v2115_v21  ;;  %v2215_v24 = vpack.c.bf16 %v10048_v15, %v10055_v11  ;;  %v2160_v2 = vmul.f32 1.442695, %v2130_v4  ;;  %8068 = vpow2.f32 %v2156_v29 }
 0x69c   : > { %12705 = vst [vmem:[#allocation40_spill] sm:$0xff] %v10059_v0  ;;  %7309 = vmatprep.mubr.bf16.mxu1 %v2214_v13  ;;  %v2346_v18 = vpop.permute.xlu0 %2345  ;;  %v2216_v43 = vpack.c.bf16 %v10050_v30, %v10059_v0  ;;  %v2424_v4 = vsel %vm1938_vm0, %v2378_v23, 0 }
 0x69d   : > { %7310 = vmatmul.mubr.bf16.gmra.mrb[20].mxu1 %v2215_v24  ;;  %v2162_v25 = vmul.f32 1.442695, %v2131_v32  ;;  %v10068_v31 = vpop.eup %8064 }
 0x69e   : > { %v2111_v40 = vpop.xlane.xlu1 %2110  ;;  %7313 = vmatprep.mubr.bf16.mxu1 %v2216_v43  ;;  %12706 = vst [vmem:[#allocation41_spill] sm:$0xff] %v10068_v31 }
 0x69f   : > { %v2129_v9 = vsub.f32 %v9961_v7, %v2111_v40  ;;  %8070 = vpow2.f32 %v2162_v25 }
 0x6a0   : > { %v2350_v36 = vpop.permute.xlu0 %2349 }
 0x6a1   : > { %v10070_v47 = vpop.eup %8066  ;;  %v2158_v60 = vmul.f32 1.442695, %v2129_v9 }
 0x6a2   : > { %12707 = vst [vmem:[#allocation42_spill] sm:$0xff] %v10070_v47  ;;  %v2376_v20 = vpop.permute.xlu1 %2375  ;;  %v2217_v10 = vpack.c.bf16 %v10070_v47, %v10068_v31 }
 0x6a3   : > { %8072 = vpow2.f32 %v2158_v60  ;;  %7638 = vmatprep.subr.msk.bf16.mxu1 %vm1938_vm0, %v2376_v20  ;;  %v2421_v28 = vsel %vm1938_vm0, %v2376_v20, 0  ;;  %v2427_v60 = vsel %vm1938_vm0, %v10044_v50, 0 }
 0x6a4   : > { %8074 = vpow2.f32 %v2160_v2  ;;  %7332 = vmatpush3.bf16.xpose.msra.mxu1 %v2421_v28  ;;  %v2354_v7 = vpop.permute.xlu0 %2353 }
 0x6a5   : > { %7314 = vmatmul.mubr.bf16.gmra.mrb[24].mxu1 %v2217_v10  ;;  %7639 = vmatprep.subr.msk.bf16.mxu1 %vm1938_vm0, %v2378_v23  ;;  %v10077_v24 = vpop.eup %8068 }
 0x6a6   : > { %v2344_v21 = vpop.permute.xlu1 %2343  ;;  %12708 = vst [vmem:[#allocation43_spill] sm:$0xff] %v10077_v24 }
 0x6a8   : > { %v2671_v13 = vpop.permute.xlu0 %2670 }
 0x6a9   : > { %7353 = vmatprep.subr.bf16.mxu0 %v2671_v13  ;;  %v10080_v43 = vpop.eup %8070 }
 0x6aa   : > { %v2348_v32 = vpop.permute.xlu1 %2347  ;;  %7354 = vmatpush3.bf16.msra.mxu0 %v2671_v13  ;;  %12709 = vst [vmem:[#allocation44_spill] sm:$0xff] %v10080_v43 }
 0x6ac   : > { %7334 = vmatpush3.bf16.xpose.msra.mxu1 %v2424_v4  ;;  %v2675_v10 = vpop.permute.xlu0 %2674 }
 0x6ad   : > { %v10082_v29 = vpop.eup %8072  ;;  %7640 = vmatprep.subr.msk.bf16.mxu1 %vm1938_vm0, %v10044_v50 }
 0x6ae   : > { %12710 = vst [vmem:[#allocation45_spill] sm:$0xff] %v10082_v29  ;;  %v10086_v25 = vpop.eup %8074  ;;  %v2352_v40 = vpop.permute.xlu1 %2351  ;;  %v2218_v9 = vpack.c.bf16 %v10082_v29, %v10077_v24 }
 0x6af   : > { %12711 = vst [vmem:[#allocation46_spill] sm:$0xff] %v10086_v25  ;;  %v2219_v2 = vpack.c.bf16 %v10080_v43, %v10086_v25 }
 0x6b0   : > { %7317 = vmatprep.mubr.bf16.mxu1 %v2218_v9  ;;  %v2683_v50 = vpop.permute.xlu0 %2682 }
 0x6b1   : > { %7318 = vmatmul.mubr.bf16.gmra.mrb[28].mxu1 %v2219_v2 }
 0x6b2   : > { %v2356_v23 = vpop.permute.xlu1 %2355  ;;  %7337 = vmatprep.mubr.msk.bf16.mxu1 %vm1938_vm0, %v2342_v53 }
 0x6b4   : > { %7336 = vmatpush3.bf16.xpose.msra.mxu1 %v2427_v60 }
 0x6b6   : > { %v2673_v20 = vpop.permute.xlu1 %2672 }
 0x6b7   : > { %7355 = vmatprep.subr.bf16.mxu0 %v2673_v20 }
 0x6b8   : > { %7356 = vmatpush3.bf16.msra.mxu0 %v2673_v20 }
 0x6b9   : > { %7357 = vmatprep.subr.bf16.mxu0 %v2675_v10 }
 0x6ba   : > { %v2677_v28 = vpop.permute.xlu1 %2676 }
 0x6bb   : > { %7338 = vmatmul.mubr.msk.bf16.vlgmr.msra.gmra.mrb[32].mxu1 %vm1938_vm0, %v2344_v21 }
 0x6bc   : > { %7341 = vmatprep.mubr.msk.bf16.mxu1 %vm1938_vm0, %v2346_v18  ;;  %7358 = vmatpush3.bf16.msra.mxu0 %v2675_v10  ;;  %v10101_v18 = vpop.permute.xlu0 %2823 }
 0x6bd   : > { %7359 = vmatprep.subr.bf16.mxu0 %v2677_v28 }
 0x6be   : > { %v2679_v13 = vpop.permute.xlu1 %2678 }
 0x6c0   : > { %7360 = vmatpush3.bf16.msra.mxu0 %v2677_v28 }
 0x6c1   : > { %7361 = vmatprep.subr.bf16.mxu0 %v2679_v13 }
 0x6c2   : > { %v2681_v53 = vpop.permute.xlu1 %2680 }
 0x6c3   : > { %7342 = vmatmul.mubr.msk.bf16.gmra.mrb[36].mxu1 %vm1938_vm0, %v2348_v32 }
 0x6c4   : > { %7345 = vmatprep.mubr.msk.bf16.mxu1 %vm1938_vm0, %v2350_v36  ;;  %7362 = vmatpush3.bf16.msra.mxu0 %v2679_v13 }
 0x6c5   : > { %7363 = vmatprep.subr.bf16.mxu0 %v2681_v53 }
 0x6c6   : > { %v2685_v21 = vpop.permute.xlu1 %2684 }
 0x6c8   : > { %7364 = vmatpush3.bf16.msra.mxu0 %v2681_v53 }
 0x6c9   : > { %7365 = vmatprep.subr.bf16.mxu0 %v2683_v50 }
 0x6cb   : > { %7346 = vmatmul.mubr.msk.bf16.gmra.mrb[40].mxu1 %vm1938_vm0, %v2352_v40 }
 0x6cc   : > { %7349 = vmatprep.mubr.msk.bf16.mxu1 %vm1938_vm0, %v2354_v7  ;;  %7366 = vmatpush3.bf16.msra.mxu0 %v2683_v50 }
 0x6cd   : > { %7367 = vmatprep.subr.bf16.mxu0 %v2685_v21 }
 0x6d0   : > { %7368 = vmatpush3.bf16.msra.mxu0 %v2685_v21 }
 0x6d1   : > { %7641 = vmatprep.subr.msk.bf16.mxu0 %vm1938_vm0, %v10101_v18 }
 0x6d3   : > { %7350 = vmatmul.mubr.msk.bf16.gmra.mrb[44].mxu1 %vm1938_vm0, %v2356_v23 }
 0x733   : > { %v10106_v36 = vpop.f32.mrb[16].mxu1 }
 0x734   : > { %12712 = vst [vmem:[#allocation47_spill] sm:$0xff] %v10106_v36  ;;  %v10108_v32 = vpop.f32.mrb[17].mxu1 }
 0x735   : > { %12713 = vst [vmem:[#allocation48_spill] sm:$0xff] %v10108_v32  ;;  %v10110_v4 = vpop.f32.mrb[18].mxu1 }
 0x736   : > { %12714 = vst [vmem:[#allocation49_spill] sm:$0xff] %v10110_v4  ;;  %v10112_v40 = vpop.f32.mrb[19].mxu1 }
 0x737   : > { %12715 = vst [vmem:[#allocation50_spill] sm:$0xff] %v10112_v40 }
 0x770   : > { %v10114_v9 = vpop.f32.mrb[20].mxu1 }
 0x771   : > { %12716 = vst [vmem:[#allocation51_spill] sm:$0xff] %v10114_v9  ;;  %v10116_v7 = vpop.f32.mrb[21].mxu1 }
 0x772   : > { %12717 = vst [vmem:[#allocation52_spill] sm:$0xff] %v10116_v7  ;;  %v10118_v2 = vpop.f32.mrb[22].mxu1  ;;  %v12735_v7 = vld [vmem:[#allocation27_spill] sm:$0xff] }
 0x773   : > { %12718 = vst [vmem:[#allocation53_spill] sm:$0xff] %v10118_v2  ;;  %v10120_v60 = vpop.f32.mrb[23].mxu1 }
 0x774   : > { %12719 = vst [vmem:[#allocation54_spill] sm:$0xff] %v10120_v60 }
 0x778   : > { %v10122_v20 = vpop.f32.mrb[24].mxu1 }
 0x779   : > { %12720 = vst [vmem:[#allocation55_spill] sm:$0xff] %v10122_v20  ;;  %v10124_v10 = vpop.f32.mrb[25].mxu1 }
 0x77a   : > { %12721 = vst [vmem:[#allocation56_spill] sm:$0xff] %v10124_v10  ;;  %v10126_v23 = vpop.f32.mrb[26].mxu1 }
 0x77b   : > { %12722 = vst [vmem:[#allocation57_spill] sm:$0xff] %v10126_v23  ;;  %v10128_v28 = vpop.f32.mrb[27].mxu1 }
 0x77c   : > { %12723 = vst [vmem:[#allocation58_spill] sm:$0xff] %v10128_v28 }
 0x784   : > { %v10130_v13 = vpop.f32.mrb[28].mxu1 }
 0x785   : > { %12724 = vst [vmem:[#allocation59_spill] sm:$0xff] %v10130_v13  ;;  %v10132_v53 = vpop.f32.mrb[29].mxu1 }
 0x786   : > { %12725 = vst [vmem:[#allocation60_spill] sm:$0xff] %v10132_v53  ;;  %v10134_v50 = vpop.f32.mrb[30].mxu1 }
 0x787   : > { %12726 = vst [vmem:[#allocation61_spill] sm:$0xff] %v10134_v50  ;;  %v10136_v21 = vpop.f32.mrb[31].mxu1 }
 0x788   : > { %12727 = vst [vmem:[#allocation62_spill] sm:$0xff] %v10136_v21 }
 0x78e   : > { %v7339_v43 = vpop.f32.mrb[32].mxu1 }
 0x78f   : > { %v10139_v29 = vadd.f32 %v7339_v43, %v9819_v34  ;;  %v2463_v2 = vpop.f32.mrb[33].mxu1 }
 0x790   : > { %v7340_v20 = vpop.f32.mrb[34].mxu1  ;;  %v10146_v13 = vadd.f32 %v2463_v2, %v9832_v39 }
 0x791   : > { %2530 = vmax.xlane.f32.xlu0 %v10139_v29  ;;  %v2466_v10 = vpop.f32.mrb[35].mxu1  ;;  %v10151_v21 = vadd.f32 %v7340_v20, %v9824_v5 }
 0x792   : > { %v10143_v23 = vadd.f32 %v2466_v10, %v9841_v49 }
 0x794   : > { %2528 = vmax.xlane.f32.xlu1 %v10143_v23 }
 0x795   : > { %2526 = vmax.xlane.f32.xlu0 %v10146_v13 }
 0x796   : > { %v7343_v50 = vpop.f32.mrb[36].mxu1 }
 0x797   : > { %v10154_v34 = vadd.f32 %v7343_v50, %v9859_v16  ;;  %v2479_v43 = vpop.f32.mrb[37].mxu1 }
 0x798   : > { %v7344_v53 = vpop.f32.mrb[38].mxu1  ;;  %v10162_v2 = vadd.f32 %v2479_v43, %v9864_v54 }
 0x799   : > { %2532 = vmax.xlane.f32.xlu0 %v10151_v21  ;;  %2538 = vmax.xlane.f32.xlu1 %v10154_v34  ;;  %v2482_v49 = vpop.f32.mrb[39].mxu1  ;;  %v10167_v16 = vadd.f32 %v7344_v53, %v9881_v45 }
 0x79a   : > { %v10159_v39 = vadd.f32 %v2482_v49, %v9899_v44 }
 0x79d   : > { %2536 = vmax.xlane.f32.xlu0 %v10159_v39  ;;  %2534 = vmax.xlane.f32.xlu1 %v10162_v2 }
 0x79e   : > { %v7347_v5 = vpop.f32.mrb[40].mxu1 }
 0x79f   : > { %v10170_v20 = vadd.f32 %v7347_v5, %v9917_v48  ;;  %v2495_v10 = vpop.f32.mrb[41].mxu1 }
 0x7a0   : > { %v7348_v50 = vpop.f32.mrb[42].mxu1  ;;  %v10175_v54 = vadd.f32 %v2495_v10, %v9872_v17 }
 0x7a1   : > { %2540 = vmax.xlane.f32.xlu1 %v10167_v16  ;;  %2546 = vmax.xlane.f32.xlu0 %v10170_v20  ;;  %v2498_v49 = vpop.f32.mrb[43].mxu1  ;;  %v10179_v28 = vadd.f32 %v7348_v50, %v9930_v63  ;;  %v12732_v50 = vld [vmem:[#allocation28_spill] sm:$0xff] }
 0x7a2   : > { %v10187_v9 = vadd.f32 %v2498_v49, %v9890_v46  ;;  %v12733_v49 = vld [vmem:[#allocation23_spill] sm:$0xff] }
 0x7a5   : > { %2542 = vmax.xlane.f32.xlu1 %v10175_v54 }
 0x7a6   : > { %v7351_v43 = vpop.f32.mrb[44].mxu1 }
 0x7a7   : > { %v2511_v45 = vpop.f32.mrb[45].mxu1  ;;  %v10191_v17 = vadd.f32 %v7351_v43, %v9908_v38  ;;  %v12728_v38 = vld [vmem:[#allocation29_spill] sm:$0xff] }
 0x7a8   : > { %v10182_v53 = vadd.f32 %v2511_v45, %v9939_v1  ;;  %v7352_v5 = vpop.f32.mrb[46].mxu1  ;;  %v10250_v45 = vpop.permute.xlu1 %2827 }
 0x7a9   : > { %2548 = vmax.xlane.f32.xlu1 %v10179_v28  ;;  %v2514_v60 = vpop.f32.mrb[47].mxu1  ;;  %v10195_v10 = vadd.f32 %v7352_v5, %v9948_v3  ;;  %v12729_v3 = vld [vmem:[#allocation30_spill] sm:$0xff]  ;;  %v12734_v5 = vld [vmem:[#allocation25_spill] sm:$0xff] }
 0x7aa   : > { %2550 = vmax.xlane.f32.xlu0 %v10182_v53  ;;  %v10213_v46 = vadd.f32 %v2514_v60, %v9957_v61  ;;  %v12731_v61 = vld [vmem:[#allocation26_spill] sm:$0xff]  ;;  %v10242_v60 = vpop.permute.xlu0 %2825 }
 0x7ad   : > { %2544 = vmax.xlane.f32.xlu1 %v10187_v9 }
 0x7ae   : > { %v10248_v43 = vpop.permute.xlu0 %2829 }
 0x7b1   : > { %2554 = vmax.xlane.f32.xlu1 %v10191_v17 }
 0x7b5   : > { %2556 = vmax.xlane.f32.xlu1 %v10195_v10 }
 0x7c0   : > { %2833 = vrot.lane.b32.xlu0 %v9766_v56, %s8849_s25 }
 0x7c6   : > { %2831 = vrot.lane.b32.xlu1 %v9752_v27, %s8849_s25 }
 0x7ca   : > { %2809 = vrot.lane.b32.xlu1 %v9679_v12, %s8849_s25 }
 0x7ce   : > { %2813 = vrot.lane.b32.xlu1 %v9731_v22, %s8849_s25 }
 0x7d2   : > { %2817 = vrot.lane.b32.xlu1 %v9768_v41, %s8849_s25 }
 0x7d6   : > { %2821 = vrot.lane.b32.xlu1 %v9792_v26, %s8849_s25 }
 0x7da   : > { %3122 = vrot.lane.b32.xlu1 %v9664_v14, %s8849_s25 }
 0x7de   : > { %3126 = vrot.lane.b32.xlu1 %v9691_v19, %s8849_s25 }
 0x7df   : > { %2552 = vmax.xlane.f32.xlu0 %v10213_v46 }
 0x7e2   : > { %3128 = vrot.lane.b32.xlu1 %v9721_v58, %s8849_s25 }
 0x7e6   : > { %3130 = vrot.lane.b32.xlu1 %v9717_v52, %s8849_s25 }
 0x7ea   : > { %3134 = vrot.lane.b32.xlu1 %v9741_v33, %s8849_s25 }
 0x7ee   : > { %3277 = vrot.lane.b32.xlu1 %v9702_v35, %s8850_s28  ;;  %v12730_v35 = vld [vmem:[#allocation24_spill] sm:$0xff] }
 0x7f5   : > { %2835 = vrot.lane.b32.xlu0 %v9778_v8, %s8849_s25 }
 0x7f9   : > { %2837 = vrot.lane.b32.xlu0 %v9790_v42, %s8849_s25 }
 0x7fd   : > { %2807 = vrot.lane.b32.xlu0 %v9652_v55, %s8849_s25 }
 0x801   : > { %2811 = vrot.lane.b32.xlu0 %v9705_v37, %s8849_s25 }
 0x805   : > { %2815 = vrot.lane.b32.xlu0 %v12728_v38, %s8849_s25 }
 0x809   : > { %2819 = vrot.lane.b32.xlu0 %v12729_v3, %s8849_s25 }
 0x80d   : > { %3120 = vrot.lane.b32.xlu0 %v12730_v35, %s8849_s25 }
 0x811   : > { %3124 = vrot.lane.b32.xlu0 %v12731_v61, %s8849_s25 }
 0x815   : > { %3132 = vrot.lane.b32.xlu0 %v12732_v50, %s8849_s25 }
 0x819   : > { %3273 = vrot.lane.b32.xlu0 %v12733_v49, %s8850_s28 }
 0x81d   : > { %3275 = vrot.lane.b32.xlu0 %v12734_v5, %s8850_s28 }
 0x81e   : > { %v2531_v4 = vpop.xlane.xlu0 %2530 }
 0x81f   : > { %v2560_v32 = vsub.f32 %v10139_v29, %v2531_v4 }
 0x821   : > { %v2529_v25 = vpop.xlane.xlu1 %2528  ;;  %3279 = vrot.lane.b32.xlu0 %v12735_v7, %s8850_s28  ;;  %v2578_v0 = vmul.f32 1.442695, %v2560_v32 }
 0x822   : > { %v2559_v40 = vsub.f32 %v10143_v23, %v2529_v25  ;;  %v2527_v36 = vpop.xlane.xlu0 %2526 }
 0x823   : > { %v2558_v24 = vsub.f32 %v10146_v13, %v2527_v36 }
 0x824   : > { %v2576_v49 = vmul.f32 1.442695, %v2559_v40 }
 0x825   : > { %v2574_v30 = vmul.f32 1.442695, %v2558_v24 }
 0x826   : > { %8076 = vpow2.f32 %v2576_v49  ;;  %v2539_v47 = vpop.xlane.xlu1 %2538  ;;  %v2533_v31 = vpop.xlane.xlu0 %2532 }
 0x827   : > { %8078 = vpow2.f32 %v2574_v30  ;;  %v2561_v5 = vsub.f32 %v10151_v21, %v2533_v31  ;;  %v2564_v51 = vsub.f32 %v10154_v34, %v2539_v47 }
 0x828   : > { %8080 = vpow2.f32 %v2578_v0 }
 0x829   : > { %v2580_v15 = vmul.f32 1.442695, %v2561_v5  ;;  %v2586_v4 = vmul.f32 1.442695, %v2564_v51  ;;  %v2864_v5 = vsel %vm1938_vm0, %v10101_v18, 0 }
 0x82a   : > { %v2535_v7 = vpop.xlane.xlu1 %2534  ;;  %v2537_v11 = vpop.xlane.xlu0 %2536 }
 0x82b   : > { %v2562_v25 = vsub.f32 %v10162_v2, %v2535_v7  ;;  %v2563_v29 = vsub.f32 %v10159_v39, %v2537_v11  ;;  %8082 = vpow2.f32 %v2580_v15 }
 0x82d   : > { %v2582_v36 = vmul.f32 1.442695, %v2562_v25  ;;  %v2584_v24 = vmul.f32 1.442695, %v2563_v29 }
 0x82e   : > { %v2541_v40 = vpop.xlane.xlu1 %2540  ;;  %v2547_v51 = vpop.xlane.xlu0 %2546 }
 0x82f   : > { %8084 = vpow2.f32 %v2582_v36  ;;  %v2565_v30 = vsub.f32 %v10167_v16, %v2541_v40  ;;  %v2568_v2 = vsub.f32 %v10170_v20, %v2547_v51 }
 0x830   : > { %v10264_v32 = vpop.eup %8076  ;;  %8086 = vpow2.f32 %v2584_v24 }
 0x831   : > { %v10266_v31 = vpop.eup %8078  ;;  %v2588_v47 = vmul.f32 1.442695, %v2565_v30  ;;  %8088 = vpow2.f32 %v2586_v4  ;;  %v2594_v36 = vmul.f32 1.442695, %v2568_v2 }
 0x832   : > { %v2543_v0 = vpop.xlane.xlu1 %2542  ;;  %v2654_v23 = vpack.c.bf16 %v10264_v32, %v10266_v31  ;;  %v10270_v15 = vpop.eup %8080 }
 0x833   : > { %8090 = vpow2.f32 %v2588_v47  ;;  %v2566_v11 = vsub.f32 %v10175_v54, %v2543_v0 }
 0x834   : > { %7369 = vmatprep.mubr.bf16.mxu0 %v2654_v23  ;;  %v2870_v23 = vsel %vm1938_vm0, %v10250_v45, 0 }
 0x835   : > { %v10273_v13 = vpop.eup %8082  ;;  %v2590_v49 = vmul.f32 1.442695, %v2566_v11 }
 0x836   : > { %v2549_v21 = vpop.xlane.xlu1 %2548  ;;  %v2655_v39 = vpack.c.bf16 %v10273_v13, %v10270_v15 }
 0x837   : > { %v2569_v34 = vsub.f32 %v10179_v28, %v2549_v21  ;;  %8092 = vpow2.f32 %v2590_v49 }
 0x838   : > { %7370 = vmatmul.mubr.bf16.vlgmr.msra.gmra.mrb[48].mxu0 %v2655_v39 }
 0x839   : > { %v10279_v16 = vpop.eup %8084  ;;  %v2596_v54 = vmul.f32 1.442695, %v2569_v34  ;;  %7386 = vmatpush3.bf16.xpose.msra.mxu0 %v2864_v5  ;;  %v2873_v34 = vsel %vm1938_vm0, %v10248_v43, 0 }
 0x83a   : > { %v10283_v7 = vpop.eup %8086  ;;  %v2545_v25 = vpop.xlane.xlu1 %2544  ;;  %7642 = vmatprep.subr.msk.bf16.mxu0 %vm1938_vm0, %v10242_v60 }
 0x83b   : > { %v2567_v28 = vsub.f32 %v10187_v9, %v2545_v25  ;;  %v2656_v20 = vpack.c.bf16 %v10283_v7, %v10279_v16  ;;  %v10290_v29 = vpop.eup %8088  ;;  %8094 = vpow2.f32 %v2596_v54  ;;  %v2867_v9 = vsel %vm1938_vm0, %v10242_v60, 0 }
 0x83d   : > { %v10292_v24 = vpop.eup %8090  ;;  %v2592_v18 = vmul.f32 1.442695, %v2567_v28  ;;  %7373 = vmatprep.mubr.bf16.mxu0 %v2656_v20 }
 0x83e   : > { %v2657_v4 = vpack.c.bf16 %v10292_v24, %v10290_v29  ;;  %v2555_v40 = vpop.xlane.xlu1 %2554 }
 0x83f   : > { %8096 = vpow2.f32 %v2592_v18 }
 0x840   : > { %8098 = vpow2.f32 %v2594_v36  ;;  %7374 = vmatmul.mubr.bf16.gmra.mrb[52].mxu0 %v2657_v4 }
 0x841   : > { %7388 = vmatpush3.bf16.xpose.msra.mxu0 %v2867_v9  ;;  %v10300_v30 = vpop.eup %8092 }
 0x842   : > { %7643 = vmatprep.subr.msk.bf16.mxu0 %vm1938_vm0, %v10250_v45  ;;  %v2557_v21 = vpop.xlane.xlu1 %2556  ;;  %v2551_v45 = vpop.xlane.xlu0 %2550 }
 0x843   : > { %v2570_v54 = vsub.f32 %v10182_v53, %v2551_v45  ;;  %v2573_v25 = vsub.f32 %v10195_v10, %v2557_v21 }
 0x845   : > { %v10302_v47 = vpop.eup %8094  ;;  %v2598_v28 = vmul.f32 1.442695, %v2570_v54  ;;  %v2604_v20 = vmul.f32 1.442695, %v2573_v25 }
 0x846   : > { %v2832_v39 = vpop.permute.xlu1 %2831  ;;  %v2834_v49 = vpop.permute.xlu0 %2833 }
 0x847   : > { %v2876_v2 = vsel %vm1938_vm0, %v2832_v39, 0  ;;  %v2879_v5 = vsel %vm1938_vm0, %v2834_v49, 0  ;;  %8100 = vpow2.f32 %v2598_v28 }
 0x848   : > { %8102 = vpow2.f32 %v2604_v20 }
 0x849   : > { %v10304_v0 = vpop.eup %8096  ;;  %7390 = vmatpush3.bf16.xpose.msra.mxu0 %v2870_v23 }
 0x84a   : > { %v10308_v51 = vpop.eup %8098  ;;  %v2658_v60 = vpack.c.bf16 %v10304_v0, %v10300_v30  ;;  %7644 = vmatprep.subr.msk.bf16.mxu0 %vm1938_vm0, %v10248_v43  ;;  %v2572_v43 = vsub.f32 %v10191_v17, %v2555_v40  ;;  %v2810_v23 = vpop.permute.xlu1 %2809 }
 0x84b   : > { %12736 = vst [vmem:[#allocation29_spill] sm:$0xff] %v10308_v51  ;;  %v2659_v11 = vpack.c.bf16 %v10302_v47, %v10308_v51 }
 0x84c   : > { %7377 = vmatprep.mubr.bf16.mxu0 %v2658_v60  ;;  %v2602_v4 = vmul.f32 1.442695, %v2572_v43 }
 0x84d   : > { %7378 = vmatmul.mubr.bf16.gmra.mrb[56].mxu0 %v2659_v11 }
 0x84e   : > { %v2814_v17 = vpop.permute.xlu1 %2813 }
 0x851   : > { %7392 = vmatpush3.bf16.xpose.msra.mxu0 %v2873_v34  ;;  %v10329_v11 = vpop.eup %8100 }
 0x852   : > { %7645 = vmatprep.subr.msk.bf16.mxu0 %vm1938_vm0, %v2832_v39  ;;  %12737 = vst [vmem:[#allocation30_spill] sm:$0xff] %v10329_v11  ;;  %v10332_v21 = vpop.eup %8102  ;;  %v2818_v45 = vpop.permute.xlu1 %2817 }
 0x853   : > { %12738 = vst [vmem:[#allocation24_spill] sm:$0xff] %v10332_v21 }
 0x856   : > { %v2822_v25 = vpop.permute.xlu1 %2821 }
 0x859   : > { %7394 = vmatpush3.bf16.xpose.msra.mxu0 %v2876_v2 }
 0x85a   : > { %7646 = vmatprep.subr.msk.bf16.mxu0 %vm1938_vm0, %v2834_v49  ;;  %v3123_v28 = vpop.permute.xlu1 %3122 }
 0x861   : > { %7396 = vmatpush3.bf16.xpose.msra.mxu0 %v2879_v5 }
 0x86c   : > { %v2553_v36 = vpop.xlane.xlu0 %2552 }
 0x86d   : > { %v2571_v18 = vsub.f32 %v10213_v46, %v2553_v36  ;;  %v3127_v36 = vpop.permute.xlu1 %3126 }
 0x86f   : > { %v2600_v9 = vmul.f32 1.442695, %v2571_v18 }
 0x870   : > { %v2836_v60 = vpop.permute.xlu0 %2835 }
 0x871   : > { %8104 = vpow2.f32 %v2600_v9  ;;  %7647 = vmatprep.subr.msk.bf16.mxu0 %vm1938_vm0, %v2836_v60  ;;  %v2882_v53 = vsel %vm1938_vm0, %v2836_v60, 0 }
 0x872   : > { %8106 = vpow2.f32 %v2602_v4  ;;  %7398 = vmatpush3.bf16.xpose.msra.mxu0 %v2882_v53  ;;  %v3129_v4 = vpop.permute.xlu1 %3128 }
 0x874   : > { %v2838_v10 = vpop.permute.xlu0 %2837 }
 0x875   : > { %7648 = vmatprep.subr.msk.bf16.mxu0 %vm1938_vm0, %v2838_v10  ;;  %v2885_v46 = vsel %vm1938_vm0, %v2838_v10, 0 }
 0x876   : > { %v3131_v9 = vpop.permute.xlu1 %3130 }
 0x878   : > { %v2808_v40 = vpop.permute.xlu0 %2807 }
 0x87a   : > { %7400 = vmatpush3.bf16.xpose.msra.mxu0 %v2885_v46  ;;  %v3135_v60 = vpop.permute.xlu1 %3134 }
 0x87b   : > { %v10334_v34 = vpop.eup %8104 }
 0x87c   : > { %12739 = vst [vmem:[#allocation26_spill] sm:$0xff] %v10334_v34  ;;  %v10336_v39 = vpop.eup %8106  ;;  %v2812_v2 = vpop.permute.xlu0 %2811  ;;  %v2660_v49 = vpack.c.bf16 %v10334_v34, %v10329_v11 }
 0x87d   : > { %12740 = vst [vmem:[#allocation28_spill] sm:$0xff] %v10336_v39  ;;  %v2661_v5 = vpack.c.bf16 %v10332_v21, %v10336_v39 }
 0x87e   : > { %7381 = vmatprep.mubr.bf16.mxu0 %v2660_v49 }
 0x87f   : > { %7382 = vmatmul.mubr.bf16.gmra.mrb[60].mxu0 %v2661_v5 }
 0x880   : > { %7401 = vmatprep.mubr.msk.bf16.mxu0 %vm1938_vm0, %v2808_v40  ;;  %v2816_v54 = vpop.permute.xlu0 %2815 }
 0x884   : > { %v2820_v43 = vpop.permute.xlu0 %2819 }
 0x887   : > { %7402 = vmatmul.mubr.msk.bf16.vlgmr.msra.gmra.mrb[64].mxu0 %vm1938_vm0, %v2810_v23 }
 0x888   : > { %7405 = vmatprep.mubr.msk.bf16.mxu0 %vm1938_vm0, %v2812_v2  ;;  %v3121_v20 = vpop.permute.xlu0 %3120 }
 0x889   : > { %7417 = vmatprep.subr.bf16.mxu1 %v3121_v20 }
 0x88a   : > { %7418 = vmatpush3.bf16.msra.mxu1 %v3121_v20 }
 0x88b   : > { %7419 = vmatprep.subr.bf16.mxu1 %v3123_v28 }
 0x88c   : > { %v3125_v18 = vpop.permute.xlu0 %3124 }
 0x88e   : > { %7420 = vmatpush3.bf16.msra.mxu1 %v3123_v28 }
 0x88f   : > { %7406 = vmatmul.mubr.msk.bf16.gmra.mrb[68].mxu0 %vm1938_vm0, %v2814_v17  ;;  %7421 = vmatprep.subr.bf16.mxu1 %v3125_v18 }
 0x890   : > { %7409 = vmatprep.mubr.msk.bf16.mxu0 %vm1938_vm0, %v2816_v54  ;;  %v3133_v23 = vpop.permute.xlu0 %3132 }
 0x892   : > { %7422 = vmatpush3.bf16.msra.mxu1 %v3125_v18 }
 0x893   : > { %7423 = vmatprep.subr.bf16.mxu1 %v3127_v36 }
 0x894   : > { %v10350_v53 = vpop.permute.xlu0 %3273 }
 0x896   : > { %7424 = vmatpush3.bf16.msra.mxu1 %v3127_v36 }
 0x897   : > { %7410 = vmatmul.mubr.msk.bf16.gmra.mrb[72].mxu0 %vm1938_vm0, %v2818_v45  ;;  %7425 = vmatprep.subr.bf16.mxu1 %v3129_v4 }
 0x898   : > { %7413 = vmatprep.mubr.msk.bf16.mxu0 %vm1938_vm0, %v2820_v43 }
 0x89a   : > { %7426 = vmatpush3.bf16.msra.mxu1 %v3129_v4 }
 0x89b   : > { %7427 = vmatprep.subr.bf16.mxu1 %v3131_v9 }
 0x89e   : > { %7428 = vmatpush3.bf16.msra.mxu1 %v3131_v9 }
 0x89f   : > { %7414 = vmatmul.mubr.msk.bf16.gmra.mrb[76].mxu0 %vm1938_vm0, %v2822_v25  ;;  %7429 = vmatprep.subr.bf16.mxu1 %v3133_v23 }
 0x8a2   : > { %7430 = vmatpush3.bf16.msra.mxu1 %v3133_v23  ;;  %v10389_v23 = vld [vmem:[%s12695_s29 + $0x10] sm:$0xff] }
 0x8a3   : > { %7431 = vmatprep.subr.bf16.mxu1 %v3135_v60 }
 0x8a6   : > { %7432 = vmatpush3.bf16.msra.mxu1 %v3135_v60 }
 0x8a7   : > { %7649 = vmatprep.subr.msk.bf16.mxu1 %vm1938_vm0, %v10350_v53 }
 0x90b   : > { %v10354_v10 = vpop.f32.mrb[48].mxu0 }
 0x90c   : > { %12741 = vst [vmem:[#allocation23_spill] sm:$0xff] %v10354_v10  ;;  %v10356_v17 = vpop.f32.mrb[49].mxu0 }
 0x90d   : > { %v10358_v40 = vpop.f32.mrb[50].mxu0 }
 0x90e   : > { %12742 = vst [vmem:[#allocation25_spill] sm:$0xff] %v10358_v40  ;;  %v10360_v46 = vpop.f32.mrb[51].mxu0 }
 0x913   : > { %v10362_v45 = vpop.f32.mrb[52].mxu0 }
 0x914   : > { %12743 = vst [vmem:[#allocation27_spill] sm:$0xff] %v10362_v45  ;;  %v10364_v2 = vpop.f32.mrb[53].mxu0 }
 0x915   : > { %12744 = vst [vmem:[#allocation63_spill] sm:$0xff] %v10364_v2  ;;  %v10366_v49 = vpop.f32.mrb[54].mxu0 }
 0x916   : > { %12745 = vst [vmem:[#allocation64_spill] sm:$0xff] %v10366_v49  ;;  %v10368_v5 = vpop.f32.mrb[55].mxu0  ;;  %v10424_v49 = vld [vmem:[%s12695_s29 + $0x30] sm:$0xff] }
 0x917   : > { %12746 = vst [vmem:[#allocation65_spill] sm:$0xff] %v10368_v5 }
 0x920   : > { %v10370_v54 = vpop.f32.mrb[56].mxu0 }
 0x921   : > { %12747 = vst [vmem:[#allocation66_spill] sm:$0xff] %v10370_v54  ;;  %v10372_v25 = vpop.f32.mrb[57].mxu0 }
 0x922   : > { %12748 = vst [vmem:[#allocation67_spill] sm:$0xff] %v10372_v25  ;;  %v10374_v43 = vpop.f32.mrb[58].mxu0 }
 0x923   : > { %12749 = vst [vmem:[#allocation68_spill] sm:$0xff] %v10374_v43  ;;  %v10376_v28 = vpop.f32.mrb[59].mxu0 }
 0x924   : > { %12750 = vst [vmem:[#allocation69_spill] sm:$0xff] %v10376_v28  ;;  %v10416_v28 = vld [vmem:[%s12695_s29 + $0x18] sm:$0xff] }
 0x952   : > { %v10378_v20 = vpop.f32.mrb[60].mxu0 }
 0x953   : > { %12751 = vst [vmem:[#allocation70_spill] sm:$0xff] %v10378_v20  ;;  %v10380_v36 = vpop.f32.mrb[61].mxu0 }
 0x954   : > { %12752 = vst [vmem:[#allocation71_spill] sm:$0xff] %v10380_v36  ;;  %v10382_v18 = vpop.f32.mrb[62].mxu0  ;;  %v10406_v36 = vld [vmem:[%s12695_s29] sm:$0xff] }
 0x955   : > { %12753 = vst [vmem:[#allocation72_spill] sm:$0xff] %v10382_v18  ;;  %v10384_v4 = vpop.f32.mrb[63].mxu0  ;;  %v10398_v18 = vld [vmem:[%s12695_s29 + $0x8] sm:$0xff] }
 0x956   : > { %12754 = vst [vmem:[#allocation73_spill] sm:$0xff] %v10384_v4 }
 0x95a   : > { %v7403_v9 = vpop.f32.mrb[64].mxu0 }
 0x95b   : > { %v10392_v60 = vadd.f32 %v10389_v23, %v7403_v9  ;;  %v2921_v54 = vpop.f32.mrb[65].mxu0 }
 0x95c   : > { %v7404_v43 = vpop.f32.mrb[66].mxu0  ;;  %v10409_v9 = vadd.f32 %v10406_v36, %v2921_v54 }
 0x95d   : > { %2988 = vmax.xlane.f32.xlu0 %v10392_v60  ;;  %v2924_v20 = vpop.f32.mrb[67].mxu0 }
 0x95e   : > { %v10401_v4 = vadd.f32 %v10398_v18, %v2924_v20  ;;  %v10419_v20 = vadd.f32 %v10416_v28, %v7404_v43  ;;  %v10437_v43 = vld [vmem:[%s12695_s29 + $0x20] sm:$0xff] }
 0x960   : > { %2986 = vmax.xlane.f32.xlu1 %v10401_v4 }
 0x961   : > { %2984 = vmax.xlane.f32.xlu0 %v10409_v9 }
 0x962   : > { %v7407_v25 = vpop.f32.mrb[68].mxu0 }
 0x963   : > { %v10427_v54 = vadd.f32 %v10424_v49, %v7407_v25  ;;  %v2937_v45 = vpop.f32.mrb[69].mxu0 }
 0x964   : > { %v7408_v5 = vpop.f32.mrb[70].mxu0  ;;  %v10440_v40 = vadd.f32 %v10437_v43, %v2937_v45 }
 0x965   : > { %2990 = vmax.xlane.f32.xlu0 %v10419_v20  ;;  %2996 = vmax.xlane.f32.xlu1 %v10427_v54  ;;  %v2940_v2 = vpop.f32.mrb[71].mxu0 }
 0x966   : > { %v10432_v10 = vadd.f32 %v2940_v2, %v9899_v44  ;;  %v10450_v44 = vadd.f32 %v10447_v59, %v7408_v5 }
 0x969   : > { %2994 = vmax.xlane.f32.xlu0 %v10432_v10  ;;  %2992 = vmax.xlane.f32.xlu1 %v10440_v40 }
 0x96a   : > { %v7411_v25 = vpop.f32.mrb[72].mxu0 }
 0x96b   : > { %v10453_v2 = vadd.f32 %v7411_v25, %v9917_v48  ;;  %v2953_v57 = vpop.f32.mrb[73].mxu0 }
 0x96c   : > { %v7412_v62 = vpop.f32.mrb[74].mxu0  ;;  %v10463_v21 = vadd.f32 %v10460_v6, %v2953_v57  ;;  %v10477_v57 = vld [vmem:[%s12695_s29 + $0x48] sm:$0xff] }
 0x96d   : > { %2998 = vmax.xlane.f32.xlu1 %v10450_v44  ;;  %3004 = vmax.xlane.f32.xlu0 %v10453_v2  ;;  %v2956_v45 = vpop.f32.mrb[75].mxu0  ;;  %v10467_v48 = vadd.f32 %v7412_v62, %v9930_v63  ;;  %v10486_v63 = vld [vmem:[%s12695_s29 + $0x70] sm:$0xff]  ;;  %v10495_v62 = vld [vmem:[%s12695_s29 + $0x78] sm:$0xff] }
 0x96e   : > { %v10480_v51 = vadd.f32 %v10477_v57, %v2956_v45 }
 0x971   : > { %3000 = vmax.xlane.f32.xlu1 %v10463_v21 }
 0x972   : > { %v7415_v5 = vpop.f32.mrb[76].mxu0 }
 0x973   : > { %v2969_v25 = vpop.f32.mrb[77].mxu0 }
 0x974   : > { %v10470_v34 = vadd.f32 %v2969_v25, %v9939_v1  ;;  %v7416_v39 = vpop.f32.mrb[78].mxu0  ;;  %v10489_v1 = vadd.f32 %v10486_v63, %v7415_v5 }
 0x975   : > { %3006 = vmax.xlane.f32.xlu1 %v10467_v48  ;;  %v2972_v11 = vpop.f32.mrb[79].mxu0  ;;  %v10498_v45 = vadd.f32 %v10495_v62, %v7416_v39 }
 0x976   : > { %3008 = vmax.xlane.f32.xlu0 %v10470_v34 }
 0x979   : > { %3002 = vmax.xlane.f32.xlu1 %v10480_v51 }
 0x97d   : > { %3012 = vmax.xlane.f32.xlu1 %v10489_v1 }
 0x981   : > { %3014 = vmax.xlane.f32.xlu1 %v10498_v45 }
 0x98c   : > { %3283 = vrot.lane.b32.xlu0 %v9766_v56, %s8850_s28  ;;  %v10518_v56 = vld [vmem:[%s12695_s29 + $0x68] sm:$0xff] }
 0x992   : > { %3281 = vrot.lane.b32.xlu1 %v9752_v27, %s8850_s28  ;;  %v10521_v27 = vadd.f32 %v10518_v56, %v2972_v11 }
 0x996   : > { %3259 = vrot.lane.b32.xlu1 %v9679_v12, %s8850_s28  ;;  %v10551_v12 = vpop.permute.xlu1 %3277 }
 0x99a   : > { %3263 = vrot.lane.b32.xlu1 %v9731_v22, %s8850_s28 }
 0x99e   : > { %3267 = vrot.lane.b32.xlu1 %v9768_v41, %s8850_s28 }
 0x9a2   : > { %3271 = vrot.lane.b32.xlu1 %v9792_v26, %s8850_s28 }
 0x9a6   : > { %3572 = vrot.lane.b32.xlu1 %v9664_v14, %s8850_s28  ;;  %v10543_v14 = vpop.permute.xlu0 %3275 }
 0x9aa   : > { %3580 = vrot.lane.b32.xlu1 %v9717_v52, %s8850_s28 }
 0x9ab   : > { %3010 = vmax.xlane.f32.xlu0 %v10521_v27 }
 0x9c1   : > { %3285 = vrot.lane.b32.xlu0 %v9778_v8, %s8850_s28 }
 0x9c5   : > { %3287 = vrot.lane.b32.xlu0 %v9790_v42, %s8850_s28 }
 0x9c9   : > { %3257 = vrot.lane.b32.xlu0 %v9652_v55, %s8850_s28  ;;  %v10549_v55 = vpop.permute.xlu0 %3279 }
 0x9cd   : > { %3261 = vrot.lane.b32.xlu0 %v9705_v37, %s8850_s28 }
 0x9ce   : > { %2608 = vadd.xlane.f32.xlu1 %v10264_v32 }
 0x9d1   : > { %3265 = vrot.lane.b32.xlu0 %v12728_v38, %s8850_s28 }
 0x9d5   : > { %3269 = vrot.lane.b32.xlu0 %v12729_v3, %s8850_s28 }
 0x9d9   : > { %3570 = vrot.lane.b32.xlu0 %v12730_v35, %s8850_s28 }
 0x9dd   : > { %3574 = vrot.lane.b32.xlu0 %v12731_v61, %s8850_s28 }
 0x9e1   : > { %3576 = vrot.lane.b32.xlu0 %v9691_v19, %s8850_s28 }
 0x9e5   : > { %3578 = vrot.lane.b32.xlu0 %v9721_v58, %s8850_s28 }
 0x9e9   : > { %3582 = vrot.lane.b32.xlu0 %v12732_v50, %s8850_s28 }
 0x9ea   : > { %v2989_v37 = vpop.xlane.xlu0 %2988 }
 0x9eb   : > { %v3018_v19 = vsub.f32 %v10392_v60, %v2989_v37 }
 0x9ed   : > { %v2987_v52 = vpop.xlane.xlu1 %2986  ;;  %3584 = vrot.lane.b32.xlu0 %v9741_v33, %s8850_s28  ;;  %v3036_v3 = vmul.f32 1.442695, %v3018_v19 }
 0x9ee   : > { %v3017_v22 = vsub.f32 %v10401_v4, %v2987_v52  ;;  %v2985_v41 = vpop.xlane.xlu0 %2984 }
 0x9ef   : > { %v3016_v8 = vsub.f32 %v10409_v9, %v2985_v41 }
 0x9f0   : > { %v3034_v58 = vmul.f32 1.442695, %v3017_v22 }
 0x9f1   : > { %v3032_v42 = vmul.f32 1.442695, %v3016_v8 }
 0x9f2   : > { %8108 = vpow2.f32 %v3034_v58  ;;  %v2997_v26 = vpop.xlane.xlu1 %2996  ;;  %v2991_v38 = vpop.xlane.xlu0 %2990 }
 0x9f3   : > { %8110 = vpow2.f32 %v3032_v42  ;;  %v3019_v35 = vsub.f32 %v10419_v20, %v2991_v38  ;;  %v3022_v50 = vsub.f32 %v10427_v54, %v2997_v26 }
 0x9f4   : > { %8112 = vpow2.f32 %v3036_v3  ;;  %v3314_v3 = vsel %vm1938_vm0, %v10350_v53, 0 }
 0x9f5   : > { %v3038_v61 = vmul.f32 1.442695, %v3019_v35  ;;  %v3044_v9 = vmul.f32 1.442695, %v3022_v50 }
 0x9f6   : > { %v2993_v33 = vpop.xlane.xlu1 %2992  ;;  %v2995_v32 = vpop.xlane.xlu0 %2994 }
 0x9f7   : > { %v3020_v11 = vsub.f32 %v10440_v40, %v2993_v33  ;;  %v3021_v39 = vsub.f32 %v10432_v10, %v2995_v32  ;;  %8114 = vpow2.f32 %v3038_v61 }
 0x9f9   : > { %v3040_v4 = vmul.f32 1.442695, %v3020_v11  ;;  %v3042_v60 = vmul.f32 1.442695, %v3021_v39 }
 0x9fa   : > { %v2999_v5 = vpop.xlane.xlu1 %2998  ;;  %v3005_v22 = vpop.xlane.xlu0 %3004 }
 0x9fb   : > { %8116 = vpow2.f32 %v3040_v4  ;;  %v3023_v25 = vsub.f32 %v10450_v44, %v2999_v5  ;;  %v3026_v42 = vsub.f32 %v10453_v2, %v3005_v22  ;;  %v3320_v5 = vsel %vm1938_vm0, %v10551_v12, 0 }
 0x9fc   : > { %v10565_v37 = vpop.eup %8108  ;;  %8118 = vpow2.f32 %v3042_v60 }
 0x9fd   : > { %v10567_v20 = vpop.eup %8110  ;;  %v3046_v54 = vmul.f32 1.442695, %v3023_v25  ;;  %8120 = vpow2.f32 %v3044_v9  ;;  %v3052_v33 = vmul.f32 1.442695, %v3026_v42 }
 0x9fe   : > { %v3001_v52 = vpop.xlane.xlu1 %3000  ;;  %v3112_v40 = vpack.c.bf16 %v10565_v37, %v10567_v20  ;;  %v10571_v10 = vpop.eup %8112 }
 0x9ff   : > { %8122 = vpow2.f32 %v3046_v54  ;;  %v3024_v41 = vsub.f32 %v10463_v21, %v3001_v52  ;;  %v3323_v52 = vsel %vm1938_vm0, %v10549_v55, 0 }
 0xa00   : > { %7433 = vmatprep.mubr.bf16.mxu1 %v3112_v40 }
 0xa01   : > { %v10574_v19 = vpop.eup %8114  ;;  %v3048_v38 = vmul.f32 1.442695, %v3024_v41 }
 0xa02   : > { %v3007_v44 = vpop.xlane.xlu1 %3006  ;;  %v3113_v58 = vpack.c.bf16 %v10574_v19, %v10571_v10 }
 0xa03   : > { %v3027_v8 = vsub.f32 %v10467_v48, %v3007_v44  ;;  %8124 = vpow2.f32 %v3048_v38 }
 0xa04   : > { %7434 = vmatmul.mubr.bf16.vlgmr.msra.gmra.mrb[48].mxu1 %v3113_v58 }
 0xa05   : > { %v10580_v26 = vpop.eup %8116  ;;  %v3054_v21 = vmul.f32 1.442695, %v3027_v8  ;;  %7450 = vmatpush3.bf16.xpose.msra.mxu1 %v3314_v3 }
 0xa06   : > { %v10584_v35 = vpop.eup %8118  ;;  %v3003_v61 = vpop.xlane.xlu1 %3002  ;;  %7650 = vmatprep.subr.msk.bf16.mxu1 %vm1938_vm0, %v10543_v14 }
 0xa07   : > { %v3025_v48 = vsub.f32 %v10480_v51, %v3003_v61  ;;  %v3114_v2 = vpack.c.bf16 %v10584_v35, %v10580_v26  ;;  %v10591_v50 = vpop.eup %8120  ;;  %8126 = vpow2.f32 %v3054_v21  ;;  %v3317_v51 = vsel %vm1938_vm0, %v10543_v14, 0 }
 0xa09   : > { %v10593_v32 = vpop.eup %8122  ;;  %v3050_v53 = vmul.f32 1.442695, %v3025_v48  ;;  %7437 = vmatprep.mubr.bf16.mxu1 %v3114_v2 }
 0xa0a   : > { %v3115_v11 = vpack.c.bf16 %v10593_v32, %v10591_v50  ;;  %v3013_v39 = vpop.xlane.xlu1 %3012 }
 0xa0b   : > { %8128 = vpow2.f32 %v3050_v53 }
 0xa0c   : > { %8130 = vpow2.f32 %v3052_v33  ;;  %2606 = vadd.xlane.f32.xlu0 %v10266_v31  ;;  %7438 = vmatmul.mubr.bf16.gmra.mrb[52].mxu1 %v3115_v11 }
 0xa0d   : > { %7452 = vmatpush3.bf16.xpose.msra.mxu1 %v3317_v51  ;;  %v10602_v4 = vpop.eup %8124 }
 0xa0e   : > { %7651 = vmatprep.subr.msk.bf16.mxu1 %vm1938_vm0, %v10551_v12  ;;  %v3015_v54 = vpop.xlane.xlu1 %3014  ;;  %v3009_v12 = vpop.xlane.xlu0 %3008 }
 0xa0f   : > { %v3028_v8 = vsub.f32 %v10470_v34, %v3009_v12  ;;  %v3031_v58 = vsub.f32 %v10498_v45, %v3015_v54 }
 0xa11   : > { %v10604_v60 = vpop.eup %8126  ;;  %v3056_v42 = vmul.f32 1.442695, %v3028_v8  ;;  %v3062_v38 = vmul.f32 1.442695, %v3031_v58 }
 0xa12   : > { %v3282_v40 = vpop.permute.xlu1 %3281  ;;  %v3284_v41 = vpop.permute.xlu0 %3283 }
 0xa13   : > { %v3326_v22 = vsel %vm1938_vm0, %v3282_v40, 0  ;;  %v3329_v44 = vsel %vm1938_vm0, %v3284_v41, 0  ;;  %8132 = vpow2.f32 %v3056_v42 }
 0xa14   : > { %8134 = vpow2.f32 %v3062_v38 }
 0xa15   : > { %v10606_v9 = vpop.eup %8128  ;;  %7454 = vmatpush3.bf16.xpose.msra.mxu1 %v3320_v5 }
 0xa16   : > { %v10610_v25 = vpop.eup %8130  ;;  %v3116_v31 = vpack.c.bf16 %v10606_v9, %v10602_v4  ;;  %7652 = vmatprep.subr.msk.bf16.mxu1 %vm1938_vm0, %v10549_v55  ;;  %v3030_v55 = vsub.f32 %v10489_v1, %v3013_v39  ;;  %v3260_v34 = vpop.permute.xlu1 %3259 }
 0xa17   : > { %v3117_v14 = vpack.c.bf16 %v10604_v60, %v10610_v25 }
 0xa18   : > { %7441 = vmatprep.mubr.bf16.mxu1 %v3116_v31  ;;  %v3060_v61 = vmul.f32 1.442695, %v3030_v55 }
 0xa19   : > { %7442 = vmatmul.mubr.bf16.gmra.mrb[56].mxu1 %v3117_v14 }
 0xa1a   : > { %v3264_v1 = vpop.permute.xlu1 %3263 }
 0xa1d   : > { %7456 = vmatpush3.bf16.xpose.msra.mxu1 %v3323_v52  ;;  %v10631_v11 = vpop.eup %8132 }
 0xa1e   : > { %7653 = vmatprep.subr.msk.bf16.mxu1 %vm1938_vm0, %v3282_v40  ;;  %v10634_v51 = vpop.eup %8134  ;;  %v3268_v52 = vpop.permute.xlu1 %3267 }
 0xa22   : > { %v3272_v12 = vpop.permute.xlu1 %3271 }
 0xa25   : > { %7458 = vmatpush3.bf16.xpose.msra.mxu1 %v3326_v22 }
 0xa26   : > { %7654 = vmatprep.subr.msk.bf16.mxu1 %vm1938_vm0, %v3284_v41 }
 0xa2d   : > { %7460 = vmatpush3.bf16.xpose.msra.mxu1 %v3329_v44  ;;  %v3573_v44 = vpop.permute.xlu1 %3572 }
 0xa31   : > { %v3581_v42 = vpop.permute.xlu1 %3580 }
 0xa38   : > { %v3011_v3 = vpop.xlane.xlu0 %3010 }
 0xa39   : > { %v3029_v21 = vsub.f32 %v10521_v27, %v3011_v3  ;;  %v12755_v3 = vmov 0  }
 0xa3b   : > { %v3058_v48 = vmul.f32 1.442695, %v3029_v21 }
 0xa3c   : > { %v3286_v2 = vpop.permute.xlu0 %3285 }
 0xa3d   : > { %8136 = vpow2.f32 %v3058_v48  ;;  %7655 = vmatprep.subr.msk.bf16.mxu1 %vm1938_vm0, %v3286_v2  ;;  %v3332_v33 = vsel %vm1938_vm0, %v3286_v2, 0 }
 0xa3e   : > { %8138 = vpow2.f32 %v3060_v61  ;;  %7462 = vmatpush3.bf16.xpose.msra.mxu1 %v3332_v33 }
 0xa40   : > { %v3288_v45 = vpop.permute.xlu0 %3287 }
 0xa41   : > { %7656 = vmatprep.subr.msk.bf16.mxu1 %vm1938_vm0, %v3288_v45  ;;  %v3335_v27 = vsel %vm1938_vm0, %v3288_v45, 0 }
 0xa44   : > { %v3258_v53 = vpop.permute.xlu0 %3257 }
 0xa46   : > { %7464 = vmatpush3.bf16.xpose.msra.mxu1 %v3335_v27 }
 0xa47   : > { %v10636_v39 = vpop.eup %8136 }
 0xa48   : > { %v10638_v5 = vpop.eup %8138  ;;  %v3262_v31 = vpop.permute.xlu0 %3261  ;;  %v3118_v14 = vpack.c.bf16 %v10636_v39, %v10631_v11 }
 0xa49   : > { %v3119_v54 = vpack.c.bf16 %v10634_v51, %v10638_v5 }
 0xa4a   : > { %7445 = vmatprep.mubr.bf16.mxu1 %v3118_v14 }
 0xa4b   : > { %7446 = vmatmul.mubr.bf16.gmra.mrb[60].mxu1 %v3119_v54 }
 0xa4c   : > { %7465 = vmatprep.mubr.msk.bf16.mxu1 %vm1938_vm0, %v3258_v53  ;;  %v3266_v40 = vpop.permute.xlu0 %3265 }
 0xa50   : > { %v3270_v22 = vpop.permute.xlu0 %3269 }
 0xa53   : > { %7466 = vmatmul.mubr.msk.bf16.vlgmr.msra.gmra.mrb[64].mxu1 %vm1938_vm0, %v3260_v34 }
 0xa54   : > { %7469 = vmatprep.mubr.msk.bf16.mxu1 %vm1938_vm0, %v3262_v31  ;;  %v3571_v41 = vpop.permute.xlu0 %3570 }
 0xa55   : > { %7481 = vmatprep.subr.bf16.mxu0 %v3571_v41 }
 0xa56   : > { %7482 = vmatpush3.bf16.msra.mxu0 %v3571_v41 }
 0xa57   : > { %7483 = vmatprep.subr.bf16.mxu0 %v3573_v44 }
 0xa58   : > { %v3575_v8 = vpop.permute.xlu0 %3574 }
 0xa5a   : > { %7484 = vmatpush3.bf16.msra.mxu0 %v3573_v44 }
 0xa5b   : > { %7470 = vmatmul.mubr.msk.bf16.gmra.mrb[68].mxu1 %vm1938_vm0, %v3264_v1  ;;  %7485 = vmatprep.subr.bf16.mxu0 %v3575_v8  ;;  %v2609_v61 = vpop.xlane.xlu1 %2608 }
 0xa5c   : > { %7473 = vmatprep.mubr.msk.bf16.mxu1 %vm1938_vm0, %v3266_v40  ;;  %v3577_v58 = vpop.permute.xlu0 %3576  ;;  %8140 = vrcp.f32 %v2609_v61 }
 0xa5e   : > { %7486 = vmatpush3.bf16.msra.mxu0 %v3575_v8 }
 0xa5f   : > { %7487 = vmatprep.subr.bf16.mxu0 %v3577_v58 }
 0xa60   : > { %v3579_v55 = vpop.permute.xlu0 %3578 }
 0xa62   : > { %7488 = vmatpush3.bf16.msra.mxu0 %v3577_v58 }
 0xa63   : > { %7474 = vmatmul.mubr.msk.bf16.gmra.mrb[72].mxu1 %vm1938_vm0, %v3268_v52  ;;  %7489 = vmatprep.subr.bf16.mxu0 %v3579_v55 }
 0xa64   : > { %7477 = vmatprep.mubr.msk.bf16.mxu1 %vm1938_vm0, %v3270_v22  ;;  %v3583_v38 = vpop.permute.xlu0 %3582 }
 0xa66   : > { %7490 = vmatpush3.bf16.msra.mxu0 %v3579_v55  ;;  %v8141_v2 = vpop.eup %8140 }
 0xa67   : > { %7491 = vmatprep.subr.bf16.mxu0 %v3581_v42  ;;  %v10657_v45 = vmul.f32 %v8141_v2, %v10360_v46 }
 0xa68   : > { %v3585_v21 = vpop.permute.xlu0 %3584 }
 0xa6a   : > { %7492 = vmatpush3.bf16.msra.mxu0 %v3581_v42 }
 0xa6b   : > { %7478 = vmatmul.mubr.msk.bf16.gmra.mrb[76].mxu1 %vm1938_vm0, %v3272_v12  ;;  %7493 = vmatprep.subr.bf16.mxu0 %v3583_v38 }
 0xa6c   : > { %4617 = vmatprep.mubr.bf16.mxu1 %v12755_v3 }
 0xa6e   : > { %7494 = vmatpush3.bf16.msra.mxu0 %v3583_v38 }
 0xa6f   : > { %7495 = vmatprep.subr.bf16.mxu0 %v3585_v21 }
 0xa72   : > { %7496 = vmatpush3.bf16.msra.mxu0 %v3585_v21 }
 0xa99   : > { %v2607_v48 = vpop.xlane.xlu0 %2606 }
 0xa9a   : > { %8142 = vrcp.f32 %v2607_v48 }
 0xaa4   : > { %v8143_v33 = vpop.eup %8142 }
 0xaa5   : > { %v10654_v34 = vmul.f32 %v8143_v33, %v10356_v17 }
 0xad7   : > { %v10661_v53 = vpop.f32.mrb[48].mxu1 }
 0xad8   : > { %v10663_v27 = vpop.f32.mrb[49].mxu1 }
 0xad9   : > { %v10665_v31 = vpop.f32.mrb[50].mxu1 }
 0xada   : > { %v10667_v14 = vpop.f32.mrb[51].mxu1 }
 0xadf   : > { %v10669_v54 = vpop.f32.mrb[52].mxu1 }
 0xae0   : > { %v10671_v52 = vpop.f32.mrb[53].mxu1 }
 0xae1   : > { %v10673_v17 = vpop.f32.mrb[54].mxu1 }
 0xae2   : > { %v10675_v40 = vpop.f32.mrb[55].mxu1 }
 0xaec   : > { %v10677_v46 = vpop.f32.mrb[56].mxu1 }
 0xaed   : > { %v10679_v12 = vpop.f32.mrb[57].mxu1 }
 0xaee   : > { %v10681_v22 = vpop.f32.mrb[58].mxu1 }
 0xaef   : > { %v10683_v41 = vpop.f32.mrb[59].mxu1 }
 0xb1e   : > { %v10685_v44 = vpop.f32.mrb[60].mxu1 }
 0xb1f   : > { %v10687_v8 = vpop.f32.mrb[61].mxu1 }
 0xb20   : > { %v10689_v58 = vpop.f32.mrb[62].mxu1 }
 0xb21   : > { %12756 = vst [vmem:[#allocation74_spill] sm:$0xff] %v10689_v58  ;;  %v10691_v55 = vpop.f32.mrb[63].mxu1 }
 0xb26   : > { %v7467_v42 = vpop.f32.mrb[64].mxu1 }
 0xb27   : > { %v10694_v38 = vadd.f32 %v10389_v23, %v7467_v42  ;;  %v3371_v21 = vpop.f32.mrb[65].mxu1 }
 0xb28   : > { %v10697_v61 = vadd.f32 %v10406_v36, %v3371_v21  ;;  %v7468_v48 = vpop.f32.mrb[66].mxu1 }
 0xb29   : > { %3438 = vmax.xlane.f32.xlu1 %v10694_v38  ;;  %v3374_v2 = vpop.f32.mrb[67].mxu1  ;;  %v10708_v42 = vadd.f32 %v10416_v28, %v7468_v48 }
 0xb2a   : > { %3434 = vmax.xlane.f32.xlu0 %v10697_v61 }
 0xb2d   : > { %2612 = vadd.xlane.f32.xlu1 %v10273_v13 }
 0xb2e   : > { %2610 = vadd.xlane.f32.xlu0 %v10270_v15  ;;  %v7471_v33 = vpop.f32.mrb[68].mxu1 }
 0xb2f   : > { %v3387_v1 = vpop.f32.mrb[69].mxu1  ;;  %v10721_v28 = vadd.f32 %v10424_v49, %v7471_v33 }
 0xb30   : > { %v7472_v3 = vpop.f32.mrb[70].mxu1  ;;  %v10711_v13 = vadd.f32 %v10437_v43, %v3387_v1 }
 0xb31   : > { %3066 = vadd.xlane.f32.xlu1 %v10565_v37  ;;  %v3390_v23 = vpop.f32.mrb[71].mxu1  ;;  %v10716_v37 = vadd.f32 %v10398_v18, %v3374_v2  ;;  %v8472_v18 = vld [vmem:[%s12695_s29 + $0x50] sm:$0xff] }
 0xb32   : > { %3064 = vadd.xlane.f32.xlu0 %v10567_v20 }
 0xb35   : > { %3070 = vadd.xlane.f32.xlu1 %v10574_v19 }
 0xb36   : > { %3068 = vadd.xlane.f32.xlu0 %v10571_v10  ;;  %v7475_v36 = vpop.f32.mrb[72].mxu1 }
 0xb37   : > { %v3403_v21 = vpop.f32.mrb[73].mxu1  ;;  %v10728_v1 = vadd.f32 %v8472_v18, %v7475_v36 }
 0xb38   : > { %v7476_v15 = vpop.f32.mrb[74].mxu1  ;;  %v10736_v49 = vadd.f32 %v10460_v6, %v3403_v21  ;;  %v12771_v21 = vld [vmem:[#allocation40_spill] sm:$0xff] }
 0xb39   : > { %3440 = vmax.xlane.f32.xlu1 %v10708_v42  ;;  %v3406_v58 = vpop.f32.mrb[75].mxu1 }
 0xb3a   : > { %3442 = vmax.xlane.f32.xlu0 %v10711_v13 }
 0xb3d   : > { %3436 = vmax.xlane.f32.xlu1 %v10716_v37 }
 0xb3e   : > { %2614 = vadd.xlane.f32.xlu0 %v10279_v16  ;;  %v7479_v20 = vpop.f32.mrb[76].mxu1  ;;  %v10733_v16 = vadd.f32 %v10447_v59, %v7472_v3  ;;  %v10760_v59 = vadd.f32 %v10477_v57, %v3406_v58  ;;  %v8475_v3 = vld [vmem:[%s12695_s29 + $0x60] sm:$0xff] }
 0xb3f   : > { %v3419_v10 = vpop.f32.mrb[77].mxu1  ;;  %v10755_v6 = vadd.f32 %v10486_v63, %v7479_v20 }
 0xb40   : > { %v7480_v43 = vpop.f32.mrb[78].mxu1  ;;  %v10765_v33 = vadd.f32 %v8475_v3, %v3419_v10 }
 0xb41   : > { %3446 = vmax.xlane.f32.xlu1 %v10721_v28  ;;  %v3422_v19 = vpop.f32.mrb[79].mxu1  ;;  %v10776_v57 = vadd.f32 %v10495_v62, %v7480_v43  ;;  %v12761_v62 = vld [vmem:[#allocation24_spill] sm:$0xff]  ;;  %v12772_v43 = vld [vmem:[#allocation41_spill] sm:$0xff] }
 0xb42   : > { %2618 = vadd.xlane.f32.xlu0 %v10290_v29  ;;  %v8473_v29 = vld [vmem:[%s12695_s29 + $0x28] sm:$0xff]  ;;  %v10781_v63 = vadd.f32 %v10518_v56, %v3422_v19  ;;  %v12762_v56 = vld [vmem:[#allocation32_spill] sm:$0xff] }
 0xb43   : > { %v10743_v48 = vadd.f32 %v8473_v29, %v3390_v23 }
 0xb45   : > { %2616 = vadd.xlane.f32.xlu1 %v10283_v7  ;;  %v8474_v7 = vld [vmem:[%s12695_s29 + $0x58] sm:$0xff] }
 0xb46   : > { %3454 = vmax.xlane.f32.xlu0 %v10728_v1  ;;  %v10748_v2 = vadd.f32 %v8474_v7, %v7476_v15  ;;  %v12773_v7 = vld [vmem:[#allocation25_spill] sm:$0xff] }
 0xb49   : > { %3448 = vmax.xlane.f32.xlu1 %v10733_v16 }
 0xb4a   : > { %3450 = vmax.xlane.f32.xlu0 %v10736_v49 }
 0xb4d   : > { %3444 = vmax.xlane.f32.xlu1 %v10743_v48 }
 0xb4e   : > { %3456 = vmax.xlane.f32.xlu0 %v10748_v2 }
 0xb51   : > { %2620 = vadd.xlane.f32.xlu1 %v10292_v24  ;;  %v12757_v24 = vld [vmem:[#allocation29_spill] sm:$0xff] }
 0xb52   : > { %3072 = vadd.xlane.f32.xlu0 %v10580_v26  ;;  %v12763_v26 = vld [vmem:[#allocation34_spill] sm:$0xff] }
 0xb55   : > { %3074 = vadd.xlane.f32.xlu1 %v10584_v35  ;;  %v12764_v35 = vld [vmem:[#allocation33_spill] sm:$0xff] }
 0xb56   : > { %3462 = vmax.xlane.f32.xlu0 %v10755_v6 }
 0xb59   : > { %3452 = vmax.xlane.f32.xlu1 %v10760_v59 }
 0xb5a   : > { %3458 = vmax.xlane.f32.xlu0 %v10765_v33 }
 0xb5d   : > { %3078 = vadd.xlane.f32.xlu1 %v10593_v32  ;;  %v12766_v32 = vld [vmem:[#allocation31_spill] sm:$0xff] }
 0xb5e   : > { %3076 = vadd.xlane.f32.xlu0 %v10591_v50  ;;  %v12765_v50 = vld [vmem:[#allocation35_spill] sm:$0xff] }
 0xb61   : > { %2624 = vadd.xlane.f32.xlu1 %v10304_v0  ;;  %v12760_v0 = vld [vmem:[#allocation26_spill] sm:$0xff] }
 0xb62   : > { %2622 = vadd.xlane.f32.xlu0 %v10300_v30  ;;  %v12758_v30 = vld [vmem:[#allocation30_spill] sm:$0xff] }
 0xb65   : > { %2628 = vadd.xlane.f32.xlu1 %v10302_v47  ;;  %v12759_v47 = vld [vmem:[#allocation28_spill] sm:$0xff] }
 0xb66   : > { %2626 = vadd.xlane.f32.xlu0 %v12757_v24 }
 0xb69   : > { %3464 = vmax.xlane.f32.xlu1 %v10776_v57 }
 0xb6a   : > { %3080 = vadd.xlane.f32.xlu0 %v10602_v4  ;;  %v12767_v4 = vld [vmem:[#allocation39_spill] sm:$0xff] }
 0xb6d   : > { %3460 = vmax.xlane.f32.xlu1 %v10781_v63 }
 0xb6e   : > { %3084 = vadd.xlane.f32.xlu0 %v10610_v25  ;;  %v12770_v25 = vpack.i.bf16 %v10657_v45, %v10654_v34 }
 0xb71   : > { %3082 = vadd.xlane.f32.xlu1 %v10606_v9  ;;  %v12769_v9 = vld [vmem:[#allocation36_spill] sm:$0xff] }
 0xb72   : > { %2630 = vadd.xlane.f32.xlu0 %v12758_v30 }
 0xb75   : > { %3086 = vadd.xlane.f32.xlu1 %v10604_v60  ;;  %v12768_v60 = vld [vmem:[#allocation38_spill] sm:$0xff] }
 0xb76   : > { %2634 = vadd.xlane.f32.xlu0 %v12759_v47  ;;  %v12774_v47 = vld [vmem:[#allocation23_spill] sm:$0xff] }
 0xb79   : > { %2632 = vadd.xlane.f32.xlu1 %v12760_v0 }
 0xb7a   : > { %3088 = vadd.xlane.f32.xlu0 %v10631_v11 }
 0xb7d   : > { %2636 = vadd.xlane.f32.xlu1 %v12761_v62 }
 0xb7e   : > { %3092 = vadd.xlane.f32.xlu0 %v10638_v5 }
 0xb81   : > { %3090 = vadd.xlane.f32.xlu1 %v10636_v39 }
 0xb82   : > { %2164 = vadd.xlane.f32.xlu0 %v12762_v56 }
 0xb85   : > { %3094 = vadd.xlane.f32.xlu1 %v10634_v51 }
 0xb86   : > { %2168 = vadd.xlane.f32.xlu0 %v12763_v26 }
 0xb89   : > { %2166 = vadd.xlane.f32.xlu1 %v12764_v35 }
 0xb8a   : > { %2172 = vadd.xlane.f32.xlu0 %v12765_v50 }
 0xb8d   : > { %2170 = vadd.xlane.f32.xlu1 %v12766_v32 }
 0xb8e   : > { %2176 = vadd.xlane.f32.xlu0 %v12767_v4 }
 0xb91   : > { %2174 = vadd.xlane.f32.xlu1 %v12768_v60 }
 0xb95   : > { %2178 = vadd.xlane.f32.xlu1 %v12769_v9 }
 0xba4   : > { %7773 = vrot.lane.b32.xlu0 %v12770_v25, %s8850_s28 }
 0xbb6   : > { %v3439_v11 = vpop.xlane.xlu1 %3438 }
 0xbb7   : > { %v3435_v51 = vpop.xlane.xlu0 %3434  ;;  %v3468_v29 = vsub.f32 %v10694_v38, %v3439_v11 }
 0xbb8   : > { %v3466_v20 = vsub.f32 %v10697_v61, %v3435_v51 }
 0xbb9   : > { %v3486_v38 = vmul.f32 1.442695, %v3468_v29 }
 0xbba   : > { %v2613_v39 = vpop.xlane.xlu1 %2612  ;;  %v3482_v30 = vmul.f32 1.442695, %v3466_v20 }
 0xbbb   : > { %v2611_v5 = vpop.xlane.xlu0 %2610  ;;  %8144 = vrcp.f32 %v2613_v39 }
 0xbbc   : > { %8146 = vrcp.f32 %v2611_v5 }
 0xbbe   : > { %v3067_v58 = vpop.xlane.xlu1 %3066 }
 0xbbf   : > { %8148 = vrcp.f32 %v3067_v58  ;;  %v3065_v23 = vpop.xlane.xlu0 %3064 }
 0xbc0   : > { %8150 = vrcp.f32 %v3065_v23 }
 0xbc2   : > { %v3071_v36 = vpop.xlane.xlu1 %3070 }
 0xbc3   : > { %8152 = vrcp.f32 %v3071_v36  ;;  %2180 = vadd.xlane.f32.xlu0 %v12771_v21  ;;  %v3069_v15 = vpop.xlane.xlu0 %3068 }
 0xbc4   : > { %8154 = vrcp.f32 %v3069_v15 }
 0xbc5   : > { %v8145_v45 = vpop.eup %8144  ;;  %8156 = vpow2.f32 %v3482_v30 }
 0xbc6   : > { %v3441_v34 = vpop.xlane.xlu1 %3440  ;;  %v8147_v18 = vpop.eup %8146  ;;  %v2794_v3 = vmul.f32 %v8145_v45, %v12773_v7 }
 0xbc7   : > { %v3469_v10 = vsub.f32 %v10708_v42, %v3441_v34  ;;  %2184 = vadd.xlane.f32.xlu0 %v12772_v43  ;;  %v3443_v19 = vpop.xlane.xlu0 %3442  ;;  %v2793_v0 = vmul.f32 %v8147_v18, %v12774_v47  ;;  %v12775_v42 = vld [vmem:[#allocation42_spill] sm:$0xff] }
 0xbc8   : > { %v3470_v23 = vsub.f32 %v10711_v13, %v3443_v19 }
 0xbc9   : > { %v8149_v24 = vpop.eup %8148  ;;  %v3488_v56 = vmul.f32 1.442695, %v3469_v10  ;;  %v7777_v50 = vpack.i.bf16 %v2794_v3, %v2793_v0  ;;  %v12776_v0 = vld [vmem:[#allocation63_spill] sm:$0xff] }
 0xbca   : > { %v8151_v62 = vpop.eup %8150  ;;  %v3437_v26 = vpop.xlane.xlu1 %3436  ;;  %v3242_v61 = vmul.f32 %v8149_v24, %v10667_v14 }
 0xbcb   : > { %v3467_v35 = vsub.f32 %v10716_v37, %v3437_v26  ;;  %2186 = vadd.xlane.f32.xlu0 %v12775_v42  ;;  %v2615_v32 = vpop.xlane.xlu0 %2614  ;;  %v3241_v4 = vmul.f32 %v8151_v62, %v10663_v27  ;;  %7778 = vrot.lane.b32.xlu1 %v7777_v50, %s8850_s28  ;;  %8158 = vpow2.f32 %v3488_v56  ;;  %v12777_v56 = vld [vmem:[#allocation65_spill] sm:$0xff] }
 0xbcd   : > { %v8153_v60 = vpop.eup %8152  ;;  %v3484_v9 = vmul.f32 1.442695, %v3467_v35  ;;  %v7782_v25 = vpack.i.bf16 %v3242_v61, %v3241_v4 }
 0xbce   : > { %v8155_v11 = vpop.eup %8154  ;;  %v3447_v51 = vpop.xlane.xlu1 %3446  ;;  %v3244_v14 = vmul.f32 %v8153_v60, %v10665_v31 }
 0xbcf   : > { %8160 = vpow2.f32 %v3484_v9  ;;  %v2619_v37 = vpop.xlane.xlu0 %2618  ;;  %v3243_v39 = vmul.f32 %v8155_v11, %v10661_v53  ;;  %7783 = vrot.lane.b32.xlu1 %v7782_v25, %s8849_s25  ;;  %v10824_v21 = vpop.eup %8156  ;;  %v3490_v53 = vmul.f32 1.442695, %v3470_v23  ;;  %v3472_v34 = vsub.f32 %v10721_v28, %v3447_v51 }
 0xbd0   : > { %8162 = vpow2.f32 %v3486_v38 }
 0xbd1   : > { %v7787_v27 = vpack.i.bf16 %v3244_v14, %v3243_v39  ;;  %8164 = vrcp.f32 %v2615_v32  ;;  %v3494_v3 = vmul.f32 1.442695, %v3472_v34 }
 0xbd2   : > { %v2617_v5 = vpop.xlane.xlu1 %2616 }
 0xbd3   : > { %v3455_v58 = vpop.xlane.xlu0 %3454  ;;  %8166 = vrcp.f32 %v2617_v5  ;;  %7788 = vrot.lane.b32.xlu1 %v7787_v27, %s8849_s25 }
 0xbd4   : > { %8168 = vpow2.f32 %v3490_v53  ;;  %v3476_v32 = vsub.f32 %v10728_v1, %v3455_v58 }
 0xbd5   : > { %v10827_v20 = vpop.eup %8158  ;;  %8170 = vrcp.f32 %v2619_v37 }
 0xbd6   : > { %v3449_v36 = vpop.xlane.xlu1 %3448 }
 0xbd7   : > { %v3473_v31 = vsub.f32 %v10733_v16, %v3449_v36  ;;  %v3451_v15 = vpop.xlane.xlu0 %3450  ;;  %v12778_v36 = vld [vmem:[#allocation27_spill] sm:$0xff] }
 0xbd8   : > { %v3474_v26 = vsub.f32 %v10736_v49, %v3451_v15  ;;  %v12779_v15 = vld [vmem:[#allocation64_spill] sm:$0xff] }
 0xbd9   : > { %v10830_v45 = vpop.eup %8160  ;;  %v3496_v43 = vmul.f32 1.442695, %v3473_v31 }
 0xbda   : > { %v10832_v10 = vpop.eup %8162  ;;  %v3445_v13 = vpop.xlane.xlu1 %3444  ;;  %v3562_v19 = vpack.c.bf16 %v10830_v45, %v10824_v21  ;;  %v3498_v4 = vmul.f32 1.442695, %v3474_v26 }
 0xbdb   : > { %v3471_v18 = vsub.f32 %v10743_v48, %v3445_v13  ;;  %v3457_v29 = vpop.xlane.xlu0 %3456  ;;  %v3563_v16 = vpack.c.bf16 %v10827_v20, %v10832_v10  ;;  %v8165_v7 = vpop.eup %8164  ;;  %8172 = vpow2.f32 %v3496_v43 }
 0xbdc   : > { %7497 = vmatprep.mubr.bf16.mxu0 %v3562_v19  ;;  %v2795_v62 = vmul.f32 %v8165_v7, %v12776_v0  ;;  %v3477_v35 = vsub.f32 %v10748_v2, %v3457_v29  ;;  %v3502_v2 = vmul.f32 1.442695, %v3476_v32  ;;  %v12780_v32 = vld [vmem:[#allocation37_spill] sm:$0xff] }
 0xbdd   : > { %v3492_v28 = vmul.f32 1.442695, %v3471_v18  ;;  %7498 = vmatmul.mubr.bf16.vlgmr.msra.gmra.mrb[80].mxu0 %v3563_v16  ;;  %v8167_v24 = vpop.eup %8166 }
 0xbde   : > { %v2621_v30 = vpop.xlane.xlu1 %2620  ;;  %v2796_v48 = vmul.f32 %v8167_v24, %v12777_v56  ;;  %v10845_v38 = vpop.eup %8168  ;;  %v3504_v60 = vmul.f32 1.442695, %v3477_v35 }
 0xbdf   : > { %8174 = vpow2.f32 %v3492_v28  ;;  %v3073_v47 = vpop.xlane.xlu0 %3072  ;;  %v8171_v25 = vpop.eup %8170 }
 0xbe0   : > { %8176 = vpow2.f32 %v3494_v3  ;;  %v7792_v61 = vpack.i.bf16 %v2796_v48, %v2795_v62  ;;  %v10859_v31 = vmul.f32 %v8171_v25, %v12778_v36  ;;  %v12781_v25 = vld [vmem:[#allocation69_spill] sm:$0xff] }
 0xbe1   : > { %8178 = vrcp.f32 %v2621_v30 }
 0xbe2   : > { %8180 = vrcp.f32 %v3073_v47  ;;  %v3075_v42 = vpop.xlane.xlu1 %3074  ;;  %7793 = vrot.lane.b32.xlu0 %v7792_v61, %s8850_s28 }
 0xbe3   : > { %8182 = vrcp.f32 %v3075_v42  ;;  %v3463_v50 = vpop.xlane.xlu0 %3462 }
 0xbe4   : > { %8184 = vpow2.f32 %v3498_v4  ;;  %v3480_v7 = vsub.f32 %v10755_v6, %v3463_v50 }
 0xbe5   : > { %v10848_v51 = vpop.eup %8172  ;;  %8186 = vpow2.f32 %v3504_v60 }
 0xbe6   : > { %v3453_v9 = vpop.xlane.xlu1 %3452  ;;  %v3510_v0 = vmul.f32 1.442695, %v3480_v7 }
 0xbe7   : > { %v3475_v49 = vsub.f32 %v10760_v59, %v3453_v9  ;;  %v3459_v11 = vpop.xlane.xlu0 %3458 }
 0xbe8   : > { %v3478_v24 = vsub.f32 %v10765_v33, %v3459_v11 }
 0xbe9   : > { %v10850_v14 = vpop.eup %8174  ;;  %v3500_v37 = vmul.f32 1.442695, %v3475_v49 }
 0xbea   : > { %v10852_v39 = vpop.eup %8176  ;;  %v3079_v1 = vpop.xlane.xlu1 %3078  ;;  %v3564_v27 = vpack.c.bf16 %v10850_v14, %v10845_v38  ;;  %v3506_v48 = vmul.f32 1.442695, %v3478_v24 }
 0xbeb   : > { %v8179_v5 = vpop.eup %8178  ;;  %8188 = vpow2.f32 %v3500_v37  ;;  %v3077_v58 = vpop.xlane.xlu0 %3076  ;;  %v3565_v59 = vpack.c.bf16 %v10848_v51, %v10852_v39  ;;  %v12782_v37 = vld [vmem:[#allocation67_spill] sm:$0xff] }
 0xbec   : > { %v8181_v23 = vpop.eup %8180  ;;  %8190 = vpow2.f32 %v3502_v2  ;;  %7501 = vmatprep.mubr.bf16.mxu0 %v3564_v27  ;;  %v10862_v53 = vmul.f32 %v8179_v5, %v12779_v15  ;;  %v12784_v15 = vld [vmem:[#allocation66_spill] sm:$0xff] }
 0xbed   : > { %v8183_v34 = vpop.eup %8182  ;;  %8192 = vrcp.f32 %v3079_v1  ;;  %7502 = vmatmul.mubr.bf16.gmra.mrb[84].mxu0 %v3565_v59  ;;  %v10867_v19 = vmul.f32 %v8181_v23, %v10671_v52  ;;  %v12783_v23 = vld [vmem:[#allocation68_spill] sm:$0xff] }
 0xbee   : > { %8194 = vrcp.f32 %v3077_v58  ;;  %v2625_v43 = vpop.xlane.xlu1 %2624  ;;  %v7797_v13 = vpack.i.bf16 %v10862_v53, %v10859_v31  ;;  %v10870_v18 = vmul.f32 %v8183_v34, %v10675_v40  ;;  %v10875_v28 = vpop.eup %8184  ;;  %v12786_v31 = vld [vmem:[#allocation71_spill] sm:$0xff] }
 0xbef   : > { %8196 = vrcp.f32 %v2625_v43  ;;  %v2623_v29 = vpop.xlane.xlu0 %2622  ;;  %v10878_v52 = vpop.eup %8186 }
 0xbf0   : > { %8198 = vrcp.f32 %v2623_v29  ;;  %v7802_v16 = vpack.i.bf16 %v10870_v18, %v10867_v19  ;;  %v12785_v29 = vld [vmem:[#allocation43_spill] sm:$0xff]  ;;  %v12788_v19 = vld [vmem:[#allocation73_spill] sm:$0xff] }
 0xbf2   : > { %v2629_v3 = vpop.xlane.xlu1 %2628 }
 0xbf3   : > { %8200 = vrcp.f32 %v2629_v3  ;;  %v2627_v30 = vpop.xlane.xlu0 %2626 }
 0xbf4   : > { %8202 = vrcp.f32 %v2627_v30 }
 0xbf5   : > { %v10880_v40 = vpop.eup %8188  ;;  %8204 = vpow2.f32 %v3510_v0 }
 0xbf6   : > { %v10882_v47 = vpop.eup %8190  ;;  %v3465_v62 = vpop.xlane.xlu1 %3464  ;;  %v3566_v56 = vpack.c.bf16 %v10880_v40, %v10875_v28  ;;  %8206 = vpow2.f32 %v3506_v48 }
 0xbf7   : > { %v8193_v6 = vpop.eup %8192  ;;  %v3481_v26 = vsub.f32 %v10776_v57, %v3465_v62  ;;  %v3081_v61 = vpop.xlane.xlu0 %3080  ;;  %v3567_v33 = vpack.c.bf16 %v10878_v52, %v10882_v47  ;;  %2182 = vadd.xlane.f32.xlu1 %v12780_v32 }
 0xbf8   : > { %v8195_v35 = vpop.eup %8194  ;;  %7505 = vmatprep.mubr.bf16.mxu0 %v3566_v56  ;;  %v10890_v42 = vmul.f32 %v8193_v6, %v10673_v17 }
 0xbf9   : > { %v8197_v50 = vpop.eup %8196  ;;  %7506 = vmatmul.mubr.bf16.gmra.mrb[88].mxu0 %v3567_v33  ;;  %v10894_v4 = vmul.f32 %v8195_v35, %v10669_v54  ;;  %v3512_v9 = vmul.f32 1.442695, %v3481_v26 }
 0xbfa   : > { %v8199_v60 = vpop.eup %8198  ;;  %v3461_v57 = vpop.xlane.xlu1 %3460  ;;  %v10897_v49 = vmul.f32 %v8197_v50, %v12781_v25 }
 0xbfb   : > { %v3479_v11 = vsub.f32 %v10781_v63, %v3461_v57  ;;  %v3085_v2 = vpop.xlane.xlu0 %3084  ;;  %v7807_v17 = vpack.i.bf16 %v10890_v42, %v10894_v4  ;;  %v10903_v1 = vmul.f32 %v8199_v60, %v12782_v37  ;;  %v12787_v57 = vld [vmem:[#allocation70_spill] sm:$0xff] }
 0xbfc   : > { %8208 = vrcp.f32 %v3085_v2 }
 0xbfd   : > { %v8201_v54 = vpop.eup %8200  ;;  %8210 = vrcp.f32 %v3081_v61  ;;  %v3508_v27 = vmul.f32 1.442695, %v3479_v11  ;;  %v7832_v5 = vpack.i.bf16 %v10897_v49, %v10903_v1 }
 0xbfe   : > { %v8203_v58 = vpop.eup %8202  ;;  %8212 = vpow2.f32 %v3512_v9  ;;  %v3083_v59 = vpop.xlane.xlu1 %3082  ;;  %v10908_v36 = vmul.f32 %v8201_v54, %v12783_v23 }
 0xbff   : > { %8214 = vpow2.f32 %v3508_v27  ;;  %v2631_v63 = vpop.xlane.xlu0 %2630  ;;  %v10911_v34 = vmul.f32 %v8203_v58, %v12784_v15  ;;  %v10916_v24 = vpop.eup %8204 }
 0xc00   : > { %8216 = vrcp.f32 %v3083_v59  ;;  %v10918_v30 = vpop.eup %8206  ;;  %v12789_v59 = vld [vmem:[#allocation72_spill] sm:$0xff] }
 0xc01   : > { %8218 = vrcp.f32 %v2631_v63  ;;  %v7837_v43 = vpack.i.bf16 %v10908_v36, %v10911_v34  ;;  %2188 = vadd.xlane.f32.xlu0 %v12785_v29 }
 0xc02   : > { %v3087_v7 = vpop.xlane.xlu1 %3086 }
 0xc03   : > { %8220 = vrcp.f32 %v3087_v7  ;;  %v2635_v3 = vpop.xlane.xlu0 %2634 }
 0xc04   : > { %8222 = vrcp.f32 %v2635_v3 }
 0xc05   : > { %3518 = vadd.xlane.f32.xlu0 %v10832_v10 }
 0xc06   : > { %v8209_v0 = vpop.eup %8208  ;;  %v2633_v62 = vpop.xlane.xlu1 %2632 }
 0xc07   : > { %v8211_v56 = vpop.eup %8210  ;;  %8224 = vrcp.f32 %v2633_v62  ;;  %v3089_v6 = vpop.xlane.xlu0 %3088  ;;  %v10922_v48 = vmul.f32 %v8209_v0, %v10677_v46  ;;  %v12790_v0 = vld [vmem:[#allocation48_spill] sm:$0xff] }
 0xc08   : > { %v10924_v26 = vpop.eup %8212  ;;  %8226 = vrcp.f32 %v3089_v6  ;;  %7798 = vrot.lane.b32.xlu1 %v7797_v13, %s8850_s28  ;;  %v10938_v32 = vmul.f32 %v8211_v56, %v10679_v12 }
 0xc09   : > { %v10926_v61 = vpop.eup %8214  ;;  %3514 = vadd.xlane.f32.xlu0 %v10824_v21  ;;  %v3569_v50 = vpack.c.bf16 %v10924_v26, %v10916_v24 }
 0xc0a   : > { %v8217_v33 = vpop.eup %8216  ;;  %v2637_v10 = vpop.xlane.xlu1 %2636  ;;  %v3568_v35 = vpack.c.bf16 %v10926_v61, %v10918_v30 }
 0xc0b   : > { %v8219_v42 = vpop.eup %8218  ;;  %8228 = vrcp.f32 %v2637_v10  ;;  %v3093_v46 = vpop.xlane.xlu0 %3092  ;;  %v10941_v4 = vmul.f32 %v8217_v33, %v10683_v41  ;;  %v12791_v10 = vld [vmem:[#allocation74_spill] sm:$0xff] }
 0xc0c   : > { %8230 = vrcp.f32 %v3093_v46  ;;  %7509 = vmatprep.mubr.bf16.mxu0 %v3568_v35  ;;  %v10944_v21 = vmul.f32 %v8219_v42, %v12786_v31  ;;  %7803 = vrot.lane.b32.xlu1 %v7802_v16, %s8849_s25 }
 0xc0d   : > { %v8221_v53 = vpop.eup %8220  ;;  %7510 = vmatmul.mubr.bf16.gmra.mrb[92].mxu0 %v3569_v50  ;;  %v7842_v13 = vpack.i.bf16 %v10941_v4, %v10938_v32  ;;  %3526 = vadd.xlane.f32.xlu0 %v10852_v39 }
 0xc0e   : > { %v8223_v60 = vpop.eup %8222  ;;  %v3091_v12 = vpop.xlane.xlu1 %3090  ;;  %v10954_v41 = vmul.f32 %v8221_v53, %v10681_v22 }
 0xc0f   : > { %8232 = vrcp.f32 %v3091_v12  ;;  %v2165_v9 = vpop.xlane.xlu0 %2164  ;;  %v10957_v25 = vmul.f32 %v8223_v60, %v12787_v57  ;;  %v12793_v60 = vld [vmem:[#allocation50_spill] sm:$0xff] }
 0xc10   : > { %8234 = vrcp.f32 %v2165_v9  ;;  %v7847_v11 = vpack.i.bf16 %v10954_v41, %v10922_v48  ;;  %7808 = vrot.lane.b32.xlu1 %v7807_v17, %s8849_s25 }
 0xc11   : > { %v8225_v2 = vpop.eup %8224  ;;  %3522 = vadd.xlane.f32.xlu0 %v10845_v38 }
 0xc12   : > { %v8227_v37 = vpop.eup %8226  ;;  %v3095_v39 = vpop.xlane.xlu1 %3094  ;;  %v10964_v18 = vmul.f32 %v8225_v2, %v12788_v19  ;;  %v12794_v2 = vld [vmem:[#allocation52_spill] sm:$0xff] }
 0xc13   : > { %8236 = vrcp.f32 %v3095_v39  ;;  %v2169_v22 = vpop.xlane.xlu0 %2168  ;;  %v10967_v16 = vmul.f32 %v8227_v37, %v10687_v8 }
 0xc14   : > { %8238 = vrcp.f32 %v2169_v22  ;;  %v7862_v54 = vpack.i.bf16 %v10964_v18, %v10944_v21 }
 0xc15   : > { %v8229_v27 = vpop.eup %8228  ;;  %3534 = vadd.xlane.f32.xlu0 %v10882_v47 }
 0xc16   : > { %v8231_v58 = vpop.eup %8230  ;;  %v2167_v17 = vpop.xlane.xlu1 %2166  ;;  %v10973_v38 = vmul.f32 %v8229_v27, %v12789_v59  ;;  %v12795_v27 = vld [vmem:[#allocation46_spill] sm:$0xff]  ;;  %v12797_v59 = vld [vmem:[#allocation51_spill] sm:$0xff] }
 0xc17   : > { %8240 = vrcp.f32 %v2167_v17  ;;  %v2173_v23 = vpop.xlane.xlu0 %2172  ;;  %v10976_v63 = vmul.f32 %v8231_v58, %v10685_v44  ;;  %v12796_v58 = vld [vmem:[#allocation49_spill] sm:$0xff] }
 0xc18   : > { %8242 = vrcp.f32 %v2173_v23  ;;  %v7867_v8 = vpack.i.bf16 %v10973_v38, %v10957_v25 }
 0xc19   : > { %v8233_v15 = vpop.eup %8232  ;;  %3530 = vadd.xlane.f32.xlu0 %v10875_v28 }
 0xc1a   : > { %v8235_v29 = vpop.eup %8234  ;;  %v2171_v7 = vpop.xlane.xlu1 %2170  ;;  %v10982_v47 = vmul.f32 %v8233_v15, %v10691_v55  ;;  %v12792_v55 = vld [vmem:[#allocation47_spill] sm:$0xff] }
 0xc1b   : > { %8244 = vrcp.f32 %v2171_v7  ;;  %v2177_v3 = vpop.xlane.xlu0 %2176  ;;  %v2317_v62 = vmul.f32 %v8235_v29, %v12790_v0  ;;  %v12798_v29 = vld [vmem:[#allocation54_spill] sm:$0xff]  ;;  %v12799_v0 = vld [vmem:[#allocation53_spill] sm:$0xff] }
 0xc1c   : > { %8246 = vrcp.f32 %v2177_v3  ;;  %v12808_v49 = vpack.i.bf16 %v10982_v47, %v10967_v16 }
 0xc1d   : > { %v8237_v56 = vpop.eup %8236  ;;  %3542 = vadd.xlane.f32.xlu0 %v10916_v24 }
 0xc1e   : > { %v8239_v6 = vpop.eup %8238  ;;  %v2175_v33 = vpop.xlane.xlu1 %2174  ;;  %v10989_v35 = vmul.f32 %v8237_v56, %v12791_v10 }
 0xc1f   : > { %8248 = vrcp.f32 %v2175_v33  ;;  %v7774_v28 = vpop.permute.xlu0 %7773  ;;  %v2319_v42 = vmul.f32 %v8239_v6, %v12792_v55 }
 0xc20   : > { %v7775_v46 = vunpack.i.l.bf16 %v7774_v28  ;;  %v7776_v9 = vunpack.i.h.bf16 %v7774_v28  ;;  %v12807_v36 = vpack.i.bf16 %v10989_v35, %v10976_v63 }
 0xc21   : > { %v8241_v31 = vpop.eup %8240  ;;  %3538 = vadd.xlane.f32.xlu0 %v10918_v30 }
 0xc22   : > { %v8243_v53 = vpop.eup %8242  ;;  %v2318_v12 = vmul.f32 %v8241_v31, %v12793_v60  ;;  %v3899_v57 = vsel %vm1938_vm0, %v2317_v62, %v7775_v46  ;;  %v2179_v24 = vpop.xlane.xlu1 %2178 }
 0xc23   : > { %8250 = vrcp.f32 %v2179_v24  ;;  %v2321_v37 = vmul.f32 %v8243_v53, %v12794_v2  ;;  %v12800_v24 = vld [vmem:[#allocation56_spill] sm:$0xff] }
 0xc24   : > { %v3900_v39 = vsel %vm1938_vm0, %v2318_v12, %v7776_v9 }
 0xc25   : > { %v8245_v19 = vpop.eup %8244  ;;  %2192 = vadd.xlane.f32.xlu0 %v12795_v27  ;;  %v12801_v27 = vld [vmem:[#allocation55_spill] sm:$0xff] }
 0xc26   : > { %v8247_v22 = vpop.eup %8246  ;;  %v2320_v17 = vmul.f32 %v8245_v19, %v12796_v58 }
 0xc27   : > { %v2323_v23 = vmul.f32 %v8247_v22, %v12797_v59 }
 0xc29   : > { %v8249_v15 = vpop.eup %8248 }
 0xc2a   : > { %v2322_v7 = vmul.f32 %v8249_v15, %v12798_v29 }
 0xc2d   : > { %v8251_v3 = vpop.eup %8250 }
 0xc2e   : > { %v2324_v30 = vmul.f32 %v8251_v3, %v12799_v0 }
 0xc34   : > { %3520 = vadd.xlane.f32.xlu1 %v10827_v20 }
 0xc38   : > { %3516 = vadd.xlane.f32.xlu1 %v10830_v45 }
 0xc3c   : > { %3528 = vadd.xlane.f32.xlu1 %v10848_v51 }
 0xc3d   : > { %v7779_v62 = vpop.permute.xlu1 %7778 }
 0xc3e   : > { %v7781_v56 = vunpack.i.h.bf16 %v7779_v62  ;;  %v7780_v6 = vunpack.i.l.bf16 %v7779_v62 }
 0xc40   : > { %v3902_v33 = vsel %vm1938_vm0, %v2320_v17, %v7781_v56  ;;  %v3901_v10 = vsel %vm1938_vm0, %v2319_v42, %v7780_v6  ;;  %3524 = vadd.xlane.f32.xlu1 %v10850_v14  ;;  %v12802_v17 = vld [vmem:[#allocation57_spill] sm:$0xff] }
 0xc41   : > { %v7784_v28 = vpop.permute.xlu1 %7783 }
 0xc42   : > { %v7786_v55 = vunpack.i.h.bf16 %v7784_v28  ;;  %v7785_v46 = vunpack.i.l.bf16 %v7784_v28 }
 0xc44   : > { %v11011_v31 = vsel %vm3915_vm1, %v3899_v57, %v7785_v46  ;;  %v11014_v20 = vsel %vm3915_vm1, %v3900_v39, %v7786_v55  ;;  %3536 = vadd.xlane.f32.xlu1 %v10878_v52 }
 0xc45   : > { %v7789_v45 = vpop.permute.xlu1 %7788 }
 0xc46   : > { %v7791_v51 = vunpack.i.h.bf16 %v7789_v45  ;;  %v7790_v53 = vunpack.i.l.bf16 %v7789_v45  ;;  %v12803_v45 = vld [vmem:[#allocation58_spill] sm:$0xff] }
 0xc48   : > { %v11018_v60 = vsel %vm3915_vm1, %v3902_v33, %v7791_v51  ;;  %v11021_v14 = vsel %vm3915_vm1, %v3901_v10, %v7790_v53  ;;  %3532 = vadd.xlane.f32.xlu1 %v10880_v40 }
 0xc4c   : > { %3544 = vadd.xlane.f32.xlu1 %v10924_v26 }
 0xc50   : > { %v2181_v42 = vpop.xlane.xlu0 %2180  ;;  %3540 = vadd.xlane.f32.xlu1 %v10926_v61 }
 0xc51   : > { %8252 = vrcp.f32 %v2181_v42 }
 0xc54   : > { %v2185_v12 = vpop.xlane.xlu0 %2184 }
 0xc55   : > { %8254 = vrcp.f32 %v2185_v12 }
 0xc58   : > { %v2187_v52 = vpop.xlane.xlu0 %2186 }
 0xc59   : > { %8256 = vrcp.f32 %v2187_v52  ;;  %v12804_v52 = vld [vmem:[#allocation60_spill] sm:$0xff] }
 0xc5b   : > { %v8253_v9 = vpop.eup %8252 }
 0xc5c   : > { %v7794_v57 = vpop.permute.xlu0 %7793  ;;  %v11027_v2 = vmul.f32 %v8253_v9, %v12800_v24  ;;  %v7925_v24 = vld [vmem:[%s9261_s21 + $0x8] sm:$0xff]  }
 0xc5d   : > { %v7796_v39 = vunpack.i.h.bf16 %v7794_v57  ;;  %v7795_v19 = vunpack.i.l.bf16 %v7794_v57  ;;  %v7924_v57 = vld [vmem:[%s9261_s21] sm:$0xff]  }
 0xc5e   : > { %7513 = vmatprep.subr.bf16.mxu0 %v7924_v57 }
 0xc5f   : > { %v8255_v22 = vpop.eup %8254  ;;  %v3904_v40 = vsel %vm1938_vm0, %v2322_v7, %v7796_v39  ;;  %v3903_v26 = vsel %vm1938_vm0, %v2321_v37, %v7795_v19  ;;  %7514 = vmatpush3.bf16.msra.mxu0 %v7924_v57  ;;  %v7926_v39 = vld [vmem:[%s9261_s21 + $0x10] sm:$0xff]   ;;  %v7927_v19 = vld [vmem:[%s9261_s21 + $0x18] sm:$0xff]  }
 0xc60   : > { %v11032_v58 = vmul.f32 %v8255_v22, %v12801_v27  ;;  %7515 = vmatprep.subr.bf16.mxu0 %v7925_v24 }
 0xc63   : > { %v8257_v61 = vpop.eup %8256  ;;  %7516 = vmatpush3.bf16.msra.mxu0 %v7925_v24 }
 0xc64   : > { %v11035_v59 = vmul.f32 %v8257_v61, %v12802_v17  ;;  %7517 = vmatprep.subr.bf16.mxu0 %v7926_v39 }
 0xc67   : > { %7518 = vmatpush3.bf16.msra.mxu0 %v7926_v39 }
 0xc68   : > { %7519 = vmatprep.subr.bf16.mxu0 %v7927_v19 }
 0xc6b   : > { %7520 = vmatpush3.bf16.msra.mxu0 %v7927_v19 }
 0xc84   : > { %v2183_v15 = vpop.xlane.xlu1 %2182 }
 0xc85   : > { %8258 = vrcp.f32 %v2183_v15  ;;  %v7929_v15 = vld [vmem:[%s9261_s21 + $0x28] sm:$0xff]  }
 0xc88   : > { %v7799_v29 = vpop.permute.xlu1 %7798 }
 0xc89   : > { %v7801_v3 = vunpack.i.h.bf16 %v7799_v29  ;;  %v7800_v0 = vunpack.i.l.bf16 %v7799_v29 }
 0xc8b   : > { %v3906_v62 = vsel %vm1938_vm0, %v2324_v30, %v7801_v3  ;;  %v3905_v56 = vsel %vm1938_vm0, %v2323_v23, %v7800_v0 }
 0xc8c   : > { %v7804_v6 = vpop.permute.xlu1 %7803 }
 0xc8d   : > { %v7806_v7 = vunpack.i.h.bf16 %v7804_v6  ;;  %v7805_v37 = vunpack.i.l.bf16 %v7804_v6 }
 0xc8e   : > { %v2189_v33 = vpop.xlane.xlu0 %2188 }
 0xc8f   : > { %8260 = vrcp.f32 %v2189_v33  ;;  %v8259_v10 = vpop.eup %8258  ;;  %v11040_v28 = vsel %vm3915_vm1, %v3903_v26, %v7805_v37  ;;  %v11043_v55 = vsel %vm3915_vm1, %v3904_v40, %v7806_v7  ;;  %v7928_v40 = vld [vmem:[%s9261_s21 + $0x20] sm:$0xff]   ;;  %v7930_v33 = vld [vmem:[%s9261_s21 + $0x30] sm:$0xff]  }
 0xc90   : > { %v7809_v46 = vpop.permute.xlu1 %7808  ;;  %v11046_v30 = vmul.f32 %v8259_v10, %v12803_v45  ;;  %7521 = vmatprep.subr.bf16.mxu0 %v7928_v40  ;;  %v7931_v45 = vld [vmem:[%s9261_s21 + $0x38] sm:$0xff]  }
 0xc91   : > { %v7811_v23 = vunpack.i.h.bf16 %v7809_v46  ;;  %v7810_v51 = vunpack.i.l.bf16 %v7809_v46  ;;  %7522 = vmatpush3.bf16.msra.mxu0 %v7928_v40 }
 0xc92   : > { %v3519_v27 = vpop.xlane.xlu0 %3518  ;;  %7523 = vmatprep.subr.bf16.mxu0 %v7929_v15 }
 0xc93   : > { %v11049_v53 = vsel %vm3915_vm1, %v3906_v62, %v7811_v23  ;;  %v11052_v42 = vsel %vm3915_vm1, %v3905_v56, %v7810_v51  ;;  %8262 = vrcp.f32 %v3519_v27 }
 0xc95   : > { %7524 = vmatpush3.bf16.msra.mxu0 %v7929_v15 }
 0xc96   : > { %v3515_v29 = vpop.xlane.xlu0 %3514  ;;  %7525 = vmatprep.subr.bf16.mxu0 %v7930_v33 }
 0xc99   : > { %v8261_v12 = vpop.eup %8260  ;;  %7526 = vmatpush3.bf16.msra.mxu0 %v7930_v33 }
 0xc9a   : > { %v11055_v9 = vmul.f32 %v8261_v12, %v12804_v52  ;;  %v3527_v3 = vpop.xlane.xlu0 %3526  ;;  %7527 = vmatprep.subr.bf16.mxu0 %v7931_v45 }
 0xc9d   : > { %v8263_v12 = vpop.eup %8262  ;;  %7528 = vmatpush3.bf16.msra.mxu0 %v7931_v45 }
 0xc9e   : > { %v3523_v37 = vpop.xlane.xlu0 %3522 }
 0xca2   : > { %v3535_v46 = vpop.xlane.xlu0 %3534 }
 0xca6   : > { %v3531_v15 = vpop.xlane.xlu0 %3530 }
 0xcb0   : > { %v7499_v22 = vpop.f32.mrb[80].mxu0 }
 0xcb1   : > { %v3628_v26 = vpop.f32.mrb[81].mxu0  ;;  %v3693_v39 = vmul.f32 %v8263_v12, %v7499_v22 }
 0xcb2   : > { %v7500_v61 = vpop.f32.mrb[82].mxu0 }
 0xcb3   : > { %v3631_v17 = vpop.f32.mrb[83].mxu0 }
 0xcc0   : > { %v7503_v0 = vpop.f32.mrb[84].mxu0 }
 0xcc1   : > { %v3644_v62 = vpop.f32.mrb[85].mxu0  ;;  %v3521_v6 = vpop.xlane.xlu1 %3520 }
 0xcc2   : > { %v7504_v56 = vpop.f32.mrb[86].mxu0  ;;  %8264 = vrcp.f32 %v3521_v6 }
 0xcc3   : > { %v3647_v7 = vpop.f32.mrb[87].mxu0  ;;  %8266 = vrcp.f32 %v3515_v29 }
 0xcc5   : > { %v3517_v10 = vpop.xlane.xlu1 %3516 }
 0xcc6   : > { %8268 = vrcp.f32 %v3517_v10 }
 0xcc7   : > { %8270 = vrcp.f32 %v3527_v3 }
 0xcc9   : > { %v3529_v23 = vpop.xlane.xlu1 %3528 }
 0xcca   : > { %8272 = vrcp.f32 %v3529_v23 }
 0xccb   : > { %8274 = vrcp.f32 %v3523_v37  ;;  %v3543_v37 = vpop.xlane.xlu0 %3542 }
 0xccc   : > { %v7507_v51 = vpop.f32.mrb[88].mxu0  ;;  %v8265_v57 = vpop.eup %8264 }
 0xccd   : > { %v3660_v52 = vpop.f32.mrb[89].mxu0  ;;  %v3525_v19 = vpop.xlane.xlu1 %3524  ;;  %v3694_v27 = vmul.f32 %v8265_v57, %v7500_v61 }
 0xcce   : > { %v7508_v24 = vpop.f32.mrb[90].mxu0  ;;  %8276 = vrcp.f32 %v3525_v19  ;;  %v8267_v29 = vpop.eup %8266 }
 0xccf   : > { %v3663_v40 = vpop.f32.mrb[91].mxu0  ;;  %v7812_v6 = vpack.i.bf16 %v3694_v27, %v3693_v39  ;;  %8278 = vrcp.f32 %v3535_v46  ;;  %v3691_v3 = vmul.f32 %v8267_v29, %v3628_v26 }
 0xcd0   : > { %v8269_v33 = vpop.eup %8268 }
 0xcd1   : > { %v3537_v10 = vpop.xlane.xlu1 %3536  ;;  %7813 = vrot.lane.b32.xlu1 %v7812_v6, %s8848_s11  ;;  %v3692_v23 = vmul.f32 %v8269_v33, %v3631_v17  ;;  %v8271_v45 = vpop.eup %8270 }
 0xcd2   : > { %8280 = vrcp.f32 %v3537_v10  ;;  %v3697_v22 = vmul.f32 %v8271_v45, %v7503_v0  ;;  %v3539_v17 = vpop.xlane.xlu0 %3538 }
 0xcd3   : > { %v7817_v44 = vpack.i.bf16 %v3692_v23, %v3691_v3  ;;  %8282 = vrcp.f32 %v3531_v15 }
 0xcd4   : > { %v8273_v50 = vpop.eup %8272 }
 0xcd5   : > { %v3533_v12 = vpop.xlane.xlu1 %3532  ;;  %7818 = vrot.lane.b32.xlu0 %v7817_v44, %s8848_s11  ;;  %v3698_v61 = vmul.f32 %v8273_v50, %v7504_v56  ;;  %v8275_v57 = vpop.eup %8274 }
 0xcd6   : > { %8284 = vrcp.f32 %v3533_v12  ;;  %v3695_v26 = vmul.f32 %v8275_v57, %v3644_v62  ;;  %v2193_v1 = vpop.xlane.xlu0 %2192 }
 0xcd7   : > { %v7822_v39 = vpack.i.bf16 %v3698_v61, %v3697_v22  ;;  %8286 = vrcp.f32 %v3543_v37 }
 0xcd8   : > { %v8277_v46 = vpop.eup %8276 }
 0xcd9   : > { %v3545_v19 = vpop.xlane.xlu1 %3544  ;;  %v3696_v27 = vmul.f32 %v8277_v46, %v3647_v7  ;;  %v8279_v29 = vpop.eup %8278 }
 0xcda   : > { %8288 = vrcp.f32 %v3545_v19  ;;  %v3701_v15 = vmul.f32 %v8279_v29, %v7507_v51  ;;  %v12805_v29 = vld [vmem:[#allocation45_spill] sm:$0xff] }
 0xcdb   : > { %v7827_v6 = vpack.i.bf16 %v3696_v27, %v3695_v26  ;;  %8290 = vrcp.f32 %v3539_v17 }
 0xcdc   : > { %v8281_v33 = vpop.eup %8280 }
 0xcdd   : > { %v3541_v0 = vpop.xlane.xlu1 %3540  ;;  %7828 = vrot.lane.b32.xlu0 %v7827_v6, %s8848_s11  ;;  %v3702_v44 = vmul.f32 %v8281_v33, %v7508_v24  ;;  %v8283_v56 = vpop.eup %8282  ;;  %v12806_v6 = vld [vmem:[#allocation44_spill] sm:$0xff] }
 0xcde   : > { %8292 = vrcp.f32 %v3541_v0  ;;  %v3699_v45 = vmul.f32 %v8283_v56, %v3660_v52 }
 0xcdf   : > { %v7857_v10 = vpack.i.bf16 %v3702_v44, %v3701_v15 }
 0xce0   : > { %v7511_v50 = vpop.f32.mrb[92].mxu0  ;;  %v8285_v23 = vpop.eup %8284 }
 0xce1   : > { %v3676_v3 = vpop.f32.mrb[93].mxu0  ;;  %v3700_v37 = vmul.f32 %v8285_v23, %v3663_v40  ;;  %v8287_v22 = vpop.eup %8286 }
 0xce2   : > { %v7512_v62 = vpop.f32.mrb[94].mxu0  ;;  %v3705_v57 = vmul.f32 %v8287_v22, %v7511_v50 }
 0xce3   : > { %v3679_v7 = vpop.f32.mrb[95].mxu0  ;;  %v7852_v12 = vpack.i.bf16 %v3700_v37, %v3699_v45 }
 0xce4   : > { %v8289_v61 = vpop.eup %8288 }
 0xce5   : > { %v3706_v46 = vmul.f32 %v8289_v61, %v7512_v62  ;;  %v8291_v51 = vpop.eup %8290 }
 0xce6   : > { %v3703_v27 = vmul.f32 %v8291_v51, %v3676_v3 }
 0xce7   : > { %v7887_v26 = vpack.i.bf16 %v3706_v46, %v3705_v57 }
 0xce8   : > { %v8293_v19 = vpop.eup %8292 }
 0xce9   : > { %v3704_v24 = vmul.f32 %v8293_v19, %v3679_v7 }
 0xceb   : > { %v7882_v17 = vpack.i.bf16 %v3704_v24, %v3703_v27 }
 0xcf5   : > { %2190 = vadd.xlane.f32.xlu1 %v12805_v29 }
 0xcfc   : > { %2194 = vadd.xlane.f32.xlu0 %v12806_v6 }
 0xd06   : > { %7823 = vrot.lane.b32.xlu1 %v7822_v39, %s8848_s11 }
 0xd0a   : > { %7838 = vrot.lane.b32.xlu1 %v7837_v43, %s8850_s28 }
 0xd0e   : > { %7843 = vrot.lane.b32.xlu1 %v7842_v13, %s8849_s25 }
 0xd12   : > { %7848 = vrot.lane.b32.xlu1 %v7847_v11, %s8849_s25  ;;  %7833 = vrot.lane.b32.xlu0 %v7832_v5, %s8850_s28 }
 0xd16   : > { %7858 = vrot.lane.b32.xlu1 %v7857_v10, %s8848_s11  ;;  %7853 = vrot.lane.b32.xlu0 %v7852_v12, %s8848_s11 }
 0xd1a   : > { %7868 = vrot.lane.b32.xlu1 %v7867_v8, %s8850_s28  ;;  %7863 = vrot.lane.b32.xlu0 %v7862_v54, %s8850_s28 }
 0xd1e   : > { %7878 = vrot.lane.b32.xlu1 %v12807_v36, %s8849_s25  ;;  %7873 = vrot.lane.b32.xlu0 %v12808_v49, %s8849_s25 }
 0xd22   : > { %7888 = vrot.lane.b32.xlu1 %v7887_v26, %s8848_s11  ;;  %7883 = vrot.lane.b32.xlu0 %v7882_v17, %s8848_s11 }
 0xd43   : > { %v7814_v5 = vpop.permute.xlu1 %7813 }
 0xd44   : > { %v7816_v34 = vunpack.i.h.bf16 %v7814_v5  ;;  %v7815_v43 = vunpack.i.l.bf16 %v7814_v5 }
 0xd46   : > { %v3936_v48 = vsel %vm3932_vm2, %v11018_v60, %v7816_v34  ;;  %v3935_v32 = vsel %vm3932_vm2, %v11021_v14, %v7815_v43 }
 0xd47   : > { %v3950_v4 = vpack.c.bf16 %v3936_v48, %v3935_v32  ;;  %v7819_v21 = vpop.permute.xlu0 %7818 }
 0xd48   : > { %v7821_v13 = vunpack.i.h.bf16 %v7819_v21  ;;  %v7820_v41 = vunpack.i.l.bf16 %v7819_v21 }
 0xd4a   : > { %v3933_v25 = vsel %vm3932_vm2, %v11011_v31, %v7820_v41  ;;  %v3934_v11 = vsel %vm3932_vm2, %v11014_v20, %v7821_v13 }
 0xd4b   : > { %v3949_v18 = vpack.c.bf16 %v3934_v11, %v3933_v25 }
 0xd4d   : > { %7529 = vmatprep.mubr.bf16.mxu0 %v3949_v18 }
 0xd4e   : > { %7530 = vmatmul.mubr.bf16.vlgmr.msra.gmra.mrb[96].mxu0 %v3950_v4  ;;  %v12809_v4 = vld [vmem:[#allocation62_spill] sm:$0xff] }
 0xd4f   : > { %v7829_v16 = vpop.permute.xlu0 %7828 }
 0xd50   : > { %v7831_v54 = vunpack.i.h.bf16 %v7829_v16  ;;  %v7830_v38 = vunpack.i.l.bf16 %v7829_v16 }
 0xd52   : > { %v3937_v63 = vsel %vm3932_vm2, %v11040_v28, %v7830_v38  ;;  %v3938_v8 = vsel %vm3932_vm2, %v11043_v55, %v7831_v54 }
 0xd53   : > { %v3951_v47 = vpack.c.bf16 %v3938_v8, %v3937_v63 }
 0xd55   : > { %7533 = vmatprep.mubr.bf16.mxu0 %v3951_v47 }
 0xd82   : > { %v2191_v35 = vpop.xlane.xlu1 %2190 }
 0xd83   : > { %8294 = vrcp.f32 %v2191_v35 }
 0xd84   : > { %8296 = vrcp.f32 %v2193_v1 }
 0xd86   : > { %v7824_v60 = vpop.permute.xlu1 %7823 }
 0xd87   : > { %v7826_v31 = vunpack.i.h.bf16 %v7824_v60  ;;  %v7825_v14 = vunpack.i.l.bf16 %v7824_v60 }
 0xd89   : > { %v2195_v52 = vpop.xlane.xlu0 %2194  ;;  %v3939_v20 = vsel %vm3932_vm2, %v11052_v42, %v7825_v14  ;;  %v3940_v40 = vsel %vm3932_vm2, %v11049_v53, %v7826_v31  ;;  %v12810_v14 = vld [vmem:[#allocation59_spill] sm:$0xff] }
 0xd8a   : > { %v7839_v39 = vpop.permute.xlu1 %7838  ;;  %v3952_v33 = vpack.c.bf16 %v3940_v40, %v3939_v20  ;;  %8298 = vrcp.f32 %v2195_v52  ;;  %v12811_v20 = vld [vmem:[#allocation61_spill] sm:$0xff] }
 0xd8b   : > { %v7841_v62 = vunpack.i.h.bf16 %v7839_v39  ;;  %v7840_v45 = vunpack.i.l.bf16 %v7839_v39 }
 0xd8c   : > { %7534 = vmatmul.mubr.bf16.gmra.mrb[100].mxu0 %v3952_v33 }
 0xd8d   : > { %v7834_v28 = vpop.permute.xlu0 %7833  ;;  %v3910_v51 = vsel %vm1938_vm0, %v11035_v59, %v7841_v62  ;;  %v3909_v26 = vsel %vm1938_vm0, %v11032_v58, %v7840_v45  ;;  %v8295_v29 = vpop.eup %8294 }
 0xd8e   : > { %v7836_v15 = vunpack.i.h.bf16 %v7834_v28  ;;  %v7835_v0 = vunpack.i.l.bf16 %v7834_v28  ;;  %v7844_v55 = vpop.permute.xlu1 %7843  ;;  %v8297_v43 = vpop.eup %8296  ;;  %v2330_v21 = vmul.f32 %v8295_v29, %v12809_v4 }
 0xd8f   : > { %v7846_v44 = vunpack.i.h.bf16 %v7844_v55  ;;  %v7845_v50 = vunpack.i.l.bf16 %v7844_v55  ;;  %v2331_v52 = vmul.f32 %v8297_v43, %v12810_v14 }
 0xd90   : > { %v3908_v56 = vsel %vm1938_vm0, %v11046_v30, %v7836_v15  ;;  %v3907_v3 = vsel %vm1938_vm0, %v11027_v2, %v7835_v0 }
 0xd91   : > { %v7854_v42 = vpop.permute.xlu0 %7853  ;;  %v3924_v7 = vsel %vm3915_vm1, %v3907_v3, %v7845_v50  ;;  %v3925_v37 = vsel %vm3915_vm1, %v3908_v56, %v7846_v44 }
 0xd92   : > { %v7856_v53 = vunpack.i.h.bf16 %v7854_v42  ;;  %v7855_v10 = vunpack.i.l.bf16 %v7854_v42  ;;  %v7849_v23 = vpop.permute.xlu1 %7848  ;;  %v12812_v42 = vmov 0  }
 0xd93   : > { %v7851_v22 = vunpack.i.h.bf16 %v7849_v23  ;;  %v7850_v12 = vunpack.i.l.bf16 %v7849_v23 }
 0xd94   : > { %v3941_v61 = vsel %vm3932_vm2, %v3924_v7, %v7855_v10  ;;  %v3942_v30 = vsel %vm3932_vm2, %v3925_v37, %v7856_v53  ;;  %v8299_v32 = vpop.eup %8298  ;;  %v11161_v53 = vld [vmem:[%s865_s6] ss:$0 sm:$0xff] }
 0xd95   : > { %v7864_v57 = vpop.permute.xlu0 %7863  ;;  %v3953_v2 = vpack.c.bf16 %v3942_v30, %v3941_v61  ;;  %v3926_v24 = vsel %vm3915_vm1, %v3909_v26, %v7850_v12  ;;  %v3927_v17 = vsel %vm3915_vm1, %v3910_v51, %v7851_v22  ;;  %v8476_v22 = vld [vmem:[#allocation2] sm:$0xff]  ;;  %v8477_v30 = vld [vmem:[#allocation2 + $0x8] sm:$0xff]  ;;  %v8479_v26 = vld [vmem:[#allocation2 + $0x18] sm:$0xff] }
 0xd96   : > { %v7859_v46 = vpop.permute.xlu1 %7858  ;;  %v7866_v1 = vunpack.i.h.bf16 %v7864_v57  ;;  %v7865_v5 = vunpack.i.l.bf16 %v7864_v57 }
 0xd97   : > { %v7861_v19 = vunpack.i.h.bf16 %v7859_v46  ;;  %v7860_v27 = vunpack.i.l.bf16 %v7859_v46  ;;  %7537 = vmatprep.mubr.bf16.mxu0 %v3953_v2  ;;  %v8478_v2 = vld [vmem:[#allocation2 + $0x10] sm:$0xff] }
 0xd98   : > { %v3912_v41 = vsel %vm1938_vm0, %v2330_v21, %v7866_v1  ;;  %v3911_v25 = vsel %vm1938_vm0, %v11055_v9, %v7865_v5  ;;  %v2332_v9 = vmul.f32 %v8299_v32, %v12811_v20  ;;  %v8483_v32 = vld [vmem:[#allocation2 + $0x38] sm:$0xff] }
 0xd99   : > { %v7874_v6 = vpop.permute.xlu0 %7873  ;;  %v3943_v36 = vsel %vm3932_vm2, %v3926_v24, %v7860_v27  ;;  %v3944_v49 = vsel %vm3932_vm2, %v3927_v17, %v7861_v19 }
 0xd9a   : > { %v7869_v34 = vpop.permute.xlu1 %7868  ;;  %v3954_v59 = vpack.c.bf16 %v3944_v49, %v3943_v36  ;;  %v7876_v48 = vunpack.i.h.bf16 %v7874_v6  ;;  %v7875_v58 = vunpack.i.l.bf16 %v7874_v6  ;;  %v8480_v49 = vld [vmem:[#allocation2 + $0x20] sm:$0xff] }
 0xd9b   : > { %v7871_v63 = vunpack.i.h.bf16 %v7869_v34  ;;  %v7870_v8 = vunpack.i.l.bf16 %v7869_v34 }
 0xd9c   : > { %7538 = vmatmul.mubr.bf16.gmra.mrb[104].mxu0 %v3954_v59  ;;  %v3928_v54 = vsel %vm3915_vm1, %v3911_v25, %v7875_v58  ;;  %v3929_v38 = vsel %vm3915_vm1, %v3912_v41, %v7876_v48  ;;  %v8481_v59 = vld [vmem:[#allocation2 + $0x28] sm:$0xff]  ;;  %v8482_v48 = vld [vmem:[#allocation2 + $0x30] sm:$0xff] }
 0xd9d   : > { %v7884_v13 = vpop.permute.xlu0 %7883  ;;  %v3913_v33 = vsel %vm1938_vm0, %v2331_v52, %v7870_v8  ;;  %v3914_v28 = vsel %vm1938_vm0, %v2332_v9, %v7871_v63  ;;  %v8485_v8 = vld [vmem:[#allocation2 + $0x48] sm:$0xff] }
 0xd9e   : > { %v7886_v11 = vunpack.i.h.bf16 %v7884_v13  ;;  %v7885_v18 = vunpack.i.l.bf16 %v7884_v13  ;;  %v7879_v16 = vpop.permute.xlu1 %7878 }
 0xd9f   : > { %v7881_v47 = vunpack.i.h.bf16 %v7879_v16  ;;  %v7880_v35 = vunpack.i.l.bf16 %v7879_v16  ;;  %v8484_v16 = vld [vmem:[#allocation2 + $0x40] sm:$0xff] }
 0xda0   : > { %v3945_v60 = vsel %vm3932_vm2, %v3928_v54, %v7885_v18  ;;  %v3946_v31 = vsel %vm3932_vm2, %v3929_v38, %v7886_v11 }
 0xda1   : > { %v3955_v40 = vpack.c.bf16 %v3946_v31, %v3945_v60  ;;  %v3930_v55 = vsel %vm3915_vm1, %v3913_v33, %v7880_v35  ;;  %v3931_v44 = vsel %vm3915_vm1, %v3914_v28, %v7881_v47  ;;  %v8486_v35 = vld [vmem:[#allocation2 + $0x50] sm:$0xff]  ;;  %v8487_v31 = vld [vmem:[#allocation2 + $0x58] sm:$0xff]  ;;  %v8488_v28 = vld [vmem:[#allocation2 + $0x60] sm:$0xff] }
 0xda2   : > { %v7889_v39 = vpop.permute.xlu1 %7888 }
 0xda3   : > { %v7891_v15 = vunpack.i.h.bf16 %v7889_v39  ;;  %v7890_v0 = vunpack.i.l.bf16 %v7889_v39  ;;  %7541 = vmatprep.mubr.bf16.mxu0 %v3955_v40 }
 0xda5   : > { %v3947_v50 = vsel %vm3932_vm2, %v3930_v55, %v7890_v0  ;;  %v3948_v56 = vsel %vm3932_vm2, %v3931_v44, %v7891_v15  ;;  %v8489_v44 = vld [vmem:[#allocation2 + $0x68] sm:$0xff] }
 0xda6   : > { %v3956_v3 = vpack.c.bf16 %v3948_v56, %v3947_v50  ;;  %v8490_v56 = vld [vmem:[#allocation2 + $0x70] sm:$0xff] }
 0xda8   : > { %7542 = vmatmul.mubr.bf16.gmra.mrb[108].mxu0 %v3956_v3 }
 0xda9   : > { %4730 = vmatprep.mubr.bf16.mxu0 %v12812_v42 }
 0xe21   : > { %v7531_v10 = vpop.f32.mrb[96].mxu0 }
 0xe22   : > { %v4062_v23 = vpop.f32.mrb[97].mxu0  ;;  %v4071_v37 = vadd.f32 %v7531_v10, %v11161_v53  ;;  %v8491_v10 = vld [vmem:[#allocation2 + $0x78] sm:$0xff] }
 0xe23   : > { %v4063_v62 = vadd.f32 %v11161_v53, %v4062_v23  ;;  %v7532_v45 = vpop.f32.mrb[98].mxu0 }
 0xe24   : > { %v4065_v7 = vpop.f32.mrb[99].mxu0  ;;  %v11171_v46 = vadd.f32 %v8478_v2, %v4071_v37  ;;  %v4074_v51 = vadd.f32 %v7532_v45, %v11161_v53  ;;  %v7935_v45 = vld [vmem:[%s9263_s12 + $0x8] ss:$16 sps:$4 sm:$0xff]   ;;  %v7940_v37 = vld [vmem:[%s9263_s12 + $0x24] ss:$16 sps:$4 sm:$0xff]  }
 0xe25   : > { %v11165_v12 = vadd.f32 %v8476_v22, %v4063_v62  ;;  %v4066_v61 = vadd.f32 %v11161_v53, %v4065_v7  ;;  %v7934_v62 = vld [vmem:[%s9263_s12 + $0x4] ss:$16 sps:$4 sm:$0xff]   ;;  %v7937_v7 = vld [vmem:[%s9263_s12 + $0xc] ss:$16 sps:$4 sm:$0xff]  }
 0xe26   : > { %12816 = vst [vmem:[#allocation28_spill] sm:$0xff] %v11171_v46  ;;  %v11176_v19 = vadd.f32 %v8479_v26, %v4074_v51  ;;  %4585 = vmatprep.subr.bf16.mxu1 %v7934_v62  ;;  %v7943_v22 = vld [vmem:[%s9263_s12 + $0x2c] ss:$16 sps:$4 sm:$0xff]   ;;  %4698 = vmatprep.subr.bf16.mxu0 %v7937_v7 }
 0xe27   : > { %12814 = vst [vmem:[#allocation29_spill] sm:$0xff] %v11165_v12  ;;  %v11168_v57 = vadd.f32 %v8477_v30, %v4066_v61  ;;  %4143 = vadd.xlane.f32.xlu0 %v11165_v12  ;;  %v7938_v61 = vld [vmem:[%s9263_s12 + $0x20] ss:$16 sps:$4 sm:$0xff]   ;;  %4699 = vmatpush1.bf16.msra.mxu0 %v7935_v45  ;;  %v7941_v30 = vld [vmem:[%s9263_s12 + $0x28] ss:$16 sps:$4 sm:$0xff]  }
 0xe28   : > { %12817 = vst [vmem:[#allocation26_spill] sm:$0xff] %v11176_v19  ;;  %4700 = vmatprep.subr.bf16.mxu0 %v7943_v22 }
 0xe29   : > { %12815 = vst [vmem:[#allocation30_spill] sm:$0xff] %v11168_v57  ;;  %4145 = vadd.xlane.f32.xlu1 %v11168_v57 }
 0xe2b   : > { %4147 = vadd.xlane.f32.xlu0 %v11171_v46  ;;  %4701 = vmatpush1.bf16.msra.mxu0 %v7941_v30 }
 0xe2f   : > { %4149 = vadd.xlane.f32.xlu0 %v11176_v19 }
 0xe5f   : > { %v7535_v27 = vpop.f32.mrb[100].mxu0 }
 0xe60   : > { %v4078_v24 = vpop.f32.mrb[101].mxu0  ;;  %v4087_v36 = vadd.f32 %v7535_v27, %v11161_v53 }
 0xe61   : > { %v4079_v17 = vadd.f32 %v11161_v53, %v4078_v24  ;;  %v7536_v29 = vpop.f32.mrb[102].mxu0 }
 0xe62   : > { %v4081_v6 = vpop.f32.mrb[103].mxu0  ;;  %v4090_v34 = vadd.f32 %v7536_v29, %v11161_v53  ;;  %v11188_v58 = vadd.f32 %v8482_v48, %v4087_v36 }
 0xe63   : > { %v11181_v1 = vadd.f32 %v8480_v49, %v4079_v17  ;;  %v4082_v5 = vadd.f32 %v11161_v53, %v4081_v6 }
 0xe64   : > { %12820 = vst [vmem:[#allocation34_spill] sm:$0xff] %v11188_v58  ;;  %v11191_v4 = vadd.f32 %v8483_v32, %v4090_v34 }
 0xe65   : > { %12818 = vst [vmem:[#allocation24_spill] sm:$0xff] %v11181_v1  ;;  %v11185_v43 = vadd.f32 %v8481_v59, %v4082_v5  ;;  %4151 = vadd.xlane.f32.xlu0 %v11181_v1 }
 0xe66   : > { %12821 = vst [vmem:[#allocation33_spill] sm:$0xff] %v11191_v4 }
 0xe67   : > { %12819 = vst [vmem:[#allocation32_spill] sm:$0xff] %v11185_v43  ;;  %4153 = vadd.xlane.f32.xlu1 %v11185_v43 }
 0xe69   : > { %4155 = vadd.xlane.f32.xlu0 %v11188_v58 }
 0xe6b   : > { %4157 = vadd.xlane.f32.xlu1 %v11191_v4 }
 0xe6f   : > { %v7539_v21 = vpop.f32.mrb[104].mxu0 }
 0xe70   : > { %v4094_v13 = vpop.f32.mrb[105].mxu0  ;;  %v4103_v18 = vadd.f32 %v7539_v21, %v11161_v53 }
 0xe71   : > { %v4095_v41 = vadd.f32 %v11161_v53, %v4094_v13  ;;  %v7540_v25 = vpop.f32.mrb[106].mxu0  ;;  %v7946_v13 = vld [vmem:[%s9263_s12 + $0x44] ss:$16 sps:$4 sm:$0xff]  }
 0xe72   : > { %v4097_v11 = vpop.f32.mrb[107].mxu0  ;;  %v4106_v63 = vadd.f32 %v7540_v25, %v11161_v53  ;;  %v11204_v60 = vadd.f32 %v8486_v35, %v4103_v18  ;;  %v7944_v25 = vld [vmem:[%s9263_s12 + $0x40] ss:$16 sps:$4 sm:$0xff]   ;;  %v7952_v18 = vld [vmem:[%s9263_s12 + $0x64] ss:$16 sps:$4 sm:$0xff]  }
 0xe73   : > { %v11197_v54 = vadd.f32 %v8484_v16, %v4095_v41  ;;  %v4098_v38 = vadd.f32 %v11161_v53, %v4097_v11  ;;  %v7949_v41 = vld [vmem:[%s9263_s12 + $0x4c] ss:$16 sps:$4 sm:$0xff]   ;;  %v7947_v11 = vld [vmem:[%s9263_s12 + $0x48] ss:$16 sps:$4 sm:$0xff]  }
 0xe74   : > { %12824 = vst [vmem:[#allocation39_spill] sm:$0xff] %v11204_v60  ;;  %v11207_v14 = vadd.f32 %v8487_v31, %v4106_v63  ;;  %4702 = vmatprep.subr.bf16.mxu0 %v7949_v41  ;;  %v7955_v16 = vld [vmem:[%s9263_s12 + $0x6c] ss:$16 sps:$4 sm:$0xff]   ;;  %v7953_v63 = vld [vmem:[%s9263_s12 + $0x68] ss:$16 sps:$4 sm:$0xff]  }
 0xe75   : > { %12822 = vst [vmem:[#allocation35_spill] sm:$0xff] %v11197_v54  ;;  %v11201_v47 = vadd.f32 %v8485_v8, %v4098_v38  ;;  %4159 = vadd.xlane.f32.xlu0 %v11197_v54  ;;  %4703 = vmatpush1.bf16.msra.mxu0 %v7947_v11  ;;  %v7950_v38 = vld [vmem:[%s9263_s12 + $0x60] ss:$16 sps:$4 sm:$0xff]   ;;  %v7958_v8 = vld [vmem:[%s9263_s12 + $0x84] ss:$16 sps:$4 sm:$0xff]  }
 0xe76   : > { %12825 = vst [vmem:[#allocation38_spill] sm:$0xff] %v11207_v14  ;;  %4704 = vmatprep.subr.bf16.mxu0 %v7955_v16  ;;  %v7961_v35 = vld [vmem:[%s9263_s12 + $0x8c] ss:$16 sps:$4 sm:$0xff]   ;;  %v7956_v31 = vld [vmem:[%s9263_s12 + $0x80] ss:$16 sps:$4 sm:$0xff]  }
 0xe77   : > { %12823 = vst [vmem:[#allocation31_spill] sm:$0xff] %v11201_v47  ;;  %4161 = vadd.xlane.f32.xlu1 %v11201_v47 }
 0xe79   : > { %4163 = vadd.xlane.f32.xlu0 %v11204_v60  ;;  %4705 = vmatpush1.bf16.msra.mxu0 %v7953_v63 }
 0xe7a   : > { %4706 = vmatprep.subr.bf16.mxu0 %v7961_v35 }
 0xe7b   : > { %v7543_v52 = vpop.f32.mrb[108].mxu0  ;;  %4165 = vadd.xlane.f32.xlu1 %v11207_v14 }
 0xe7c   : > { %v4110_v20 = vpop.f32.mrb[109].mxu0  ;;  %v4119_v33 = vadd.f32 %v7543_v52, %v11161_v53  ;;  %v7959_v52 = vld [vmem:[%s9263_s12 + $0x88] ss:$16 sps:$4 sm:$0xff]  }
 0xe7d   : > { %v4111_v9 = vadd.f32 %v11161_v53, %v4110_v20  ;;  %v7544_v40 = vpop.f32.mrb[110].mxu0  ;;  %4707 = vmatpush1.bf16.msra.mxu0 %v7959_v52  ;;  %v7964_v20 = vld [vmem:[%s9263_s12 + $0xa4] ss:$16 sps:$4 sm:$0xff]  }
 0xe7e   : > { %v4113_v39 = vpop.f32.mrb[111].mxu0  ;;  %v4122_v55 = vadd.f32 %v7544_v40, %v11161_v53  ;;  %v11220_v3 = vadd.f32 %v8490_v56, %v4119_v33  ;;  %v7962_v40 = vld [vmem:[%s9263_s12 + $0xa0] ss:$16 sps:$4 sm:$0xff]   ;;  %v7970_v33 = vld [vmem:[%s9263_s12 + $0xc4] ss:$16 sps:$4 sm:$0xff]  }
 0xe7f   : > { %v11213_v15 = vadd.f32 %v8488_v28, %v4111_v9  ;;  %v4114_v0 = vadd.f32 %v11161_v53, %v4113_v39  ;;  %v7932_v53 = vld [vmem:[%s9263_s12] ss:$16 sps:$4 sm:$0xff]   ;;  %v7967_v9 = vld [vmem:[%s9263_s12 + $0xac] ss:$16 sps:$4 sm:$0xff]   ;;  %v7965_v39 = vld [vmem:[%s9263_s12 + $0xa8] ss:$16 sps:$4 sm:$0xff]  }
 0xe80   : > { %12828 = vst [vmem:[#allocation41_spill] sm:$0xff] %v11220_v3  ;;  %v11223_v23 = vadd.f32 %v8491_v10, %v4122_v55  ;;  %4586 = vmatpush1.bf16.msra.mxu1 %v7932_v53  ;;  %4708 = vmatprep.subr.bf16.mxu0 %v7967_v9  ;;  %v7973_v28 = vld [vmem:[%s9263_s12 + $0xcc] ss:$16 sps:$4 sm:$0xff]   ;;  %v7971_v55 = vld [vmem:[%s9263_s12 + $0xc8] ss:$16 sps:$4 sm:$0xff]  }
 0xe81   : > { %12826 = vst [vmem:[#allocation36_spill] sm:$0xff] %v11213_v15  ;;  %v11217_v50 = vadd.f32 %v8489_v44, %v4114_v0  ;;  %4167 = vadd.xlane.f32.xlu0 %v11213_v15  ;;  %4587 = vmatprep.subr.bf16.mxu1 %v7940_v37  ;;  %v7968_v0 = vld [vmem:[%s9263_s12 + $0xc0] ss:$16 sps:$4 sm:$0xff]   ;;  %v7976_v56 = vld [vmem:[%s9263_s12 + $0xe4] ss:$16 sps:$4 sm:$0xff]  }
 0xe82   : > { %12829 = vst [vmem:[#allocation25_spill] sm:$0xff] %v11223_v23  ;;  %4709 = vmatpush1.bf16.msra.mxu0 %v7965_v39  ;;  %v7974_v44 = vld [vmem:[%s9263_s12 + $0xe0] ss:$16 sps:$4 sm:$0xff]   ;;  %v7977_v10 = vld [vmem:[%s9263_s12 + $0xe8] ss:$16 sps:$4 sm:$0xff]  }
 0xe83   : > { %12827 = vst [vmem:[#allocation40_spill] sm:$0xff] %v11217_v50  ;;  %4169 = vadd.xlane.f32.xlu1 %v11217_v50  ;;  %4710 = vmatprep.subr.bf16.mxu0 %v7973_v28  ;;  %v7979_v53 = vld [vmem:[%s9263_s12 + $0xec] ss:$16 sps:$4 sm:$0xff]  }
 0xe84   : > { %4588 = vmatpush1.bf16.msra.mxu1 %v7938_v61 }
 0xe85   : > { %4171 = vadd.xlane.f32.xlu0 %v11220_v3  ;;  %4589 = vmatprep.subr.bf16.mxu1 %v7946_v13 }
 0xe86   : > { %4711 = vmatpush1.bf16.msra.mxu0 %v7971_v55 }
 0xe87   : > { %4173 = vadd.xlane.f32.xlu1 %v11223_v23  ;;  %4712 = vmatprep.subr.bf16.mxu0 %v7979_v53 }
 0xe88   : > { %4590 = vmatpush1.bf16.msra.mxu1 %v7944_v25 }
 0xe89   : > { %4591 = vmatprep.subr.bf16.mxu1 %v7952_v18 }
 0xe8a   : > { %4713 = vmatpush1.bf16.msra.mxu0 %v7977_v10 }
 0xe8c   : > { %4592 = vmatpush1.bf16.msra.mxu1 %v7950_v38 }
 0xe8d   : > { %4593 = vmatprep.subr.bf16.mxu1 %v7958_v8 }
 0xe90   : > { %4594 = vmatpush1.bf16.msra.mxu1 %v7956_v31 }
 0xe91   : > { %4595 = vmatprep.subr.bf16.mxu1 %v7964_v20 }
 0xe94   : > { %4596 = vmatpush1.bf16.msra.mxu1 %v7962_v40 }
 0xe95   : > { %4597 = vmatprep.subr.bf16.mxu1 %v7970_v33 }
 0xe98   : > { %4598 = vmatpush1.bf16.msra.mxu1 %v7968_v0 }
 0xe99   : > { %4599 = vmatprep.subr.bf16.mxu1 %v7976_v56 }
 0xe9c   : > { %4600 = vmatpush1.bf16.msra.mxu1 %v7974_v44 }
 0xeb4   : > { %v4144_v2 = vpop.xlane.xlu0 %4143 }
 0xeb5   : > { %v4175_v51 = vmul.f32 0.0078125, %v4144_v2 }
 0xeb6   : > { %v4146_v26 = vpop.xlane.xlu1 %4145 }
 0xeb7   : > { %v11236_v27 = vsub.f32 %v11165_v12, %v4175_v51  ;;  %v4176_v24 = vmul.f32 0.0078125, %v4146_v26 }
 0xeb8   : > { %v4148_v17 = vpop.xlane.xlu0 %4147 }
 0xeb9   : > { %v11239_v29 = vsub.f32 %v11168_v57, %v4176_v24  ;;  %v4177_v6 = vmul.f32 0.0078125, %v4148_v17  ;;  %v4207_v36 = vmul.f32 %v11236_v27, %v11236_v27 }
 0xebb   : > { %v11244_v49 = vsub.f32 %v11171_v46, %v4177_v6  ;;  %4223 = vadd.xlane.f32.xlu0 %v4207_v36  ;;  %v4208_v5 = vmul.f32 %v11239_v29, %v11239_v29 }
 0xebc   : > { %v4150_v34 = vpop.xlane.xlu0 %4149 }
 0xebd   : > { %v4178_v59 = vmul.f32 0.0078125, %v4150_v34  ;;  %4225 = vadd.xlane.f32.xlu1 %v4208_v5  ;;  %v4209_v48 = vmul.f32 %v11244_v49, %v11244_v49 }
 0xebf   : > { %v11251_v32 = vsub.f32 %v11176_v19, %v4178_v59  ;;  %4227 = vadd.xlane.f32.xlu0 %v4209_v48 }
 0xec1   : > { %v4210_v21 = vmul.f32 %v11251_v32, %v11251_v32 }
 0xec3   : > { %4229 = vadd.xlane.f32.xlu1 %v4210_v21 }
 0xef2   : > { %v4152_v62 = vpop.xlane.xlu0 %4151 }
 0xef3   : > { %v4179_v45 = vmul.f32 0.0078125, %v4152_v62 }
 0xef4   : > { %v4154_v7 = vpop.xlane.xlu1 %4153 }
 0xef5   : > { %v11280_v37 = vsub.f32 %v11181_v1, %v4179_v45  ;;  %v4180_v22 = vmul.f32 0.0078125, %v4154_v7 }
 0xef6   : > { %v4156_v61 = vpop.xlane.xlu0 %4155 }
 0xef7   : > { %v11283_v30 = vsub.f32 %v11185_v43, %v4180_v22  ;;  %v4181_v2 = vmul.f32 0.0078125, %v4156_v61  ;;  %v4211_v51 = vmul.f32 %v11280_v37, %v11280_v37 }
 0xef8   : > { %v4158_v26 = vpop.xlane.xlu1 %4157 }
 0xef9   : > { %v11288_v24 = vsub.f32 %v11188_v58, %v4181_v2  ;;  %v4182_v17 = vmul.f32 0.0078125, %v4158_v26  ;;  %4231 = vadd.xlane.f32.xlu0 %v4211_v51  ;;  %v4212_v6 = vmul.f32 %v11283_v30, %v11283_v30 }
 0xefb   : > { %v11293_v36 = vsub.f32 %v11191_v4, %v4182_v17  ;;  %4233 = vadd.xlane.f32.xlu1 %v4212_v6  ;;  %v4213_v5 = vmul.f32 %v11288_v24, %v11288_v24 }
 0xefd   : > { %4235 = vadd.xlane.f32.xlu0 %v4213_v5  ;;  %v4214_v34 = vmul.f32 %v11293_v36, %v11293_v36 }
 0xeff   : > { %4237 = vadd.xlane.f32.xlu1 %v4214_v34 }
 0xf02   : > { %v4160_v59 = vpop.xlane.xlu0 %4159 }
 0xf03   : > { %v4183_v48 = vmul.f32 0.0078125, %v4160_v59 }
 0xf04   : > { %v4162_v21 = vpop.xlane.xlu1 %4161 }
 0xf05   : > { %v11300_v13 = vsub.f32 %v11197_v54, %v4183_v48  ;;  %v4184_v41 = vmul.f32 0.0078125, %v4162_v21 }
 0xf06   : > { %v4164_v25 = vpop.xlane.xlu0 %4163 }
 0xf07   : > { %v11303_v11 = vsub.f32 %v11201_v47, %v4184_v41  ;;  %v4185_v18 = vmul.f32 0.0078125, %v4164_v25  ;;  %v4215_v16 = vmul.f32 %v11300_v13, %v11300_v13 }
 0xf08   : > { %v4166_v38 = vpop.xlane.xlu1 %4165 }
 0xf09   : > { %v11308_v63 = vsub.f32 %v11204_v60, %v4185_v18  ;;  %v4186_v8 = vmul.f32 0.0078125, %v4166_v38  ;;  %4239 = vadd.xlane.f32.xlu0 %v4215_v16  ;;  %v4216_v35 = vmul.f32 %v11303_v11, %v11303_v11  ;;  %v11344_v16 = vld [vmem:[%s868_s23] ss:$0 sm:$0xff] }
 0xf0b   : > { %v11313_v31 = vsub.f32 %v11207_v14, %v4186_v8  ;;  %4241 = vadd.xlane.f32.xlu1 %v4216_v35  ;;  %v4217_v52 = vmul.f32 %v11308_v63, %v11308_v63 }
 0xf0d   : > { %4243 = vadd.xlane.f32.xlu0 %v4217_v52  ;;  %v4218_v20 = vmul.f32 %v11313_v31, %v11313_v31 }
 0xf0e   : > { %v4168_v9 = vpop.xlane.xlu0 %4167 }
 0xf0f   : > { %v4187_v40 = vmul.f32 0.0078125, %v4168_v9  ;;  %4245 = vadd.xlane.f32.xlu1 %v4218_v20  ;;  %v11354_v9 = vld [vmem:[%s871_s0] ss:$0 sm:$0xff] }
 0xf10   : > { %v4170_v39 = vpop.xlane.xlu1 %4169 }
 0xf11   : > { %v11320_v33 = vsub.f32 %v11213_v15, %v4187_v40  ;;  %v4188_v28 = vmul.f32 0.0078125, %v4170_v39 }
 0xf12   : > { %v4172_v0 = vpop.xlane.xlu0 %4171 }
 0xf13   : > { %v11323_v55 = vsub.f32 %v11217_v50, %v4188_v28  ;;  %v4189_v44 = vmul.f32 0.0078125, %v4172_v0  ;;  %v4219_v56 = vmul.f32 %v11320_v33, %v11320_v33 }
 0xf14   : > { %v4174_v10 = vpop.xlane.xlu1 %4173 }
 0xf15   : > { %v11328_v53 = vsub.f32 %v11220_v3, %v4189_v44  ;;  %v4190_v62 = vmul.f32 0.0078125, %v4174_v10  ;;  %4247 = vadd.xlane.f32.xlu0 %v4219_v56  ;;  %v4220_v45 = vmul.f32 %v11323_v55, %v11323_v55 }
 0xf17   : > { %v11333_v7 = vsub.f32 %v11223_v23, %v4190_v62  ;;  %4249 = vadd.xlane.f32.xlu1 %v4220_v45  ;;  %v4221_v22 = vmul.f32 %v11328_v53, %v11328_v53 }
 0xf19   : > { %4251 = vadd.xlane.f32.xlu0 %v4221_v22  ;;  %v4222_v61 = vmul.f32 %v11333_v7, %v11333_v7 }
 0xf1b   : > { %4253 = vadd.xlane.f32.xlu1 %v4222_v61 }
 0xf48   : > { %v4224_v2 = vpop.xlane.xlu0 %4223 }
 0xf49   : > { %v4255_v51 = vmul.f32 0.0078125, %v4224_v2 }
 0xf4a   : > { %v4226_v26 = vpop.xlane.xlu1 %4225 }
 0xf4b   : > { %v4271_v17 = vadd.f32 1e-05, %v4255_v51  ;;  %v4256_v6 = vmul.f32 0.0078125, %v4226_v26 }
 0xf4c   : > { %v4228_v5 = vpop.xlane.xlu0 %4227 }
 0xf4d   : > { %8300 = vrsqrt.f32 %v4271_v17  ;;  %v4272_v34 = vadd.f32 1e-05, %v4256_v6  ;;  %v4257_v59 = vmul.f32 0.0078125, %v4228_v5 }
 0xf4f   : > { %8302 = vrsqrt.f32 %v4272_v34  ;;  %v4273_v48 = vadd.f32 1e-05, %v4257_v59 }
 0xf50   : > { %v4230_v21 = vpop.xlane.xlu1 %4229 }
 0xf51   : > { %8304 = vrsqrt.f32 %v4273_v48  ;;  %v4258_v41 = vmul.f32 0.0078125, %v4230_v21 }
 0xf53   : > { %v4274_v25 = vadd.f32 1e-05, %v4258_v41 }
 0xf55   : > { %8306 = vrsqrt.f32 %v4274_v25 }
 0xf57   : > { %v8301_v18 = vpop.eup %8300 }
 0xf58   : > { %v4303_v38 = vmul.f32 %v8301_v18, %v11236_v27 }
 0xf59   : > { %v8303_v8 = vpop.eup %8302 }
 0xf5a   : > { %v4325_v35 = vmul.f32 %v11344_v16, %v4303_v38  ;;  %v4304_v52 = vmul.f32 %v8303_v8, %v11239_v29 }
 0xf5b   : > { %v8305_v20 = vpop.eup %8304 }
 0xf5c   : > { %v4326_v40 = vmul.f32 %v11344_v16, %v4304_v52  ;;  %v4347_v39 = vadd.f32 %v11354_v9, %v4325_v35  ;;  %v4305_v27 = vmul.f32 %v8305_v20, %v11244_v49 }
 0xf5e   : > { %v4348_v28 = vadd.f32 %v11354_v9, %v4326_v40  ;;  %v4327_v29 = vmul.f32 %v11344_v16, %v4305_v27 }
 0xf5f   : > { %v8307_v0 = vpop.eup %8306 }
 0xf60   : > { %v4363_v44 = vpack.c.bf16 %v4348_v28, %v4347_v39  ;;  %v4306_v56 = vmul.f32 %v8307_v0, %v11251_v32  ;;  %v4349_v45 = vadd.f32 %v11354_v9, %v4327_v29 }
 0xf62   : > { %4618 = vmatmul.mubr.bf16.vlgmr.msra.gmra.mrb[80].mxu1 %v4363_v44  ;;  %4731 = vmatmul.mubr.bf16.vlgmr.msra.gmra.mrb[112].mxu0 %v4363_v44  ;;  %v4328_v10 = vmul.f32 %v11344_v16, %v4306_v56 }
 0xf63   : > { %4627 = vmatprep.mubr.bf16.mxu1 %v12812_v42  ;;  %4740 = vmatprep.mubr.bf16.mxu0 %v12812_v42 }
 0xf64   : > { %v4350_v62 = vadd.f32 %v11354_v9, %v4328_v10 }
 0xf66   : > { %v4364_v22 = vpack.c.bf16 %v4350_v62, %v4349_v45 }
 0xf6a   : > { %4628 = vmatmul.mubr.bf16.gmra.mrb[84].mxu1 %v4364_v22  ;;  %4741 = vmatmul.mubr.bf16.gmra.mrb[116].mxu0 %v4364_v22 }
 0xf6b   : > { %4637 = vmatprep.mubr.bf16.mxu1 %v12812_v42  ;;  %4750 = vmatprep.mubr.bf16.mxu0 %v12812_v42 }
 0xf86   : > { %v4232_v49 = vpop.xlane.xlu0 %4231 }
 0xf87   : > { %v4259_v32 = vmul.f32 0.0078125, %v4232_v49 }
 0xf88   : > { %v4234_v61 = vpop.xlane.xlu1 %4233 }
 0xf89   : > { %v4275_v2 = vadd.f32 1e-05, %v4259_v32  ;;  %v4260_v51 = vmul.f32 0.0078125, %v4234_v61 }
 0xf8a   : > { %v4236_v26 = vpop.xlane.xlu0 %4235 }
 0xf8b   : > { %8308 = vrsqrt.f32 %v4275_v2  ;;  %v4276_v17 = vadd.f32 1e-05, %v4260_v51  ;;  %v4261_v6 = vmul.f32 0.0078125, %v4236_v26 }
 0xf8c   : > { %v4238_v5 = vpop.xlane.xlu1 %4237 }
 0xf8d   : > { %8310 = vrsqrt.f32 %v4276_v17  ;;  %v4277_v34 = vadd.f32 1e-05, %v4261_v6  ;;  %v4262_v59 = vmul.f32 0.0078125, %v4238_v5 }
 0xf8f   : > { %8312 = vrsqrt.f32 %v4277_v34  ;;  %v4278_v48 = vadd.f32 1e-05, %v4262_v59 }
 0xf91   : > { %8314 = vrsqrt.f32 %v4278_v48 }
 0xf95   : > { %v8309_v21 = vpop.eup %8308 }
 0xf96   : > { %v4240_v41 = vpop.xlane.xlu0 %4239  ;;  %v4307_v25 = vmul.f32 %v8309_v21, %v11280_v37 }
 0xf97   : > { %v8311_v18 = vpop.eup %8310  ;;  %v4263_v38 = vmul.f32 0.0078125, %v4240_v41 }
 0xf98   : > { %v4242_v8 = vpop.xlane.xlu1 %4241  ;;  %v4308_v35 = vmul.f32 %v8311_v18, %v11283_v30  ;;  %v4329_v52 = vmul.f32 %v11344_v16, %v4307_v25 }
 0xf99   : > { %v8313_v20 = vpop.eup %8312  ;;  %v4279_v40 = vadd.f32 1e-05, %v4263_v38  ;;  %v4264_v39 = vmul.f32 0.0078125, %v4242_v8 }
 0xf9a   : > { %v4244_v28 = vpop.xlane.xlu0 %4243  ;;  %v4330_v27 = vmul.f32 %v11344_v16, %v4308_v35  ;;  %v4351_v37 = vadd.f32 %v11354_v9, %v4329_v52  ;;  %v4309_v62 = vmul.f32 %v8313_v20, %v11288_v24 }
 0xf9b   : > { %v8315_v0 = vpop.eup %8314  ;;  %8316 = vrsqrt.f32 %v4279_v40  ;;  %v4280_v44 = vadd.f32 1e-05, %v4264_v39  ;;  %v4265_v56 = vmul.f32 0.0078125, %v4244_v28 }
 0xf9c   : > { %v4246_v29 = vpop.xlane.xlu1 %4245  ;;  %v4352_v10 = vadd.f32 %v11354_v9, %v4330_v27  ;;  %v4310_v30 = vmul.f32 %v8315_v0, %v11293_v36  ;;  %v4331_v2 = vmul.f32 %v11344_v16, %v4309_v62 }
 0xf9d   : > { %8318 = vrsqrt.f32 %v4280_v44  ;;  %v4281_v45 = vadd.f32 1e-05, %v4265_v56  ;;  %v4266_v22 = vmul.f32 0.0078125, %v4246_v29 }
 0xf9e   : > { %v4365_v49 = vpack.c.bf16 %v4352_v10, %v4351_v37  ;;  %v4332_v32 = vmul.f32 %v11344_v16, %v4310_v30  ;;  %v4353_v17 = vadd.f32 %v11354_v9, %v4331_v2  ;;  %v11404_v2 = vld [vmem:[%s9265_s7 + $0xc0] sm:$0xff]  }
 0xf9f   : > { %8320 = vrsqrt.f32 %v4281_v45  ;;  %v4282_v61 = vadd.f32 1e-05, %v4266_v22  ;;  %7161 = vmatprep.subr.bf16.mxu0 %v11404_v2 }
 0xfa0   : > { %4638 = vmatmul.mubr.bf16.gmra.mrb[88].mxu1 %v4365_v49  ;;  %4751 = vmatmul.mubr.bf16.gmra.mrb[120].mxu0 %v4365_v49  ;;  %v4354_v36 = vadd.f32 %v11354_v9, %v4332_v32 }
 0xfa1   : > { %8322 = vrsqrt.f32 %v4282_v61  ;;  %4647 = vmatprep.mubr.bf16.mxu1 %v12812_v42  ;;  %4760 = vmatprep.mubr.bf16.mxu0 %v12812_v42  ;;  %v7980_v61 = vld [vmem:[%s9265_s7 + $0x40] sm:$0xff]  }
 0xfa2   : > { %v4248_v24 = vpop.xlane.xlu0 %4247  ;;  %v4366_v48 = vpack.c.bf16 %v4354_v36, %v4353_v17  ;;  %7097 = vmatprep.subr.bf16.mxu1 %v7980_v61 }
 0xfa3   : > { %v4267_v51 = vmul.f32 0.0078125, %v4248_v24 }
 0xfa4   : > { %v4250_v26 = vpop.xlane.xlu1 %4249 }
 0xfa5   : > { %v8317_v6 = vpop.eup %8316  ;;  %v4283_v5 = vadd.f32 1e-05, %v4267_v51  ;;  %v4268_v34 = vmul.f32 0.0078125, %v4250_v26 }
 0xfa6   : > { %v4252_v59 = vpop.xlane.xlu0 %4251  ;;  %v4311_v21 = vmul.f32 %v8317_v6, %v11300_v13 }
 0xfa7   : > { %v8319_v41 = vpop.eup %8318  ;;  %8324 = vrsqrt.f32 %v4283_v5  ;;  %v4284_v25 = vadd.f32 1e-05, %v4268_v34  ;;  %v4269_v18 = vmul.f32 0.0078125, %v4252_v59  ;;  %v7984_v5 = vld [vmem:[%s9265_s7 + $0x48] sm:$0xff]  }
 0xfa8   : > { %v4254_v38 = vpop.xlane.xlu1 %4253  ;;  %4648 = vmatmul.mubr.bf16.gmra.mrb[92].mxu1 %v4366_v48  ;;  %4761 = vmatmul.mubr.bf16.gmra.mrb[124].mxu0 %v4366_v48  ;;  %v4312_v8 = vmul.f32 %v8319_v41, %v11303_v11  ;;  %v4333_v35 = vmul.f32 %v11344_v16, %v4311_v21  ;;  %v11421_v34 = vld [vmem:[%s9265_s7 + $0xc8] sm:$0xff]  }
 0xfa9   : > { %v8321_v52 = vpop.eup %8320  ;;  %8326 = vrsqrt.f32 %v4284_v25  ;;  %v4270_v20 = vmul.f32 0.0078125, %v4254_v38  ;;  %4657 = vmatprep.mubr.bf16.mxu1 %v12812_v42  ;;  %4770 = vmatprep.mubr.bf16.mxu0 %v12812_v42  ;;  %v4285_v39 = vadd.f32 1e-05, %v4269_v18  ;;  %v7986_v59 = vld [vmem:[%s9265_s7 + $0x8] sm:$0xff]   ;;  %v7988_v25 = vld [vmem:[%s9265_s7 + $0x50] sm:$0xff]  }
 0xfaa   : > { %v4334_v13 = vmul.f32 %v11344_v16, %v4312_v8  ;;  %v4355_v27 = vadd.f32 %v11354_v9, %v4333_v35  ;;  %v4313_v11 = vmul.f32 %v8321_v52, %v11308_v63  ;;  %v11425_v48 = vld [vmem:[%s9265_s7 + $0x88] sm:$0xff]   ;;  %v11436_v18 = vld [vmem:[%s9265_s7 + $0xd0] sm:$0xff]   ;;  %v11447_v52 = vld [vmem:[%s9265_s7 + $0xd8] sm:$0xff]  }
 0xfab   : > { %v8323_v40 = vpop.eup %8322  ;;  %v4286_v28 = vadd.f32 1e-05, %v4270_v20  ;;  %v7990_v8 = vld [vmem:[%s9265_s7 + $0x10] sm:$0xff]   ;;  %v11451_v20 = vld [vmem:[%s9265_s7 + $0x98] sm:$0xff]  }
 0xfac   : > { %v4356_v0 = vadd.f32 %v11354_v9, %v4334_v13  ;;  %v4314_v44 = vmul.f32 %v8323_v40, %v11313_v31  ;;  %v4335_v37 = vmul.f32 %v11344_v16, %v4313_v11  ;;  %v7996_v13 = vld [vmem:[%s9265_s7 + $0x60] sm:$0xff]   ;;  %v8002_v11 = vld [vmem:[%s9265_s7 + $0x28] sm:$0xff]  }
 0xfad   : > { %8328 = vrsqrt.f32 %v4286_v28  ;;  %v11457_v40 = vld [vmem:[%s9265_s7 + $0xe0] sm:$0xff]  }
 0xfae   : > { %v4367_v56 = vpack.c.bf16 %v4356_v0, %v4355_v27  ;;  %v4336_v29 = vmul.f32 %v11344_v16, %v4314_v44  ;;  %8330 = vrsqrt.f32 %v4285_v39  ;;  %v4357_v62 = vadd.f32 %v11354_v9, %v4335_v37  ;;  %v7998_v39 = vld [vmem:[%s9265_s7 + $0x20] sm:$0xff]   ;;  %v8000_v27 = vld [vmem:[%s9265_s7 + $0x68] sm:$0xff]   ;;  %v8006_v37 = vld [vmem:[%s9265_s7 + $0x30] sm:$0xff]  }
 0xfaf   : > { %v11461_v28 = vld [vmem:[%s9265_s7 + $0xa0] sm:$0xff]   ;;  %v11466_v0 = vld [vmem:[%s9265_s7 + $0xe8] sm:$0xff]  }
 0xfb0   : > { %4658 = vmatmul.mubr.bf16.gmra.mrb[96].mxu1 %v4367_v56  ;;  %4771 = vmatmul.mubr.bf16.gmra.mrb[128].mxu0 %v4367_v56  ;;  %v4358_v63 = vadd.f32 %v11354_v9, %v4336_v29  ;;  %v11471_v44 = vld [vmem:[%s9265_s7 + $0xa8] sm:$0xff]   ;;  %v8004_v56 = vld [vmem:[%s9265_s7 + $0x70] sm:$0xff]  }
 0xfb1   : > { %v8325_v10 = vpop.eup %8324  ;;  %4667 = vmatprep.mubr.bf16.mxu1 %v12812_v42  ;;  %4780 = vmatprep.mubr.bf16.mxu0 %v12812_v42  ;;  %v11476_v29 = vld [vmem:[%s9265_s7 + $0xf0] sm:$0xff]  }
 0xfb2   : > { %v4315_v30 = vmul.f32 %v8325_v10, %v11320_v33  ;;  %v4368_v22 = vpack.c.bf16 %v4358_v63, %v4357_v62  ;;  %v7982_v33 = vld [vmem:[%s9265_s7] sm:$0xff]   ;;  %v11481_v10 = vld [vmem:[%s9265_s7 + $0xb0] sm:$0xff]   ;;  %v8008_v63 = vld [vmem:[%s9265_s7 + $0x78] sm:$0xff]  }
 0xfb3   : > { %v8327_v31 = vpop.eup %8326  ;;  %7098 = vmatpush3.bf16.msra.mxu1 %v7982_v33  ;;  %v8010_v62 = vld [vmem:[%s9265_s7 + $0x38] sm:$0xff]  }
 0xfb4   : > { %v4316_v45 = vmul.f32 %v8327_v31, %v11323_v55  ;;  %v4337_v24 = vmul.f32 %v11344_v16, %v4315_v30  ;;  %v11411_v55 = vld [vmem:[%s9265_s7 + $0x80] sm:$0xff]   ;;  %7099 = vmatprep.subr.bf16.mxu1 %v7984_v5  ;;  %v11486_v31 = vld [vmem:[%s9265_s7 + $0xf8] sm:$0xff]  }
 0xfb5   : > { %7162 = vmatpush3.bf16.msra.mxu0 %v11411_v55  ;;  %v11491_v30 = vld [vmem:[%s9265_s7 + $0xb8] sm:$0xff]  }
 0xfb6   : > { %v4338_v49 = vmul.f32 %v11344_v16, %v4316_v45  ;;  %v4359_v17 = vadd.f32 %v11354_v9, %v4337_v24  ;;  %7163 = vmatprep.subr.bf16.mxu0 %v11421_v34  ;;  %v4403_v45 = vld [vmem:[%s9305_s14] sm:$0xf] }
 0xfb7   : > { %v8329_v32 = vpop.eup %8328  ;;  %7100 = vmatpush3.bf16.msra.mxu1 %v7986_v59 }
 0xfb8   : > { %4668 = vmatmul.mubr.bf16.gmra.mrb[100].mxu1 %v4368_v22  ;;  %4781 = vmatmul.mubr.bf16.gmra.mrb[132].mxu0 %v4368_v22  ;;  %v8331_v36 = vpop.eup %8330  ;;  %v4360_v51 = vadd.f32 %v11354_v9, %v4338_v49  ;;  %v4318_v26 = vmul.f32 %v8329_v32, %v11333_v7  ;;  %v12832_v22 = vld [vmem:[#allocation22_spill] sm:$0xff] }
 0xfb9   : > { %4677 = vmatprep.mubr.bf16.mxu1 %v12812_v42  ;;  %4790 = vmatprep.mubr.bf16.mxu0 %v12812_v42  ;;  %v4317_v6 = vmul.f32 %v8331_v36, %v11328_v53  ;;  %v12833_v49 = vsub.s32 0, %v12832_v22  ;;  %v12834_v61 = vsub.s32 2, %v12832_v22  ;;  %v4419_v36 = vsub.s32 3, %v12832_v22 }
 0xfba   : > { %v4369_v21 = vpack.c.bf16 %v4360_v51, %v4359_v17  ;;  %v4340_v7 = vmul.f32 %v11344_v16, %v4318_v26  ;;  %7164 = vmatpush3.bf16.msra.mxu0 %v11425_v48  ;;  %7101 = vmatprep.subr.bf16.mxu1 %v7988_v25  ;;  %v12835_v26 = vsub.s32 1, %v12832_v22 }
 0xfbb   : > { %v4339_v53 = vmul.f32 %v11344_v16, %v4317_v6  ;;  %7165 = vmatprep.subr.bf16.mxu0 %v11436_v18  ;;  %v11442_v16 = vld [vmem:[%s9265_s7 + $0x90] sm:$0xff]   ;;  %7102 = vmatpush3.bf16.msra.mxu1 %v7990_v8  ;;  %v11499_v32 = vrot.slane %v4403_v45, %v12833_v49  ;;  %v11503_v24 = vrot.slane %v4403_v45, %v12834_v61 }
 0xfbc   : > { %v4362_v41 = vadd.f32 %v11354_v9, %v4340_v7  ;;  %v11508_v17 = vrot.slane %v4403_v45, %v12835_v26 }
 0xfbd   : > { %v4361_v38 = vadd.f32 %v11354_v9, %v4339_v53  ;;  %v7994_v9 = vld [vmem:[%s9265_s7 + $0x18] sm:$0xff]  }
 0xfbe   : > { %7166 = vmatpush3.bf16.msra.mxu0 %v11442_v16 }
 0xfbf   : > { %v4370_v35 = vpack.c.bf16 %v4362_v41, %v4361_v38  ;;  %7167 = vmatprep.subr.bf16.mxu0 %v11447_v52 }
 0xfc0   : > { %4678 = vmatmul.mubr.bf16.gmra.mrb[104].mxu1 %v4369_v21  ;;  %4791 = vmatmul.mubr.bf16.gmra.mrb[136].mxu0 %v4369_v21  ;;  %v11512_v21 = vrot.slane %v4403_v45, %v4419_v36 }
 0xfc1   : > { %4687 = vmatprep.mubr.bf16.mxu1 %v12812_v42  ;;  %4800 = vmatprep.mubr.bf16.mxu0 %v12812_v42  ;;  %v7992_v42 = vld [vmem:[%s9265_s7 + $0x58] sm:$0xff]  }
 0xfc2   : > { %7103 = vmatprep.subr.bf16.mxu1 %v7992_v42  ;;  %7168 = vmatpush3.bf16.msra.mxu0 %v11451_v20 }
 0xfc3   : > { %7104 = vmatpush3.bf16.msra.mxu1 %v7994_v9  ;;  %7169 = vmatprep.subr.bf16.mxu0 %v11457_v40 }
 0xfc4   : > { %7105 = vmatprep.subr.bf16.mxu1 %v7996_v13 }
 0xfc6   : > { %7170 = vmatpush3.bf16.msra.mxu0 %v11461_v28 }
 0xfc7   : > { %7106 = vmatpush3.bf16.msra.mxu1 %v7998_v39  ;;  %7171 = vmatprep.subr.bf16.mxu0 %v11466_v0 }
 0xfc8   : > { %4688 = vmatmul.mubr.bf16.gmra.mrb[108].mxu1 %v4370_v35  ;;  %4801 = vmatmul.mubr.bf16.gmra.mrb[140].mxu0 %v4370_v35 }
 0xfc9   : > { %7107 = vmatprep.subr.bf16.mxu1 %v8000_v27 }
 0xfca   : > { %7172 = vmatpush3.bf16.msra.mxu0 %v11471_v44 }
 0xfcb   : > { %7108 = vmatpush3.bf16.msra.mxu1 %v8002_v11  ;;  %7173 = vmatprep.subr.bf16.mxu0 %v11476_v29 }
 0xfcc   : > { %7109 = vmatprep.subr.bf16.mxu1 %v8004_v56 }
 0xfce   : > { %7174 = vmatpush3.bf16.msra.mxu0 %v11481_v10 }
 0xfcf   : > { %7110 = vmatpush3.bf16.msra.mxu1 %v8006_v37  ;;  %7175 = vmatprep.subr.bf16.mxu0 %v11486_v31 }
 0xfd0   : > { %7111 = vmatprep.subr.bf16.mxu1 %v8008_v63 }
 0xfd2   : > { %7176 = vmatpush3.bf16.msra.mxu0 %v11491_v30 }
 0xfd3   : > { %7112 = vmatpush3.bf16.msra.mxu1 %v8010_v62 }
 0xfd4   : > { %7593 = vmatprep.subr.bf16.mxu1 %v11404_v2 }
0x1035   : > { %v4619_v33 = vpop.f32.mrb[80].mxu1  ;;  %v4732_v51 = vpop.f32.mrb[112].mxu0 }
0x1036   : > { %v4620_v6 = vadd.f32 %v4619_v33, %v11499_v32  ;;  %v4733_v2 = vadd.f32 %v4732_v51, %v11503_v24  ;;  %v4621_v5 = vpop.f32.mrb[81].mxu1  ;;  %v4734_v59 = vpop.f32.mrb[113].mxu0 }
0x1037   : > { %v4623_v7 = vpop.f32.mrb[82].mxu1  ;;  %v4736_v53 = vpop.f32.mrb[114].mxu0  ;;  %v11515_v38 = vadd.f32 %v4621_v5, %v11508_v17  ;;  %v11525_v11 = vadd.f32 %v4734_v59, %v11512_v21 }
0x1038   : > { %v4875_v41 = vmul.f32 0.044715, %v4620_v6  ;;  %v4877_v25 = vmul.f32 0.044715, %v4733_v2  ;;  %v4624_v8 = vadd.f32 %v4623_v7, %v11499_v32  ;;  %v11519_v35 = vadd.f32 %v4736_v53, %v11503_v24  ;;  %v4625_v42 = vpop.f32.mrb[83].mxu1  ;;  %v4738_v9 = vpop.f32.mrb[115].mxu0 }
0x1039   : > { %v11522_v27 = vadd.f32 %v4625_v42, %v11508_v17  ;;  %v11528_v37 = vadd.f32 %v4738_v9, %v11512_v21  ;;  %v11530_v63 = vmul.f32 0.5, %v4620_v6  ;;  %v4876_v49 = vmul.f32 0.044715, %v11515_v38 }
0x103a   : > { %v4939_v13 = vmul.f32 %v4875_v41, %v4620_v6  ;;  %v4941_v39 = vmul.f32 %v4877_v25, %v4733_v2  ;;  %v4879_v56 = vmul.f32 0.044715, %v4624_v8  ;;  %v4881_v22 = vmul.f32 0.044715, %v11519_v35 }
0x103b   : > { %v4880_v36 = vmul.f32 0.044715, %v11522_v27  ;;  %v11535_v5 = vmul.f32 0.5, %v4733_v2  ;;  %v4878_v25 = vmul.f32 0.044715, %v11525_v11  ;;  %v4817_v14 = vmul.f32 0.5, %v11519_v35 }
0x103c   : > { %v5003_v62 = vmul.f32 %v4939_v13, %v4620_v6  ;;  %v5005_v45 = vmul.f32 %v4941_v39, %v4733_v2  ;;  %v4943_v61 = vmul.f32 %v4879_v56, %v4624_v8  ;;  %v4945_v7 = vmul.f32 %v4881_v22, %v11519_v35 }
0x103d   : > { %v4629_v33 = vpop.f32.mrb[84].mxu1  ;;  %v4742_v51 = vpop.f32.mrb[116].mxu0  ;;  %v4882_v9 = vmul.f32 0.044715, %v11528_v37  ;;  %v4944_v50 = vmul.f32 %v4880_v36, %v11522_v27 }
0x103e   : > { %v5067_v26 = vadd.f32 %v5003_v62, %v4620_v6  ;;  %v5069_v59 = vadd.f32 %v5005_v45, %v4733_v2  ;;  %v4631_v53 = vpop.f32.mrb[85].mxu1  ;;  %v4744_v41 = vpop.f32.mrb[117].mxu0  ;;  %v5007_v42 = vmul.f32 %v4943_v61, %v4624_v8  ;;  %v11541_v13 = vadd.f32 %v4629_v33, %v11499_v32 }
0x103f   : > { %v4633_v39 = vpop.f32.mrb[86].mxu1  ;;  %v4746_v56 = vpop.f32.mrb[118].mxu0  ;;  %v5009_v6 = vmul.f32 %v4945_v7, %v11519_v35  ;;  %v4940_v45 = vmul.f32 %v4876_v49, %v11515_v38  ;;  %v11547_v61 = vadd.f32 %v4742_v51, %v11503_v24  ;;  %v4946_v49 = vmul.f32 %v4882_v9, %v11528_v37 }
0x1040   : > { %v5131_v23 = vmul.f32 0.7978846, %v5067_v26  ;;  %v5133_v3 = vmul.f32 0.7978846, %v5069_v59  ;;  %v4635_v62 = vpop.f32.mrb[87].mxu1  ;;  %v4748_v2 = vpop.f32.mrb[119].mxu0  ;;  %v5071_v22 = vadd.f32 %v5007_v42, %v4624_v8  ;;  %v11552_v26 = vadd.f32 %v4631_v53, %v11508_v17 }
0x1041   : > { %v5073_v33 = vadd.f32 %v5009_v6, %v11519_v35  ;;  %v4883_v15 = vmul.f32 0.044715, %v11541_v13  ;;  %v4942_v59 = vmul.f32 %v4878_v25, %v11525_v11  ;;  %v11558_v51 = vadd.f32 %v4744_v41, %v11512_v21 }
0x1042   : > { %8332 = vtanh.f32 %v5131_v23  ;;  %v5135_v7 = vmul.f32 0.7978846, %v5071_v22  ;;  %v4884_v36 = vmul.f32 0.044715, %v11552_v26  ;;  %v11561_v23 = vadd.f32 %v4633_v39, %v11499_v32 }
0x1043   : > { %8334 = vtanh.f32 %v5133_v3  ;;  %v5137_v42 = vmul.f32 0.7978846, %v5073_v33  ;;  %v5004_v6 = vmul.f32 %v4940_v45, %v11515_v38  ;;  %v5008_v53 = vmul.f32 %v4944_v50, %v11522_v27 }
0x1044   : > { %8336 = vtanh.f32 %v5135_v7  ;;  %v11566_v3 = vadd.f32 %v4746_v56, %v11503_v24  ;;  %v4947_v25 = vmul.f32 %v4883_v15, %v11541_v13  ;;  %v4885_v9 = vmul.f32 0.044715, %v11547_v61 }
0x1045   : > { %8338 = vtanh.f32 %v5137_v42  ;;  %v4886_v22 = vmul.f32 0.044715, %v11558_v51  ;;  %v4815_v41 = vmul.f32 0.5, %v4624_v8  ;;  %v4948_v33 = vmul.f32 %v4884_v36, %v11552_v26 }
0x1046   : > { %v11573_v39 = vadd.f32 %v4635_v62, %v11508_v17  ;;  %v11576_v45 = vadd.f32 %v4748_v2, %v11512_v21  ;;  %v5006_v50 = vmul.f32 %v4942_v59, %v11525_v11  ;;  %v5010_v56 = vmul.f32 %v4946_v49, %v11528_v37 }
0x1047   : > { %v4887_v7 = vmul.f32 0.044715, %v11561_v23  ;;  %v4889_v15 = vmul.f32 0.044715, %v11566_v3  ;;  %v4950_v42 = vmul.f32 %v4886_v22, %v11558_v51  ;;  %v5068_v62 = vadd.f32 %v5004_v6, %v11515_v38 }
0x1048   : > { %v4888_v8 = vmul.f32 0.044715, %v11573_v39  ;;  %v4890_v36 = vmul.f32 0.044715, %v11576_v45  ;;  %v5011_v2 = vmul.f32 %v4947_v25, %v11541_v13  ;;  %v4949_v59 = vmul.f32 %v4885_v9, %v11547_v61 }
0x1049   : > { %v5072_v49 = vadd.f32 %v5008_v53, %v11522_v27  ;;  %v5012_v60 = vmul.f32 %v4948_v33, %v11552_v26  ;;  %v5132_v54 = vmul.f32 0.7978846, %v5068_v62  ;;  %v4951_v58 = vmul.f32 %v4887_v7, %v11561_v23 }
0x104a   : > { %v4952_v47 = vmul.f32 %v4888_v8, %v11573_v39  ;;  %v4954_v22 = vmul.f32 %v4890_v36, %v11576_v45  ;;  %v5070_v6 = vadd.f32 %v5006_v50, %v11525_v11  ;;  %v5074_v35 = vadd.f32 %v5010_v56, %v11528_v37 }
0x104b   : > { %v5136_v43 = vmul.f32 0.7978846, %v5072_v49  ;;  %v5014_v9 = vmul.f32 %v4950_v42, %v11558_v51  ;;  %v4953_v53 = vmul.f32 %v4889_v15, %v11566_v3  ;;  %8340 = vtanh.f32 %v5132_v54 }
0x104c   : > { %v8333_v4 = vpop.eup %8332  ;;  %v5016_v33 = vmul.f32 %v4952_v47, %v11573_v39  ;;  %v5134_v8 = vmul.f32 0.7978846, %v5070_v6  ;;  %v5138_v36 = vmul.f32 0.7978846, %v5074_v35  ;;  %v5013_v7 = vmul.f32 %v4949_v59, %v11547_v61 }
0x104d   : > { %v8335_v25 = vpop.eup %8334  ;;  %8342 = vtanh.f32 %v5136_v43  ;;  %v5259_v62 = vadd.f32 1.0, %v8333_v4  ;;  %v5018_v49 = vmul.f32 %v4954_v22, %v11576_v45  ;;  %v5076_v56 = vadd.f32 %v5012_v60, %v11552_v26 }
0x104e   : > { %v8337_v1 = vpop.eup %8336  ;;  %v5261_v50 = vadd.f32 1.0, %v8335_v25  ;;  %v5015_v42 = vmul.f32 %v4951_v58, %v11561_v23  ;;  %8344 = vtanh.f32 %v5134_v8  ;;  %v5080_v47 = vadd.f32 %v5016_v33, %v11573_v39 }
0x104f   : > { %v8339_v19 = vpop.eup %8338  ;;  %v5263_v15 = vadd.f32 1.0, %v8337_v1  ;;  %v5017_v43 = vmul.f32 %v4953_v53, %v11566_v3  ;;  %8346 = vtanh.f32 %v5138_v36  ;;  %v5140_v4 = vmul.f32 0.7978846, %v5076_v56 }
0x1050   : > { %v5265_v54 = vadd.f32 1.0, %v8339_v19  ;;  %v5323_v6 = vmul.f32 %v5259_v62, %v11530_v63  ;;  %v5144_v35 = vmul.f32 0.7978846, %v5080_v47  ;;  %v5078_v22 = vadd.f32 %v5014_v9, %v11558_v51 }
0x1051   : > { %v5327_v59 = vmul.f32 %v5263_v15, %v4815_v41  ;;  %v5325_v60 = vmul.f32 %v5261_v50, %v11535_v5  ;;  %8348 = vtanh.f32 %v5140_v4  ;;  %v5082_v58 = vadd.f32 %v5018_v49, %v11576_v45 }
0x1052   : > { %v5329_v25 = vmul.f32 %v5265_v54, %v4817_v14  ;;  %8350 = vtanh.f32 %v5144_v35  ;;  %v5142_v33 = vmul.f32 0.7978846, %v5078_v22  ;;  %v5075_v19 = vadd.f32 %v5011_v2, %v11541_v13 }
0x1053   : > { %v5387_v1 = vpack.c.bf16 %v5327_v59, %v5323_v6  ;;  %v5146_v53 = vmul.f32 0.7978846, %v5082_v58  ;;  %v5079_v36 = vadd.f32 %v5015_v42, %v11561_v23  ;;  %v5077_v63 = vadd.f32 %v5013_v7, %v11547_v61 }
0x1054   : > { %v5389_v8 = vpack.c.bf16 %v5329_v25, %v5325_v60  ;;  %8352 = vtanh.f32 %v5142_v33  ;;  %v5139_v9 = vmul.f32 0.7978846, %v5075_v19  ;;  %v5081_v14 = vadd.f32 %v5017_v43, %v11566_v3 }
0x1055   : > { %v8341_v41 = vpop.eup %8340  ;;  %8354 = vtanh.f32 %v5146_v53  ;;  %v5143_v5 = vmul.f32 0.7978846, %v5079_v36  ;;  %v4812_v49 = vmul.f32 0.5, %v11515_v38  ;;  %v5141_v56 = vmul.f32 0.7978846, %v5077_v63 }
0x1056   : > { %v5260_v50 = vadd.f32 1.0, %v8341_v41  ;;  %v4816_v15 = vmul.f32 0.5, %v11522_v27  ;;  %8356 = vtanh.f32 %v5139_v9  ;;  %v5145_v2 = vmul.f32 0.7978846, %v5081_v14 }
0x1057   : > { %v8343_v62 = vpop.eup %8342  ;;  %8358 = vtanh.f32 %v5143_v5  ;;  %v4814_v59 = vmul.f32 0.5, %v11525_v11  ;;  %v4818_v43 = vmul.f32 0.5, %v11528_v37  ;;  %v4820_v33 = vmul.f32 0.5, %v11552_v26 }
0x1058   : > { %v5264_v47 = vadd.f32 1.0, %v8343_v62  ;;  %v8345_v42 = vpop.eup %8344  ;;  %v5324_v7 = vmul.f32 %v5260_v50, %v4812_v49  ;;  %8360 = vtanh.f32 %v5141_v56  ;;  %v4824_v53 = vmul.f32 0.5, %v11573_v39 }
0x1059   : > { %v8347_v54 = vpop.eup %8346  ;;  %v5262_v6 = vadd.f32 1.0, %v8345_v42  ;;  %8362 = vtanh.f32 %v5145_v2  ;;  %v4822_v5 = vmul.f32 0.5, %v11558_v51  ;;  %v4826_v14 = vmul.f32 0.5, %v11576_v45 }
0x105a   : > { %v5328_v4 = vmul.f32 %v5264_v47, %v4816_v15  ;;  %v5266_v35 = vadd.f32 1.0, %v8347_v54  ;;  %v4819_v47 = vmul.f32 0.5, %v11541_v13 }
0x105b   : > { %v8349_v38 = vpop.eup %8348  ;;  %v5326_v27 = vmul.f32 %v5262_v6, %v4814_v59 }
0x105c   : > { %v5388_v22 = vpack.c.bf16 %v5328_v4, %v5324_v7  ;;  %v8351_v60 = vpop.eup %8350  ;;  %v5330_v25 = vmul.f32 %v5266_v35, %v4818_v43  ;;  %v5268_v58 = vadd.f32 1.0, %v8349_v38  ;;  %v4825_v7 = vmul.f32 0.5, %v11566_v3 }
0x105d   : > { %v5272_v19 = vadd.f32 1.0, %v8351_v60 }
0x105e   : > { %5714 = vmatprep.mubr.bf16.mxu1 %v5388_v22  ;;  %v8353_v36 = vpop.eup %8352  ;;  %v5390_v63 = vpack.c.bf16 %v5330_v25, %v5326_v27  ;;  %v5332_v41 = vmul.f32 %v5268_v58, %v4820_v33 }
0x105f   : > { %5715 = vmatmul.mubr.bf16.vlgmr.msra.gmra.mrb[112].mxu1 %v5387_v1  ;;  %v8355_v11 = vpop.eup %8354  ;;  %v5336_v37 = vmul.f32 %v5272_v19, %v4824_v53  ;;  %v5270_v9 = vadd.f32 1.0, %v8353_v36 }
0x1060   : > { %7601 = vmatpush3.bf16.msra.mxu1 %v11411_v55  ;;  %5811 = vmatprep.mubr.bf16.mxu0 %v5390_v63  ;;  %v5274_v62 = vadd.f32 1.0, %v8355_v11  ;;  %v8357_v26 = vpop.eup %8356  ;;  %v4823_v55 = vmul.f32 0.5, %v11561_v23 }
0x1061   : > { %7594 = vmatprep.subr.bf16.mxu1 %v11421_v34  ;;  %5812 = vmatmul.mubr.bf16.vlgmr.msra.gmra.mrb[144].mxu0 %v5389_v8  ;;  %v5392_v39 = vpack.c.bf16 %v5336_v37, %v5332_v41  ;;  %v8359_v49 = vpop.eup %8358  ;;  %v5334_v50 = vmul.f32 %v5270_v9, %v4822_v5  ;;  %v5267_v56 = vadd.f32 1.0, %v8357_v26  ;;  %v4821_v34 = vmul.f32 0.5, %v11547_v61 }
0x1062   : > { %v5338_v1 = vmul.f32 %v5274_v62, %v4826_v14  ;;  %v8361_v15 = vpop.eup %8360  ;;  %v5271_v2 = vadd.f32 1.0, %v8359_v49 }
0x1063   : > { %5722 = vmatprep.mubr.bf16.mxu1 %v5392_v39  ;;  %v8363_v51 = vpop.eup %8362  ;;  %v5269_v42 = vadd.f32 1.0, %v8361_v15  ;;  %v5331_v8 = vmul.f32 %v5267_v56, %v4819_v47 }
0x1064   : > { %7602 = vmatpush3.bf16.msra.mxu1 %v11425_v48  ;;  %v5394_v45 = vpack.c.bf16 %v5338_v1, %v5334_v50  ;;  %v5335_v54 = vmul.f32 %v5271_v2, %v4823_v55  ;;  %v5273_v4 = vadd.f32 1.0, %v8363_v51 }
0x1065   : > { %7595 = vmatprep.subr.bf16.mxu1 %v11436_v18  ;;  %v5333_v13 = vmul.f32 %v5269_v42, %v4821_v34 }
0x1066   : > { %5819 = vmatprep.mubr.bf16.mxu0 %v5394_v45  ;;  %v5391_v6 = vpack.c.bf16 %v5335_v54, %v5331_v8  ;;  %v5337_v59 = vmul.f32 %v5273_v4, %v4825_v7 }
0x1068   : > { %7603 = vmatpush3.bf16.msra.mxu1 %v11442_v16  ;;  %v5393_v48 = vpack.c.bf16 %v5337_v59, %v5333_v13 }
0x1069   : > { %7596 = vmatprep.subr.bf16.mxu1 %v11447_v52  ;;  %5723 = vmatmul.mubr.bf16.gmra.mrb[116].mxu1 %v5391_v6 }
0x106a   : > { %5820 = vmatmul.mubr.bf16.gmra.mrb[148].mxu0 %v5393_v48 }
0x106c   : > { %7604 = vmatpush3.bf16.msra.mxu1 %v11451_v20 }
0x106d   : > { %7597 = vmatprep.subr.bf16.mxu1 %v11457_v40 }
0x1070   : > { %7605 = vmatpush3.bf16.msra.mxu1 %v11461_v28 }
0x1071   : > { %7598 = vmatprep.subr.bf16.mxu1 %v11466_v0 }
0x1073   : > { %v4639_v18 = vpop.f32.mrb[88].mxu1  ;;  %v4752_v61 = vpop.f32.mrb[120].mxu0 }
0x1074   : > { %v11636_v23 = vadd.f32 %v4639_v18, %v11499_v32  ;;  %v11639_v16 = vadd.f32 %v4752_v61, %v11503_v24  ;;  %v4641_v52 = vpop.f32.mrb[89].mxu1  ;;  %v4754_v3 = vpop.f32.mrb[121].mxu0  ;;  %7606 = vmatpush3.bf16.msra.mxu1 %v11471_v44 }
0x1075   : > { %v11642_v43 = vadd.f32 %v4641_v52, %v11508_v17  ;;  %v11645_v20 = vadd.f32 %v4754_v3, %v11512_v21  ;;  %v4643_v40 = vpop.f32.mrb[90].mxu1  ;;  %v4756_v28 = vpop.f32.mrb[122].mxu0  ;;  %7599 = vmatprep.subr.bf16.mxu1 %v11476_v29 }
0x1076   : > { %v4891_v0 = vmul.f32 0.044715, %v11636_v23  ;;  %v11650_v35 = vadd.f32 %v4643_v40, %v11499_v32  ;;  %v11653_v38 = vadd.f32 %v4756_v28, %v11503_v24  ;;  %v4645_v22 = vpop.f32.mrb[91].mxu1  ;;  %v4758_v60 = vpop.f32.mrb[123].mxu0  ;;  %v4893_v27 = vmul.f32 0.044715, %v11639_v16 }
0x1077   : > { %v4892_v25 = vmul.f32 0.044715, %v11642_v43  ;;  %v11659_v58 = vadd.f32 %v4645_v22, %v11508_v17  ;;  %v11662_v44 = vadd.f32 %v4758_v60, %v11512_v21  ;;  %v4894_v33 = vmul.f32 0.044715, %v11645_v20 }
0x1078   : > { %v4895_v53 = vmul.f32 0.044715, %v11650_v35  ;;  %v4897_v19 = vmul.f32 0.044715, %v11653_v38  ;;  %7607 = vmatpush3.bf16.msra.mxu1 %v11481_v10  ;;  %v4955_v63 = vmul.f32 %v4891_v0, %v11636_v23  ;;  %v4957_v11 = vmul.f32 %v4893_v27, %v11639_v16 }
0x1079   : > { %v4896_v36 = vmul.f32 0.044715, %v11659_v58  ;;  %v4898_v29 = vmul.f32 0.044715, %v11662_v44  ;;  %7600 = vmatprep.subr.bf16.mxu1 %v11486_v31  ;;  %v4956_v41 = vmul.f32 %v4892_v25, %v11642_v43  ;;  %v4958_v5 = vmul.f32 %v4894_v33, %v11645_v20 }
0x107a   : > { %v4959_v14 = vmul.f32 %v4895_v53, %v11650_v35  ;;  %v4961_v39 = vmul.f32 %v4897_v19, %v11653_v38  ;;  %v11708_v7 = vmul.f32 %v4955_v63, %v11636_v23  ;;  %v11711_v4 = vmul.f32 %v4957_v11, %v11639_v16 }
0x107b   : > { %v4649_v37 = vpop.f32.mrb[92].mxu1  ;;  %v4762_v9 = vpop.f32.mrb[124].mxu0  ;;  %v4960_v49 = vmul.f32 %v4896_v36, %v11659_v58  ;;  %v4962_v47 = vmul.f32 %v4898_v29, %v11662_v44  ;;  %v11716_v59 = vmul.f32 %v4956_v41, %v11642_v43  ;;  %v11719_v48 = vmul.f32 %v4958_v5, %v11645_v20 }
0x107c   : > { %v11677_v62 = vadd.f32 %v4649_v37, %v11499_v32  ;;  %v11680_v10 = vadd.f32 %v4762_v9, %v11503_v24  ;;  %v4651_v26 = vpop.f32.mrb[93].mxu1  ;;  %v4764_v31 = vpop.f32.mrb[125].mxu0  ;;  %7608 = vmatpush3.bf16.msra.mxu1 %v11491_v30  ;;  %v11724_v52 = vmul.f32 %v4959_v14, %v11650_v35  ;;  %v11727_v3 = vmul.f32 %v4961_v39, %v11653_v38 }
0x107d   : > { %v11685_v50 = vadd.f32 %v4651_v26, %v11508_v17  ;;  %v11688_v1 = vadd.f32 %v4764_v31, %v11512_v21  ;;  %v4653_v56 = vpop.f32.mrb[94].mxu1  ;;  %v4766_v15 = vpop.f32.mrb[126].mxu0  ;;  %v11730_v40 = vmul.f32 %v4960_v49, %v11659_v58  ;;  %v11734_v0 = vmul.f32 %v4962_v47, %v11662_v44 }
0x107e   : > { %12836 = vst [vmem:[#allocation23_spill] sm:$0xff] %v11677_v62  ;;  %12837 = vst [vmem:[#allocation42_spill] sm:$0xff] %v11680_v10  ;;  %v4899_v55 = vmul.f32 0.044715, %v11677_v62  ;;  %v11694_v2 = vadd.f32 %v4653_v56, %v11499_v32  ;;  %v11697_v51 = vadd.f32 %v4766_v15, %v11503_v24  ;;  %v4655_v45 = vpop.f32.mrb[95].mxu1  ;;  %v4768_v34 = vpop.f32.mrb[127].mxu0 }
0x107f   : > { %v4901_v42 = vmul.f32 0.044715, %v11680_v10  ;;  %v4900_v8 = vmul.f32 0.044715, %v11685_v50  ;;  %v11702_v54 = vadd.f32 %v4655_v45, %v11508_v17  ;;  %v11705_v30 = vadd.f32 %v4768_v34, %v11512_v21 }
0x1080   : > { %12838 = vst [vmem:[#allocation63_spill] sm:$0xff] %v11694_v2  ;;  %12839 = vst [vmem:[#allocation65_spill] sm:$0xff] %v11697_v51  ;;  %v4902_v6 = vmul.f32 0.044715, %v11688_v1  ;;  %v4903_v13 = vmul.f32 0.044715, %v11694_v2  ;;  %v4963_v22 = vmul.f32 %v4899_v55, %v11677_v62 }
0x1081   : > { %v4905_v18 = vmul.f32 0.044715, %v11697_v51  ;;  %v4904_v61 = vmul.f32 0.044715, %v11702_v54  ;;  %v4906_v28 = vmul.f32 0.044715, %v11705_v30  ;;  %v4965_v60 = vmul.f32 %v4901_v42, %v11680_v10 }
0x1082   : > { %v4964_v27 = vmul.f32 %v4900_v8, %v11685_v50  ;;  %v4966_v53 = vmul.f32 %v4902_v6, %v11688_v1  ;;  %v4967_v19 = vmul.f32 %v4903_v13, %v11694_v2  ;;  %v11770_v8 = vmul.f32 %v4963_v22, %v11677_v62 }
0x1083   : > { %v4659_v25 = vpop.f32.mrb[96].mxu1  ;;  %v4772_v33 = vpop.f32.mrb[128].mxu0  ;;  %v4969_v41 = vmul.f32 %v4905_v18, %v11697_v51  ;;  %v4968_v37 = vmul.f32 %v4904_v61, %v11702_v54  ;;  %v4970_v31 = vmul.f32 %v4906_v28, %v11705_v30  ;;  %v11773_v6 = vmul.f32 %v4965_v60, %v11680_v10 }
0x1084   : > { %v11742_v36 = vadd.f32 %v4659_v25, %v11499_v32  ;;  %v11745_v29 = vadd.f32 %v4772_v33, %v11503_v24  ;;  %v4661_v63 = vpop.f32.mrb[97].mxu1  ;;  %v4774_v11 = vpop.f32.mrb[129].mxu0  ;;  %12844 = vst [vmem:[#allocation67_spill] sm:$0xff] %v11770_v8  ;;  %v11780_v61 = vmul.f32 %v4964_v27, %v11685_v50  ;;  %v11783_v28 = vmul.f32 %v4966_v53, %v11688_v1 }
0x1085   : > { %v11750_v9 = vadd.f32 %v4661_v63, %v11508_v17  ;;  %v11753_v5 = vadd.f32 %v4774_v11, %v11512_v21  ;;  %v4663_v14 = vpop.f32.mrb[98].mxu1  ;;  %v4776_v26 = vpop.f32.mrb[130].mxu0  ;;  %12845 = vst [vmem:[#allocation68_spill] sm:$0xff] %v11773_v6  ;;  %v11788_v22 = vmul.f32 %v4967_v19, %v11694_v2  ;;  %v11791_v60 = vmul.f32 %v4969_v41, %v11697_v51 }
0x1086   : > { %12840 = vst [vmem:[#allocation27_spill] sm:$0xff] %v11742_v36  ;;  %12841 = vst [vmem:[#allocation64_spill] sm:$0xff] %v11745_v29  ;;  %v4907_v39 = vmul.f32 0.044715, %v11742_v36  ;;  %v11758_v49 = vadd.f32 %v4663_v14, %v11499_v32  ;;  %v11761_v56 = vadd.f32 %v4776_v26, %v11503_v24  ;;  %v4665_v15 = vpop.f32.mrb[99].mxu1  ;;  %v4778_v47 = vpop.f32.mrb[131].mxu0  ;;  %v11794_v63 = vmul.f32 %v4968_v37, %v11702_v54 }
0x1087   : > { %v4909_v55 = vmul.f32 0.044715, %v11745_v29  ;;  %v4908_v45 = vmul.f32 0.044715, %v11750_v9  ;;  %v4910_v34 = vmul.f32 0.044715, %v11753_v5  ;;  %v11767_v42 = vadd.f32 %v4665_v15, %v11508_v17 }
0x1088   : > { %12842 = vst [vmem:[#allocation37_spill] sm:$0xff] %v11758_v49  ;;  %12843 = vst [vmem:[#allocation69_spill] sm:$0xff] %v11761_v56  ;;  %v4911_v13 = vmul.f32 0.044715, %v11758_v49  ;;  %v11777_v18 = vadd.f32 %v4778_v47, %v11512_v21  ;;  %v4913_v25 = vmul.f32 0.044715, %v11761_v56  ;;  %v11797_v11 = vmul.f32 %v4970_v31, %v11705_v30 }
0x1089   : > { %v4912_v33 = vmul.f32 0.044715, %v11767_v42  ;;  %12847 = vst [vmem:[#allocation43_spill] sm:$0xff] %v11788_v22  ;;  %12848 = vst [vmem:[#allocation71_spill] sm:$0xff] %v11791_v60  ;;  %v4971_v27 = vmul.f32 %v4907_v39, %v11742_v36  ;;  %v4973_v53 = vmul.f32 %v4909_v55, %v11745_v29  ;;  %v4972_v14 = vmul.f32 %v4908_v45, %v11750_v9 }
0x108a   : > { %12846 = vst [vmem:[#allocation66_spill] sm:$0xff] %v11777_v18  ;;  %v4974_v26 = vmul.f32 %v4910_v34, %v11753_v5  ;;  %v4975_v47 = vmul.f32 %v4911_v13, %v11758_v49  ;;  %v4914_v41 = vmul.f32 0.044715, %v11777_v18  ;;  %v4977_v55 = vmul.f32 %v4913_v25, %v11761_v56 }
0x108b   : > { %v4669_v15 = vpop.f32.mrb[100].mxu1  ;;  %v4782_v19 = vpop.f32.mrb[132].mxu0  ;;  %v4976_v45 = vmul.f32 %v4912_v33, %v11767_v42  ;;  %v11836_v22 = vmul.f32 %v4971_v27, %v11742_v36  ;;  %v11844_v8 = vmul.f32 %v4972_v14, %v11750_v9 }
0x108c   : > { %v11806_v37 = vadd.f32 %v4669_v15, %v11499_v32  ;;  %v11809_v31 = vadd.f32 %v4782_v19, %v11503_v24  ;;  %v4671_v46 = vpop.f32.mrb[101].mxu1  ;;  %v4784_v39 = vpop.f32.mrb[133].mxu0  ;;  %v11847_v62 = vmul.f32 %v4974_v26, %v11753_v5  ;;  %v11852_v27 = vmul.f32 %v4975_v47, %v11758_v49 }
0x108d   : > { %v11814_v34 = vadd.f32 %v4671_v46, %v11508_v17  ;;  %v11817_v57 = vadd.f32 %v4784_v39, %v11512_v21  ;;  %v4673_v13 = vpop.f32.mrb[102].mxu1  ;;  %v4786_v12 = vpop.f32.mrb[134].mxu0  ;;  %12855 = vst [vmem:[#allocation50_spill] sm:$0xff] %v11836_v22  ;;  %v11861_v14 = vmul.f32 %v4976_v45, %v11767_v42 }
0x108e   : > { %12849 = vst [vmem:[#allocation70_spill] sm:$0xff] %v11806_v37  ;;  %12850 = vst [vmem:[#allocation73_spill] sm:$0xff] %v11809_v31  ;;  %v4915_v15 = vmul.f32 0.044715, %v11806_v37  ;;  %v4917_v60 = vmul.f32 0.044715, %v11809_v31  ;;  %v11822_v19 = vadd.f32 %v4673_v13, %v11499_v32  ;;  %v11825_v51 = vadd.f32 %v4786_v12, %v11503_v24 }
0x108f   : > { %12851 = vst [vmem:[#allocation72_spill] sm:$0xff] %v11817_v57  ;;  %v4675_v25 = vpop.f32.mrb[103].mxu1  ;;  %v4788_v33 = vpop.f32.mrb[135].mxu0  ;;  %v4916_v46 = vmul.f32 0.044715, %v11814_v34  ;;  %v11839_v13 = vmul.f32 %v4973_v53, %v11745_v29  ;;  %v4978_v12 = vmul.f32 %v4914_v41, %v11777_v18  ;;  %12857 = vst [vmem:[#allocation46_spill] sm:$0xff] %v11847_v62  ;;  %v11858_v29 = vmul.f32 %v4977_v55, %v11761_v56 }
0x1090   : > { %12852 = vst [vmem:[#allocation48_spill] sm:$0xff] %v11822_v19  ;;  %12853 = vst [vmem:[#allocation74_spill] sm:$0xff] %v11825_v51  ;;  %v4918_v6 = vmul.f32 0.044715, %v11817_v57  ;;  %v11830_v39 = vadd.f32 %v4675_v25, %v11508_v17  ;;  %v11833_v10 = vadd.f32 %v4788_v33, %v11512_v21  ;;  %v4919_v2 = vmul.f32 0.044715, %v11822_v19 }
0x1091   : > { %12856 = vst [vmem:[#allocation52_spill] sm:$0xff] %v11839_v13  ;;  %v4921_v25 = vmul.f32 0.044715, %v11825_v51  ;;  %12858 = vst [vmem:[#allocation49_spill] sm:$0xff] %v11852_v27  ;;  %v4979_v53 = vmul.f32 %v4915_v15, %v11806_v37  ;;  %v4981_v13 = vmul.f32 %v4917_v60, %v11809_v31  ;;  %v4980_v26 = vmul.f32 %v4916_v46, %v11814_v34 }
0x1092   : > { %12854 = vst [vmem:[#allocation47_spill] sm:$0xff] %v11833_v10  ;;  %v4920_v33 = vmul.f32 0.044715, %v11830_v39  ;;  %v4922_v41 = vmul.f32 0.044715, %v11833_v10  ;;  %12859 = vst [vmem:[#allocation51_spill] sm:$0xff] %v11858_v29  ;;  %v4982_v22 = vmul.f32 %v4918_v6, %v11817_v57  ;;  %v11866_v47 = vmul.f32 %v4978_v12, %v11777_v18 }
0x1093   : > { %v4679_v36 = vpop.f32.mrb[104].mxu1  ;;  %v4792_v62 = vpop.f32.mrb[136].mxu0  ;;  %v4983_v15 = vmul.f32 %v4919_v2, %v11822_v19  ;;  %v4985_v45 = vmul.f32 %v4921_v25, %v11825_v51  ;;  %v11882_v2 = vmul.f32 %v4979_v53, %v11806_v37  ;;  %v11889_v25 = vmul.f32 %v4980_v26, %v11814_v34 }
0x1094   : > { %12860 = vst [vmem:[#allocation54_spill] sm:$0xff] %v11866_v47  ;;  %v11870_v60 = vadd.f32 %v4679_v36, %v11499_v32  ;;  %v4793_v55 = vadd.f32 %v4792_v62, %v11503_v24  ;;  %v4681_v29 = vpop.f32.mrb[105].mxu1  ;;  %v4794_v56 = vpop.f32.mrb[137].mxu0  ;;  %v4984_v46 = vmul.f32 %v4920_v33, %v11830_v39  ;;  %v11885_v36 = vmul.f32 %v4981_v13, %v11809_v31 }
0x1095   : > { %v11876_v6 = vadd.f32 %v4681_v29, %v11508_v17  ;;  %v11879_v27 = vadd.f32 %v4794_v56, %v11512_v21  ;;  %v4683_v12 = vpop.f32.mrb[106].mxu1  ;;  %v4796_v49 = vpop.f32.mrb[138].mxu0  ;;  %12862 = vst [vmem:[#allocation56_spill] sm:$0xff] %v11882_v2  ;;  %v4986_v62 = vmul.f32 %v4922_v41, %v11833_v10  ;;  %v11892_v29 = vmul.f32 %v4982_v22, %v11817_v57 }
0x1096   : > { %12863 = vst [vmem:[#allocation55_spill] sm:$0xff] %v11885_v36  ;;  %v4925_v47 = vmul.f32 0.044715, %v4793_v55  ;;  %v4923_v56 = vmul.f32 0.044715, %v11870_v60  ;;  %v5084_v33 = vadd.f32 %v11716_v59, %v11642_v43  ;;  %v4685_v18 = vpop.f32.mrb[107].mxu1  ;;  %v11898_v53 = vmul.f32 %v4983_v15, %v11822_v19 }
0x1097   : > { %12861 = vst [vmem:[#allocation53_spill] sm:$0xff] %v11879_v27  ;;  %12864 = vst [vmem:[#allocation57_spill] sm:$0xff] %v11892_v29  ;;  %v4924_v36 = vmul.f32 0.044715, %v11876_v6  ;;  %v5088_v41 = vadd.f32 %v11730_v40, %v11659_v58  ;;  %v4798_v26 = vpop.f32.mrb[139].mxu0  ;;  %v11904_v31 = vmul.f32 %v4985_v45, %v11825_v51  ;;  %v11907_v22 = vmul.f32 %v4984_v46, %v11830_v39 }
0x1098   : > { %12865 = vst [vmem:[#allocation58_spill] sm:$0xff] %v11898_v53  ;;  %v4989_v13 = vmul.f32 %v4925_v47, %v4793_v55  ;;  %v4926_v2 = vmul.f32 0.044715, %v11879_v27  ;;  %v5148_v59 = vmul.f32 0.7978846, %v5084_v33  ;;  %v11911_v37 = vmul.f32 %v4986_v62, %v11833_v10 }
0x1099   : > { %12866 = vst [vmem:[#allocation60_spill] sm:$0xff] %v11904_v31  ;;  %v11913_v15 = vmul.f32 0.5, %v4793_v55  ;;  %v5152_v47 = vmul.f32 0.7978846, %v5088_v41  ;;  %v5086_v53 = vadd.f32 %v11719_v48, %v11645_v20  ;;  %v4987_v40 = vmul.f32 %v4923_v56, %v11870_v60 }
0x109a   : > { %12867 = vst [vmem:[#allocation45_spill] sm:$0xff] %v11911_v37  ;;  %v11919_v45 = vmul.f32 0.5, %v11642_v43  ;;  %8364 = vtanh.f32 %v5148_v59  ;;  %v5090_v46 = vadd.f32 %v11734_v0, %v11662_v44  ;;  %v5053_v51 = vmul.f32 %v4989_v13, %v4793_v55 }
0x109b   : > { %12868 = vst [vmem:[#allocation44_spill] sm:$0xff] %v11913_v15  ;;  %v4689_v31 = vpop.f32.mrb[108].mxu1  ;;  %v4802_v33 = vpop.f32.mrb[140].mxu0  ;;  %v4988_v62 = vmul.f32 %v4924_v36, %v11876_v6  ;;  %8366 = vtanh.f32 %v5152_v47  ;;  %v5150_v15 = vmul.f32 0.7978846, %v5086_v53  ;;  %v4990_v48 = vmul.f32 %v4926_v2, %v11879_v27 }
0x109c   : > { %v4691_v41 = vpop.f32.mrb[109].mxu1  ;;  %v11924_v19 = vpop.f32.mrb[141].mxu0  ;;  %v4832_v56 = vmul.f32 0.5, %v11659_v58  ;;  %v5154_v43 = vmul.f32 0.7978846, %v5090_v46  ;;  %v4797_v59 = vadd.f32 %v4796_v49, %v11503_v24  ;;  %v11934_v13 = vmul.f32 0.5, %v11645_v20 }
0x109d   : > { %v11929_v37 = vpop.f32.mrb[110].mxu1  ;;  %v11931_v0 = vpop.f32.mrb[142].mxu0  ;;  %8368 = vtanh.f32 %v5150_v15  ;;  %v11937_v36 = vadd.f32 %v4683_v12, %v11499_v32  ;;  %v5083_v53 = vadd.f32 %v11708_v7, %v11636_v23  ;;  %v4834_v49 = vmul.f32 0.5, %v11662_v44 }
0x109e   : > { %v11941_v2 = vpop.f32.mrb[111].mxu1  ;;  %v11943_v58 = vpop.f32.mrb[143].mxu0  ;;  %8370 = vtanh.f32 %v5154_v43  ;;  %v4929_v47 = vmul.f32 0.044715, %v4797_v59  ;;  %v5087_v46 = vadd.f32 %v11724_v52, %v11650_v35  ;;  %v11949_v20 = vmul.f32 %v4987_v40, %v11870_v60 }
0x109f   : > { %v5117_v15 = vadd.f32 %v5053_v51, %v4793_v55  ;;  %v11952_v12 = vmul.f32 %v4988_v62, %v11876_v6  ;;  %v5147_v10 = vmul.f32 0.7978846, %v5083_v53  ;;  %v11955_v7 = vmul.f32 %v4990_v48, %v11879_v27 }
0x10a0   : > { %12869 = vst [vmem:[#allocation62_spill] sm:$0xff] %v11949_v20  ;;  %v4993_v29 = vmul.f32 %v4929_v47, %v4797_v59  ;;  %v5151_v57 = vmul.f32 0.7978846, %v5087_v46  ;;  %v5085_v44 = vadd.f32 %v11711_v4, %v11639_v16  ;;  %v4927_v43 = vmul.f32 0.044715, %v11937_v36 }
0x10a1   : > { %12870 = vst [vmem:[#allocation59_spill] sm:$0xff] %v11955_v7  ;;  %8372 = vtanh.f32 %v5147_v10  ;;  %v5089_v52 = vadd.f32 %v11727_v3, %v11653_v38  ;;  %v11963_v51 = vadd.f32 %v4685_v18, %v11508_v17  ;;  %v11966_v62 = vadd.f32 %v4798_v26, %v11512_v21 }
0x10a2   : > { %v5057_v55 = vmul.f32 %v4993_v29, %v4797_v59  ;;  %8374 = vtanh.f32 %v5151_v57  ;;  %v5149_v40 = vmul.f32 0.7978846, %v5085_v44  ;;  %v5181_v48 = vmul.f32 0.7978846, %v5117_v15 }
0x10a3   : > { %v5153_v53 = vmul.f32 0.7978846, %v5089_v52  ;;  %v4928_v47 = vmul.f32 0.044715, %v11963_v51  ;;  %v11970_v4 = vadd.f32 %v4689_v31, %v11499_v32  ;;  %v4827_v3 = vmul.f32 0.5, %v11636_v23 }
0x10a4   : > { %v8365_v10 = vpop.eup %8364  ;;  %v5121_v46 = vadd.f32 %v5057_v55, %v4797_v59  ;;  %v4831_v18 = vmul.f32 0.5, %v11650_v35  ;;  %8376 = vtanh.f32 %v5149_v40  ;;  %v4930_v26 = vmul.f32 0.044715, %v11966_v62 }
0x10a5   : > { %v8367_v29 = vpop.eup %8366  ;;  %v5276_v57 = vadd.f32 1.0, %v8365_v10  ;;  %8378 = vtanh.f32 %v5153_v53  ;;  %v4931_v15 = vmul.f32 0.044715, %v11970_v4  ;;  %v4991_v52 = vmul.f32 %v4927_v43, %v11937_v36 }
0x10a6   : > { %v5280_v44 = vadd.f32 1.0, %v8367_v29  ;;  %v4992_v31 = vmul.f32 %v4928_v47, %v11963_v51  ;;  %v11979_v7 = vadd.f32 %v4802_v33, %v11503_v24  ;;  %8380 = vtanh.f32 %v5181_v48 }
0x10a7   : > { %v8369_v55 = vpop.eup %8368  ;;  %v11981_v23 = vmul.f32 0.5, %v4797_v59  ;;  %v5185_v35 = vmul.f32 0.7978846, %v5121_v46  ;;  %v11984_v40 = vadd.f32 %v4691_v41, %v11508_v17  ;;  %v5340_v10 = vmul.f32 %v5276_v57, %v11919_v45 }
0x10a8   : > { %v8371_v53 = vpop.eup %8370  ;;  %v5344_v27 = vmul.f32 %v5280_v44, %v4832_v56  ;;  %v5278_v29 = vadd.f32 1.0, %v8369_v55  ;;  %v4829_v43 = vmul.f32 0.5, %v11639_v16  ;;  %v4833_v47 = vmul.f32 0.5, %v11653_v38 }
0x10a9   : > { %v5282_v20 = vadd.f32 1.0, %v8371_v53  ;;  %v4994_v33 = vmul.f32 %v4930_v26, %v11966_v62  ;;  %v4995_v48 = vmul.f32 %v4931_v15, %v11970_v4  ;;  %v11992_v46 = vmul.f32 %v4991_v52, %v11937_v36 }
0x10aa   : > { %v5396_v59 = vpack.c.bf16 %v5344_v27, %v5340_v10  ;;  %v11995_v41 = vmul.f32 %v4992_v31, %v11963_v51  ;;  %v4933_v45 = vmul.f32 0.044715, %v11979_v7  ;;  %v5342_v57 = vmul.f32 %v5278_v29, %v11934_v13 }
0x10ab   : > { %v8373_v56 = vpop.eup %8372  ;;  %v5346_v16 = vmul.f32 %v5282_v20, %v4834_v49  ;;  %8382 = vtanh.f32 %v5185_v35  ;;  %v4932_v38 = vmul.f32 0.044715, %v11984_v40  ;;  %v12002_v27 = vadd.f32 %v11924_v19, %v11512_v21 }
0x10ac   : > { %v8375_v44 = vpop.eup %8374  ;;  %5730 = vmatprep.mubr.bf16.mxu1 %v5396_v59  ;;  %v5275_v26 = vadd.f32 1.0, %v8373_v56  ;;  %v5092_v15 = vadd.f32 %v11780_v61, %v11685_v50  ;;  %v5096_v52 = vadd.f32 %v11794_v63, %v11702_v54  ;;  %v12009_v13 = vmul.f32 %v4994_v33, %v11966_v62 }
0x10ad   : > { %v5398_v31 = vpack.c.bf16 %v5346_v16, %v5342_v57  ;;  %v5279_v55 = vadd.f32 1.0, %v8375_v44  ;;  %v12012_v49 = vmul.f32 %v4995_v48, %v11970_v4  ;;  %v4997_v53 = vmul.f32 %v4933_v45, %v11979_v7 }
0x10ae   : > { %v8377_v20 = vpop.eup %8376  ;;  %v5339_v35 = vmul.f32 %v5275_v26, %v4827_v3  ;;  %v5156_v19 = vmul.f32 0.7978846, %v5092_v15  ;;  %v5160_v10 = vmul.f32 0.7978846, %v5096_v52  ;;  %v5094_v63 = vadd.f32 %v11783_v28, %v11688_v1  ;;  %v12872_v52 = vld [vmem:[#allocation67_spill] sm:$0xff] }
0x10af   : > { %v8379_v29 = vpop.eup %8378  ;;  %5827 = vmatprep.mubr.bf16.mxu0 %v5398_v31  ;;  %v5343_v61 = vmul.f32 %v5279_v55, %v4831_v18  ;;  %v5277_v59 = vadd.f32 1.0, %v8377_v20  ;;  %v5098_v33 = vadd.f32 %v11797_v11, %v11705_v30  ;;  %v4934_v48 = vmul.f32 0.044715, %v12002_v27  ;;  %v12874_v20 = vld [vmem:[#allocation43_spill] sm:$0xff] }
0x10b0   : > { %v5281_v56 = vadd.f32 1.0, %v8379_v29  ;;  %8384 = vtanh.f32 %v5156_v19  ;;  %v12022_v3 = vadd.f32 %v11929_v37, %v11499_v32  ;;  %v12024_v45 = vpop.eup %8380  ;;  %v4996_v18 = vmul.f32 %v4932_v38, %v11984_v40  ;;  %v12871_v37 = vld [vmem:[#allocation23_spill] sm:$0xff]  ;;  %v12875_v29 = vld [vmem:[#allocation42_spill] sm:$0xff] }
0x10b1   : > { %v5395_v57 = vpack.c.bf16 %v5343_v61, %v5339_v35  ;;  %8386 = vtanh.f32 %v5160_v10  ;;  %v5158_v16 = vmul.f32 0.7978846, %v5094_v63  ;;  %v5341_v44 = vmul.f32 %v5277_v59, %v4829_v43  ;;  %v12876_v61 = vld [vmem:[#allocation68_spill] sm:$0xff]  ;;  %v12877_v63 = vld [vmem:[#allocation65_spill] sm:$0xff] }
0x10b2   : > { %v5345_v28 = vmul.f32 %v5281_v56, %v4833_v47  ;;  %v5162_v26 = vmul.f32 0.7978846, %v5098_v33  ;;  %v12029_v11 = vadd.f32 %v11931_v0, %v11503_v24  ;;  %v4836_v15 = vmul.f32 0.5, %v11685_v50  ;;  %v12873_v0 = vld [vmem:[#allocation63_spill] sm:$0xff] }
0x10b3   : > { %5731 = vmatmul.mubr.bf16.gmra.mrb[120].mxu1 %v5395_v57  ;;  %8388 = vtanh.f32 %v5158_v16  ;;  %v4935_v32 = vmul.f32 0.044715, %v12022_v3  ;;  %v5091_v31 = vadd.f32 %v12872_v52, %v12871_v37  ;;  %v12036_v38 = vmul.f32 %v4997_v53, %v11979_v7  ;;  %v12878_v33 = vld [vmem:[#allocation71_spill] sm:$0xff] }
0x10b4   : > { %v5397_v55 = vpack.c.bf16 %v5345_v28, %v5341_v44  ;;  %v4998_v43 = vmul.f32 %v4934_v48, %v12002_v27  ;;  %8390 = vtanh.f32 %v5162_v26  ;;  %v12042_v24 = vmul.f32 %v4996_v18, %v11984_v40 }
0x10b5   : > { %v12039_v47 = vpop.eup %8382  ;;  %v4937_v50 = vmul.f32 0.044715, %v12029_v11  ;;  %v5095_v35 = vadd.f32 %v12874_v20, %v12873_v0  ;;  %v5155_v19 = vmul.f32 0.7978846, %v5091_v31  ;;  %v4840_v10 = vmul.f32 0.5, %v11702_v54 }
0x10b6   : > { %5828 = vmatmul.mubr.bf16.gmra.mrb[152].mxu0 %v5397_v55  ;;  %v4838_v53 = vmul.f32 0.5, %v11688_v1  ;;  %v5093_v59 = vadd.f32 %v12876_v61, %v12875_v29  ;;  %v5097_v56 = vadd.f32 %v12878_v33, %v12877_v63  ;;  %v4842_v48 = vmul.f32 0.5, %v11705_v30 }
0x10b7   : > { %v4999_v57 = vmul.f32 %v4935_v32, %v12022_v3  ;;  %v5159_v18 = vmul.f32 0.7978846, %v5095_v35  ;;  %8392 = vtanh.f32 %v5155_v19  ;;  %v12056_v16 = vmul.f32 %v4998_v43, %v12002_v27 }
0x10b8   : > { %v4835_v44 = vmul.f32 0.5, %v12871_v37  ;;  %v5157_v54 = vmul.f32 0.7978846, %v5093_v59  ;;  %v5161_v28 = vmul.f32 0.7978846, %v5097_v56  ;;  %v5001_v1 = vmul.f32 %v4937_v50, %v12029_v11 }
0x10b9   : > { %v4839_v26 = vmul.f32 0.5, %v12873_v0  ;;  %8394 = vtanh.f32 %v5159_v18  ;;  %v12062_v52 = vmul.f32 0.5, %v12875_v29  ;;  %v12065_v32 = vmul.f32 0.5, %v12877_v63  ;;  %v12879_v63 = vld [vmem:[#allocation46_spill] sm:$0xff] }
0x10ba   : > { %v8385_v30 = vpop.eup %8384  ;;  %8396 = vtanh.f32 %v5157_v54  ;;  %v5100_v31 = vadd.f32 %v11844_v8, %v11750_v9  ;;  %v5104_v37 = vadd.f32 %v11861_v14, %v11767_v42  ;;  %v12072_v50 = vmul.f32 %v4999_v57, %v12022_v3  ;;  %v12880_v57 = vld [vmem:[#allocation66_spill] sm:$0xff] }
0x10bb   : > { %v8387_v55 = vpop.eup %8386  ;;  %v5284_v43 = vadd.f32 1.0, %v8385_v30  ;;  %8398 = vtanh.f32 %v5161_v28  ;;  %v12076_v0 = vadd.f32 %v11941_v2, %v11508_v17  ;;  %v12080_v35 = vadd.f32 %v11943_v58, %v11512_v21  ;;  %v12881_v21 = vld [vmem:[#allocation54_spill] sm:$0xff] }
0x10bc   : > { %v5288_v20 = vadd.f32 1.0, %v8387_v55  ;;  %v5164_v19 = vmul.f32 0.7978846, %v5100_v31  ;;  %v5168_v8 = vmul.f32 0.7978846, %v5104_v37  ;;  %v12083_v14 = vmul.f32 %v5001_v1, %v12029_v11  ;;  %v12882_v55 = vld [vmem:[#allocation27_spill] sm:$0xff] }
0x10bd   : > { %v8389_v29 = vpop.eup %8388  ;;  %v5348_v61 = vmul.f32 %v5284_v43, %v4836_v15  ;;  %v12086_v59 = vmul.f32 0.5, %v11750_v9  ;;  %v5102_v33 = vadd.f32 %v12879_v63, %v11753_v5  ;;  %v5106_v58 = vadd.f32 %v12881_v21, %v12880_v57 }
0x10be   : > { %v8391_v17 = vpop.eup %8390  ;;  %v5352_v2 = vmul.f32 %v5288_v20, %v4840_v10  ;;  %v5286_v56 = vadd.f32 1.0, %v8389_v29  ;;  %8400 = vtanh.f32 %v5164_v19  ;;  %v4936_v54 = vmul.f32 0.044715, %v12076_v0  ;;  %v12883_v10 = vld [vmem:[#allocation50_spill] sm:$0xff]  ;;  %v12884_v20 = vld [vmem:[#allocation37_spill] sm:$0xff] }
0x10bf   : > { %v5290_v18 = vadd.f32 1.0, %v8391_v17  ;;  %8402 = vtanh.f32 %v5168_v8  ;;  %v5166_v15 = vmul.f32 0.7978846, %v5102_v33  ;;  %v4938_v9 = vmul.f32 0.044715, %v12080_v35  ;;  %v12885_v19 = vld [vmem:[#allocation49_spill] sm:$0xff] }
0x10c0   : > { %v5400_v28 = vpack.c.bf16 %v5352_v2, %v5348_v61  ;;  %v5350_v1 = vmul.f32 %v5286_v56, %v4838_v53  ;;  %v5170_v30 = vmul.f32 0.7978846, %v5106_v58  ;;  %v5099_v43 = vadd.f32 %v12883_v10, %v12882_v55  ;;  %v12886_v56 = vld [vmem:[#allocation64_spill] sm:$0xff] }
0x10c1   : > { %v8393_v31 = vpop.eup %8392  ;;  %v5354_v37 = vmul.f32 %v5290_v18, %v4842_v48  ;;  %8404 = vtanh.f32 %v5166_v15  ;;  %v5103_v29 = vadd.f32 %v12885_v19, %v12884_v20  ;;  %v4848_v17 = vmul.f32 0.5, %v11767_v42  ;;  %v12887_v48 = vld [vmem:[#allocation52_spill] sm:$0xff] }
0x10c2   : > { %5738 = vmatprep.mubr.bf16.mxu1 %v5400_v28  ;;  %v5283_v63 = vadd.f32 1.0, %v8393_v31  ;;  %v4846_v8 = vmul.f32 0.5, %v11753_v5  ;;  %8406 = vtanh.f32 %v5170_v30  ;;  %v5163_v33 = vmul.f32 0.7978846, %v5099_v43  ;;  %v12888_v28 = vld [vmem:[#allocation69_spill] sm:$0xff]  ;;  %v12889_v31 = vld [vmem:[#allocation51_spill] sm:$0xff] }
0x10c3   : > { %v8395_v53 = vpop.eup %8394  ;;  %v5402_v61 = vpack.c.bf16 %v5354_v37, %v5350_v1  ;;  %v5167_v2 = vmul.f32 0.7978846, %v5103_v29  ;;  %v5101_v21 = vadd.f32 %v12887_v48, %v12886_v56  ;;  %v5000_v15 = vmul.f32 %v4936_v54, %v12076_v0 }
0x10c4   : > { %v8397_v58 = vpop.eup %8396  ;;  %v5287_v18 = vadd.f32 1.0, %v8395_v53  ;;  %v5002_v10 = vmul.f32 %v4938_v9, %v12080_v35  ;;  %v5105_v19 = vadd.f32 %v12889_v31, %v12888_v28  ;;  %v5347_v5 = vmul.f32 %v5283_v63, %v4835_v44 }
0x10c5   : > { %v8399_v42 = vpop.eup %8398  ;;  %5835 = vmatprep.mubr.bf16.mxu0 %v5402_v61  ;;  %v5285_v30 = vadd.f32 1.0, %v8397_v58  ;;  %8408 = vtanh.f32 %v5163_v33  ;;  %v5165_v1 = vmul.f32 0.7978846, %v5101_v21  ;;  %v4850_v48 = vmul.f32 0.5, %v12880_v57  ;;  %v12890_v58 = vld [vmem:[#allocation72_spill] sm:$0xff] }
0x10c6   : > { %v5351_v37 = vmul.f32 %v5287_v18, %v4839_v26  ;;  %v5289_v43 = vadd.f32 1.0, %v8399_v42  ;;  %8410 = vtanh.f32 %v5167_v2  ;;  %v5169_v29 = vmul.f32 0.7978846, %v5105_v19  ;;  %v12891_v18 = vld [vmem:[#allocation57_spill] sm:$0xff]  ;;  %v12892_v19 = vld [vmem:[#allocation47_spill] sm:$0xff] }
0x10c7   : > { %8412 = vtanh.f32 %v5165_v1  ;;  %v5108_v54 = vadd.f32 %v11889_v25, %v11814_v34  ;;  %v5112_v9 = vadd.f32 %v11907_v22, %v11830_v39  ;;  %v5349_v44 = vmul.f32 %v5285_v30, %v12062_v52  ;;  %v12893_v42 = vld [vmem:[#allocation45_spill] sm:$0xff] }
0x10c8   : > { %v8401_v53 = vpop.eup %8400  ;;  %v5399_v31 = vpack.c.bf16 %v5351_v37, %v5347_v5  ;;  %v5353_v63 = vmul.f32 %v5289_v43, %v12065_v32  ;;  %8414 = vtanh.f32 %v5169_v29  ;;  %v12114_v61 = vmul.f32 %v5000_v15, %v12076_v0 }
0x10c9   : > { %v8403_v26 = vpop.eup %8402  ;;  %v5292_v33 = vadd.f32 1.0, %v8401_v53  ;;  %v5172_v57 = vmul.f32 0.7978846, %v5108_v54  ;;  %v5176_v2 = vmul.f32 0.7978846, %v5112_v9  ;;  %v5110_v22 = vadd.f32 %v12891_v18, %v12890_v58  ;;  %v12894_v53 = vld [vmem:[#allocation70_spill] sm:$0xff] }
0x10ca   : > { %5739 = vmatmul.mubr.bf16.gmra.mrb[124].mxu1 %v5399_v31  ;;  %v5401_v21 = vpack.c.bf16 %v5353_v63, %v5349_v44  ;;  %v5296_v25 = vadd.f32 1.0, %v8403_v26  ;;  %v5114_v5 = vadd.f32 %v12893_v42, %v12892_v19  ;;  %v12121_v32 = vmul.f32 %v5002_v10, %v12080_v35  ;;  %v12895_v31 = vld [vmem:[#allocation56_spill] sm:$0xff]  ;;  %v12897_v26 = vld [vmem:[#allocation58_spill] sm:$0xff] }
0x10cb   : > { %v8405_v52 = vpop.eup %8404  ;;  %v5356_v30 = vmul.f32 %v5292_v33, %v12086_v59  ;;  %v4843_v15 = vmul.f32 0.5, %v12882_v55  ;;  %8416 = vtanh.f32 %v5172_v57  ;;  %v5174_v29 = vmul.f32 0.7978846, %v5110_v22  ;;  %v12896_v63 = vld [vmem:[#allocation48_spill] sm:$0xff]  ;;  %v12898_v22 = vld [vmem:[#allocation73_spill] sm:$0xff] }
0x10cc   : > { %v8407_v1 = vpop.eup %8406  ;;  %5836 = vmatmul.mubr.bf16.gmra.mrb[156].mxu0 %v5401_v21  ;;  %v5360_v37 = vmul.f32 %v5296_v25, %v4848_v17  ;;  %v5294_v43 = vadd.f32 1.0, %v8405_v52  ;;  %8418 = vtanh.f32 %v5176_v2  ;;  %v5178_v9 = vmul.f32 0.7978846, %v5114_v5  ;;  %v12899_v5 = vld [vmem:[#allocation55_spill] sm:$0xff] }
0x10cd   : > { %v5298_v54 = vadd.f32 1.0, %v8407_v1  ;;  %v5107_v44 = vadd.f32 %v12895_v31, %v12894_v53  ;;  %v5111_v10 = vadd.f32 %v12897_v26, %v12896_v63  ;;  %v4847_v59 = vmul.f32 0.5, %v12884_v20  ;;  %v12900_v1 = vld [vmem:[#allocation74_spill] sm:$0xff]  ;;  %v12901_v31 = vld [vmem:[#allocation60_spill] sm:$0xff] }
0x10ce   : > { %v5404_v18 = vpack.c.bf16 %v5360_v37, %v5356_v30  ;;  %v5358_v42 = vmul.f32 %v5294_v43, %v4846_v8  ;;  %8420 = vtanh.f32 %v5174_v29  ;;  %v4845_v25 = vmul.f32 0.5, %v12886_v56 }
0x10cf   : > { %v8409_v55 = vpop.eup %8408  ;;  %v5362_v33 = vmul.f32 %v5298_v54, %v4850_v48  ;;  %8422 = vtanh.f32 %v5178_v9  ;;  %v5171_v17 = vmul.f32 0.7978846, %v5107_v44  ;;  %v5175_v57 = vmul.f32 0.7978846, %v5111_v10 }
0x10d0   : > { %v8411_v2 = vpop.eup %8410  ;;  %5746 = vmatprep.mubr.bf16.mxu1 %v5404_v18  ;;  %v5291_v21 = vadd.f32 1.0, %v8409_v55  ;;  %v5109_v52 = vadd.f32 %v12899_v5, %v12898_v22  ;;  %v5113_v30 = vadd.f32 %v12901_v31, %v12900_v1  ;;  %v4849_v43 = vmul.f32 0.5, %v12888_v28 }
0x10d1   : > { %v8413_v8 = vpop.eup %8412  ;;  %v5406_v37 = vpack.c.bf16 %v5362_v33, %v5358_v42  ;;  %v5295_v20 = vadd.f32 1.0, %v8411_v2  ;;  %8424 = vtanh.f32 %v5171_v17  ;;  %v4852_v54 = vmul.f32 0.5, %v11814_v34 }
0x10d2   : > { %v8415_v48 = vpop.eup %8414  ;;  %v5293_v29 = vadd.f32 1.0, %v8413_v8  ;;  %8426 = vtanh.f32 %v5175_v57  ;;  %v5173_v9 = vmul.f32 0.7978846, %v5109_v52  ;;  %v5355_v56 = vmul.f32 %v5291_v21, %v4843_v15  ;;  %v12902_v52 = vld [vmem:[#allocation62_spill] sm:$0xff] }
0x10d3   : > { %5843 = vmatprep.mubr.bf16.mxu0 %v5406_v37  ;;  %v5359_v44 = vmul.f32 %v5295_v20, %v4847_v59  ;;  %v5297_v26 = vadd.f32 1.0, %v8415_v48  ;;  %v5177_v10 = vmul.f32 0.7978846, %v5113_v30  ;;  %v4856_v18 = vmul.f32 0.5, %v11830_v39 }
0x10d4   : > { %8428 = vtanh.f32 %v5173_v9  ;;  %v5116_v42 = vadd.f32 %v11952_v12, %v11876_v6  ;;  %v5120_v28 = vadd.f32 %v11995_v41, %v11963_v51  ;;  %v5357_v17 = vmul.f32 %v5293_v29, %v4845_v25 }
0x10d5   : > { %v8417_v55 = vpop.eup %8416  ;;  %v5403_v33 = vpack.c.bf16 %v5359_v44, %v5355_v56  ;;  %v5361_v34 = vmul.f32 %v5297_v26, %v4849_v43  ;;  %8430 = vtanh.f32 %v5177_v10  ;;  %v4854_v15 = vmul.f32 0.5, %v12890_v58 }
0x10d6   : > { %v8419_v57 = vpop.eup %8418  ;;  %v5300_v2 = vadd.f32 1.0, %v8417_v55  ;;  %v5180_v59 = vmul.f32 0.7978846, %v5116_v42  ;;  %v5184_v21 = vmul.f32 0.7978846, %v5120_v28  ;;  %v5115_v12 = vadd.f32 %v12902_v52, %v11870_v60  ;;  %v12903_v52 = vld [vmem:[#allocation53_spill] sm:$0xff] }
0x10d7   : > { %5747 = vmatmul.mubr.bf16.gmra.mrb[128].mxu1 %v5403_v33  ;;  %v5405_v39 = vpack.c.bf16 %v5361_v34, %v5357_v17  ;;  %v5304_v5 = vadd.f32 1.0, %v8419_v57  ;;  %v5119_v41 = vadd.f32 %v11992_v46, %v11937_v36  ;;  %v4858_v25 = vmul.f32 0.5, %v12892_v19 }
0x10d8   : > { %v8421_v31 = vpop.eup %8420  ;;  %v5364_v30 = vmul.f32 %v5300_v2, %v4852_v54  ;;  %v4851_v8 = vmul.f32 0.5, %v12894_v53  ;;  %8432 = vtanh.f32 %v5180_v59  ;;  %v5179_v43 = vmul.f32 0.7978846, %v5115_v12  ;;  %v12904_v12 = vld [vmem:[#allocation59_spill] sm:$0xff] }
0x10d9   : > { %v8423_v37 = vpop.eup %8422  ;;  %5844 = vmatmul.mubr.bf16.gmra.mrb[160].mxu0 %v5405_v39  ;;  %v5368_v58 = vmul.f32 %v5304_v5, %v4856_v18  ;;  %v5302_v20 = vadd.f32 1.0, %v8421_v31  ;;  %8434 = vtanh.f32 %v5184_v21  ;;  %v5183_v29 = vmul.f32 0.7978846, %v5119_v41 }
0x10da   : > { %v5306_v48 = vadd.f32 1.0, %v8423_v37  ;;  %v5124_v9 = vadd.f32 %v12042_v24, %v11984_v40  ;;  %v5128_v46 = vadd.f32 %v12114_v61, %v12076_v0  ;;  %v4855_v53 = vmul.f32 0.5, %v12896_v63 }
0x10db   : > { %v8425_v54 = vpop.eup %8424  ;;  %v5408_v56 = vpack.c.bf16 %v5368_v58, %v5364_v30  ;;  %v5366_v19 = vmul.f32 %v5302_v20, %v4854_v15  ;;  %8436 = vtanh.f32 %v5179_v43  ;;  %v4853_v28 = vmul.f32 0.5, %v12898_v22 }
0x10dc   : > { %v8427_v44 = vpop.eup %8426  ;;  %v5370_v26 = vmul.f32 %v5306_v48, %v4858_v25  ;;  %v5299_v10 = vadd.f32 1.0, %v8425_v54  ;;  %8438 = vtanh.f32 %v5183_v29  ;;  %v5188_v18 = vmul.f32 0.7978846, %v5124_v9  ;;  %v12905_v54 = vld [vmem:[#allocation44_spill] sm:$0xff] }
0x10dd   : > { %5754 = vmatprep.mubr.bf16.mxu1 %v5408_v56  ;;  %v5303_v42 = vadd.f32 1.0, %v8427_v44  ;;  %v5192_v55 = vmul.f32 0.7978846, %v5128_v46  ;;  %v5123_v24 = vadd.f32 %v12012_v49, %v11970_v4  ;;  %v5127_v63 = vadd.f32 %v12072_v50, %v12022_v3 }
0x10de   : > { %v8429_v61 = vpop.eup %8428  ;;  %v5410_v33 = vpack.c.bf16 %v5370_v26, %v5366_v19  ;;  %v5363_v17 = vmul.f32 %v5299_v10, %v4851_v8  ;;  %8440 = vtanh.f32 %v5188_v18  ;;  %v4857_v59 = vmul.f32 0.5, %v12900_v1 }
0x10df   : > { %v8431_v34 = vpop.eup %8430  ;;  %v5367_v57 = vmul.f32 %v5303_v42, %v4855_v53  ;;  %v5301_v2 = vadd.f32 1.0, %v8429_v61  ;;  %8442 = vtanh.f32 %v5192_v55  ;;  %v5187_v15 = vmul.f32 0.7978846, %v5123_v24 }
0x10e0   : > { %5851 = vmatprep.mubr.bf16.mxu0 %v5410_v33  ;;  %v5305_v22 = vadd.f32 1.0, %v8431_v34  ;;  %v4860_v21 = vmul.f32 0.5, %v11876_v6  ;;  %v5191_v39 = vmul.f32 0.7978846, %v5127_v63  ;;  %v5118_v41 = vadd.f32 %v12904_v12, %v12903_v52 }
0x10e1   : > { %v5407_v49 = vpack.c.bf16 %v5367_v57, %v5363_v17  ;;  %v5365_v5 = vmul.f32 %v5301_v2, %v4853_v28  ;;  %8444 = vtanh.f32 %v5187_v15  ;;  %v5122_v30 = vadd.f32 %v12009_v13, %v11966_v62 }
0x10e2   : > { %v8433_v31 = vpop.eup %8432  ;;  %v5369_v50 = vmul.f32 %v5305_v22, %v4857_v59  ;;  %8446 = vtanh.f32 %v5191_v39  ;;  %v5309_v25 = vadd.f32 1.0, %v12024_v45  ;;  %v4864_v1 = vmul.f32 0.5, %v11963_v51 }
0x10e3   : > { %v8435_v8 = vpop.eup %8434  ;;  %5755 = vmatmul.mubr.bf16.gmra.mrb[132].mxu1 %v5407_v49  ;;  %v5308_v6 = vadd.f32 1.0, %v8433_v31  ;;  %v5182_v37 = vmul.f32 0.7978846, %v5118_v41  ;;  %v5313_v58 = vadd.f32 1.0, %v12039_v47  ;;  %v4859_v48 = vmul.f32 0.5, %v11870_v60 }
0x10e4   : > { %v5409_v20 = vpack.c.bf16 %v5369_v50, %v5365_v5  ;;  %v5312_v43 = vadd.f32 1.0, %v8435_v8  ;;  %v5186_v29 = vmul.f32 0.7978846, %v5122_v30  ;;  %v12170_v13 = vmul.f32 %v5309_v25, %v12905_v54 }
0x10e5   : > { %v8437_v9 = vpop.eup %8436  ;;  %v5372_v46 = vmul.f32 %v5308_v6, %v4860_v21  ;;  %8448 = vtanh.f32 %v5182_v37  ;;  %v12173_v45 = vmul.f32 %v5313_v58, %v11981_v23  ;;  %v5126_v47 = vadd.f32 %v12056_v16, %v12002_v27 }
0x10e6   : > { %v8439_v56 = vpop.eup %8438  ;;  %5852 = vmatmul.mubr.bf16.gmra.mrb[164].mxu0 %v5409_v20  ;;  %v5376_v51 = vmul.f32 %v5312_v43, %v4864_v1  ;;  %v5307_v19 = vadd.f32 1.0, %v8437_v9  ;;  %8450 = vtanh.f32 %v5186_v29  ;;  %v4863_v60 = vmul.f32 0.5, %v11937_v36 }
0x10e7   : > { %v5311_v53 = vadd.f32 1.0, %v8439_v56  ;;  %v5413_v44 = vpack.c.bf16 %v12173_v45, %v12170_v13  ;;  %v5130_v26 = vadd.f32 %v12121_v32, %v12080_v35  ;;  %v4868_v42 = vmul.f32 0.5, %v11984_v40 }
0x10e8   : > { %v8441_v10 = vpop.eup %8440  ;;  %v5412_v23 = vpack.c.bf16 %v5376_v51, %v5372_v46  ;;  %v5371_v18 = vmul.f32 %v5307_v19, %v4859_v48  ;;  %v5190_v28 = vmul.f32 0.7978846, %v5126_v47  ;;  %v5125_v36 = vadd.f32 %v12036_v38, %v11979_v7 }
0x10e9   : > { %v8443_v55 = vpop.eup %8442  ;;  %v5375_v24 = vmul.f32 %v5311_v53, %v4863_v60  ;;  %v5316_v61 = vadd.f32 1.0, %v8441_v10  ;;  %v5194_v33 = vmul.f32 0.7978846, %v5130_v26  ;;  %v4872_v16 = vmul.f32 0.5, %v12076_v0  ;;  %v12204_v60 = vld [vmem:[%s878_s17] ss:$0 sm:$0xff] }
0x10ea   : > { %5762 = vmatprep.mubr.bf16.mxu1 %v5412_v23  ;;  %v5320_v17 = vadd.f32 1.0, %v8443_v55  ;;  %8452 = vtanh.f32 %v5190_v28  ;;  %v5129_v32 = vadd.f32 %v12083_v14, %v12029_v11  ;;  %v5189_v40 = vmul.f32 0.7978846, %v5125_v36  ;;  %s12923_s17 = sld [smem:[#allocation90_spill]] (!%p6831_p7) }
0x10eb   : > { %v8445_v63 = vpop.eup %8444  ;;  %v5411_v34 = vpack.c.bf16 %v5375_v24, %v5371_v18  ;;  %8454 = vtanh.f32 %v5194_v33  ;;  %v5380_v2 = vmul.f32 %v5316_v61, %v4868_v42  ;;  %v4867_v38 = vmul.f32 0.5, %v11970_v4  ;;  %v12907_v61 = vld [vmem:[#allocation29_spill] sm:$0xff] }
0x10ec   : > { %v8447_v57 = vpop.eup %8446  ;;  %v5384_v15 = vmul.f32 %v5320_v17, %v4872_v16  ;;  %v5315_v59 = vadd.f32 1.0, %v8445_v63  ;;  %v5193_v22 = vmul.f32 0.7978846, %v5129_v32  ;;  %v4871_v21 = vmul.f32 0.5, %v12022_v3  ;;  %v12908_v16 = vld [vmem:[#allocation30_spill] sm:$0xff] }
0x10ed   : > { %5763 = vmatmul.mubr.bf16.gmra.mrb[136].mxu1 %v5411_v34  ;;  %v5319_v0 = vadd.f32 1.0, %v8447_v57  ;;  %8456 = vtanh.f32 %v5189_v40  ;;  %v4862_v50 = vmul.f32 0.5, %v12903_v52  ;;  %v4866_v30 = vmul.f32 0.5, %v11966_v62 }
0x10ee   : > { %v5416_v39 = vpack.c.bf16 %v5384_v15, %v5380_v2  ;;  %8458 = vtanh.f32 %v5193_v22  ;;  %v5379_v14 = vmul.f32 %v5315_v59, %v4867_v38  ;;  %v4870_v58 = vmul.f32 0.5, %v12002_v27 }
0x10ef   : > { %v8449_v49 = vpop.eup %8448  ;;  %v5383_v5 = vmul.f32 %v5319_v0, %v4871_v21  ;;  %v4874_v20 = vmul.f32 0.5, %v12080_v35  ;;  %v4869_v46 = vmul.f32 0.5, %v11979_v7  ;;  %v4873_v54 = vmul.f32 0.5, %v12029_v11 }
0x10f0   : > { %v8451_v12 = vpop.eup %8450  ;;  %5770 = vmatprep.mubr.bf16.mxu1 %v5416_v39  ;;  %v5310_v41 = vadd.f32 1.0, %v8449_v49 }
0x10f1   : > { %v5415_v31 = vpack.c.bf16 %v5383_v5, %v5379_v14  ;;  %v5314_v25 = vadd.f32 1.0, %v8451_v12  ;;  %v12909_v5 = vld [vmem:[#allocation28_spill] sm:$0xff] }
0x10f2   : > { %v5374_v8 = vmul.f32 %v5310_v41, %v4862_v50 }
0x10f3   : > { %v5378_v4 = vmul.f32 %v5314_v25, %v4866_v30 }
0x10f4   : > { %v8453_v1 = vpop.eup %8452 }
0x10f5   : > { %v8455_v3 = vpop.eup %8454  ;;  %5771 = vmatmul.mubr.bf16.gmra.mrb[140].mxu1 %v5415_v31  ;;  %v5414_v6 = vpack.c.bf16 %v5378_v4, %v5374_v8  ;;  %v5318_v37 = vadd.f32 1.0, %v8453_v1  ;;  %v12910_v31 = vld [vmem:[#allocation26_spill] sm:$0xff] }
0x10f6   : > { %v5322_v43 = vadd.f32 1.0, %v8455_v3 }
0x10f7   : > { %v8457_v48 = vpop.eup %8456  ;;  %5859 = vmatprep.mubr.bf16.mxu1 %v5414_v6  ;;  %v5382_v52 = vmul.f32 %v5318_v37, %v4870_v58 }
0x10f8   : > { %v8459_v29 = vpop.eup %8458  ;;  %v5386_v9 = vmul.f32 %v5322_v43, %v4874_v20  ;;  %v5317_v62 = vadd.f32 1.0, %v8457_v48 }
0x10f9   : > { %v5321_v56 = vadd.f32 1.0, %v8459_v29 }
0x10fa   : > { %v5418_v51 = vpack.c.bf16 %v5386_v9, %v5382_v52  ;;  %v5381_v19 = vmul.f32 %v5317_v62, %v4869_v46  ;;  %v12911_v62 = vld [vmem:[#allocation24_spill] sm:$0xff] }
0x10fb   : > { %v5385_v47 = vmul.f32 %v5321_v56, %v4873_v54  ;;  %v12912_v56 = vld [vmem:[#allocation32_spill] sm:$0xff] }
0x10fd   : > { %5860 = vmatmul.mubr.bf16.vlgmr.msra.gmra.mrb[144].mxu1 %v5413_v44  ;;  %v5417_v27 = vpack.c.bf16 %v5385_v47, %v5381_v19 }
0x10fe   : > { %5867 = vmatprep.mubr.bf16.mxu1 %v5418_v51 }
0x1105   : > { %5868 = vmatmul.mubr.bf16.gmra.mrb[148].mxu1 %v5417_v27 }
0x1132   : > { %v7113_v35 = vpop.f32.mrb[112].mxu1 }
0x1133   : > { %v7114_v7 = vpop.f32.mrb[113].mxu1 }
0x1134   : > { %v7115_v11 = vadd.f32 %v7114_v7, %v7113_v35  ;;  %v7116_v53 = vpop.f32.mrb[114].mxu1  ;;  %v7177_v26 = vpop.f32.mrb[144].mxu0 }
0x1135   : > { %v7117_v10 = vpop.f32.mrb[115].mxu1  ;;  %v7178_v18 = vpop.f32.mrb[145].mxu0 }
0x1136   : > { %v5717_v23 = vadd.f32 %v7115_v11, %v12204_v60  ;;  %v7118_v13 = vadd.f32 %v7117_v10, %v7116_v53  ;;  %v7179_v45 = vadd.f32 %v7178_v18, %v7177_v26  ;;  %v7180_v44 = vpop.f32.mrb[146].mxu0 }
0x1137   : > { %v7181_v28 = vpop.f32.mrb[147].mxu0 }
0x1138   : > { %v5720_v42 = vadd.f32 %v7118_v13, %v12204_v60  ;;  %v5814_v55 = vadd.f32 %v7179_v45, %v5717_v23  ;;  %v7182_v24 = vadd.f32 %v7181_v28, %v7180_v44  ;;  %v12913_v28 = vld [vmem:[#allocation34_spill] sm:$0xff] }
0x113a   : > { %v12209_v33 = vadd.f32 %v5814_v55, %v12907_v61  ;;  %v5817_v36 = vadd.f32 %v7182_v24, %v5720_v42  ;;  %v12914_v61 = vld [vmem:[#allocation33_spill] sm:$0xff] }
0x113c   : > { %5892 = vst [vmem:[#allocation2] sm:$0xff] %v12209_v33  ;;  %v12213_v17 = vadd.f32 %v5817_v36, %v12908_v16  ;;  %v7119_v32 = vpop.f32.mrb[116].mxu1  ;;  %5914 = vadd.xlane.f32.xlu0 (!%p6831_p7), %v12209_v33 }
0x113d   : > { %v7120_v63 = vpop.f32.mrb[117].mxu1  ;;  %v7183_v34 = vpop.f32.mrb[148].mxu0 }
0x113e   : > { %5893 = vst [vmem:[#allocation2 + $0x8] sm:$0xff] %v12213_v17  ;;  %v7121_v40 = vadd.f32 %v7120_v63, %v7119_v32  ;;  %v7122_v57 = vpop.f32.mrb[118].mxu1  ;;  %v7184_v2 = vpop.f32.mrb[149].mxu0 }
0x113f   : > { %v7123_v15 = vpop.f32.mrb[119].mxu1  ;;  %v7185_v22 = vadd.f32 %v7184_v2, %v7183_v34  ;;  %v7186_v38 = vpop.f32.mrb[150].mxu0 }
0x1140   : > { %v5725_v59 = vadd.f32 %v7121_v40, %v12204_v60  ;;  %v7124_v21 = vadd.f32 %v7123_v15, %v7122_v57  ;;  %v7187_v0 = vpop.f32.mrb[151].mxu0  ;;  %5916 = vadd.xlane.f32.xlu0 (!%p6831_p7), %v12213_v17 }
0x1141   : > { %v7188_v14 = vadd.f32 %v7187_v0, %v7186_v38 }
0x1142   : > { %v5822_v39 = vadd.f32 %v7185_v22, %v5725_v59  ;;  %v5728_v49 = vadd.f32 %v7124_v21, %v12204_v60 }
0x1144   : > { %v12219_v12 = vadd.f32 %v5822_v39, %v12909_v5  ;;  %v5825_v41 = vadd.f32 %v7188_v14, %v5728_v49  ;;  %v12915_v14 = vld [vmem:[#allocation35_spill] sm:$0xff] }
0x1146   : > { %5894 = vst [vmem:[#allocation2 + $0x10] sm:$0xff] %v12219_v12  ;;  %v12223_v50 = vadd.f32 %v5825_v41, %v12910_v31  ;;  %v12916_v31 = vld [vmem:[#allocation31_spill] sm:$0xff]  ;;  %5918 = vadd.xlane.f32.xlu0 (!%p6831_p7), %v12219_v12 }
0x1148   : > { %5895 = vst [vmem:[#allocation2 + $0x18] sm:$0xff] %v12223_v50 }
0x1186   : > { %v7125_v30 = vpop.f32.mrb[120].mxu1 }
0x1187   : > { %v7126_v25 = vpop.f32.mrb[121].mxu1 }
0x1188   : > { %v7127_v8 = vadd.f32 %v7126_v25, %v7125_v30  ;;  %v7128_v4 = vpop.f32.mrb[122].mxu1 }
0x1189   : > { %v7189_v1 = vpop.f32.mrb[152].mxu0  ;;  %v7129_v3 = vpop.f32.mrb[123].mxu1 }
0x118a   : > { %v5733_v6 = vadd.f32 %v7127_v8, %v12204_v60  ;;  %v7190_v37 = vpop.f32.mrb[153].mxu0  ;;  %v7130_v58 = vadd.f32 %v7129_v3, %v7128_v4 }
0x118b   : > { %v7191_v20 = vadd.f32 %v7190_v37, %v7189_v1  ;;  %v7192_v43 = vpop.f32.mrb[154].mxu0 }
0x118c   : > { %v5736_v48 = vadd.f32 %v7130_v58, %v12204_v60  ;;  %v7193_v29 = vpop.f32.mrb[155].mxu0 }
0x118d   : > { %v5830_v52 = vadd.f32 %v7191_v20, %v5733_v6  ;;  %v7194_v9 = vadd.f32 %v7193_v29, %v7192_v43 }
0x118f   : > { %v12229_v46 = vadd.f32 %v5830_v52, %v12911_v62  ;;  %v5833_v54 = vadd.f32 %v7194_v9, %v5736_v48 }
0x1191   : > { %5896 = vst [vmem:[#allocation2 + $0x20] sm:$0xff] %v12229_v46  ;;  %v12233_v51 = vadd.f32 %v5833_v54, %v12912_v56  ;;  %v12917_v54 = vld [vmem:[#allocation39_spill] sm:$0xff] }
0x1193   : > { %5897 = vst [vmem:[#allocation2 + $0x28] sm:$0xff] %v12233_v51 }
0x119d   : > { %v7131_v19 = vpop.f32.mrb[124].mxu1 }
0x119e   : > { %v7132_v47 = vpop.f32.mrb[125].mxu1 }
0x119f   : > { %v7195_v27 = vpop.f32.mrb[156].mxu0  ;;  %v7133_v35 = vadd.f32 %v7132_v47, %v7131_v19  ;;  %v7134_v7 = vpop.f32.mrb[126].mxu1 }
0x11a0   : > { %v7196_v11 = vpop.f32.mrb[157].mxu0  ;;  %v7135_v53 = vpop.f32.mrb[127].mxu1 }
0x11a1   : > { %v5741_v26 = vadd.f32 %v7133_v35, %v12204_v60  ;;  %v7197_v10 = vadd.f32 %v7196_v11, %v7195_v27  ;;  %v7198_v23 = vpop.f32.mrb[158].mxu0  ;;  %v7136_v18 = vadd.f32 %v7135_v53, %v7134_v7  ;;  %v12918_v27 = vld [vmem:[#allocation38_spill] sm:$0xff] }
0x11a2   : > { %v7199_v13 = vpop.f32.mrb[159].mxu0 }
0x11a3   : > { %v5838_v45 = vadd.f32 %v7197_v10, %v5741_v26  ;;  %v5744_v44 = vadd.f32 %v7136_v18, %v12204_v60  ;;  %v7200_v42 = vadd.f32 %v7199_v13, %v7198_v23 }
0x11a5   : > { %v12239_v55 = vadd.f32 %v5838_v45, %v12913_v28  ;;  %v5841_v24 = vadd.f32 %v7200_v42, %v5744_v44 }
0x11a7   : > { %5898 = vst [vmem:[#allocation2 + $0x30] sm:$0xff] %v12239_v55  ;;  %v12243_v36 = vadd.f32 %v5841_v24, %v12914_v61 }
0x11a9   : > { %5899 = vst [vmem:[#allocation2 + $0x38] sm:$0xff] %v12243_v36 }
0x11aa   : > { %v7137_v16 = vpop.f32.mrb[128].mxu1 }
0x11ab   : > { %v7138_v32 = vpop.f32.mrb[129].mxu1 }
0x11ac   : > { %v7201_v63 = vpop.f32.mrb[160].mxu0  ;;  %v7139_v34 = vadd.f32 %v7138_v32, %v7137_v16  ;;  %v7140_v40 = vpop.f32.mrb[130].mxu1 }
0x11ad   : > { %v7202_v57 = vpop.f32.mrb[161].mxu0  ;;  %v7141_v2 = vpop.f32.mrb[131].mxu1 }
0x11ae   : > { %v5749_v15 = vadd.f32 %v7139_v34, %v12204_v60  ;;  %v7203_v59 = vadd.f32 %v7202_v57, %v7201_v63  ;;  %v7204_v22 = vpop.f32.mrb[162].mxu0  ;;  %v7142_v38 = vadd.f32 %v7141_v2, %v7140_v40  ;;  %v12919_v2 = vld [vmem:[#allocation36_spill] sm:$0xff] }
0x11af   : > { %v7205_v21 = vpop.f32.mrb[163].mxu0 }
0x11b0   : > { %v5846_v0 = vadd.f32 %v7203_v59, %v5749_v15  ;;  %v5752_v39 = vadd.f32 %v7142_v38, %v12204_v60  ;;  %v7206_v49 = vadd.f32 %v7205_v21, %v7204_v22  ;;  %v12920_v22 = vld [vmem:[#allocation40_spill] sm:$0xff] }
0x11b2   : > { %v12249_v5 = vadd.f32 %v5846_v0, %v12915_v14  ;;  %v5849_v41 = vadd.f32 %v7206_v49, %v5752_v39 }
0x11b4   : > { %5900 = vst [vmem:[#allocation2 + $0x40] sm:$0xff] %v12249_v5  ;;  %v12253_v30 = vadd.f32 %v5849_v41, %v12916_v31  ;;  %5930 = vadd.xlane.f32.xlu1 (!%p6831_p7), %v12249_v5 }
0x11b6   : > { %5901 = vst [vmem:[#allocation2 + $0x48] sm:$0xff] %v12253_v30  ;;  %v7143_v25 = vpop.f32.mrb[132].mxu1 }
0x11b7   : > { %v7144_v8 = vpop.f32.mrb[133].mxu1 }
0x11b8   : > { %v7145_v4 = vadd.f32 %v7144_v8, %v7143_v25  ;;  %v7146_v1 = vpop.f32.mrb[134].mxu1  ;;  %5932 = vadd.xlane.f32.xlu1 (!%p6831_p7), %v12253_v30 }
0x11b9   : > { %v7207_v3 = vpop.f32.mrb[164].mxu0  ;;  %v7147_v6 = vpop.f32.mrb[135].mxu1 }
0x11ba   : > { %v5757_v37 = vadd.f32 %v7145_v4, %v12204_v60  ;;  %v7208_v58 = vpop.f32.mrb[165].mxu0  ;;  %v7148_v20 = vadd.f32 %v7147_v6, %v7146_v1  ;;  %v12921_v4 = vld [vmem:[#allocation41_spill] sm:$0xff] }
0x11bb   : > { %v7209_v43 = vadd.f32 %v7208_v58, %v7207_v3  ;;  %v7210_v48 = vpop.f32.mrb[166].mxu0  ;;  %v12922_v6 = vld [vmem:[#allocation25_spill] sm:$0xff]  ;;  %v8494_v58 = vld [vmem:[#allocation12] ss:$8 sps:$4 sm:$0xff] (!%p6831_p7)  }
0x11bc   : > { %v5760_v29 = vadd.f32 %v7148_v20, %v12204_v60  ;;  %v7211_v52 = vpop.f32.mrb[167].mxu0  ;;  %5920 = vadd.xlane.f32.xlu1 (!%p6831_p7), %v12223_v50 }
0x11bd   : > { %v5854_v9 = vadd.f32 %v7209_v43, %v5757_v37  ;;  %v7212_v62 = vadd.f32 %v7211_v52, %v7210_v48 }
0x11bf   : > { %v12259_v56 = vadd.f32 %v5854_v9, %v12917_v54  ;;  %v5857_v19 = vadd.f32 %v7212_v62, %v5760_v29 }
0x11c0   : > { %v7149_v47 = vpop.f32.mrb[136].mxu1 }
0x11c1   : > { %5902 = vst [vmem:[#allocation2 + $0x50] sm:$0xff] %v12259_v56  ;;  %v12263_v35 = vadd.f32 %v5857_v19, %v12918_v27  ;;  %v7150_v7 = vpop.f32.mrb[137].mxu1  ;;  %5934 = vadd.xlane.f32.xlu0 (!%p6831_p7), %v12259_v56 }
0x11c2   : > { %v7151_v11 = vadd.f32 %v7150_v7, %v7149_v47  ;;  %v7152_v53 = vpop.f32.mrb[138].mxu1 }
0x11c3   : > { %5903 = vst [vmem:[#allocation2 + $0x58] sm:$0xff] %v12263_v35  ;;  %v7153_v26 = vpop.f32.mrb[139].mxu1  ;;  %5936 = vadd.xlane.f32.xlu1 (!%p6831_p7), %v12263_v35 }
0x11c4   : > { %v7154_v10 = vadd.f32 %v7153_v26, %v7152_v53  ;;  %v5765_v61 = vadd.f32 %v7151_v11, %v12204_v60 }
0x11c5   : > { %5922 = vadd.xlane.f32.xlu0 (!%p6831_p7), %v12229_v46 }
0x11c6   : > { %v5768_v34 = vadd.f32 %v7154_v10, %v12204_v60 }
0x11c7   : > { %5924 = vadd.xlane.f32.xlu1 (!%p6831_p7), %v12233_v51 }
0x11c8   : > { %v7155_v23 = vpop.f32.mrb[140].mxu1 }
0x11c9   : > { %v7156_v18 = vpop.f32.mrb[141].mxu1  ;;  %v5915_v20 = vpop.xlane.xlu0 (!%p6831_p7), %5914 }
0x11ca   : > { %v7157_v13 = vadd.f32 %v7156_v18, %v7155_v23  ;;  %v7158_v45 = vpop.f32.mrb[142].mxu1  ;;  %v5946_v48 = vmul.f32 (!%p6831_p7), 0.0078125, %v5915_v20 }
0x11cb   : > { %v7159_v44 = vpop.f32.mrb[143].mxu1 }
0x11cc   : > { %v7160_v42 = vadd.f32 %v7159_v44, %v7158_v45  ;;  %v5773_v39 = vadd.f32 %v7157_v13, %v12204_v60  ;;  %v12304_v52 = vsub.f32 (!%p6831_p7), %v12209_v33, %v5946_v48 }
0x11cd   : > { %v5917_v62 = vpop.xlane.xlu0 (!%p6831_p7), %5916 }
0x11ce   : > { %v5776_v31 = vadd.f32 %v7160_v42, %v12204_v60  ;;  %v8492_v60 = vld [vmem:[#allocation12 + $0x4] ss:$8 sps:$4 sm:$0xff] (!%p6831_p7)   ;;  %v5947_v19 = vmul.f32 (!%p6831_p7), 0.0078125, %v5917_v62  ;;  %v5978_v47 = vmul.f32 (!%p6831_p7), %v12304_v52, %v12304_v52 }
0x11cf   : > { %6238 = vmatprep.subr.bf16.mxu0 (!%p6831_p7), %v8492_v60  ;;  %7609 = vmatprep.subr.bf16.mxu1 (!%p6831_p7), %v8492_v60  ;;  %v8501_v60 = vld [vmem:[#allocation12 + $0x34] ss:$8 sps:$4 sm:$0xff] (!%p6831_p7)  }
0x11d0   : > { %v7213_v28 = vpop.f32.mrb[144].mxu1  ;;  %6239 = vmatpush1.bf16.msra.mxu0 (!%p6831_p7), %v8494_v58  ;;  %7617 = vmatpush1.bf16.msra.mxu1 (!%p6831_p7), %v8494_v58  ;;  %v12312_v7 = vsub.f32 (!%p6831_p7), %v12213_v17, %v5947_v19  ;;  %v8504_v19 = vld [vmem:[#allocation12 + $0x44] ss:$8 sps:$4 sm:$0xff] (!%p6831_p7)  }
0x11d1   : > { %v7214_v24 = vpop.f32.mrb[145].mxu1 }
0x11d2   : > { %v7215_v16 = vadd.f32 %v7214_v24, %v7213_v28  ;;  %v7216_v32 = vpop.f32.mrb[146].mxu1  ;;  %v5979_v10 = vmul.f32 (!%p6831_p7), %v12312_v7, %v12312_v7 }
0x11d3   : > { %v7217_v63 = vpop.f32.mrb[147].mxu1  ;;  %v5919_v53 = vpop.xlane.xlu0 (!%p6831_p7), %5918 }
0x11d4   : > { %v5862_v40 = vadd.f32 %v7215_v16, %v5765_v61  ;;  %v7218_v57 = vadd.f32 %v7217_v63, %v7216_v32  ;;  %v5948_v26 = vmul.f32 (!%p6831_p7), 0.0078125, %v5919_v53  ;;  %v8510_v53 = vld [vmem:[#allocation12 + $0x64] ss:$8 sps:$4 sm:$0xff] (!%p6831_p7)  }
0x11d6   : > { %v12269_v15 = vadd.f32 %v5862_v40, %v12919_v2  ;;  %v5865_v59 = vadd.f32 %v7218_v57, %v5768_v34  ;;  %v12322_v18 = vsub.f32 (!%p6831_p7), %v12219_v12, %v5948_v26  ;;  %v8495_v40 = vld [vmem:[#allocation12 + $0x14] ss:$8 sps:$4 sm:$0xff] (!%p6831_p7)   ;;  %v8497_v2 = vld [vmem:[#allocation12 + $0x10] ss:$8 sps:$4 sm:$0xff] (!%p6831_p7)  }
0x11d7   : > { %6240 = vmatprep.subr.bf16.mxu0 (!%p6831_p7), %v8495_v40  ;;  %7610 = vmatprep.subr.bf16.mxu1 (!%p6831_p7), %v8495_v40  ;;  %v8513_v26 = vld [vmem:[#allocation12 + $0x74] ss:$8 sps:$4 sm:$0xff] (!%p6831_p7)  }
0x11d8   : > { %5904 = vst [vmem:[#allocation2 + $0x60] sm:$0xff] %v12269_v15  ;;  %v12273_v38 = vadd.f32 %v5865_v59, %v12920_v22  ;;  %v7219_v21 = vpop.f32.mrb[148].mxu1  ;;  %5938 = vadd.xlane.f32.xlu0 (!%p6831_p7), %v12269_v15  ;;  %v5980_v42 = vmul.f32 (!%p6831_p7), %v12322_v18, %v12322_v18  ;;  %6241 = vmatpush1.bf16.msra.mxu0 (!%p6831_p7), %v8497_v2 }
0x11d9   : > { %v7220_v0 = vpop.f32.mrb[149].mxu1  ;;  %7618 = vmatpush1.bf16.msra.mxu1 (!%p6831_p7), %v8497_v2 }
0x11da   : > { %5905 = vst [vmem:[#allocation2 + $0x68] sm:$0xff] %v12273_v38  ;;  %v7221_v49 = vadd.f32 %v7220_v0, %v7219_v21  ;;  %v7222_v14 = vpop.f32.mrb[150].mxu1  ;;  %5940 = vadd.xlane.f32.xlu1 (!%p6831_p7), %v12273_v38 }
0x11db   : > { %v7223_v41 = vpop.f32.mrb[151].mxu1 }
0x11dc   : > { %v5870_v25 = vadd.f32 %v7221_v49, %v5773_v39  ;;  %v7224_v8 = vadd.f32 %v7223_v41, %v7222_v14  ;;  %5911 = sbr.rel (%p6831_p7) target bundleno = 5107 (0x13f3), region = 132  ;;  %5926 = vadd.xlane.f32.xlu0 (!%p6831_p7), %v12239_v55  ;;  %v8498_v14 = vld [vmem:[#allocation12 + $0x24] ss:$8 sps:$4 sm:$0xff] (!%p6831_p7)  }
0x11dd   : > { %6242 = vmatprep.subr.bf16.mxu0 (!%p6831_p7), %v8498_v14  ;;  %7611 = vmatprep.subr.bf16.mxu1 (!%p6831_p7), %v8498_v14 }
0x11de   : > { %v12279_v1 = vadd.f32 %v5870_v25, %v12921_v4  ;;  %v5873_v3 = vadd.f32 %v7224_v8, %v5776_v31  ;;  %5928 = vadd.xlane.f32.xlu1 (!%p6831_p7), %v12243_v36  ;;  %v8500_v25 = vld [vmem:[#allocation12 + $0x20] ss:$8 sps:$4 sm:$0xff] (!%p6831_p7)  }
0x11df   : > { %6243 = vmatpush1.bf16.msra.mxu0 (!%p6831_p7), %v8500_v25  ;;  %7619 = vmatpush1.bf16.msra.mxu1 (!%p6831_p7), %v8500_v25 }
0x11e0   : > { %5906 = vst [vmem:[#allocation2 + $0x70] sm:$0xff] %v12279_v1  ;;  %v12283_v37 = vadd.f32 %v5873_v3, %v12922_v6  ;;  %5942 = vadd.xlane.f32.xlu0 (!%p6831_p7), %v12279_v1  ;;  %6244 = vmatprep.subr.bf16.mxu0 (!%p6831_p7), %v8501_v60 }
0x11e1   : > { %7612 = vmatprep.subr.bf16.mxu1 (!%p6831_p7), %v8501_v60 }
0x11e2   : > { %5907 = vst [vmem:[#allocation2 + $0x78] sm:$0xff] %v12283_v37  ;;  %5944 = vadd.xlane.f32.xlu1 (!%p6831_p7), %v12283_v37 }
0x11e4   : > { %5994 = vadd.xlane.f32.xlu0 %v5978_v47  ;;  %v8506_v47 = vld [vmem:[#allocation12 + $0x40] ss:$8 sps:$4 sm:$0xff]  }
0x11e6   : > { %5996 = vadd.xlane.f32.xlu1 %v5979_v10  ;;  %v8515_v10 = vld [vmem:[#allocation12 + $0x70] ss:$8 sps:$4 sm:$0xff]  }
0x1241   : > { %v5931_v43 = vpop.xlane.xlu1 %5930 }
0x1242   : > { %v5954_v29 = vmul.f32 0.0078125, %v5931_v43  ;;  %v8503_v43 = vld [vmem:[#allocation12 + $0x30] ss:$8 sps:$4 sm:$0xff]  }
0x1243   : > { %6245 = vmatpush1.bf16.msra.mxu0 %v8503_v43  ;;  %7620 = vmatpush1.bf16.msra.mxu1 %v8503_v43 }
0x1244   : > { %v12307_v9 = vsub.f32 %v12249_v5, %v5954_v29  ;;  %6246 = vmatprep.subr.bf16.mxu0 %v8504_v19  ;;  %7613 = vmatprep.subr.bf16.mxu1 %v8504_v19  ;;  %v12396_v19 = vld [vmem:[%s12924_s10] ss:$0 sm:$0xff] }
0x1245   : > { %v5933_v54 = vpop.xlane.xlu1 %5932 }
0x1246   : > { %v5955_v27 = vmul.f32 0.0078125, %v5933_v54  ;;  %v5986_v33 = vmul.f32 %v12307_v9, %v12307_v9 }
0x1247   : > { %6247 = vmatpush1.bf16.msra.mxu0 %v8506_v47  ;;  %7621 = vmatpush1.bf16.msra.mxu1 %v8506_v47 }
0x1248   : > { %v12315_v11 = vsub.f32 %v12253_v30, %v5955_v27  ;;  %6010 = vadd.xlane.f32.xlu0 %v5986_v33  ;;  %v8507_v33 = vld [vmem:[#allocation12 + $0x54] ss:$8 sps:$4 sm:$0xff]  }
0x1249   : > { %v5921_v5 = vpop.xlane.xlu1 %5920  ;;  %6248 = vmatprep.subr.bf16.mxu0 %v8507_v33  ;;  %7614 = vmatprep.subr.bf16.mxu1 %v8507_v33 }
0x124a   : > { %v5949_v23 = vmul.f32 0.0078125, %v5921_v5  ;;  %v5987_v30 = vmul.f32 %v12315_v11, %v12315_v11  ;;  %v8512_v5 = vld [vmem:[#allocation12 + $0x60] ss:$8 sps:$4 sm:$0xff]  }
0x124c   : > { %v12325_v17 = vsub.f32 %v12223_v50, %v5949_v23  ;;  %6012 = vadd.xlane.f32.xlu1 %v5987_v30  ;;  %5998 = vadd.xlane.f32.xlu0 %v5980_v42  ;;  %v8851_v23 = vmov 0  }
0x124d   : > { %6270 = vmatprep.mubr.bf16.mxu0 %v8851_v23  ;;  %6310 = vmatprep.mubr.bf16.mxu1 %v8851_v23 }
0x124e   : > { %v5935_v13 = vpop.xlane.xlu0 %5934  ;;  %v5981_v50 = vmul.f32 %v12325_v17, %v12325_v17 }
0x124f   : > { %v5956_v44 = vmul.f32 0.0078125, %v5935_v13 }
0x1250   : > { %v5937_v45 = vpop.xlane.xlu1 %5936  ;;  %6000 = vadd.xlane.f32.xlu1 %v5981_v50 }
0x1251   : > { %v5957_v28 = vmul.f32 0.0078125, %v5937_v45  ;;  %v12332_v24 = vsub.f32 %v12259_v56, %v5956_v44 }
0x1252   : > { %v5923_v61 = vpop.xlane.xlu0 %5922 }
0x1253   : > { %v12335_v12 = vsub.f32 %v12263_v35, %v5957_v28  ;;  %v5950_v32 = vmul.f32 0.0078125, %v5923_v61  ;;  %v5988_v63 = vmul.f32 %v12332_v24, %v12332_v24 }
0x1254   : > { %v5925_v16 = vpop.xlane.xlu1 %5924 }
0x1255   : > { %v5951_v34 = vmul.f32 0.0078125, %v5925_v16  ;;  %v12342_v57 = vsub.f32 %v12229_v46, %v5950_v32  ;;  %6014 = vadd.xlane.f32.xlu0 %v5988_v63  ;;  %v5989_v35 = vmul.f32 %v12335_v12, %v12335_v12 }
0x1257   : > { %v12345_v56 = vsub.f32 %v12233_v51, %v5951_v34  ;;  %v5982_v0 = vmul.f32 %v12342_v57, %v12342_v57  ;;  %6016 = vadd.xlane.f32.xlu1 %v5989_v35 }
0x1259   : > { %6002 = vadd.xlane.f32.xlu0 %v5982_v0  ;;  %v5983_v49 = vmul.f32 %v12345_v56, %v12345_v56 }
0x125b   : > { %6004 = vadd.xlane.f32.xlu1 %v5983_v49 }
0x1265   : > { %v5939_v59 = vpop.xlane.xlu0 %5938 }
0x1266   : > { %v5958_v21 = vmul.f32 0.0078125, %v5939_v59 }
0x1267   : > { %v5941_v22 = vpop.xlane.xlu1 %5940 }
0x1268   : > { %v5959_v39 = vmul.f32 0.0078125, %v5941_v22  ;;  %v12352_v46 = vsub.f32 %v12269_v15, %v5958_v21 }
0x1269   : > { %v5927_v41 = vpop.xlane.xlu0 %5926 }
0x126a   : > { %v12355_v51 = vsub.f32 %v12273_v38, %v5959_v39  ;;  %v5952_v8 = vmul.f32 0.0078125, %v5927_v41  ;;  %v5990_v4 = vmul.f32 %v12352_v46, %v12352_v46 }
0x126b   : > { %v5929_v31 = vpop.xlane.xlu1 %5928 }
0x126c   : > { %v5953_v3 = vmul.f32 0.0078125, %v5929_v31  ;;  %v12362_v15 = vsub.f32 %v12239_v55, %v5952_v8  ;;  %6018 = vadd.xlane.f32.xlu0 %v5990_v4  ;;  %v5991_v6 = vmul.f32 %v12355_v51, %v12355_v51 }
0x126d   : > { %v5943_v58 = vpop.xlane.xlu0 %5942 }
0x126e   : > { %v12365_v38 = vsub.f32 %v12243_v36, %v5953_v3  ;;  %v5960_v48 = vmul.f32 0.0078125, %v5943_v58  ;;  %v5984_v29 = vmul.f32 %v12362_v15, %v12362_v15  ;;  %6020 = vadd.xlane.f32.xlu1 %v5991_v6  ;;  %v12389_v3 = vld [vmem:[%s12923_s17] ss:$0 sm:$0xff] }
0x126f   : > { %v5945_v20 = vpop.xlane.xlu1 %5944 }
0x1270   : > { %v5961_v62 = vmul.f32 0.0078125, %v5945_v20  ;;  %v12372_v55 = vsub.f32 %v12279_v1, %v5960_v48  ;;  %6006 = vadd.xlane.f32.xlu0 %v5984_v29  ;;  %v5985_v54 = vmul.f32 %v12365_v38, %v12365_v38 }
0x1271   : > { %v5995_v30 = vpop.xlane.xlu0 %5994 }
0x1272   : > { %v12375_v36 = vsub.f32 %v12283_v37, %v5961_v62  ;;  %v5992_v27 = vmul.f32 %v12372_v55, %v12372_v55  ;;  %6008 = vadd.xlane.f32.xlu1 %v5985_v54  ;;  %v8509_v37 = vld [vmem:[#allocation12 + $0x50] ss:$8 sps:$4 sm:$0xff]   ;;  %v6026_v13 = vmul.f32 0.0078125, %v5995_v30 }
0x1273   : > { %6249 = vmatpush1.bf16.msra.mxu0 %v8509_v37  ;;  %7622 = vmatpush1.bf16.msra.mxu1 %v8509_v37  ;;  %v5997_v44 = vpop.xlane.xlu1 %5996 }
0x1274   : > { %6022 = vadd.xlane.f32.xlu0 %v5992_v27  ;;  %v5993_v1 = vmul.f32 %v12375_v36, %v12375_v36  ;;  %6250 = vmatprep.subr.bf16.mxu0 %v8510_v53  ;;  %v6042_v45 = vadd.f32 1e-05, %v6026_v13  ;;  %v6027_v28 = vmul.f32 0.0078125, %v5997_v44 }
0x1275   : > { %7615 = vmatprep.subr.bf16.mxu1 %v8510_v53 }
0x1276   : > { %6024 = vadd.xlane.f32.xlu1 %v5993_v1  ;;  %8516 = vrsqrt.f32 %v6042_v45  ;;  %v6043_v61 = vadd.f32 1e-05, %v6027_v28 }
0x1277   : > { %6251 = vmatpush1.bf16.msra.mxu0 %v8512_v5  ;;  %7623 = vmatpush1.bf16.msra.mxu1 %v8512_v5 }
0x1278   : > { %6252 = vmatprep.subr.bf16.mxu0 %v8513_v26  ;;  %7616 = vmatprep.subr.bf16.mxu1 %v8513_v26  ;;  %8518 = vrsqrt.f32 %v6043_v61 }
0x127b   : > { %6253 = vmatpush1.bf16.msra.mxu0 %v8515_v10  ;;  %7624 = vmatpush1.bf16.msra.mxu1 %v8515_v10 }
0x1280   : > { %v8517_v39 = vpop.eup %8516 }
0x1281   : > { %v6074_v25 = vmul.f32 %v8517_v39, %v12304_v52 }
0x1282   : > { %v8519_v6 = vpop.eup %8518 }
0x1283   : > { %v6075_v29 = vmul.f32 %v8519_v6, %v12312_v7  ;;  %v6096_v62 = vmul.f32 %v12389_v3, %v6074_v25 }
0x1285   : > { %v6097_v27 = vmul.f32 %v12389_v3, %v6075_v29  ;;  %v6118_v26 = vadd.f32 %v12396_v19, %v6096_v62 }
0x1287   : > { %v6119_v10 = vadd.f32 %v12396_v19, %v6097_v27 }
0x1289   : > { %v6134_v44 = vpack.c.bf16 %v6119_v10, %v6118_v26 }
0x128b   : > { %6271 = vmatmul.mubr.bf16.vlgmr.msra.gmra.mrb[0].mxu0 %v6134_v44 }
0x128c   : > { %6280 = vmatprep.mubr.bf16.mxu0 %v8851_v23 }
0x12d5   : > { %v6011_v42 = vpop.xlane.xlu0 %6010 }
0x12d6   : > { %v6034_v50 = vmul.f32 0.0078125, %v6011_v42 }
0x12d8   : > { %v6050_v16 = vadd.f32 1e-05, %v6034_v50 }
0x12d9   : > { %v6013_v32 = vpop.xlane.xlu1 %6012  ;;  %v5999_v63 = vpop.xlane.xlu0 %5998 }
0x12da   : > { %v6035_v34 = vmul.f32 0.0078125, %v6013_v32  ;;  %v6028_v40 = vmul.f32 0.0078125, %v5999_v63  ;;  %8520 = vrsqrt.f32 %v6050_v16 }
0x12dc   : > { %v6051_v35 = vadd.f32 1e-05, %v6035_v34  ;;  %v6044_v2 = vadd.f32 1e-05, %v6028_v40 }
0x12dd   : > { %v6001_v59 = vpop.xlane.xlu1 %6000 }
0x12de   : > { %8522 = vrsqrt.f32 %v6051_v35  ;;  %v6029_v21 = vmul.f32 0.0078125, %v6001_v59 }
0x12df   : > { %8524 = vrsqrt.f32 %v6044_v2 }
0x12e0   : > { %v6045_v49 = vadd.f32 1e-05, %v6029_v21 }
0x12e2   : > { %v6015_v22 = vpop.xlane.xlu0 %6014  ;;  %8526 = vrsqrt.f32 %v6045_v49 }
0x12e3   : > { %v6036_v0 = vmul.f32 0.0078125, %v6015_v22 }
0x12e4   : > { %v6017_v41 = vpop.xlane.xlu1 %6016  ;;  %v8521_v20 = vpop.eup %8520 }
0x12e5   : > { %v6052_v14 = vadd.f32 1e-05, %v6036_v0  ;;  %v6037_v8 = vmul.f32 0.0078125, %v6017_v41  ;;  %v6082_v47 = vmul.f32 %v8521_v20, %v12307_v9 }
0x12e6   : > { %v6003_v31 = vpop.xlane.xlu0 %6002 }
0x12e7   : > { %v6030_v4 = vmul.f32 0.0078125, %v6003_v31  ;;  %8528 = vrsqrt.f32 %v6052_v14  ;;  %v6053_v60 = vadd.f32 1e-05, %v6037_v8  ;;  %v6104_v13 = vmul.f32 %v12389_v3, %v6082_v47 }
0x12e8   : > { %v6005_v43 = vpop.xlane.xlu1 %6004  ;;  %v8523_v1 = vpop.eup %8522 }
0x12e9   : > { %v6046_v58 = vadd.f32 1e-05, %v6030_v4  ;;  %8530 = vrsqrt.f32 %v6053_v60  ;;  %v6031_v52 = vmul.f32 0.0078125, %v6005_v43  ;;  %v8525_v53 = vpop.eup %8524  ;;  %v6083_v30 = vmul.f32 %v8523_v1, %v12315_v11 }
0x12ea   : > { %v6076_v28 = vmul.f32 %v8525_v53, %v12322_v18  ;;  %v6126_v11 = vadd.f32 %v12396_v19, %v6104_v13 }
0x12eb   : > { %8532 = vrsqrt.f32 %v6046_v58  ;;  %v6047_v33 = vadd.f32 1e-05, %v6031_v52  ;;  %v6105_v42 = vmul.f32 %v12389_v3, %v6083_v30 }
0x12ec   : > { %v8527_v50 = vpop.eup %8526  ;;  %v6098_v2 = vmul.f32 %v12389_v3, %v6076_v28 }
0x12ed   : > { %8534 = vrsqrt.f32 %v6047_v33  ;;  %v6127_v40 = vadd.f32 %v12396_v19, %v6105_v42  ;;  %v6077_v35 = vmul.f32 %v8527_v50, %v12325_v17 }
0x12ee   : > { %v6120_v17 = vadd.f32 %v12396_v19, %v6098_v2 }
0x12ef   : > { %v6138_v21 = vpack.c.bf16 %v6127_v40, %v6126_v11  ;;  %v6099_v0 = vmul.f32 %v12389_v3, %v6077_v35 }
0x12f1   : > { %v8529_v32 = vpop.eup %8528  ;;  %6311 = vmatmul.mubr.bf16.vlgmr.msra.gmra.mrb[0].mxu1 %v6138_v21  ;;  %v6121_v25 = vadd.f32 %v12396_v19, %v6099_v0 }
0x12f2   : > { %v6084_v18 = vmul.f32 %v8529_v32, %v12332_v24  ;;  %6320 = vmatprep.mubr.bf16.mxu1 %v8851_v23 }
0x12f3   : > { %v8531_v39 = vpop.eup %8530  ;;  %v6135_v60 = vpack.c.bf16 %v6121_v25, %v6120_v17 }
0x12f4   : > { %v6085_v8 = vmul.f32 %v8531_v39, %v12335_v12  ;;  %v6106_v4 = vmul.f32 %v12389_v3, %v6084_v18 }
0x12f5   : > { %v8533_v41 = vpop.eup %8532  ;;  %6281 = vmatmul.mubr.bf16.gmra.mrb[4].mxu0 %v6135_v60 }
0x12f6   : > { %v6078_v6 = vmul.f32 %v8533_v41, %v12342_v57  ;;  %v6107_v58 = vmul.f32 %v12389_v3, %v6085_v8  ;;  %v6128_v29 = vadd.f32 %v12396_v19, %v6106_v4  ;;  %6290 = vmatprep.mubr.bf16.mxu0 %v8851_v23 }
0x12f7   : > { %v8535_v20 = vpop.eup %8534 }
0x12f8   : > { %v6129_v12 = vadd.f32 %v12396_v19, %v6107_v58  ;;  %v6079_v62 = vmul.f32 %v8535_v20, %v12345_v56  ;;  %v6100_v52 = vmul.f32 %v12389_v3, %v6078_v6 }
0x12f9   : > { %v6019_v48 = vpop.xlane.xlu0 %6018 }
0x12fa   : > { %v6038_v54 = vmul.f32 0.0078125, %v6019_v48  ;;  %v6101_v47 = vmul.f32 %v12389_v3, %v6079_v62  ;;  %v6122_v33 = vadd.f32 %v12396_v19, %v6100_v52 }
0x12fb   : > { %v6021_v7 = vpop.xlane.xlu1 %6020 }
0x12fc   : > { %v6054_v37 = vadd.f32 1e-05, %v6038_v54  ;;  %v6039_v45 = vmul.f32 0.0078125, %v6021_v7  ;;  %v6139_v54 = vpack.c.bf16 %v6129_v12, %v6128_v29 }
0x12fd   : > { %v6007_v5 = vpop.xlane.xlu0 %6006 }
0x12fe   : > { %v6032_v9 = vmul.f32 0.0078125, %v6007_v5  ;;  %8536 = vrsqrt.f32 %v6054_v37  ;;  %v6055_v61 = vadd.f32 1e-05, %v6039_v45  ;;  %6321 = vmatmul.mubr.bf16.gmra.mrb[4].mxu1 %v6139_v54  ;;  %v6123_v37 = vadd.f32 %v12396_v19, %v6101_v47 }
0x12ff   : > { %v6009_v63 = vpop.xlane.xlu1 %6008  ;;  %6330 = vmatprep.mubr.bf16.mxu1 %v8851_v23 }
0x1300   : > { %v6048_v16 = vadd.f32 1e-05, %v6032_v9  ;;  %8538 = vrsqrt.f32 %v6055_v61  ;;  %v6033_v59 = vmul.f32 0.0078125, %v6009_v63  ;;  %v6136_v5 = vpack.c.bf16 %v6123_v37, %v6122_v33 }
0x1301   : > { %v6023_v34 = vpop.xlane.xlu0 %6022 }
0x1302   : > { %v6040_v22 = vmul.f32 0.0078125, %v6023_v34  ;;  %8540 = vrsqrt.f32 %v6048_v16  ;;  %v6049_v49 = vadd.f32 1e-05, %v6033_v59  ;;  %6291 = vmatmul.mubr.bf16.gmra.mrb[8].mxu0 %v6136_v5 }
0x1303   : > { %v6025_v31 = vpop.xlane.xlu1 %6024  ;;  %6300 = vmatprep.mubr.bf16.mxu0 %v8851_v23 }
0x1304   : > { %v6056_v14 = vadd.f32 1e-05, %v6040_v22  ;;  %8542 = vrsqrt.f32 %v6049_v49  ;;  %v6041_v24 = vmul.f32 0.0078125, %v6025_v31 }
0x1306   : > { %8544 = vrsqrt.f32 %v6056_v14  ;;  %v6057_v43 = vadd.f32 1e-05, %v6041_v24 }
0x1308   : > { %v8537_v48 = vpop.eup %8536  ;;  %8546 = vrsqrt.f32 %v6057_v43 }
0x1309   : > { %v6086_v57 = vmul.f32 %v8537_v48, %v12352_v46 }
0x130a   : > { %v8539_v27 = vpop.eup %8538 }
0x130b   : > { %v6087_v53 = vmul.f32 %v8539_v27, %v12355_v51  ;;  %v6108_v56 = vmul.f32 %v12389_v3, %v6086_v57 }
0x130c   : > { %v8541_v1 = vpop.eup %8540 }
0x130d   : > { %v6080_v7 = vmul.f32 %v8541_v1, %v12362_v15  ;;  %v6109_v46 = vmul.f32 %v12389_v3, %v6087_v53  ;;  %v6130_v30 = vadd.f32 %v12396_v19, %v6108_v56 }
0x130e   : > { %v8543_v26 = vpop.eup %8542 }
0x130f   : > { %v6131_v13 = vadd.f32 %v12396_v19, %v6109_v46  ;;  %v6081_v45 = vmul.f32 %v8543_v26, %v12365_v38  ;;  %v6102_v51 = vmul.f32 %v12389_v3, %v6080_v7 }
0x1310   : > { %v8545_v10 = vpop.eup %8544 }
0x1311   : > { %v6088_v9 = vmul.f32 %v8545_v10, %v12372_v55  ;;  %v6140_v44 = vpack.c.bf16 %v6131_v13, %v6130_v30  ;;  %v6103_v15 = vmul.f32 %v12389_v3, %v6081_v45  ;;  %v6124_v28 = vadd.f32 %v12396_v19, %v6102_v51 }
0x1312   : > { %v8547_v42 = vpop.eup %8546 }
0x1313   : > { %6331 = vmatmul.mubr.bf16.gmra.mrb[8].mxu1 %v6140_v44  ;;  %v6125_v50 = vadd.f32 %v12396_v19, %v6103_v15  ;;  %v6089_v61 = vmul.f32 %v8547_v42, %v12375_v36  ;;  %v6110_v16 = vmul.f32 %v12389_v3, %v6088_v9 }
0x1314   : > { %6340 = vmatprep.mubr.bf16.mxu1 %v8851_v23 }
0x1315   : > { %v6137_v38 = vpack.c.bf16 %v6125_v50, %v6124_v28  ;;  %v6111_v32 = vmul.f32 %v12389_v3, %v6089_v61  ;;  %v6132_v55 = vadd.f32 %v12396_v19, %v6110_v16 }
0x1317   : > { %6301 = vmatmul.mubr.bf16.gmra.mrb[12].mxu0 %v6137_v38  ;;  %v6133_v63 = vadd.f32 %v12396_v19, %v6111_v32 }
0x1319   : > { %v6141_v34 = vpack.c.bf16 %v6133_v63, %v6132_v55 }
0x131b   : > { %6341 = vmatmul.mubr.bf16.gmra.mrb[12].mxu1 %v6141_v34 }
0x135e   : > { %v6272_v11 = vpop.f32.mrb[0].mxu0 }
0x135f   : > { %6351 = vst [vmem:[#allocation13] sm:$0xff] %v6272_v11  ;;  %v6274_v40 = vpop.f32.mrb[1].mxu0 }
0x1360   : > { %6352 = vst [vmem:[#allocation13 + $0x8] sm:$0xff] %v6274_v40  ;;  %v6276_v35 = vpop.f32.mrb[2].mxu0 }
0x1361   : > { %6353 = vst [vmem:[#allocation13 + $0x10] sm:$0xff] %v6276_v35  ;;  %v6278_v36 = vpop.f32.mrb[3].mxu0 }
0x1362   : > { %6354 = vst [vmem:[#allocation13 + $0x18] sm:$0xff] %v6278_v36 }
0x13c4   : > { %v6312_v2 = vpop.f32.mrb[0].mxu1 }
0x13c5   : > { %6367 = vst [vmem:[#allocation13 + $0x80] sm:$0xff] %v6312_v2  ;;  %v6314_v23 = vpop.f32.mrb[1].mxu1 }
0x13c6   : > { %6368 = vst [vmem:[#allocation13 + $0x88] sm:$0xff] %v6314_v23  ;;  %v6316_v3 = vpop.f32.mrb[2].mxu1 }
0x13c7   : > { %6369 = vst [vmem:[#allocation13 + $0x90] sm:$0xff] %v6316_v3  ;;  %v6318_v59 = vpop.f32.mrb[3].mxu1 }
0x13c8   : > { %6370 = vst [vmem:[#allocation13 + $0x98] sm:$0xff] %v6318_v59  ;;  %v6282_v22 = vpop.f32.mrb[4].mxu0 }
0x13c9   : > { %6355 = vst [vmem:[#allocation13 + $0x20] sm:$0xff] %v6282_v22  ;;  %v6284_v19 = vpop.f32.mrb[5].mxu0 }
0x13ca   : > { %6356 = vst [vmem:[#allocation13 + $0x28] sm:$0xff] %v6284_v19  ;;  %v6286_v18 = vpop.f32.mrb[6].mxu0 }
0x13cb   : > { %6357 = vst [vmem:[#allocation13 + $0x30] sm:$0xff] %v6286_v18  ;;  %v6288_v21 = vpop.f32.mrb[7].mxu0 }
0x13cc   : > { %6358 = vst [vmem:[#allocation13 + $0x38] sm:$0xff] %v6288_v21 }
0x13d1   : > { %v6322_v0 = vpop.f32.mrb[4].mxu1 }
0x13d2   : > { %6371 = vst [vmem:[#allocation13 + $0xa0] sm:$0xff] %v6322_v0  ;;  %v6324_v39 = vpop.f32.mrb[5].mxu1 }
0x13d3   : > { %6372 = vst [vmem:[#allocation13 + $0xa8] sm:$0xff] %v6324_v39  ;;  %v6326_v49 = vpop.f32.mrb[6].mxu1 }
0x13d4   : > { %6373 = vst [vmem:[#allocation13 + $0xb0] sm:$0xff] %v6326_v49  ;;  %v6328_v14 = vpop.f32.mrb[7].mxu1 }
0x13d5   : > { %6374 = vst [vmem:[#allocation13 + $0xb8] sm:$0xff] %v6328_v14  ;;  %v6292_v41 = vpop.f32.mrb[8].mxu0 }
0x13d6   : > { %6359 = vst [vmem:[#allocation13 + $0x40] sm:$0xff] %v6292_v41  ;;  %v6294_v31 = vpop.f32.mrb[9].mxu0 }
0x13d7   : > { %6360 = vst [vmem:[#allocation13 + $0x48] sm:$0xff] %v6294_v31  ;;  %v6296_v17 = vpop.f32.mrb[10].mxu0 }
0x13d8   : > { %6361 = vst [vmem:[#allocation13 + $0x50] sm:$0xff] %v6296_v17  ;;  %v6298_v25 = vpop.f32.mrb[11].mxu0 }
0x13d9   : > { %6362 = vst [vmem:[#allocation13 + $0x58] sm:$0xff] %v6298_v25 }
0x13e6   : > { %v6332_v8 = vpop.f32.mrb[8].mxu1 }
0x13e7   : > { %6375 = vst [vmem:[#allocation13 + $0xc0] sm:$0xff] %v6332_v8  ;;  %v6334_v4 = vpop.f32.mrb[9].mxu1 }
0x13e8   : > { %6376 = vst [vmem:[#allocation13 + $0xc8] sm:$0xff] %v6334_v4  ;;  %v6336_v24 = vpop.f32.mrb[10].mxu1 }
0x13e9   : > { %6377 = vst [vmem:[#allocation13 + $0xd0] sm:$0xff] %v6336_v24  ;;  %v6338_v6 = vpop.f32.mrb[11].mxu1 }
0x13ea   : > { %6378 = vst [vmem:[#allocation13 + $0xd8] sm:$0xff] %v6338_v6  ;;  %v6302_v60 = vpop.f32.mrb[12].mxu0 }
0x13eb   : > { %6363 = vst [vmem:[#allocation13 + $0x60] sm:$0xff] %v6302_v60  ;;  %v6304_v58 = vpop.f32.mrb[13].mxu0 }
0x13ec   : > { %6364 = vst [vmem:[#allocation13 + $0x68] sm:$0xff] %v6304_v58  ;;  %v6306_v20 = vpop.f32.mrb[14].mxu0 }
0x13ed   : > { %6365 = vst [vmem:[#allocation13 + $0x70] sm:$0xff] %v6306_v20  ;;  %v6308_v43 = vpop.f32.mrb[15].mxu0 }
0x13ee   : > { %6366 = vst [vmem:[#allocation13 + $0x78] sm:$0xff] %v6308_v43  ;;  %v6342_v48 = vpop.f32.mrb[12].mxu1 }
0x13ef   : > { %6379 = vst [vmem:[#allocation13 + $0xe0] sm:$0xff] %v6342_v48  ;;  %v6344_v29 = vpop.f32.mrb[13].mxu1 }
0x13f0   : > { %6380 = vst [vmem:[#allocation13 + $0xe8] sm:$0xff] %v6344_v29  ;;  %v6346_v12 = vpop.f32.mrb[14].mxu1 }
0x13f1   : > { %6381 = vst [vmem:[#allocation13 + $0xf0] sm:$0xff] %v6346_v12  ;;  %v6348_v62 = vpop.f32.mrb[15].mxu1 }
0x13f2   : > { %6382 = vst [vmem:[#allocation13 + $0xf8] sm:$0xff] %v6348_v62 }
0x13f3 PF: > { %p7715_p13 = scmp.eq.s32.totalorder %s8974_s1, 1  ;;  %s8852_s13 = smov [#allocation13]  }
0x13f4   : > { %s6389_s2 = sshll.u32 %s8852_s13, 4  ;;  %s6390_s2 = int_to_ptr.vmem [resolvable:$true] %s6389_s2 }
0x13f5   : > { %s8752_s16 = scalar_lea.vmem %s6390_s2, 4096  ;;  %p8759_p12 = scmp.lt.s32.totalorder %s6390_s2, %s6390_s2 }
0x13f6   : > { %p8753_p3 = scmp.ne.s32.totalorder %s6390_s2, %s8752_s16  ;;  %p8760_p2 = scmp.lt.s32.totalorder %s8752_s16, %s8752_s16 }
0x13f8   : > { %p8754_p1 = pnand %p8753_p3, %p7715_p13  ;;  %p8761_p4 = por %p8760_p2, %p8759_p12 }
0x13fa   : > { %p8755_p9 = pneg %p8754_p1 }
0x13fc   : > { %p8762_p6 = pnand %p8761_p4, %p8755_p9 }
0x13fe   : > { %8765 = shalt.err (!%p8762_p6)
}
0x13ff   : > { %s12925_s27 = sld [smem:[#allocation92_spill]] }
0x1405   : > { %s8766_s19 = scalar_lea.hbm %s12925_s27, 4096 }
0x1406   : > { %p8767_p8 = scmp.ne.s32.totalorder %s12925_s27, %s8766_s19  ;;  %p8772_p10 = scmp.lt.u32.totalorder %s8766_s19, %s12925_s27 }
0x1408   : > { %p8768_p11 = pnand %p8767_p8, %p7715_p13 }
0x140a   : > { %p8769_p5 = pneg %p8768_p11 }
0x140c   : > { %p8774_p0 = pnand %p8772_p10, %p8769_p5 }
0x140e   : > { %8777 = shalt.err (!%p8774_p0)
}
0x140f   : > { %s8853_s6 = smov 256   ;;  %s8854_s28 = smov 16  }
0x1410   : > { %7682 = dma.vmem_to_hbm [thread:$0]  (%p7715_p13), %s6390_s2, 4096, %s12925_s27, [#allocation5], %s8853_s6, %s8853_s6, %s8854_s28  }
0x1411   : > { %8811 = dma.done.wait (%p7715_p13), [#allocation5], 4096  }
0x1412   : > { %8813 = vsyncadd (%p7715_p13), [#allocation5], 4294963200 }
0x1413 PF: > { %s12926_s21 = sld [smem:[#allocation20_spill]]  ;;  %s12927_s26 = sld [smem:[#allocation19_spill]] }
0x1414   : > { %s12928_s20 = sld [smem:[#allocation21_spill]]  ;;  %s12929_s0 = smov %s8820_s30 }
0x1419   : > { %p29_p7 = scmp.ge.s32.totalorder %s12926_s21, 4   ;;  %s12930_s30 = smov %s12927_s26 }
0x141b   :  { %31 = sbr.rel (!%p29_p7) target bundleno = 23 (0x17), region = 209 }
0x1422   :  { %6405 = vsyncpa [#allocation4], 1 }
0x1423   :  { %6407 = vsyncpa [#allocation4 + $0x1], 1 }
0x1424   :  { %6408 = vsyncpa [#allocation7], 1 }
0x1425   :  { %6409 = vsyncpa [#allocation5], 1 }
0x1426   :  { %6411 = vsyncpa [#allocation5 + $0x1], 1 }

</bundles_post_ra>
